<compile_context>
chip_gen: v6e
topology: v6e:2x2x1
jax: 0.10.0
libtpu: 0.0.40
codegen_flags: <defaults>
</compile_context>

<pallas_src>
import jax
import jax.numpy as jnp
from jax.experimental import pallas as pl
from jax.experimental.pallas import tpu as pltpu


def _pick_time_chunk(T, requested):
    """Largest legal time chunk: divides T and is a multiple of 8 (sublane
    constraint on the batch-first (Bt, Tc, H) output block), else whole T."""
    for c in (requested, 64, 32, 16, 8):
        if c is not None and c >= 8 and c % 8 == 0 and T % c == 0:
            return c
    return T  # single chunk: block == full time dim is always layout-legal


# ---------------------------------------------------------------------------
# Fused input-projection + time-chunked sequential LSTM recurrence
# ---------------------------------------------------------------------------
def _lstm_kernel(x_ref, h0_ref, c0_ref, wih_ref, whh_ref, b_ref,
                 out_ref, hn_ref, cn_ref, gx_scr, h_scr, c_scr):
    """One grid step == Tc LSTM timesteps for one batch tile.

    x_ref   : (Tc, Bt, E)  bf16  time-major embedded inputs for this chunk
    wih_ref : (E, 4H)      bf16  resident input-projection weight
    whh_ref : (H, 4H)      bf16  resident recurrent weight
    b_ref   : (1, 4H)      f32   b_ih + b_hh
    out_ref : (Bt, Tc, H)  f32   batch-first output block
    gx_scr  : (Tc*Bt, 4H)  f32   per-chunk hoisted input projection
    h_scr/c_scr : (Bt, H)  f32   carries across time chunks
    """
    t_chunk = pl.program_id(1)
    n_chunks = pl.num_programs(1)
    Tc, Bt, E = x_ref.shape
    H = h0_ref.shape[-1]

    @pl.when(t_chunk == 0)
    def _():
        h_scr[...] = h0_ref[...]
        c_scr[...] = c0_ref[...]

    # Hoisted input projection for the whole chunk: one MXU-friendly bf16
    # matmul [Tc*Bt, E] @ [E, 4H] with the bias folded in once per chunk.
    # Merging (Tc, Bt) with Bt == sublane count is tile-aligned (free reshape).
    x2d = x_ref[...].reshape(Tc * Bt, E)
    gx_scr[...] = (jnp.dot(x2d, wih_ref[...],
                           preferred_element_type=jnp.float32)
                   + b_ref[...])

    h = h_scr[...]
    c = c_scr[...]

    # Static Python loop == fully unrolled; static indices keep the gx loads
    # dense and the per-step output writes compile-time addressed.
    for s in range(Tc):
        gx = gx_scr[s * Bt:(s + 1) * Bt, :]              # (Bt, 4H) dense load
        # Recurrent matmul: bf16 operands, f32 accumulate.  whh_ref is passed
        # straight into the dot (never materialized as a loop-long value).
        gates = gx + jnp.dot(h.astype(jnp.bfloat16), whh_ref[...],
                             preferred_element_type=jnp.float32)
        # H is a multiple of 128 -> each gate slice is a lane-dense vreg.
        i_g = jax.nn.sigmoid(gates[:, 0:H])
        f_g = jax.nn.sigmoid(gates[:, H:2 * H])
        g_g = jnp.tanh(gates[:, 2 * H:3 * H])
        o_g = jax.nn.sigmoid(gates[:, 3 * H:4 * H])
        c = f_g * c + i_g * g_g
        h = o_g * jnp.tanh(c)
        # Batch-first write straight into the output block's VMEM buffer
        # (cheap masked sublane store, hidden under MXU latency); the HBM
        # writeback remains a single dense DMA per chunk, and no post-kernel
        # [T,B,H] -> [B,T,H] transpose round trip is needed.
        out_ref[:, s, :] = h

    # Persist carries for the next time chunk.
    h_scr[...] = h
    c_scr[...] = c

    # Final-state outputs written once, on the last chunk only.
    @pl.when(t_chunk == n_chunks - 1)
    def _():
        hn_ref[...] = h
        cn_ref[...] = c


def encoder_forward(x_tokens, hidden, params, *, time_chunk=32, batch_tile=None):
    """Mirrors Encoder.forward(x, hidden) -> (output, (h_n, c_n))."""
    h0, c0 = hidden                                    # each [1, B, H]
    B, T = x_tokens.shape
    E = params["embedding"].shape[1]
    H = h0.shape[-1]

    # Embedding gather directly in time-major layout [T, B, E]; cast to bf16
    # so the fused projection runs at native MXU precision.
    emb_t = params["embedding"][x_tokens.T].astype(jnp.bfloat16)

    w_ih = params["w_ih"].astype(jnp.bfloat16)         # [E, 4H]
    w_hh = params["w_hh"].astype(jnp.bfloat16)         # [H, 4H]
    bias = (params["b_ih"] + params["b_hh"]).reshape(1, 4 * H).astype(jnp.float32)

    Tc = _pick_time_chunk(T, time_chunk)
    Bt = B if batch_tile is None else batch_tile
    # Megacore batch split is only legal/profitable with Bt % 8 == 0 and B>=16.
    assert B % Bt == 0 and (Bt % 8 == 0 or Bt == B), (B, Bt)
    assert T % Tc == 0

    output, hn, cn = pl.pallas_call(
        _lstm_kernel,
        out_shape=(
            jax.ShapeDtypeStruct((B, T, H), jnp.float32),   # batch-first output
            jax.ShapeDtypeStruct((B, H), jnp.float32),      # h_n
            jax.ShapeDtypeStruct((B, H), jnp.float32),      # c_n
        ),
        grid_spec=pltpu.PrefetchScalarGridSpec(
            num_scalar_prefetch=0,
            grid=(B // Bt, T // Tc),                 # time (serial) is last
            in_specs=[
                pl.BlockSpec((Tc, Bt, E), lambda b, t: (t, b, 0)),   # emb chunk
                pl.BlockSpec((Bt, H), lambda b, t: (b, 0)),          # h0
                pl.BlockSpec((Bt, H), lambda b, t: (b, 0)),          # c0
                pl.BlockSpec((E, 4 * H), lambda b, t: (0, 0)),       # W_ih
                pl.BlockSpec((H, 4 * H), lambda b, t: (0, 0)),       # W_hh
                pl.BlockSpec((1, 4 * H), lambda b, t: (0, 0)),       # bias
            ],
            out_specs=[
                pl.BlockSpec((Bt, Tc, H), lambda b, t: (b, t, 0)),   # output
                pl.BlockSpec((Bt, H), lambda b, t: (b, 0)),          # h_n
                pl.BlockSpec((Bt, H), lambda b, t: (b, 0)),          # c_n
            ],
            scratch_shapes=[
                pltpu.VMEM((Tc * Bt, 4 * H), jnp.float32),  # per-chunk gates_x
                pltpu.VMEM((Bt, H), jnp.float32),           # h carry
                pltpu.VMEM((Bt, H), jnp.float32),           # c carry
            ],
        ),
        compiler_params=pltpu.CompilerParams(
            dimension_semantics=("parallel", "arbitrary")),
    )(emb_t, h0[0].astype(jnp.float32), c0[0].astype(jnp.float32),
      w_ih, w_hh, bias)

    return output, (hn[None, ...], cn[None, ...])


def init_params(key, vocab_size, embed_dim, hidden_size):
    """Deterministic parameter init matching PyTorch layer shapes/defaults."""
    k_emb, k_wih, k_whh, k_bih, k_bhh = jax.random.split(key, 5)
    k = 1.0 / jnp.sqrt(hidden_size)
    return {
        # nn.Embedding default: N(0, 1)
        "embedding": jax.random.normal(k_emb, (vocab_size, embed_dim), jnp.float32),
        # nn.LSTM default: U(-1/sqrt(H), 1/sqrt(H)); stored transposed [in, 4H]
        "w_ih": jax.random.uniform(k_wih, (embed_dim, 4 * hidden_size),
                                   jnp.float32, -k, k),
        "w_hh": jax.random.uniform(k_whh, (hidden_size, 4 * hidden_size),
                                   jnp.float32, -k, k),
        "b_ih": jax.random.uniform(k_bih, (4 * hidden_size,), jnp.float32, -k, k),
        "b_hh": jax.random.uniform(k_bhh, (4 * hidden_size,), jnp.float32, -k, k),
    }


def encoder_reference(x_tokens, hidden, params):
    """Pure-JAX f32 reference (lax.scan) for numerical cross-check."""
    h0, c0 = hidden
    emb = params["embedding"][x_tokens].astype(jnp.float32)     # [B, T, E]
    b = (params["b_ih"] + params["b_hh"])[None, :]
    H = h0.shape[-1]

    def step(carry, x_t):
        h, c = carry
        gates = x_t @ params["w_ih"] + h @ params["w_hh"] + b
        i_g = jax.nn.sigmoid(gates[:, 0:H])
        f_g = jax.nn.sigmoid(gates[:, H:2 * H])
        g_g = jnp.tanh(gates[:, 2 * H:3 * H])
        o_g = jax.nn.sigmoid(gates[:, 3 * H:4 * H])
        c_new = f_g * c + i_g * g_g
        h_new = o_g * jnp.tanh(c_new)
        return (h_new, c_new), h_new

    (hn, cn), out_t = jax.lax.scan(step, (h0[0], c0[0]),
                                   jnp.transpose(emb, (1, 0, 2)))
    return jnp.transpose(out_t, (1, 0, 2)), (hn[None], cn[None])


if __name__ == "__main__":
    # Small shapes consistent with the module (embed/hidden scaled down, but
    # kept lane/sublane-aligned: E = H = 128, B = 8, T = 32).
    VOCAB, EMBED, HIDDEN = 50, 128, 128
    B, T = 8, 32

    key = jax.random.PRNGKey(0)
    k_params, k_tok = jax.random.split(key)
    params = init_params(k_params, VOCAB, EMBED, HIDDEN)

    x = jax.random.randint(k_tok, (B, T), 0, VOCAB, dtype=jnp.int32)
    h0 = jnp.zeros((1, B, HIDDEN), jnp.float32)
    c0 = jnp.zeros((1, B, HIDDEN), jnp.float32)

    fwd = jax.jit(encoder_forward)
    output, (hn, cn) = fwd(x, (h0, c0), params)
    jax.block_until_ready((output, hn, cn))

    # Cross-check against pure-JAX scan reference (bf16 matmul operands in the
    # kernel vs f32 reference -> slightly looser tolerance).
    ref_out, (ref_hn, ref_cn) = encoder_reference(x, (h0, c0), params)
    assert output.shape == (B, T, HIDDEN)
    assert hn.shape == (1, B, HIDDEN) and cn.shape == (1, B, HIDDEN)
    assert jnp.allclose(output, ref_out, atol=2e-2, rtol=2e-2)
    assert jnp.allclose(hn, ref_hn, atol=2e-2, rtol=2e-2)
    assert jnp.allclose(cn, ref_cn, atol=2e-2, rtol=2e-2)

    print("KERNEL_OK")
</pallas_src>

<mosaic_0001>
module attributes {stable_mosaic.version = 11 : i64} {
  func.func @_lstm_kernel(%arg0: i32, %arg1: i32, %arg2: memref<32x8x128xbf16, #tpu.memory_space<vmem>>, %arg3: memref<8x128xf32, #tpu.memory_space<vmem>>, %arg4: memref<8x128xf32, #tpu.memory_space<vmem>>, %arg5: memref<128x512xbf16, #tpu.memory_space<vmem>>, %arg6: memref<128x512xbf16, #tpu.memory_space<vmem>>, %arg7: memref<1x512xf32, #tpu.memory_space<vmem>>, %arg8: memref<8x32x128xf32, #tpu.memory_space<vmem>>, %arg9: memref<8x128xf32, #tpu.memory_space<vmem>>, %arg10: memref<8x128xf32, #tpu.memory_space<vmem>>, %arg11: memref<256x512xf32, #tpu.memory_space<vmem>>, %arg12: memref<8x128xf32, #tpu.memory_space<vmem>>, %arg13: memref<8x128xf32, #tpu.memory_space<vmem>>) attributes {dimension_semantics = [#tpu.dimension_semantics<parallel>, #tpu.dimension_semantics<arbitrary>], iteration_bounds = array<i64: 1, 1>, scalar_prefetch = 0 : i64, scratch_operands = 3 : i64, tpu.core_type = #tpu.core_type<tc>, window_params = [{transform_indices = @transform_0, window_bounds = array<i64: 32, 8, 128>}, {transform_indices = @transform_1, window_bounds = array<i64: 8, 128>}, {transform_indices = @transform_2, window_bounds = array<i64: 8, 128>}, {pipeline_mode = #tpu.pipeline_mode<synchronous>, transform_indices = @transform_3, window_bounds = array<i64: 128, 512>}, {pipeline_mode = #tpu.pipeline_mode<synchronous>, transform_indices = @transform_4, window_bounds = array<i64: 128, 512>}, {pipeline_mode = #tpu.pipeline_mode<synchronous>, transform_indices = @transform_5, window_bounds = array<i64: 1, 512>}, {transform_indices = @transform_6, window_bounds = array<i64: 8, 32, 128>}, {transform_indices = @transform_7, window_bounds = array<i64: 8, 128>}, {transform_indices = @transform_8, window_bounds = array<i64: 8, 128>}]} {
    %c0_i32 = arith.constant 0 : i32
    %0 = arith.cmpi eq, %arg1, %c0_i32 : i32
    %1 = arith.extui %0 : i1 to i32
    %c0_i32_0 = arith.constant 0 : i32
    %2 = arith.cmpi ne, %1, %c0_i32_0 : i32
    scf.if %2 {
      %c0_312 = arith.constant 0 : index
      %c0_313 = arith.constant 0 : index
      %1074 = vector.load %arg3[%c0_312, %c0_313] : memref<8x128xf32, #tpu.memory_space<vmem>>, vector<8x128xf32>
      %c0_314 = arith.constant 0 : index
      %c0_315 = arith.constant 0 : index
      %1075 = vector.load %arg12[%c0_314, %c0_315] : memref<8x128xf32, #tpu.memory_space<vmem>>, vector<8x128xf32>
      tpu.vector_store %arg12[%c0_314, %c0_315], %1074 {strides = array<i32>} : memref<8x128xf32, #tpu.memory_space<vmem>>, vector<8x128xf32>,
      %c0_316 = arith.constant 0 : index
      %c0_317 = arith.constant 0 : index
      %1076 = vector.load %arg4[%c0_316, %c0_317] : memref<8x128xf32, #tpu.memory_space<vmem>>, vector<8x128xf32>
      %c0_318 = arith.constant 0 : index
      %c0_319 = arith.constant 0 : index
      %1077 = vector.load %arg13[%c0_318, %c0_319] : memref<8x128xf32, #tpu.memory_space<vmem>>, vector<8x128xf32>
      tpu.vector_store %arg13[%c0_318, %c0_319], %1076 {strides = array<i32>} : memref<8x128xf32, #tpu.memory_space<vmem>>, vector<8x128xf32>,
    } else {
    }
    %c0 = arith.constant 0 : index
    %c0_1 = arith.constant 0 : index
    %c0_2 = arith.constant 0 : index
    %3 = vector.load %arg2[%c0, %c0_1, %c0_2] : memref<32x8x128xbf16, #tpu.memory_space<vmem>>, vector<32x8x128xbf16>
    %4 = vector.shape_cast %3 : vector<32x8x128xbf16> to vector<256x128xbf16>
    %c0_3 = arith.constant 0 : index
    %c0_4 = arith.constant 0 : index
    %5 = vector.load %arg5[%c0_3, %c0_4] : memref<128x512xbf16, #tpu.memory_space<vmem>>, vector<128x512xbf16>
    %cst = arith.constant dense<0.000000e+00> : vector<256x512xf32>
    %6 = tpu.matmul %4, %5, %cst {dimension_numbers = #tpu.dot_dimension_numbers<[1], [0], [0], [1], [0, 0, 1, 1], [], []>} : vector<256x128xbf16>, vector<128x512xbf16>, vector<256x512xf32> -> vector<256x512xf32>
    %c0_5 = arith.constant 0 : index
    %c0_6 = arith.constant 0 : index
    %7 = vector.load %arg7[%c0_5, %c0_6] : memref<1x512xf32, #tpu.memory_space<vmem>>, vector<1x512xf32>
    %8 = vector.broadcast %7 : vector<1x512xf32> to vector<256x512xf32>
    %9 = arith.addf %6, %8 : vector<256x512xf32>
    %c0_7 = arith.constant 0 : index
    %c0_8 = arith.constant 0 : index
    %10 = vector.load %arg11[%c0_7, %c0_8] : memref<256x512xf32, #tpu.memory_space<vmem>>, vector<256x512xf32>
    tpu.vector_store %arg11[%c0_7, %c0_8], %9 {strides = array<i32>} : memref<256x512xf32, #tpu.memory_space<vmem>>, vector<256x512xf32>,
    %c0_9 = arith.constant 0 : index
    %c0_10 = arith.constant 0 : index
    %11 = vector.load %arg12[%c0_9, %c0_10] : memref<8x128xf32, #tpu.memory_space<vmem>>, vector<8x128xf32>
    %c0_11 = arith.constant 0 : index
    %c0_12 = arith.constant 0 : index
    %12 = vector.load %arg13[%c0_11, %c0_12] : memref<8x128xf32, #tpu.memory_space<vmem>>, vector<8x128xf32>
    %c0_13 = arith.constant 0 : index
    %c0_14 = arith.constant 0 : index
    %13 = vector.load %arg11[%c0_13, %c0_14] : memref<256x512xf32, #tpu.memory_space<vmem>>, vector<8x512xf32>
    %14 = arith.truncf %11 : vector<8x128xf32> to vector<8x128xbf16>
    %c0_15 = arith.constant 0 : index
    %c0_16 = arith.constant 0 : index
    %15 = vector.load %arg6[%c0_15, %c0_16] : memref<128x512xbf16, #tpu.memory_space<vmem>>, vector<128x512xbf16>
    %cst_17 = arith.constant dense<0.000000e+00> : vector<8x512xf32>
    %16 = tpu.matmul %14, %15, %cst_17 {dimension_numbers = #tpu.dot_dimension_numbers<[1], [0], [0], [1], [0, 0, 1, 1], [], []>} : vector<8x128xbf16>, vector<128x512xbf16>, vector<8x512xf32> -> vector<8x512xf32>
    %17 = arith.addf %13, %16 : vector<8x512xf32>
    %18 = vector.extract_strided_slice %17 {offsets = [0, 0], sizes = [8, 128], strides = [1, 1]} : vector<8x512xf32> to vector<8x128xf32>
    %19 = arith.negf %18 : vector<8x128xf32>
    %20 = math.exp %19 : vector<8x128xf32>
    %cst_18 = arith.constant 1.000000e+00 : f32
    %21 = vector.broadcast %cst_18 : f32 to vector<8x128xf32>
    %22 = arith.addf %21, %20 : vector<8x128xf32>
    %23 = arith.divf %21, %22 : vector<8x128xf32>
    %24 = vector.extract_strided_slice %17 {offsets = [0, 128], sizes = [8, 128], strides = [1, 1]} : vector<8x512xf32> to vector<8x128xf32>
    %25 = arith.negf %24 : vector<8x128xf32>
    %26 = math.exp %25 : vector<8x128xf32>
    %cst_19 = arith.constant 1.000000e+00 : f32
    %27 = vector.broadcast %cst_19 : f32 to vector<8x128xf32>
    %28 = arith.addf %27, %26 : vector<8x128xf32>
    %29 = arith.divf %27, %28 : vector<8x128xf32>
    %30 = vector.extract_strided_slice %17 {offsets = [0, 256], sizes = [8, 128], strides = [1, 1]} : vector<8x512xf32> to vector<8x128xf32>
    %31 = math.tanh %30 : vector<8x128xf32>
    %32 = vector.extract_strided_slice %17 {offsets = [0, 384], sizes = [8, 128], strides = [1, 1]} : vector<8x512xf32> to vector<8x128xf32>
    %33 = arith.negf %32 : vector<8x128xf32>
    %34 = math.exp %33 : vector<8x128xf32>
    %cst_20 = arith.constant 1.000000e+00 : f32
    %35 = vector.broadcast %cst_20 : f32 to vector<8x128xf32>
    %36 = arith.addf %35, %34 : vector<8x128xf32>
    %37 = arith.divf %35, %36 : vector<8x128xf32>
    %38 = arith.mulf %29, %12 : vector<8x128xf32>
    %39 = arith.mulf %23, %31 : vector<8x128xf32>
    %40 = arith.addf %38, %39 : vector<8x128xf32>
    %41 = math.tanh %40 : vector<8x128xf32>
    %42 = arith.mulf %37, %41 : vector<8x128xf32>
    %c0_21 = arith.constant 0 : index
    %c0_22 = arith.constant 0 : index
    %c0_23 = arith.constant 0 : index
    %43 = vector.load %arg8[%c0_21, %c0_22, %c0_23] : memref<8x32x128xf32, #tpu.memory_space<vmem>>, vector<8x1x128xf32>
    %44 = vector.shape_cast %43 : vector<8x1x128xf32> to vector<8x128xf32>
    %45 = vector.shape_cast %42 : vector<8x128xf32> to vector<8x1x128xf32>
    tpu.vector_store %arg8[%c0_21, %c0_22, %c0_23], %45 {strides = array<i32>} : memref<8x32x128xf32, #tpu.memory_space<vmem>>, vector<8x1x128xf32>,
    %c8 = arith.constant 8 : index
    %c0_24 = arith.constant 0 : index
    %46 = vector.load %arg11[%c8, %c0_24] : memref<256x512xf32, #tpu.memory_space<vmem>>, vector<8x512xf32>
    %47 = arith.truncf %42 : vector<8x128xf32> to vector<8x128xbf16>
    %c0_25 = arith.constant 0 : index
    %c0_26 = arith.constant 0 : index
    %48 = vector.load %arg6[%c0_25, %c0_26] : memref<128x512xbf16, #tpu.memory_space<vmem>>, vector<128x512xbf16>
    %cst_27 = arith.constant dense<0.000000e+00> : vector<8x512xf32>
    %49 = tpu.matmul %47, %48, %cst_27 {dimension_numbers = #tpu.dot_dimension_numbers<[1], [0], [0], [1], [0, 0, 1, 1], [], []>} : vector<8x128xbf16>, vector<128x512xbf16>, vector<8x512xf32> -> vector<8x512xf32>
    %50 = arith.addf %46, %49 : vector<8x512xf32>
    %51 = vector.extract_strided_slice %50 {offsets = [0, 0], sizes = [8, 128], strides = [1, 1]} : vector<8x512xf32> to vector<8x128xf32>
    %52 = arith.negf %51 : vector<8x128xf32>
    %53 = math.exp %52 : vector<8x128xf32>
    %cst_28 = arith.constant 1.000000e+00 : f32
    %54 = vector.broadcast %cst_28 : f32 to vector<8x128xf32>
    %55 = arith.addf %54, %53 : vector<8x128xf32>
    %56 = arith.divf %54, %55 : vector<8x128xf32>
    %57 = vector.extract_strided_slice %50 {offsets = [0, 128], sizes = [8, 128], strides = [1, 1]} : vector<8x512xf32> to vector<8x128xf32>
    %58 = arith.negf %57 : vector<8x128xf32>
    %59 = math.exp %58 : vector<8x128xf32>
    %cst_29 = arith.constant 1.000000e+00 : f32
    %60 = vector.broadcast %cst_29 : f32 to vector<8x128xf32>
    %61 = arith.addf %60, %59 : vector<8x128xf32>
    %62 = arith.divf %60, %61 : vector<8x128xf32>
    %63 = vector.extract_strided_slice %50 {offsets = [0, 256], sizes = [8, 128], strides = [1, 1]} : vector<8x512xf32> to vector<8x128xf32>
    %64 = math.tanh %63 : vector<8x128xf32>
    %65 = vector.extract_strided_slice %50 {offsets = [0, 384], sizes = [8, 128], strides = [1, 1]} : vector<8x512xf32> to vector<8x128xf32>
    %66 = arith.negf %65 : vector<8x128xf32>
    %67 = math.exp %66 : vector<8x128xf32>
    %cst_30 = arith.constant 1.000000e+00 : f32
    %68 = vector.broadcast %cst_30 : f32 to vector<8x128xf32>
    %69 = arith.addf %68, %67 : vector<8x128xf32>
    %70 = arith.divf %68, %69 : vector<8x128xf32>
    %71 = arith.mulf %62, %40 : vector<8x128xf32>
    %72 = arith.mulf %56, %64 : vector<8x128xf32>
    %73 = arith.addf %71, %72 : vector<8x128xf32>
    %74 = math.tanh %73 : vector<8x128xf32>
    %75 = arith.mulf %70, %74 : vector<8x128xf32>
    %c0_31 = arith.constant 0 : index
    %c1 = arith.constant 1 : index
    %c0_32 = arith.constant 0 : index
    %76 = vector.load %arg8[%c0_31, %c1, %c0_32] : memref<8x32x128xf32, #tpu.memory_space<vmem>>, vector<8x1x128xf32>
    %77 = vector.shape_cast %76 : vector<8x1x128xf32> to vector<8x128xf32>
    %78 = vector.shape_cast %75 : vector<8x128xf32> to vector<8x1x128xf32>
    tpu.vector_store %arg8[%c0_31, %c1, %c0_32], %78 {strides = array<i32>} : memref<8x32x128xf32, #tpu.memory_space<vmem>>, vector<8x1x128xf32>,
    %c16 = arith.constant 16 : index
    %c0_33 = arith.constant 0 : index
    %79 = vector.load %arg11[%c16, %c0_33] : memref<256x512xf32, #tpu.memory_space<vmem>>, vector<8x512xf32>
    %80 = arith.truncf %75 : vector<8x128xf32> to vector<8x128xbf16>
    %c0_34 = arith.constant 0 : index
    %c0_35 = arith.constant 0 : index
    %81 = vector.load %arg6[%c0_34, %c0_35] : memref<128x512xbf16, #tpu.memory_space<vmem>>, vector<128x512xbf16>
    %cst_36 = arith.constant dense<0.000000e+00> : vector<8x512xf32>
    %82 = tpu.matmul %80, %81, %cst_36 {dimension_numbers = #tpu.dot_dimension_numbers<[1], [0], [0], [1], [0, 0, 1, 1], [], []>} : vector<8x128xbf16>, vector<128x512xbf16>, vector<8x512xf32> -> vector<8x512xf32>
    %83 = arith.addf %79, %82 : vector<8x512xf32>
    %84 = vector.extract_strided_slice %83 {offsets = [0, 0], sizes = [8, 128], strides = [1, 1]} : vector<8x512xf32> to vector<8x128xf32>
    %85 = arith.negf %84 : vector<8x128xf32>
    %86 = math.exp %85 : vector<8x128xf32>
    %cst_37 = arith.constant 1.000000e+00 : f32
    %87 = vector.broadcast %cst_37 : f32 to vector<8x128xf32>
    %88 = arith.addf %87, %86 : vector<8x128xf32>
    %89 = arith.divf %87, %88 : vector<8x128xf32>
    %90 = vector.extract_strided_slice %83 {offsets = [0, 128], sizes = [8, 128], strides = [1, 1]} : vector<8x512xf32> to vector<8x128xf32>
    %91 = arith.negf %90 : vector<8x128xf32>
    %92 = math.exp %91 : vector<8x128xf32>
    %cst_38 = arith.constant 1.000000e+00 : f32
    %93 = vector.broadcast %cst_38 : f32 to vector<8x128xf32>
    %94 = arith.addf %93, %92 : vector<8x128xf32>
    %95 = arith.divf %93, %94 : vector<8x128xf32>
    %96 = vector.extract_strided_slice %83 {offsets = [0, 256], sizes = [8, 128], strides = [1, 1]} : vector<8x512xf32> to vector<8x128xf32>
    %97 = math.tanh %96 : vector<8x128xf32>
    %98 = vector.extract_strided_slice %83 {offsets = [0, 384], sizes = [8, 128], strides = [1, 1]} : vector<8x512xf32> to vector<8x128xf32>
    %99 = arith.negf %98 : vector<8x128xf32>
    %100 = math.exp %99 : vector<8x128xf32>
    %cst_39 = arith.constant 1.000000e+00 : f32
    %101 = vector.broadcast %cst_39 : f32 to vector<8x128xf32>
    %102 = arith.addf %101, %100 : vector<8x128xf32>
    %103 = arith.divf %101, %102 : vector<8x128xf32>
    %104 = arith.mulf %95, %73 : vector<8x128xf32>
    %105 = arith.mulf %89, %97 : vector<8x128xf32>
    %106 = arith.addf %104, %105 : vector<8x128xf32>
    %107 = math.tanh %106 : vector<8x128xf32>
    %108 = arith.mulf %103, %107 : vector<8x128xf32>
    %c0_40 = arith.constant 0 : index
    %c2 = arith.constant 2 : index
    %c0_41 = arith.constant 0 : index
    %109 = vector.load %arg8[%c0_40, %c2, %c0_41] : memref<8x32x128xf32, #tpu.memory_space<vmem>>, vector<8x1x128xf32>
    %110 = vector.shape_cast %109 : vector<8x1x128xf32> to vector<8x128xf32>
    %111 = vector.shape_cast %108 : vector<8x128xf32> to vector<8x1x128xf32>
    tpu.vector_store %arg8[%c0_40, %c2, %c0_41], %111 {strides = array<i32>} : memref<8x32x128xf32, #tpu.memory_space<vmem>>, vector<8x1x128xf32>,
    %c24 = arith.constant 24 : index
    %c0_42 = arith.constant 0 : index
    %112 = vector.load %arg11[%c24, %c0_42] : memref<256x512xf32, #tpu.memory_space<vmem>>, vector<8x512xf32>
    %113 = arith.truncf %108 : vector<8x128xf32> to vector<8x128xbf16>
    %c0_43 = arith.constant 0 : index
    %c0_44 = arith.constant 0 : index
    %114 = vector.load %arg6[%c0_43, %c0_44] : memref<128x512xbf16, #tpu.memory_space<vmem>>, vector<128x512xbf16>
    %cst_45 = arith.constant dense<0.000000e+00> : vector<8x512xf32>
    %115 = tpu.matmul %113, %114, %cst_45 {dimension_numbers = #tpu.dot_dimension_numbers<[1], [0], [0], [1], [0, 0, 1, 1], [], []>} : vector<8x128xbf16>, vector<128x512xbf16>, vector<8x512xf32> -> vector<8x512xf32>
    %116 = arith.addf %112, %115 : vector<8x512xf32>
    %117 = vector.extract_strided_slice %116 {offsets = [0, 0], sizes = [8, 128], strides = [1, 1]} : vector<8x512xf32> to vector<8x128xf32>
    %118 = arith.negf %117 : vector<8x128xf32>
    %119 = math.exp %118 : vector<8x128xf32>
    %cst_46 = arith.constant 1.000000e+00 : f32
    %120 = vector.broadcast %cst_46 : f32 to vector<8x128xf32>
    %121 = arith.addf %120, %119 : vector<8x128xf32>
    %122 = arith.divf %120, %121 : vector<8x128xf32>
    %123 = vector.extract_strided_slice %116 {offsets = [0, 128], sizes = [8, 128], strides = [1, 1]} : vector<8x512xf32> to vector<8x128xf32>
    %124 = arith.negf %123 : vector<8x128xf32>
    %125 = math.exp %124 : vector<8x128xf32>
    %cst_47 = arith.constant 1.000000e+00 : f32
    %126 = vector.broadcast %cst_47 : f32 to vector<8x128xf32>
    %127 = arith.addf %126, %125 : vector<8x128xf32>
    %128 = arith.divf %126, %127 : vector<8x128xf32>
    %129 = vector.extract_strided_slice %116 {offsets = [0, 256], sizes = [8, 128], strides = [1, 1]} : vector<8x512xf32> to vector<8x128xf32>
    %130 = math.tanh %129 : vector<8x128xf32>
    %131 = vector.extract_strided_slice %116 {offsets = [0, 384], sizes = [8, 128], strides = [1, 1]} : vector<8x512xf32> to vector<8x128xf32>
    %132 = arith.negf %131 : vector<8x128xf32>
    %133 = math.exp %132 : vector<8x128xf32>
    %cst_48 = arith.constant 1.000000e+00 : f32
    %134 = vector.broadcast %cst_48 : f32 to vector<8x128xf32>
    %135 = arith.addf %134, %133 : vector<8x128xf32>
    %136 = arith.divf %134, %135 : vector<8x128xf32>
    %137 = arith.mulf %128, %106 : vector<8x128xf32>
    %138 = arith.mulf %122, %130 : vector<8x128xf32>
    %139 = arith.addf %137, %138 : vector<8x128xf32>
    %140 = math.tanh %139 : vector<8x128xf32>
    %141 = arith.mulf %136, %140 : vector<8x128xf32>
    %c0_49 = arith.constant 0 : index
    %c3 = arith.constant 3 : index
    %c0_50 = arith.constant 0 : index
    %142 = vector.load %arg8[%c0_49, %c3, %c0_50] : memref<8x32x128xf32, #tpu.memory_space<vmem>>, vector<8x1x128xf32>
    %143 = vector.shape_cast %142 : vector<8x1x128xf32> to vector<8x128xf32>
    %144 = vector.shape_cast %141 : vector<8x128xf32> to vector<8x1x128xf32>
    tpu.vector_store %arg8[%c0_49, %c3, %c0_50], %144 {strides = array<i32>} : memref<8x32x128xf32, #tpu.memory_space<vmem>>, vector<8x1x128xf32>,
    %c32 = arith.constant 32 : index
    %c0_51 = arith.constant 0 : index
    %145 = vector.load %arg11[%c32, %c0_51] : memref<256x512xf32, #tpu.memory_space<vmem>>, vector<8x512xf32>
    %146 = arith.truncf %141 : vector<8x128xf32> to vector<8x128xbf16>
    %c0_52 = arith.constant 0 : index
    %c0_53 = arith.constant 0 : index
    %147 = vector.load %arg6[%c0_52, %c0_53] : memref<128x512xbf16, #tpu.memory_space<vmem>>, vector<128x512xbf16>
    %cst_54 = arith.constant dense<0.000000e+00> : vector<8x512xf32>
    %148 = tpu.matmul %146, %147, %cst_54 {dimension_numbers = #tpu.dot_dimension_numbers<[1], [0], [0], [1], [0, 0, 1, 1], [], []>} : vector<8x128xbf16>, vector<128x512xbf16>, vector<8x512xf32> -> vector<8x512xf32>
    %149 = arith.addf %145, %148 : vector<8x512xf32>
    %150 = vector.extract_strided_slice %149 {offsets = [0, 0], sizes = [8, 128], strides = [1, 1]} : vector<8x512xf32> to vector<8x128xf32>
    %151 = arith.negf %150 : vector<8x128xf32>
    %152 = math.exp %151 : vector<8x128xf32>
    %cst_55 = arith.constant 1.000000e+00 : f32
    %153 = vector.broadcast %cst_55 : f32 to vector<8x128xf32>
    %154 = arith.addf %153, %152 : vector<8x128xf32>
    %155 = arith.divf %153, %154 : vector<8x128xf32>
    %156 = vector.extract_strided_slice %149 {offsets = [0, 128], sizes = [8, 128], strides = [1, 1]} : vector<8x512xf32> to vector<8x128xf32>
    %157 = arith.negf %156 : vector<8x128xf32>
    %158 = math.exp %157 : vector<8x128xf32>
    %cst_56 = arith.constant 1.000000e+00 : f32
    %159 = vector.broadcast %cst_56 : f32 to vector<8x128xf32>
    %160 = arith.addf %159, %158 : vector<8x128xf32>
    %161 = arith.divf %159, %160 : vector<8x128xf32>
    %162 = vector.extract_strided_slice %149 {offsets = [0, 256], sizes = [8, 128], strides = [1, 1]} : vector<8x512xf32> to vector<8x128xf32>
    %163 = math.tanh %162 : vector<8x128xf32>
    %164 = vector.extract_strided_slice %149 {offsets = [0, 384], sizes = [8, 128], strides = [1, 1]} : vector<8x512xf32> to vector<8x128xf32>
    %165 = arith.negf %164 : vector<8x128xf32>
    %166 = math.exp %165 : vector<8x128xf32>
    %cst_57 = arith.constant 1.000000e+00 : f32
    %167 = vector.broadcast %cst_57 : f32 to vector<8x128xf32>
    %168 = arith.addf %167, %166 : vector<8x128xf32>
    %169 = arith.divf %167, %168 : vector<8x128xf32>
    %170 = arith.mulf %161, %139 : vector<8x128xf32>
    %171 = arith.mulf %155, %163 : vector<8x128xf32>
    %172 = arith.addf %170, %171 : vector<8x128xf32>
    %173 = math.tanh %172 : vector<8x128xf32>
    %174 = arith.mulf %169, %173 : vector<8x128xf32>
    %c0_58 = arith.constant 0 : index
    %c4 = arith.constant 4 : index
    %c0_59 = arith.constant 0 : index
    %175 = vector.load %arg8[%c0_58, %c4, %c0_59] : memref<8x32x128xf32, #tpu.memory_space<vmem>>, vector<8x1x128xf32>
    %176 = vector.shape_cast %175 : vector<8x1x128xf32> to vector<8x128xf32>
    %177 = vector.shape_cast %174 : vector<8x128xf32> to vector<8x1x128xf32>
    tpu.vector_store %arg8[%c0_58, %c4, %c0_59], %177 {strides = array<i32>} : memref<8x32x128xf32, #tpu.memory_space<vmem>>, vector<8x1x128xf32>,
    %c40 = arith.constant 40 : index
    %c0_60 = arith.constant 0 : index
    %178 = vector.load %arg11[%c40, %c0_60] : memref<256x512xf32, #tpu.memory_space<vmem>>, vector<8x512xf32>
    %179 = arith.truncf %174 : vector<8x128xf32> to vector<8x128xbf16>
    %c0_61 = arith.constant 0 : index
    %c0_62 = arith.constant 0 : index
    %180 = vector.load %arg6[%c0_61, %c0_62] : memref<128x512xbf16, #tpu.memory_space<vmem>>, vector<128x512xbf16>
    %cst_63 = arith.constant dense<0.000000e+00> : vector<8x512xf32>
    %181 = tpu.matmul %179, %180, %cst_63 {dimension_numbers = #tpu.dot_dimension_numbers<[1], [0], [0], [1], [0, 0, 1, 1], [], []>} : vector<8x128xbf16>, vector<128x512xbf16>, vector<8x512xf32> -> vector<8x512xf32>
    %182 = arith.addf %178, %181 : vector<8x512xf32>
    %183 = vector.extract_strided_slice %182 {offsets = [0, 0], sizes = [8, 128], strides = [1, 1]} : vector<8x512xf32> to vector<8x128xf32>
    %184 = arith.negf %183 : vector<8x128xf32>
    %185 = math.exp %184 : vector<8x128xf32>
    %cst_64 = arith.constant 1.000000e+00 : f32
    %186 = vector.broadcast %cst_64 : f32 to vector<8x128xf32>
    %187 = arith.addf %186, %185 : vector<8x128xf32>
    %188 = arith.divf %186, %187 : vector<8x128xf32>
    %189 = vector.extract_strided_slice %182 {offsets = [0, 128], sizes = [8, 128], strides = [1, 1]} : vector<8x512xf32> to vector<8x128xf32>
    %190 = arith.negf %189 : vector<8x128xf32>
    %191 = math.exp %190 : vector<8x128xf32>
    %cst_65 = arith.constant 1.000000e+00 : f32
    %192 = vector.broadcast %cst_65 : f32 to vector<8x128xf32>
    %193 = arith.addf %192, %191 : vector<8x128xf32>
    %194 = arith.divf %192, %193 : vector<8x128xf32>
    %195 = vector.extract_strided_slice %182 {offsets = [0, 256], sizes = [8, 128], strides = [1, 1]} : vector<8x512xf32> to vector<8x128xf32>
    %196 = math.tanh %195 : vector<8x128xf32>
    %197 = vector.extract_strided_slice %182 {offsets = [0, 384], sizes = [8, 128], strides = [1, 1]} : vector<8x512xf32> to vector<8x128xf32>
    %198 = arith.negf %197 : vector<8x128xf32>
    %199 = math.exp %198 : vector<8x128xf32>
    %cst_66 = arith.constant 1.000000e+00 : f32
    %200 = vector.broadcast %cst_66 : f32 to vector<8x128xf32>
    %201 = arith.addf %200, %199 : vector<8x128xf32>
    %202 = arith.divf %200, %201 : vector<8x128xf32>
    %203 = arith.mulf %194, %172 : vector<8x128xf32>
    %204 = arith.mulf %188, %196 : vector<8x128xf32>
    %205 = arith.addf %203, %204 : vector<8x128xf32>
    %206 = math.tanh %205 : vector<8x128xf32>
    %207 = arith.mulf %202, %206 : vector<8x128xf32>
    %c0_67 = arith.constant 0 : index
    %c5 = arith.constant 5 : index
    %c0_68 = arith.constant 0 : index
    %208 = vector.load %arg8[%c0_67, %c5, %c0_68] : memref<8x32x128xf32, #tpu.memory_space<vmem>>, vector<8x1x128xf32>
    %209 = vector.shape_cast %208 : vector<8x1x128xf32> to vector<8x128xf32>
    %210 = vector.shape_cast %207 : vector<8x128xf32> to vector<8x1x128xf32>
    tpu.vector_store %arg8[%c0_67, %c5, %c0_68], %210 {strides = array<i32>} : memref<8x32x128xf32, #tpu.memory_space<vmem>>, vector<8x1x128xf32>,
    %c48 = arith.constant 48 : index
    %c0_69 = arith.constant 0 : index
    %211 = vector.load %arg11[%c48, %c0_69] : memref<256x512xf32, #tpu.memory_space<vmem>>, vector<8x512xf32>
    %212 = arith.truncf %207 : vector<8x128xf32> to vector<8x128xbf16>
    %c0_70 = arith.constant 0 : index
    %c0_71 = arith.constant 0 : index
    %213 = vector.load %arg6[%c0_70, %c0_71] : memref<128x512xbf16, #tpu.memory_space<vmem>>, vector<128x512xbf16>
    %cst_72 = arith.constant dense<0.000000e+00> : vector<8x512xf32>
    %214 = tpu.matmul %212, %213, %cst_72 {dimension_numbers = #tpu.dot_dimension_numbers<[1], [0], [0], [1], [0, 0, 1, 1], [], []>} : vector<8x128xbf16>, vector<128x512xbf16>, vector<8x512xf32> -> vector<8x512xf32>
    %215 = arith.addf %211, %214 : vector<8x512xf32>
    %216 = vector.extract_strided_slice %215 {offsets = [0, 0], sizes = [8, 128], strides = [1, 1]} : vector<8x512xf32> to vector<8x128xf32>
    %217 = arith.negf %216 : vector<8x128xf32>
    %218 = math.exp %217 : vector<8x128xf32>
    %cst_73 = arith.constant 1.000000e+00 : f32
    %219 = vector.broadcast %cst_73 : f32 to vector<8x128xf32>
    %220 = arith.addf %219, %218 : vector<8x128xf32>
    %221 = arith.divf %219, %220 : vector<8x128xf32>
    %222 = vector.extract_strided_slice %215 {offsets = [0, 128], sizes = [8, 128], strides = [1, 1]} : vector<8x512xf32> to vector<8x128xf32>
    %223 = arith.negf %222 : vector<8x128xf32>
    %224 = math.exp %223 : vector<8x128xf32>
    %cst_74 = arith.constant 1.000000e+00 : f32
    %225 = vector.broadcast %cst_74 : f32 to vector<8x128xf32>
    %226 = arith.addf %225, %224 : vector<8x128xf32>
    %227 = arith.divf %225, %226 : vector<8x128xf32>
    %228 = vector.extract_strided_slice %215 {offsets = [0, 256], sizes = [8, 128], strides = [1, 1]} : vector<8x512xf32> to vector<8x128xf32>
    %229 = math.tanh %228 : vector<8x128xf32>
    %230 = vector.extract_strided_slice %215 {offsets = [0, 384], sizes = [8, 128], strides = [1, 1]} : vector<8x512xf32> to vector<8x128xf32>
    %231 = arith.negf %230 : vector<8x128xf32>
    %232 = math.exp %231 : vector<8x128xf32>
    %cst_75 = arith.constant 1.000000e+00 : f32
    %233 = vector.broadcast %cst_75 : f32 to vector<8x128xf32>
    %234 = arith.addf %233, %232 : vector<8x128xf32>
    %235 = arith.divf %233, %234 : vector<8x128xf32>
    %236 = arith.mulf %227, %205 : vector<8x128xf32>
    %237 = arith.mulf %221, %229 : vector<8x128xf32>
    %238 = arith.addf %236, %237 : vector<8x128xf32>
    %239 = math.tanh %238 : vector<8x128xf32>
    %240 = arith.mulf %235, %239 : vector<8x128xf32>
    %c0_76 = arith.constant 0 : index
    %c6 = arith.constant 6 : index
    %c0_77 = arith.constant 0 : index
    %241 = vector.load %arg8[%c0_76, %c6, %c0_77] : memref<8x32x128xf32, #tpu.memory_space<vmem>>, vector<8x1x128xf32>
    %242 = vector.shape_cast %241 : vector<8x1x128xf32> to vector<8x128xf32>
    %243 = vector.shape_cast %240 : vector<8x128xf32> to vector<8x1x128xf32>
    tpu.vector_store %arg8[%c0_76, %c6, %c0_77], %243 {strides = array<i32>} : memref<8x32x128xf32, #tpu.memory_space<vmem>>, vector<8x1x128xf32>,
    %c56 = arith.constant 56 : index
    %c0_78 = arith.constant 0 : index
    %244 = vector.load %arg11[%c56, %c0_78] : memref<256x512xf32, #tpu.memory_space<vmem>>, vector<8x512xf32>
    %245 = arith.truncf %240 : vector<8x128xf32> to vector<8x128xbf16>
    %c0_79 = arith.constant 0 : index
    %c0_80 = arith.constant 0 : index
    %246 = vector.load %arg6[%c0_79, %c0_80] : memref<128x512xbf16, #tpu.memory_space<vmem>>, vector<128x512xbf16>
    %cst_81 = arith.constant dense<0.000000e+00> : vector<8x512xf32>
    %247 = tpu.matmul %245, %246, %cst_81 {dimension_numbers = #tpu.dot_dimension_numbers<[1], [0], [0], [1], [0, 0, 1, 1], [], []>} : vector<8x128xbf16>, vector<128x512xbf16>, vector<8x512xf32> -> vector<8x512xf32>
    %248 = arith.addf %244, %247 : vector<8x512xf32>
    %249 = vector.extract_strided_slice %248 {offsets = [0, 0], sizes = [8, 128], strides = [1, 1]} : vector<8x512xf32> to vector<8x128xf32>
    %250 = arith.negf %249 : vector<8x128xf32>
    %251 = math.exp %250 : vector<8x128xf32>
    %cst_82 = arith.constant 1.000000e+00 : f32
    %252 = vector.broadcast %cst_82 : f32 to vector<8x128xf32>
    %253 = arith.addf %252, %251 : vector<8x128xf32>
    %254 = arith.divf %252, %253 : vector<8x128xf32>
    %255 = vector.extract_strided_slice %248 {offsets = [0, 128], sizes = [8, 128], strides = [1, 1]} : vector<8x512xf32> to vector<8x128xf32>
    %256 = arith.negf %255 : vector<8x128xf32>
    %257 = math.exp %256 : vector<8x128xf32>
    %cst_83 = arith.constant 1.000000e+00 : f32
    %258 = vector.broadcast %cst_83 : f32 to vector<8x128xf32>
    %259 = arith.addf %258, %257 : vector<8x128xf32>
    %260 = arith.divf %258, %259 : vector<8x128xf32>
    %261 = vector.extract_strided_slice %248 {offsets = [0, 256], sizes = [8, 128], strides = [1, 1]} : vector<8x512xf32> to vector<8x128xf32>
    %262 = math.tanh %261 : vector<8x128xf32>
    %263 = vector.extract_strided_slice %248 {offsets = [0, 384], sizes = [8, 128], strides = [1, 1]} : vector<8x512xf32> to vector<8x128xf32>
    %264 = arith.negf %263 : vector<8x128xf32>
    %265 = math.exp %264 : vector<8x128xf32>
    %cst_84 = arith.constant 1.000000e+00 : f32
    %266 = vector.broadcast %cst_84 : f32 to vector<8x128xf32>
    %267 = arith.addf %266, %265 : vector<8x128xf32>
    %268 = arith.divf %266, %267 : vector<8x128xf32>
    %269 = arith.mulf %260, %238 : vector<8x128xf32>
    %270 = arith.mulf %254, %262 : vector<8x128xf32>
    %271 = arith.addf %269, %270 : vector<8x128xf32>
    %272 = math.tanh %271 : vector<8x128xf32>
    %273 = arith.mulf %268, %272 : vector<8x128xf32>
    %c0_85 = arith.constant 0 : index
    %c7 = arith.constant 7 : index
    %c0_86 = arith.constant 0 : index
    %274 = vector.load %arg8[%c0_85, %c7, %c0_86] : memref<8x32x128xf32, #tpu.memory_space<vmem>>, vector<8x1x128xf32>
    %275 = vector.shape_cast %274 : vector<8x1x128xf32> to vector<8x128xf32>
    %276 = vector.shape_cast %273 : vector<8x128xf32> to vector<8x1x128xf32>
    tpu.vector_store %arg8[%c0_85, %c7, %c0_86], %276 {strides = array<i32>} : memref<8x32x128xf32, #tpu.memory_space<vmem>>, vector<8x1x128xf32>,
    %c64 = arith.constant 64 : index
    %c0_87 = arith.constant 0 : index
    %277 = vector.load %arg11[%c64, %c0_87] : memref<256x512xf32, #tpu.memory_space<vmem>>, vector<8x512xf32>
    %278 = arith.truncf %273 : vector<8x128xf32> to vector<8x128xbf16>
    %c0_88 = arith.constant 0 : index
    %c0_89 = arith.constant 0 : index
    %279 = vector.load %arg6[%c0_88, %c0_89] : memref<128x512xbf16, #tpu.memory_space<vmem>>, vector<128x512xbf16>
    %cst_90 = arith.constant dense<0.000000e+00> : vector<8x512xf32>
    %280 = tpu.matmul %278, %279, %cst_90 {dimension_numbers = #tpu.dot_dimension_numbers<[1], [0], [0], [1], [0, 0, 1, 1], [], []>} : vector<8x128xbf16>, vector<128x512xbf16>, vector<8x512xf32> -> vector<8x512xf32>
    %281 = arith.addf %277, %280 : vector<8x512xf32>
    %282 = vector.extract_strided_slice %281 {offsets = [0, 0], sizes = [8, 128], strides = [1, 1]} : vector<8x512xf32> to vector<8x128xf32>
    %283 = arith.negf %282 : vector<8x128xf32>
    %284 = math.exp %283 : vector<8x128xf32>
    %cst_91 = arith.constant 1.000000e+00 : f32
    %285 = vector.broadcast %cst_91 : f32 to vector<8x128xf32>
    %286 = arith.addf %285, %284 : vector<8x128xf32>
    %287 = arith.divf %285, %286 : vector<8x128xf32>
    %288 = vector.extract_strided_slice %281 {offsets = [0, 128], sizes = [8, 128], strides = [1, 1]} : vector<8x512xf32> to vector<8x128xf32>
    %289 = arith.negf %288 : vector<8x128xf32>
    %290 = math.exp %289 : vector<8x128xf32>
    %cst_92 = arith.constant 1.000000e+00 : f32
    %291 = vector.broadcast %cst_92 : f32 to vector<8x128xf32>
    %292 = arith.addf %291, %290 : vector<8x128xf32>
    %293 = arith.divf %291, %292 : vector<8x128xf32>
    %294 = vector.extract_strided_slice %281 {offsets = [0, 256], sizes = [8, 128], strides = [1, 1]} : vector<8x512xf32> to vector<8x128xf32>
    %295 = math.tanh %294 : vector<8x128xf32>
    %296 = vector.extract_strided_slice %281 {offsets = [0, 384], sizes = [8, 128], strides = [1, 1]} : vector<8x512xf32> to vector<8x128xf32>
    %297 = arith.negf %296 : vector<8x128xf32>
    %298 = math.exp %297 : vector<8x128xf32>
    %cst_93 = arith.constant 1.000000e+00 : f32
    %299 = vector.broadcast %cst_93 : f32 to vector<8x128xf32>
    %300 = arith.addf %299, %298 : vector<8x128xf32>
    %301 = arith.divf %299, %300 : vector<8x128xf32>
    %302 = arith.mulf %293, %271 : vector<8x128xf32>
    %303 = arith.mulf %287, %295 : vector<8x128xf32>
    %304 = arith.addf %302, %303 : vector<8x128xf32>
    %305 = math.tanh %304 : vector<8x128xf32>
    %306 = arith.mulf %301, %305 : vector<8x128xf32>
    %c0_94 = arith.constant 0 : index
    %c8_95 = arith.constant 8 : index
    %c0_96 = arith.constant 0 : index
    %307 = vector.load %arg8[%c0_94, %c8_95, %c0_96] : memref<8x32x128xf32, #tpu.memory_space<vmem>>, vector<8x1x128xf32>
    %308 = vector.shape_cast %307 : vector<8x1x128xf32> to vector<8x128xf32>
    %309 = vector.shape_cast %306 : vector<8x128xf32> to vector<8x1x128xf32>
    tpu.vector_store %arg8[%c0_94, %c8_95, %c0_96], %309 {strides = array<i32>} : memref<8x32x128xf32, #tpu.memory_space<vmem>>, vector<8x1x128xf32>,
    %c72 = arith.constant 72 : index
    %c0_97 = arith.constant 0 : index
    %310 = vector.load %arg11[%c72, %c0_97] : memref<256x512xf32, #tpu.memory_space<vmem>>, vector<8x512xf32>
    %311 = arith.truncf %306 : vector<8x128xf32> to vector<8x128xbf16>
    %c0_98 = arith.constant 0 : index
    %c0_99 = arith.constant 0 : index
    %312 = vector.load %arg6[%c0_98, %c0_99] : memref<128x512xbf16, #tpu.memory_space<vmem>>, vector<128x512xbf16>
    %cst_100 = arith.constant dense<0.000000e+00> : vector<8x512xf32>
    %313 = tpu.matmul %311, %312, %cst_100 {dimension_numbers = #tpu.dot_dimension_numbers<[1], [0], [0], [1], [0, 0, 1, 1], [], []>} : vector<8x128xbf16>, vector<128x512xbf16>, vector<8x512xf32> -> vector<8x512xf32>
    %314 = arith.addf %310, %313 : vector<8x512xf32>
    %315 = vector.extract_strided_slice %314 {offsets = [0, 0], sizes = [8, 128], strides = [1, 1]} : vector<8x512xf32> to vector<8x128xf32>
    %316 = arith.negf %315 : vector<8x128xf32>
    %317 = math.exp %316 : vector<8x128xf32>
    %cst_101 = arith.constant 1.000000e+00 : f32
    %318 = vector.broadcast %cst_101 : f32 to vector<8x128xf32>
    %319 = arith.addf %318, %317 : vector<8x128xf32>
    %320 = arith.divf %318, %319 : vector<8x128xf32>
    %321 = vector.extract_strided_slice %314 {offsets = [0, 128], sizes = [8, 128], strides = [1, 1]} : vector<8x512xf32> to vector<8x128xf32>
    %322 = arith.negf %321 : vector<8x128xf32>
    %323 = math.exp %322 : vector<8x128xf32>
    %cst_102 = arith.constant 1.000000e+00 : f32
    %324 = vector.broadcast %cst_102 : f32 to vector<8x128xf32>
    %325 = arith.addf %324, %323 : vector<8x128xf32>
    %326 = arith.divf %324, %325 : vector<8x128xf32>
    %327 = vector.extract_strided_slice %314 {offsets = [0, 256], sizes = [8, 128], strides = [1, 1]} : vector<8x512xf32> to vector<8x128xf32>
    %328 = math.tanh %327 : vector<8x128xf32>
    %329 = vector.extract_strided_slice %314 {offsets = [0, 384], sizes = [8, 128], strides = [1, 1]} : vector<8x512xf32> to vector<8x128xf32>
    %330 = arith.negf %329 : vector<8x128xf32>
    %331 = math.exp %330 : vector<8x128xf32>
    %cst_103 = arith.constant 1.000000e+00 : f32
    %332 = vector.broadcast %cst_103 : f32 to vector<8x128xf32>
    %333 = arith.addf %332, %331 : vector<8x128xf32>
    %334 = arith.divf %332, %333 : vector<8x128xf32>
    %335 = arith.mulf %326, %304 : vector<8x128xf32>
    %336 = arith.mulf %320, %328 : vector<8x128xf32>
    %337 = arith.addf %335, %336 : vector<8x128xf32>
    %338 = math.tanh %337 : vector<8x128xf32>
    %339 = arith.mulf %334, %338 : vector<8x128xf32>
    %c0_104 = arith.constant 0 : index
    %c9 = arith.constant 9 : index
    %c0_105 = arith.constant 0 : index
    %340 = vector.load %arg8[%c0_104, %c9, %c0_105] : memref<8x32x128xf32, #tpu.memory_space<vmem>>, vector<8x1x128xf32>
    %341 = vector.shape_cast %340 : vector<8x1x128xf32> to vector<8x128xf32>
    %342 = vector.shape_cast %339 : vector<8x128xf32> to vector<8x1x128xf32>
    tpu.vector_store %arg8[%c0_104, %c9, %c0_105], %342 {strides = array<i32>} : memref<8x32x128xf32, #tpu.memory_space<vmem>>, vector<8x1x128xf32>,
    %c80 = arith.constant 80 : index
    %c0_106 = arith.constant 0 : index
    %343 = vector.load %arg11[%c80, %c0_106] : memref<256x512xf32, #tpu.memory_space<vmem>>, vector<8x512xf32>
    %344 = arith.truncf %339 : vector<8x128xf32> to vector<8x128xbf16>
    %c0_107 = arith.constant 0 : index
    %c0_108 = arith.constant 0 : index
    %345 = vector.load %arg6[%c0_107, %c0_108] : memref<128x512xbf16, #tpu.memory_space<vmem>>, vector<128x512xbf16>
    %cst_109 = arith.constant dense<0.000000e+00> : vector<8x512xf32>
    %346 = tpu.matmul %344, %345, %cst_109 {dimension_numbers = #tpu.dot_dimension_numbers<[1], [0], [0], [1], [0, 0, 1, 1], [], []>} : vector<8x128xbf16>, vector<128x512xbf16>, vector<8x512xf32> -> vector<8x512xf32>
    %347 = arith.addf %343, %346 : vector<8x512xf32>
    %348 = vector.extract_strided_slice %347 {offsets = [0, 0], sizes = [8, 128], strides = [1, 1]} : vector<8x512xf32> to vector<8x128xf32>
    %349 = arith.negf %348 : vector<8x128xf32>
    %350 = math.exp %349 : vector<8x128xf32>
    %cst_110 = arith.constant 1.000000e+00 : f32
    %351 = vector.broadcast %cst_110 : f32 to vector<8x128xf32>
    %352 = arith.addf %351, %350 : vector<8x128xf32>
    %353 = arith.divf %351, %352 : vector<8x128xf32>
    %354 = vector.extract_strided_slice %347 {offsets = [0, 128], sizes = [8, 128], strides = [1, 1]} : vector<8x512xf32> to vector<8x128xf32>
    %355 = arith.negf %354 : vector<8x128xf32>
    %356 = math.exp %355 : vector<8x128xf32>
    %cst_111 = arith.constant 1.000000e+00 : f32
    %357 = vector.broadcast %cst_111 : f32 to vector<8x128xf32>
    %358 = arith.addf %357, %356 : vector<8x128xf32>
    %359 = arith.divf %357, %358 : vector<8x128xf32>
    %360 = vector.extract_strided_slice %347 {offsets = [0, 256], sizes = [8, 128], strides = [1, 1]} : vector<8x512xf32> to vector<8x128xf32>
    %361 = math.tanh %360 : vector<8x128xf32>
    %362 = vector.extract_strided_slice %347 {offsets = [0, 384], sizes = [8, 128], strides = [1, 1]} : vector<8x512xf32> to vector<8x128xf32>
    %363 = arith.negf %362 : vector<8x128xf32>
    %364 = math.exp %363 : vector<8x128xf32>
    %cst_112 = arith.constant 1.000000e+00 : f32
    %365 = vector.broadcast %cst_112 : f32 to vector<8x128xf32>
    %366 = arith.addf %365, %364 : vector<8x128xf32>
    %367 = arith.divf %365, %366 : vector<8x128xf32>
    %368 = arith.mulf %359, %337 : vector<8x128xf32>
    %369 = arith.mulf %353, %361 : vector<8x128xf32>
    %370 = arith.addf %368, %369 : vector<8x128xf32>
    %371 = math.tanh %370 : vector<8x128xf32>
    %372 = arith.mulf %367, %371 : vector<8x128xf32>
    %c0_113 = arith.constant 0 : index
    %c10 = arith.constant 10 : index
    %c0_114 = arith.constant 0 : index
    %373 = vector.load %arg8[%c0_113, %c10, %c0_114] : memref<8x32x128xf32, #tpu.memory_space<vmem>>, vector<8x1x128xf32>
    %374 = vector.shape_cast %373 : vector<8x1x128xf32> to vector<8x128xf32>
    %375 = vector.shape_cast %372 : vector<8x128xf32> to vector<8x1x128xf32>
    tpu.vector_store %arg8[%c0_113, %c10, %c0_114], %375 {strides = array<i32>} : memref<8x32x128xf32, #tpu.memory_space<vmem>>, vector<8x1x128xf32>,
    %c88 = arith.constant 88 : index
    %c0_115 = arith.constant 0 : index
    %376 = vector.load %arg11[%c88, %c0_115] : memref<256x512xf32, #tpu.memory_space<vmem>>, vector<8x512xf32>
    %377 = arith.truncf %372 : vector<8x128xf32> to vector<8x128xbf16>
    %c0_116 = arith.constant 0 : index
    %c0_117 = arith.constant 0 : index
    %378 = vector.load %arg6[%c0_116, %c0_117] : memref<128x512xbf16, #tpu.memory_space<vmem>>, vector<128x512xbf16>
    %cst_118 = arith.constant dense<0.000000e+00> : vector<8x512xf32>
    %379 = tpu.matmul %377, %378, %cst_118 {dimension_numbers = #tpu.dot_dimension_numbers<[1], [0], [0], [1], [0, 0, 1, 1], [], []>} : vector<8x128xbf16>, vector<128x512xbf16>, vector<8x512xf32> -> vector<8x512xf32>
    %380 = arith.addf %376, %379 : vector<8x512xf32>
    %381 = vector.extract_strided_slice %380 {offsets = [0, 0], sizes = [8, 128], strides = [1, 1]} : vector<8x512xf32> to vector<8x128xf32>
    %382 = arith.negf %381 : vector<8x128xf32>
    %383 = math.exp %382 : vector<8x128xf32>
    %cst_119 = arith.constant 1.000000e+00 : f32
    %384 = vector.broadcast %cst_119 : f32 to vector<8x128xf32>
    %385 = arith.addf %384, %383 : vector<8x128xf32>
    %386 = arith.divf %384, %385 : vector<8x128xf32>
    %387 = vector.extract_strided_slice %380 {offsets = [0, 128], sizes = [8, 128], strides = [1, 1]} : vector<8x512xf32> to vector<8x128xf32>
    %388 = arith.negf %387 : vector<8x128xf32>
    %389 = math.exp %388 : vector<8x128xf32>
    %cst_120 = arith.constant 1.000000e+00 : f32
    %390 = vector.broadcast %cst_120 : f32 to vector<8x128xf32>
    %391 = arith.addf %390, %389 : vector<8x128xf32>
    %392 = arith.divf %390, %391 : vector<8x128xf32>
    %393 = vector.extract_strided_slice %380 {offsets = [0, 256], sizes = [8, 128], strides = [1, 1]} : vector<8x512xf32> to vector<8x128xf32>
    %394 = math.tanh %393 : vector<8x128xf32>
    %395 = vector.extract_strided_slice %380 {offsets = [0, 384], sizes = [8, 128], strides = [1, 1]} : vector<8x512xf32> to vector<8x128xf32>
    %396 = arith.negf %395 : vector<8x128xf32>
    %397 = math.exp %396 : vector<8x128xf32>
    %cst_121 = arith.constant 1.000000e+00 : f32
    %398 = vector.broadcast %cst_121 : f32 to vector<8x128xf32>
    %399 = arith.addf %398, %397 : vector<8x128xf32>
    %400 = arith.divf %398, %399 : vector<8x128xf32>
    %401 = arith.mulf %392, %370 : vector<8x128xf32>
    %402 = arith.mulf %386, %394 : vector<8x128xf32>
    %403 = arith.addf %401, %402 : vector<8x128xf32>
    %404 = math.tanh %403 : vector<8x128xf32>
    %405 = arith.mulf %400, %404 : vector<8x128xf32>
    %c0_122 = arith.constant 0 : index
    %c11 = arith.constant 11 : index
    %c0_123 = arith.constant 0 : index
    %406 = vector.load %arg8[%c0_122, %c11, %c0_123] : memref<8x32x128xf32, #tpu.memory_space<vmem>>, vector<8x1x128xf32>
    %407 = vector.shape_cast %406 : vector<8x1x128xf32> to vector<8x128xf32>
    %408 = vector.shape_cast %405 : vector<8x128xf32> to vector<8x1x128xf32>
    tpu.vector_store %arg8[%c0_122, %c11, %c0_123], %408 {strides = array<i32>} : memref<8x32x128xf32, #tpu.memory_space<vmem>>, vector<8x1x128xf32>,
    %c96 = arith.constant 96 : index
    %c0_124 = arith.constant 0 : index
    %409 = vector.load %arg11[%c96, %c0_124] : memref<256x512xf32, #tpu.memory_space<vmem>>, vector<8x512xf32>
    %410 = arith.truncf %405 : vector<8x128xf32> to vector<8x128xbf16>
    %c0_125 = arith.constant 0 : index
    %c0_126 = arith.constant 0 : index
    %411 = vector.load %arg6[%c0_125, %c0_126] : memref<128x512xbf16, #tpu.memory_space<vmem>>, vector<128x512xbf16>
    %cst_127 = arith.constant dense<0.000000e+00> : vector<8x512xf32>
    %412 = tpu.matmul %410, %411, %cst_127 {dimension_numbers = #tpu.dot_dimension_numbers<[1], [0], [0], [1], [0, 0, 1, 1], [], []>} : vector<8x128xbf16>, vector<128x512xbf16>, vector<8x512xf32> -> vector<8x512xf32>
    %413 = arith.addf %409, %412 : vector<8x512xf32>
    %414 = vector.extract_strided_slice %413 {offsets = [0, 0], sizes = [8, 128], strides = [1, 1]} : vector<8x512xf32> to vector<8x128xf32>
    %415 = arith.negf %414 : vector<8x128xf32>
    %416 = math.exp %415 : vector<8x128xf32>
    %cst_128 = arith.constant 1.000000e+00 : f32
    %417 = vector.broadcast %cst_128 : f32 to vector<8x128xf32>
    %418 = arith.addf %417, %416 : vector<8x128xf32>
    %419 = arith.divf %417, %418 : vector<8x128xf32>
    %420 = vector.extract_strided_slice %413 {offsets = [0, 128], sizes = [8, 128], strides = [1, 1]} : vector<8x512xf32> to vector<8x128xf32>
    %421 = arith.negf %420 : vector<8x128xf32>
    %422 = math.exp %421 : vector<8x128xf32>
    %cst_129 = arith.constant 1.000000e+00 : f32
    %423 = vector.broadcast %cst_129 : f32 to vector<8x128xf32>
    %424 = arith.addf %423, %422 : vector<8x128xf32>
    %425 = arith.divf %423, %424 : vector<8x128xf32>
    %426 = vector.extract_strided_slice %413 {offsets = [0, 256], sizes = [8, 128], strides = [1, 1]} : vector<8x512xf32> to vector<8x128xf32>
    %427 = math.tanh %426 : vector<8x128xf32>
    %428 = vector.extract_strided_slice %413 {offsets = [0, 384], sizes = [8, 128], strides = [1, 1]} : vector<8x512xf32> to vector<8x128xf32>
    %429 = arith.negf %428 : vector<8x128xf32>
    %430 = math.exp %429 : vector<8x128xf32>
    %cst_130 = arith.constant 1.000000e+00 : f32
    %431 = vector.broadcast %cst_130 : f32 to vector<8x128xf32>
    %432 = arith.addf %431, %430 : vector<8x128xf32>
    %433 = arith.divf %431, %432 : vector<8x128xf32>
    %434 = arith.mulf %425, %403 : vector<8x128xf32>
    %435 = arith.mulf %419, %427 : vector<8x128xf32>
    %436 = arith.addf %434, %435 : vector<8x128xf32>
    %437 = math.tanh %436 : vector<8x128xf32>
    %438 = arith.mulf %433, %437 : vector<8x128xf32>
    %c0_131 = arith.constant 0 : index
    %c12 = arith.constant 12 : index
    %c0_132 = arith.constant 0 : index
    %439 = vector.load %arg8[%c0_131, %c12, %c0_132] : memref<8x32x128xf32, #tpu.memory_space<vmem>>, vector<8x1x128xf32>
    %440 = vector.shape_cast %439 : vector<8x1x128xf32> to vector<8x128xf32>
    %441 = vector.shape_cast %438 : vector<8x128xf32> to vector<8x1x128xf32>
    tpu.vector_store %arg8[%c0_131, %c12, %c0_132], %441 {strides = array<i32>} : memref<8x32x128xf32, #tpu.memory_space<vmem>>, vector<8x1x128xf32>,
    %c104 = arith.constant 104 : index
    %c0_133 = arith.constant 0 : index
    %442 = vector.load %arg11[%c104, %c0_133] : memref<256x512xf32, #tpu.memory_space<vmem>>, vector<8x512xf32>
    %443 = arith.truncf %438 : vector<8x128xf32> to vector<8x128xbf16>
    %c0_134 = arith.constant 0 : index
    %c0_135 = arith.constant 0 : index
    %444 = vector.load %arg6[%c0_134, %c0_135] : memref<128x512xbf16, #tpu.memory_space<vmem>>, vector<128x512xbf16>
    %cst_136 = arith.constant dense<0.000000e+00> : vector<8x512xf32>
    %445 = tpu.matmul %443, %444, %cst_136 {dimension_numbers = #tpu.dot_dimension_numbers<[1], [0], [0], [1], [0, 0, 1, 1], [], []>} : vector<8x128xbf16>, vector<128x512xbf16>, vector<8x512xf32> -> vector<8x512xf32>
    %446 = arith.addf %442, %445 : vector<8x512xf32>
    %447 = vector.extract_strided_slice %446 {offsets = [0, 0], sizes = [8, 128], strides = [1, 1]} : vector<8x512xf32> to vector<8x128xf32>
    %448 = arith.negf %447 : vector<8x128xf32>
    %449 = math.exp %448 : vector<8x128xf32>
    %cst_137 = arith.constant 1.000000e+00 : f32
    %450 = vector.broadcast %cst_137 : f32 to vector<8x128xf32>
    %451 = arith.addf %450, %449 : vector<8x128xf32>
    %452 = arith.divf %450, %451 : vector<8x128xf32>
    %453 = vector.extract_strided_slice %446 {offsets = [0, 128], sizes = [8, 128], strides = [1, 1]} : vector<8x512xf32> to vector<8x128xf32>
    %454 = arith.negf %453 : vector<8x128xf32>
    %455 = math.exp %454 : vector<8x128xf32>
    %cst_138 = arith.constant 1.000000e+00 : f32
    %456 = vector.broadcast %cst_138 : f32 to vector<8x128xf32>
    %457 = arith.addf %456, %455 : vector<8x128xf32>
    %458 = arith.divf %456, %457 : vector<8x128xf32>
    %459 = vector.extract_strided_slice %446 {offsets = [0, 256], sizes = [8, 128], strides = [1, 1]} : vector<8x512xf32> to vector<8x128xf32>
    %460 = math.tanh %459 : vector<8x128xf32>
    %461 = vector.extract_strided_slice %446 {offsets = [0, 384], sizes = [8, 128], strides = [1, 1]} : vector<8x512xf32> to vector<8x128xf32>
    %462 = arith.negf %461 : vector<8x128xf32>
    %463 = math.exp %462 : vector<8x128xf32>
    %cst_139 = arith.constant 1.000000e+00 : f32
    %464 = vector.broadcast %cst_139 : f32 to vector<8x128xf32>
    %465 = arith.addf %464, %463 : vector<8x128xf32>
    %466 = arith.divf %464, %465 : vector<8x128xf32>
    %467 = arith.mulf %458, %436 : vector<8x128xf32>
    %468 = arith.mulf %452, %460 : vector<8x128xf32>
    %469 = arith.addf %467, %468 : vector<8x128xf32>
    %470 = math.tanh %469 : vector<8x128xf32>
    %471 = arith.mulf %466, %470 : vector<8x128xf32>
    %c0_140 = arith.constant 0 : index
    %c13 = arith.constant 13 : index
    %c0_141 = arith.constant 0 : index
    %472 = vector.load %arg8[%c0_140, %c13, %c0_141] : memref<8x32x128xf32, #tpu.memory_space<vmem>>, vector<8x1x128xf32>
    %473 = vector.shape_cast %472 : vector<8x1x128xf32> to vector<8x128xf32>
    %474 = vector.shape_cast %471 : vector<8x128xf32> to vector<8x1x128xf32>
    tpu.vector_store %arg8[%c0_140, %c13, %c0_141], %474 {strides = array<i32>} : memref<8x32x128xf32, #tpu.memory_space<vmem>>, vector<8x1x128xf32>,
    %c112 = arith.constant 112 : index
    %c0_142 = arith.constant 0 : index
    %475 = vector.load %arg11[%c112, %c0_142] : memref<256x512xf32, #tpu.memory_space<vmem>>, vector<8x512xf32>
    %476 = arith.truncf %471 : vector<8x128xf32> to vector<8x128xbf16>
    %c0_143 = arith.constant 0 : index
    %c0_144 = arith.constant 0 : index
    %477 = vector.load %arg6[%c0_143, %c0_144] : memref<128x512xbf16, #tpu.memory_space<vmem>>, vector<128x512xbf16>
    %cst_145 = arith.constant dense<0.000000e+00> : vector<8x512xf32>
    %478 = tpu.matmul %476, %477, %cst_145 {dimension_numbers = #tpu.dot_dimension_numbers<[1], [0], [0], [1], [0, 0, 1, 1], [], []>} : vector<8x128xbf16>, vector<128x512xbf16>, vector<8x512xf32> -> vector<8x512xf32>
    %479 = arith.addf %475, %478 : vector<8x512xf32>
    %480 = vector.extract_strided_slice %479 {offsets = [0, 0], sizes = [8, 128], strides = [1, 1]} : vector<8x512xf32> to vector<8x128xf32>
    %481 = arith.negf %480 : vector<8x128xf32>
    %482 = math.exp %481 : vector<8x128xf32>
    %cst_146 = arith.constant 1.000000e+00 : f32
    %483 = vector.broadcast %cst_146 : f32 to vector<8x128xf32>
    %484 = arith.addf %483, %482 : vector<8x128xf32>
    %485 = arith.divf %483, %484 : vector<8x128xf32>
    %486 = vector.extract_strided_slice %479 {offsets = [0, 128], sizes = [8, 128], strides = [1, 1]} : vector<8x512xf32> to vector<8x128xf32>
    %487 = arith.negf %486 : vector<8x128xf32>
    %488 = math.exp %487 : vector<8x128xf32>
    %cst_147 = arith.constant 1.000000e+00 : f32
    %489 = vector.broadcast %cst_147 : f32 to vector<8x128xf32>
    %490 = arith.addf %489, %488 : vector<8x128xf32>
    %491 = arith.divf %489, %490 : vector<8x128xf32>
    %492 = vector.extract_strided_slice %479 {offsets = [0, 256], sizes = [8, 128], strides = [1, 1]} : vector<8x512xf32> to vector<8x128xf32>
    %493 = math.tanh %492 : vector<8x128xf32>
    %494 = vector.extract_strided_slice %479 {offsets = [0, 384], sizes = [8, 128], strides = [1, 1]} : vector<8x512xf32> to vector<8x128xf32>
    %495 = arith.negf %494 : vector<8x128xf32>
    %496 = math.exp %495 : vector<8x128xf32>
    %cst_148 = arith.constant 1.000000e+00 : f32
    %497 = vector.broadcast %cst_148 : f32 to vector<8x128xf32>
    %498 = arith.addf %497, %496 : vector<8x128xf32>
    %499 = arith.divf %497, %498 : vector<8x128xf32>
    %500 = arith.mulf %491, %469 : vector<8x128xf32>
    %501 = arith.mulf %485, %493 : vector<8x128xf32>
    %502 = arith.addf %500, %501 : vector<8x128xf32>
    %503 = math.tanh %502 : vector<8x128xf32>
    %504 = arith.mulf %499, %503 : vector<8x128xf32>
    %c0_149 = arith.constant 0 : index
    %c14 = arith.constant 14 : index
    %c0_150 = arith.constant 0 : index
    %505 = vector.load %arg8[%c0_149, %c14, %c0_150] : memref<8x32x128xf32, #tpu.memory_space<vmem>>, vector<8x1x128xf32>
    %506 = vector.shape_cast %505 : vector<8x1x128xf32> to vector<8x128xf32>
    %507 = vector.shape_cast %504 : vector<8x128xf32> to vector<8x1x128xf32>
    tpu.vector_store %arg8[%c0_149, %c14, %c0_150], %507 {strides = array<i32>} : memref<8x32x128xf32, #tpu.memory_space<vmem>>, vector<8x1x128xf32>,
    %c120 = arith.constant 120 : index
    %c0_151 = arith.constant 0 : index
    %508 = vector.load %arg11[%c120, %c0_151] : memref<256x512xf32, #tpu.memory_space<vmem>>, vector<8x512xf32>
    %509 = arith.truncf %504 : vector<8x128xf32> to vector<8x128xbf16>
    %c0_152 = arith.constant 0 : index
    %c0_153 = arith.constant 0 : index
    %510 = vector.load %arg6[%c0_152, %c0_153] : memref<128x512xbf16, #tpu.memory_space<vmem>>, vector<128x512xbf16>
    %cst_154 = arith.constant dense<0.000000e+00> : vector<8x512xf32>
    %511 = tpu.matmul %509, %510, %cst_154 {dimension_numbers = #tpu.dot_dimension_numbers<[1], [0], [0], [1], [0, 0, 1, 1], [], []>} : vector<8x128xbf16>, vector<128x512xbf16>, vector<8x512xf32> -> vector<8x512xf32>
    %512 = arith.addf %508, %511 : vector<8x512xf32>
    %513 = vector.extract_strided_slice %512 {offsets = [0, 0], sizes = [8, 128], strides = [1, 1]} : vector<8x512xf32> to vector<8x128xf32>
    %514 = arith.negf %513 : vector<8x128xf32>
    %515 = math.exp %514 : vector<8x128xf32>
    %cst_155 = arith.constant 1.000000e+00 : f32
    %516 = vector.broadcast %cst_155 : f32 to vector<8x128xf32>
    %517 = arith.addf %516, %515 : vector<8x128xf32>
    %518 = arith.divf %516, %517 : vector<8x128xf32>
    %519 = vector.extract_strided_slice %512 {offsets = [0, 128], sizes = [8, 128], strides = [1, 1]} : vector<8x512xf32> to vector<8x128xf32>
    %520 = arith.negf %519 : vector<8x128xf32>
    %521 = math.exp %520 : vector<8x128xf32>
    %cst_156 = arith.constant 1.000000e+00 : f32
    %522 = vector.broadcast %cst_156 : f32 to vector<8x128xf32>
    %523 = arith.addf %522, %521 : vector<8x128xf32>
    %524 = arith.divf %522, %523 : vector<8x128xf32>
    %525 = vector.extract_strided_slice %512 {offsets = [0, 256], sizes = [8, 128], strides = [1, 1]} : vector<8x512xf32> to vector<8x128xf32>
    %526 = math.tanh %525 : vector<8x128xf32>
    %527 = vector.extract_strided_slice %512 {offsets = [0, 384], sizes = [8, 128], strides = [1, 1]} : vector<8x512xf32> to vector<8x128xf32>
    %528 = arith.negf %527 : vector<8x128xf32>
    %529 = math.exp %528 : vector<8x128xf32>
    %cst_157 = arith.constant 1.000000e+00 : f32
    %530 = vector.broadcast %cst_157 : f32 to vector<8x128xf32>
    %531 = arith.addf %530, %529 : vector<8x128xf32>
    %532 = arith.divf %530, %531 : vector<8x128xf32>
    %533 = arith.mulf %524, %502 : vector<8x128xf32>
    %534 = arith.mulf %518, %526 : vector<8x128xf32>
    %535 = arith.addf %533, %534 : vector<8x128xf32>
    %536 = math.tanh %535 : vector<8x128xf32>
    %537 = arith.mulf %532, %536 : vector<8x128xf32>
    %c0_158 = arith.constant 0 : index
    %c15 = arith.constant 15 : index
    %c0_159 = arith.constant 0 : index
    %538 = vector.load %arg8[%c0_158, %c15, %c0_159] : memref<8x32x128xf32, #tpu.memory_space<vmem>>, vector<8x1x128xf32>
    %539 = vector.shape_cast %538 : vector<8x1x128xf32> to vector<8x128xf32>
    %540 = vector.shape_cast %537 : vector<8x128xf32> to vector<8x1x128xf32>
    tpu.vector_store %arg8[%c0_158, %c15, %c0_159], %540 {strides = array<i32>} : memref<8x32x128xf32, #tpu.memory_space<vmem>>, vector<8x1x128xf32>,
    %c128 = arith.constant 128 : index
    %c0_160 = arith.constant 0 : index
    %541 = vector.load %arg11[%c128, %c0_160] : memref<256x512xf32, #tpu.memory_space<vmem>>, vector<8x512xf32>
    %542 = arith.truncf %537 : vector<8x128xf32> to vector<8x128xbf16>
    %c0_161 = arith.constant 0 : index
    %c0_162 = arith.constant 0 : index
    %543 = vector.load %arg6[%c0_161, %c0_162] : memref<128x512xbf16, #tpu.memory_space<vmem>>, vector<128x512xbf16>
    %cst_163 = arith.constant dense<0.000000e+00> : vector<8x512xf32>
    %544 = tpu.matmul %542, %543, %cst_163 {dimension_numbers = #tpu.dot_dimension_numbers<[1], [0], [0], [1], [0, 0, 1, 1], [], []>} : vector<8x128xbf16>, vector<128x512xbf16>, vector<8x512xf32> -> vector<8x512xf32>
    %545 = arith.addf %541, %544 : vector<8x512xf32>
    %546 = vector.extract_strided_slice %545 {offsets = [0, 0], sizes = [8, 128], strides = [1, 1]} : vector<8x512xf32> to vector<8x128xf32>
    %547 = arith.negf %546 : vector<8x128xf32>
    %548 = math.exp %547 : vector<8x128xf32>
    %cst_164 = arith.constant 1.000000e+00 : f32
    %549 = vector.broadcast %cst_164 : f32 to vector<8x128xf32>
    %550 = arith.addf %549, %548 : vector<8x128xf32>
    %551 = arith.divf %549, %550 : vector<8x128xf32>
    %552 = vector.extract_strided_slice %545 {offsets = [0, 128], sizes = [8, 128], strides = [1, 1]} : vector<8x512xf32> to vector<8x128xf32>
    %553 = arith.negf %552 : vector<8x128xf32>
    %554 = math.exp %553 : vector<8x128xf32>
    %cst_165 = arith.constant 1.000000e+00 : f32
    %555 = vector.broadcast %cst_165 : f32 to vector<8x128xf32>
    %556 = arith.addf %555, %554 : vector<8x128xf32>
    %557 = arith.divf %555, %556 : vector<8x128xf32>
    %558 = vector.extract_strided_slice %545 {offsets = [0, 256], sizes = [8, 128], strides = [1, 1]} : vector<8x512xf32> to vector<8x128xf32>
    %559 = math.tanh %558 : vector<8x128xf32>
    %560 = vector.extract_strided_slice %545 {offsets = [0, 384], sizes = [8, 128], strides = [1, 1]} : vector<8x512xf32> to vector<8x128xf32>
    %561 = arith.negf %560 : vector<8x128xf32>
    %562 = math.exp %561 : vector<8x128xf32>
    %cst_166 = arith.constant 1.000000e+00 : f32
    %563 = vector.broadcast %cst_166 : f32 to vector<8x128xf32>
    %564 = arith.addf %563, %562 : vector<8x128xf32>
    %565 = arith.divf %563, %564 : vector<8x128xf32>
    %566 = arith.mulf %557, %535 : vector<8x128xf32>
    %567 = arith.mulf %551, %559 : vector<8x128xf32>
    %568 = arith.addf %566, %567 : vector<8x128xf32>
    %569 = math.tanh %568 : vector<8x128xf32>
    %570 = arith.mulf %565, %569 : vector<8x128xf32>
    %c0_167 = arith.constant 0 : index
    %c16_168 = arith.constant 16 : index
    %c0_169 = arith.constant 0 : index
    %571 = vector.load %arg8[%c0_167, %c16_168, %c0_169] : memref<8x32x128xf32, #tpu.memory_space<vmem>>, vector<8x1x128xf32>
    %572 = vector.shape_cast %571 : vector<8x1x128xf32> to vector<8x128xf32>
    %573 = vector.shape_cast %570 : vector<8x128xf32> to vector<8x1x128xf32>
    tpu.vector_store %arg8[%c0_167, %c16_168, %c0_169], %573 {strides = array<i32>} : memref<8x32x128xf32, #tpu.memory_space<vmem>>, vector<8x1x128xf32>,
    %c136 = arith.constant 136 : index
    %c0_170 = arith.constant 0 : index
    %574 = vector.load %arg11[%c136, %c0_170] : memref<256x512xf32, #tpu.memory_space<vmem>>, vector<8x512xf32>
    %575 = arith.truncf %570 : vector<8x128xf32> to vector<8x128xbf16>
    %c0_171 = arith.constant 0 : index
    %c0_172 = arith.constant 0 : index
    %576 = vector.load %arg6[%c0_171, %c0_172] : memref<128x512xbf16, #tpu.memory_space<vmem>>, vector<128x512xbf16>
    %cst_173 = arith.constant dense<0.000000e+00> : vector<8x512xf32>
    %577 = tpu.matmul %575, %576, %cst_173 {dimension_numbers = #tpu.dot_dimension_numbers<[1], [0], [0], [1], [0, 0, 1, 1], [], []>} : vector<8x128xbf16>, vector<128x512xbf16>, vector<8x512xf32> -> vector<8x512xf32>
    %578 = arith.addf %574, %577 : vector<8x512xf32>
    %579 = vector.extract_strided_slice %578 {offsets = [0, 0], sizes = [8, 128], strides = [1, 1]} : vector<8x512xf32> to vector<8x128xf32>
    %580 = arith.negf %579 : vector<8x128xf32>
    %581 = math.exp %580 : vector<8x128xf32>
    %cst_174 = arith.constant 1.000000e+00 : f32
    %582 = vector.broadcast %cst_174 : f32 to vector<8x128xf32>
    %583 = arith.addf %582, %581 : vector<8x128xf32>
    %584 = arith.divf %582, %583 : vector<8x128xf32>
    %585 = vector.extract_strided_slice %578 {offsets = [0, 128], sizes = [8, 128], strides = [1, 1]} : vector<8x512xf32> to vector<8x128xf32>
    %586 = arith.negf %585 : vector<8x128xf32>
    %587 = math.exp %586 : vector<8x128xf32>
    %cst_175 = arith.constant 1.000000e+00 : f32
    %588 = vector.broadcast %cst_175 : f32 to vector<8x128xf32>
    %589 = arith.addf %588, %587 : vector<8x128xf32>
    %590 = arith.divf %588, %589 : vector<8x128xf32>
    %591 = vector.extract_strided_slice %578 {offsets = [0, 256], sizes = [8, 128], strides = [1, 1]} : vector<8x512xf32> to vector<8x128xf32>
    %592 = math.tanh %591 : vector<8x128xf32>
    %593 = vector.extract_strided_slice %578 {offsets = [0, 384], sizes = [8, 128], strides = [1, 1]} : vector<8x512xf32> to vector<8x128xf32>
    %594 = arith.negf %593 : vector<8x128xf32>
    %595 = math.exp %594 : vector<8x128xf32>
    %cst_176 = arith.constant 1.000000e+00 : f32
    %596 = vector.broadcast %cst_176 : f32 to vector<8x128xf32>
    %597 = arith.addf %596, %595 : vector<8x128xf32>
    %598 = arith.divf %596, %597 : vector<8x128xf32>
    %599 = arith.mulf %590, %568 : vector<8x128xf32>
    %600 = arith.mulf %584, %592 : vector<8x128xf32>
    %601 = arith.addf %599, %600 : vector<8x128xf32>
    %602 = math.tanh %601 : vector<8x128xf32>
    %603 = arith.mulf %598, %602 : vector<8x128xf32>
    %c0_177 = arith.constant 0 : index
    %c17 = arith.constant 17 : index
    %c0_178 = arith.constant 0 : index
    %604 = vector.load %arg8[%c0_177, %c17, %c0_178] : memref<8x32x128xf32, #tpu.memory_space<vmem>>, vector<8x1x128xf32>
    %605 = vector.shape_cast %604 : vector<8x1x128xf32> to vector<8x128xf32>
    %606 = vector.shape_cast %603 : vector<8x128xf32> to vector<8x1x128xf32>
    tpu.vector_store %arg8[%c0_177, %c17, %c0_178], %606 {strides = array<i32>} : memref<8x32x128xf32, #tpu.memory_space<vmem>>, vector<8x1x128xf32>,
    %c144 = arith.constant 144 : index
    %c0_179 = arith.constant 0 : index
    %607 = vector.load %arg11[%c144, %c0_179] : memref<256x512xf32, #tpu.memory_space<vmem>>, vector<8x512xf32>
    %608 = arith.truncf %603 : vector<8x128xf32> to vector<8x128xbf16>
    %c0_180 = arith.constant 0 : index
    %c0_181 = arith.constant 0 : index
    %609 = vector.load %arg6[%c0_180, %c0_181] : memref<128x512xbf16, #tpu.memory_space<vmem>>, vector<128x512xbf16>
    %cst_182 = arith.constant dense<0.000000e+00> : vector<8x512xf32>
    %610 = tpu.matmul %608, %609, %cst_182 {dimension_numbers = #tpu.dot_dimension_numbers<[1], [0], [0], [1], [0, 0, 1, 1], [], []>} : vector<8x128xbf16>, vector<128x512xbf16>, vector<8x512xf32> -> vector<8x512xf32>
    %611 = arith.addf %607, %610 : vector<8x512xf32>
    %612 = vector.extract_strided_slice %611 {offsets = [0, 0], sizes = [8, 128], strides = [1, 1]} : vector<8x512xf32> to vector<8x128xf32>
    %613 = arith.negf %612 : vector<8x128xf32>
    %614 = math.exp %613 : vector<8x128xf32>
    %cst_183 = arith.constant 1.000000e+00 : f32
    %615 = vector.broadcast %cst_183 : f32 to vector<8x128xf32>
    %616 = arith.addf %615, %614 : vector<8x128xf32>
    %617 = arith.divf %615, %616 : vector<8x128xf32>
    %618 = vector.extract_strided_slice %611 {offsets = [0, 128], sizes = [8, 128], strides = [1, 1]} : vector<8x512xf32> to vector<8x128xf32>
    %619 = arith.negf %618 : vector<8x128xf32>
    %620 = math.exp %619 : vector<8x128xf32>
    %cst_184 = arith.constant 1.000000e+00 : f32
    %621 = vector.broadcast %cst_184 : f32 to vector<8x128xf32>
    %622 = arith.addf %621, %620 : vector<8x128xf32>
    %623 = arith.divf %621, %622 : vector<8x128xf32>
    %624 = vector.extract_strided_slice %611 {offsets = [0, 256], sizes = [8, 128], strides = [1, 1]} : vector<8x512xf32> to vector<8x128xf32>
    %625 = math.tanh %624 : vector<8x128xf32>
    %626 = vector.extract_strided_slice %611 {offsets = [0, 384], sizes = [8, 128], strides = [1, 1]} : vector<8x512xf32> to vector<8x128xf32>
    %627 = arith.negf %626 : vector<8x128xf32>
    %628 = math.exp %627 : vector<8x128xf32>
    %cst_185 = arith.constant 1.000000e+00 : f32
    %629 = vector.broadcast %cst_185 : f32 to vector<8x128xf32>
    %630 = arith.addf %629, %628 : vector<8x128xf32>
    %631 = arith.divf %629, %630 : vector<8x128xf32>
    %632 = arith.mulf %623, %601 : vector<8x128xf32>
    %633 = arith.mulf %617, %625 : vector<8x128xf32>
    %634 = arith.addf %632, %633 : vector<8x128xf32>
    %635 = math.tanh %634 : vector<8x128xf32>
    %636 = arith.mulf %631, %635 : vector<8x128xf32>
    %c0_186 = arith.constant 0 : index
    %c18 = arith.constant 18 : index
    %c0_187 = arith.constant 0 : index
    %637 = vector.load %arg8[%c0_186, %c18, %c0_187] : memref<8x32x128xf32, #tpu.memory_space<vmem>>, vector<8x1x128xf32>
    %638 = vector.shape_cast %637 : vector<8x1x128xf32> to vector<8x128xf32>
    %639 = vector.shape_cast %636 : vector<8x128xf32> to vector<8x1x128xf32>
    tpu.vector_store %arg8[%c0_186, %c18, %c0_187], %639 {strides = array<i32>} : memref<8x32x128xf32, #tpu.memory_space<vmem>>, vector<8x1x128xf32>,
    %c152 = arith.constant 152 : index
    %c0_188 = arith.constant 0 : index
    %640 = vector.load %arg11[%c152, %c0_188] : memref<256x512xf32, #tpu.memory_space<vmem>>, vector<8x512xf32>
    %641 = arith.truncf %636 : vector<8x128xf32> to vector<8x128xbf16>
    %c0_189 = arith.constant 0 : index
    %c0_190 = arith.constant 0 : index
    %642 = vector.load %arg6[%c0_189, %c0_190] : memref<128x512xbf16, #tpu.memory_space<vmem>>, vector<128x512xbf16>
    %cst_191 = arith.constant dense<0.000000e+00> : vector<8x512xf32>
    %643 = tpu.matmul %641, %642, %cst_191 {dimension_numbers = #tpu.dot_dimension_numbers<[1], [0], [0], [1], [0, 0, 1, 1], [], []>} : vector<8x128xbf16>, vector<128x512xbf16>, vector<8x512xf32> -> vector<8x512xf32>
    %644 = arith.addf %640, %643 : vector<8x512xf32>
    %645 = vector.extract_strided_slice %644 {offsets = [0, 0], sizes = [8, 128], strides = [1, 1]} : vector<8x512xf32> to vector<8x128xf32>
    %646 = arith.negf %645 : vector<8x128xf32>
    %647 = math.exp %646 : vector<8x128xf32>
    %cst_192 = arith.constant 1.000000e+00 : f32
    %648 = vector.broadcast %cst_192 : f32 to vector<8x128xf32>
    %649 = arith.addf %648, %647 : vector<8x128xf32>
    %650 = arith.divf %648, %649 : vector<8x128xf32>
    %651 = vector.extract_strided_slice %644 {offsets = [0, 128], sizes = [8, 128], strides = [1, 1]} : vector<8x512xf32> to vector<8x128xf32>
    %652 = arith.negf %651 : vector<8x128xf32>
    %653 = math.exp %652 : vector<8x128xf32>
    %cst_193 = arith.constant 1.000000e+00 : f32
    %654 = vector.broadcast %cst_193 : f32 to vector<8x128xf32>
    %655 = arith.addf %654, %653 : vector<8x128xf32>
    %656 = arith.divf %654, %655 : vector<8x128xf32>
    %657 = vector.extract_strided_slice %644 {offsets = [0, 256], sizes = [8, 128], strides = [1, 1]} : vector<8x512xf32> to vector<8x128xf32>
    %658 = math.tanh %657 : vector<8x128xf32>
    %659 = vector.extract_strided_slice %644 {offsets = [0, 384], sizes = [8, 128], strides = [1, 1]} : vector<8x512xf32> to vector<8x128xf32>
    %660 = arith.negf %659 : vector<8x128xf32>
    %661 = math.exp %660 : vector<8x128xf32>
    %cst_194 = arith.constant 1.000000e+00 : f32
    %662 = vector.broadcast %cst_194 : f32 to vector<8x128xf32>
    %663 = arith.addf %662, %661 : vector<8x128xf32>
    %664 = arith.divf %662, %663 : vector<8x128xf32>
    %665 = arith.mulf %656, %634 : vector<8x128xf32>
    %666 = arith.mulf %650, %658 : vector<8x128xf32>
    %667 = arith.addf %665, %666 : vector<8x128xf32>
    %668 = math.tanh %667 : vector<8x128xf32>
    %669 = arith.mulf %664, %668 : vector<8x128xf32>
    %c0_195 = arith.constant 0 : index
    %c19 = arith.constant 19 : index
    %c0_196 = arith.constant 0 : index
    %670 = vector.load %arg8[%c0_195, %c19, %c0_196] : memref<8x32x128xf32, #tpu.memory_space<vmem>>, vector<8x1x128xf32>
    %671 = vector.shape_cast %670 : vector<8x1x128xf32> to vector<8x128xf32>
    %672 = vector.shape_cast %669 : vector<8x128xf32> to vector<8x1x128xf32>
    tpu.vector_store %arg8[%c0_195, %c19, %c0_196], %672 {strides = array<i32>} : memref<8x32x128xf32, #tpu.memory_space<vmem>>, vector<8x1x128xf32>,
    %c160 = arith.constant 160 : index
    %c0_197 = arith.constant 0 : index
    %673 = vector.load %arg11[%c160, %c0_197] : memref<256x512xf32, #tpu.memory_space<vmem>>, vector<8x512xf32>
    %674 = arith.truncf %669 : vector<8x128xf32> to vector<8x128xbf16>
    %c0_198 = arith.constant 0 : index
    %c0_199 = arith.constant 0 : index
    %675 = vector.load %arg6[%c0_198, %c0_199] : memref<128x512xbf16, #tpu.memory_space<vmem>>, vector<128x512xbf16>
    %cst_200 = arith.constant dense<0.000000e+00> : vector<8x512xf32>
    %676 = tpu.matmul %674, %675, %cst_200 {dimension_numbers = #tpu.dot_dimension_numbers<[1], [0], [0], [1], [0, 0, 1, 1], [], []>} : vector<8x128xbf16>, vector<128x512xbf16>, vector<8x512xf32> -> vector<8x512xf32>
    %677 = arith.addf %673, %676 : vector<8x512xf32>
    %678 = vector.extract_strided_slice %677 {offsets = [0, 0], sizes = [8, 128], strides = [1, 1]} : vector<8x512xf32> to vector<8x128xf32>
    %679 = arith.negf %678 : vector<8x128xf32>
    %680 = math.exp %679 : vector<8x128xf32>
    %cst_201 = arith.constant 1.000000e+00 : f32
    %681 = vector.broadcast %cst_201 : f32 to vector<8x128xf32>
    %682 = arith.addf %681, %680 : vector<8x128xf32>
    %683 = arith.divf %681, %682 : vector<8x128xf32>
    %684 = vector.extract_strided_slice %677 {offsets = [0, 128], sizes = [8, 128], strides = [1, 1]} : vector<8x512xf32> to vector<8x128xf32>
    %685 = arith.negf %684 : vector<8x128xf32>
    %686 = math.exp %685 : vector<8x128xf32>
    %cst_202 = arith.constant 1.000000e+00 : f32
    %687 = vector.broadcast %cst_202 : f32 to vector<8x128xf32>
    %688 = arith.addf %687, %686 : vector<8x128xf32>
    %689 = arith.divf %687, %688 : vector<8x128xf32>
    %690 = vector.extract_strided_slice %677 {offsets = [0, 256], sizes = [8, 128], strides = [1, 1]} : vector<8x512xf32> to vector<8x128xf32>
    %691 = math.tanh %690 : vector<8x128xf32>
    %692 = vector.extract_strided_slice %677 {offsets = [0, 384], sizes = [8, 128], strides = [1, 1]} : vector<8x512xf32> to vector<8x128xf32>
    %693 = arith.negf %692 : vector<8x128xf32>
    %694 = math.exp %693 : vector<8x128xf32>
    %cst_203 = arith.constant 1.000000e+00 : f32
    %695 = vector.broadcast %cst_203 : f32 to vector<8x128xf32>
    %696 = arith.addf %695, %694 : vector<8x128xf32>
    %697 = arith.divf %695, %696 : vector<8x128xf32>
    %698 = arith.mulf %689, %667 : vector<8x128xf32>
    %699 = arith.mulf %683, %691 : vector<8x128xf32>
    %700 = arith.addf %698, %699 : vector<8x128xf32>
    %701 = math.tanh %700 : vector<8x128xf32>
    %702 = arith.mulf %697, %701 : vector<8x128xf32>
    %c0_204 = arith.constant 0 : index
    %c20 = arith.constant 20 : index
    %c0_205 = arith.constant 0 : index
    %703 = vector.load %arg8[%c0_204, %c20, %c0_205] : memref<8x32x128xf32, #tpu.memory_space<vmem>>, vector<8x1x128xf32>
    %704 = vector.shape_cast %703 : vector<8x1x128xf32> to vector<8x128xf32>
    %705 = vector.shape_cast %702 : vector<8x128xf32> to vector<8x1x128xf32>
    tpu.vector_store %arg8[%c0_204, %c20, %c0_205], %705 {strides = array<i32>} : memref<8x32x128xf32, #tpu.memory_space<vmem>>, vector<8x1x128xf32>,
    %c168 = arith.constant 168 : index
    %c0_206 = arith.constant 0 : index
    %706 = vector.load %arg11[%c168, %c0_206] : memref<256x512xf32, #tpu.memory_space<vmem>>, vector<8x512xf32>
    %707 = arith.truncf %702 : vector<8x128xf32> to vector<8x128xbf16>
    %c0_207 = arith.constant 0 : index
    %c0_208 = arith.constant 0 : index
    %708 = vector.load %arg6[%c0_207, %c0_208] : memref<128x512xbf16, #tpu.memory_space<vmem>>, vector<128x512xbf16>
    %cst_209 = arith.constant dense<0.000000e+00> : vector<8x512xf32>
    %709 = tpu.matmul %707, %708, %cst_209 {dimension_numbers = #tpu.dot_dimension_numbers<[1], [0], [0], [1], [0, 0, 1, 1], [], []>} : vector<8x128xbf16>, vector<128x512xbf16>, vector<8x512xf32> -> vector<8x512xf32>
    %710 = arith.addf %706, %709 : vector<8x512xf32>
    %711 = vector.extract_strided_slice %710 {offsets = [0, 0], sizes = [8, 128], strides = [1, 1]} : vector<8x512xf32> to vector<8x128xf32>
    %712 = arith.negf %711 : vector<8x128xf32>
    %713 = math.exp %712 : vector<8x128xf32>
    %cst_210 = arith.constant 1.000000e+00 : f32
    %714 = vector.broadcast %cst_210 : f32 to vector<8x128xf32>
    %715 = arith.addf %714, %713 : vector<8x128xf32>
    %716 = arith.divf %714, %715 : vector<8x128xf32>
    %717 = vector.extract_strided_slice %710 {offsets = [0, 128], sizes = [8, 128], strides = [1, 1]} : vector<8x512xf32> to vector<8x128xf32>
    %718 = arith.negf %717 : vector<8x128xf32>
    %719 = math.exp %718 : vector<8x128xf32>
    %cst_211 = arith.constant 1.000000e+00 : f32
    %720 = vector.broadcast %cst_211 : f32 to vector<8x128xf32>
    %721 = arith.addf %720, %719 : vector<8x128xf32>
    %722 = arith.divf %720, %721 : vector<8x128xf32>
    %723 = vector.extract_strided_slice %710 {offsets = [0, 256], sizes = [8, 128], strides = [1, 1]} : vector<8x512xf32> to vector<8x128xf32>
    %724 = math.tanh %723 : vector<8x128xf32>
    %725 = vector.extract_strided_slice %710 {offsets = [0, 384], sizes = [8, 128], strides = [1, 1]} : vector<8x512xf32> to vector<8x128xf32>
    %726 = arith.negf %725 : vector<8x128xf32>
    %727 = math.exp %726 : vector<8x128xf32>
    %cst_212 = arith.constant 1.000000e+00 : f32
    %728 = vector.broadcast %cst_212 : f32 to vector<8x128xf32>
    %729 = arith.addf %728, %727 : vector<8x128xf32>
    %730 = arith.divf %728, %729 : vector<8x128xf32>
    %731 = arith.mulf %722, %700 : vector<8x128xf32>
    %732 = arith.mulf %716, %724 : vector<8x128xf32>
    %733 = arith.addf %731, %732 : vector<8x128xf32>
    %734 = math.tanh %733 : vector<8x128xf32>
    %735 = arith.mulf %730, %734 : vector<8x128xf32>
    %c0_213 = arith.constant 0 : index
    %c21 = arith.constant 21 : index
    %c0_214 = arith.constant 0 : index
    %736 = vector.load %arg8[%c0_213, %c21, %c0_214] : memref<8x32x128xf32, #tpu.memory_space<vmem>>, vector<8x1x128xf32>
    %737 = vector.shape_cast %736 : vector<8x1x128xf32> to vector<8x128xf32>
    %738 = vector.shape_cast %735 : vector<8x128xf32> to vector<8x1x128xf32>
    tpu.vector_store %arg8[%c0_213, %c21, %c0_214], %738 {strides = array<i32>} : memref<8x32x128xf32, #tpu.memory_space<vmem>>, vector<8x1x128xf32>,
    %c176 = arith.constant 176 : index
    %c0_215 = arith.constant 0 : index
    %739 = vector.load %arg11[%c176, %c0_215] : memref<256x512xf32, #tpu.memory_space<vmem>>, vector<8x512xf32>
    %740 = arith.truncf %735 : vector<8x128xf32> to vector<8x128xbf16>
    %c0_216 = arith.constant 0 : index
    %c0_217 = arith.constant 0 : index
    %741 = vector.load %arg6[%c0_216, %c0_217] : memref<128x512xbf16, #tpu.memory_space<vmem>>, vector<128x512xbf16>
    %cst_218 = arith.constant dense<0.000000e+00> : vector<8x512xf32>
    %742 = tpu.matmul %740, %741, %cst_218 {dimension_numbers = #tpu.dot_dimension_numbers<[1], [0], [0], [1], [0, 0, 1, 1], [], []>} : vector<8x128xbf16>, vector<128x512xbf16>, vector<8x512xf32> -> vector<8x512xf32>
    %743 = arith.addf %739, %742 : vector<8x512xf32>
    %744 = vector.extract_strided_slice %743 {offsets = [0, 0], sizes = [8, 128], strides = [1, 1]} : vector<8x512xf32> to vector<8x128xf32>
    %745 = arith.negf %744 : vector<8x128xf32>
    %746 = math.exp %745 : vector<8x128xf32>
    %cst_219 = arith.constant 1.000000e+00 : f32
    %747 = vector.broadcast %cst_219 : f32 to vector<8x128xf32>
    %748 = arith.addf %747, %746 : vector<8x128xf32>
    %749 = arith.divf %747, %748 : vector<8x128xf32>
    %750 = vector.extract_strided_slice %743 {offsets = [0, 128], sizes = [8, 128], strides = [1, 1]} : vector<8x512xf32> to vector<8x128xf32>
    %751 = arith.negf %750 : vector<8x128xf32>
    %752 = math.exp %751 : vector<8x128xf32>
    %cst_220 = arith.constant 1.000000e+00 : f32
    %753 = vector.broadcast %cst_220 : f32 to vector<8x128xf32>
    %754 = arith.addf %753, %752 : vector<8x128xf32>
    %755 = arith.divf %753, %754 : vector<8x128xf32>
    %756 = vector.extract_strided_slice %743 {offsets = [0, 256], sizes = [8, 128], strides = [1, 1]} : vector<8x512xf32> to vector<8x128xf32>
    %757 = math.tanh %756 : vector<8x128xf32>
    %758 = vector.extract_strided_slice %743 {offsets = [0, 384], sizes = [8, 128], strides = [1, 1]} : vector<8x512xf32> to vector<8x128xf32>
    %759 = arith.negf %758 : vector<8x128xf32>
    %760 = math.exp %759 : vector<8x128xf32>
    %cst_221 = arith.constant 1.000000e+00 : f32
    %761 = vector.broadcast %cst_221 : f32 to vector<8x128xf32>
    %762 = arith.addf %761, %760 : vector<8x128xf32>
    %763 = arith.divf %761, %762 : vector<8x128xf32>
    %764 = arith.mulf %755, %733 : vector<8x128xf32>
    %765 = arith.mulf %749, %757 : vector<8x128xf32>
    %766 = arith.addf %764, %765 : vector<8x128xf32>
    %767 = math.tanh %766 : vector<8x128xf32>
    %768 = arith.mulf %763, %767 : vector<8x128xf32>
    %c0_222 = arith.constant 0 : index
    %c22 = arith.constant 22 : index
    %c0_223 = arith.constant 0 : index
    %769 = vector.load %arg8[%c0_222, %c22, %c0_223] : memref<8x32x128xf32, #tpu.memory_space<vmem>>, vector<8x1x128xf32>
    %770 = vector.shape_cast %769 : vector<8x1x128xf32> to vector<8x128xf32>
    %771 = vector.shape_cast %768 : vector<8x128xf32> to vector<8x1x128xf32>
    tpu.vector_store %arg8[%c0_222, %c22, %c0_223], %771 {strides = array<i32>} : memref<8x32x128xf32, #tpu.memory_space<vmem>>, vector<8x1x128xf32>,
    %c184 = arith.constant 184 : index
    %c0_224 = arith.constant 0 : index
    %772 = vector.load %arg11[%c184, %c0_224] : memref<256x512xf32, #tpu.memory_space<vmem>>, vector<8x512xf32>
    %773 = arith.truncf %768 : vector<8x128xf32> to vector<8x128xbf16>
    %c0_225 = arith.constant 0 : index
    %c0_226 = arith.constant 0 : index
    %774 = vector.load %arg6[%c0_225, %c0_226] : memref<128x512xbf16, #tpu.memory_space<vmem>>, vector<128x512xbf16>
    %cst_227 = arith.constant dense<0.000000e+00> : vector<8x512xf32>
    %775 = tpu.matmul %773, %774, %cst_227 {dimension_numbers = #tpu.dot_dimension_numbers<[1], [0], [0], [1], [0, 0, 1, 1], [], []>} : vector<8x128xbf16>, vector<128x512xbf16>, vector<8x512xf32> -> vector<8x512xf32>
    %776 = arith.addf %772, %775 : vector<8x512xf32>
    %777 = vector.extract_strided_slice %776 {offsets = [0, 0], sizes = [8, 128], strides = [1, 1]} : vector<8x512xf32> to vector<8x128xf32>
    %778 = arith.negf %777 : vector<8x128xf32>
    %779 = math.exp %778 : vector<8x128xf32>
    %cst_228 = arith.constant 1.000000e+00 : f32
    %780 = vector.broadcast %cst_228 : f32 to vector<8x128xf32>
    %781 = arith.addf %780, %779 : vector<8x128xf32>
    %782 = arith.divf %780, %781 : vector<8x128xf32>
    %783 = vector.extract_strided_slice %776 {offsets = [0, 128], sizes = [8, 128], strides = [1, 1]} : vector<8x512xf32> to vector<8x128xf32>
    %784 = arith.negf %783 : vector<8x128xf32>
    %785 = math.exp %784 : vector<8x128xf32>
    %cst_229 = arith.constant 1.000000e+00 : f32
    %786 = vector.broadcast %cst_229 : f32 to vector<8x128xf32>
    %787 = arith.addf %786, %785 : vector<8x128xf32>
    %788 = arith.divf %786, %787 : vector<8x128xf32>
    %789 = vector.extract_strided_slice %776 {offsets = [0, 256], sizes = [8, 128], strides = [1, 1]} : vector<8x512xf32> to vector<8x128xf32>
    %790 = math.tanh %789 : vector<8x128xf32>
    %791 = vector.extract_strided_slice %776 {offsets = [0, 384], sizes = [8, 128], strides = [1, 1]} : vector<8x512xf32> to vector<8x128xf32>
    %792 = arith.negf %791 : vector<8x128xf32>
    %793 = math.exp %792 : vector<8x128xf32>
    %cst_230 = arith.constant 1.000000e+00 : f32
    %794 = vector.broadcast %cst_230 : f32 to vector<8x128xf32>
    %795 = arith.addf %794, %793 : vector<8x128xf32>
    %796 = arith.divf %794, %795 : vector<8x128xf32>
    %797 = arith.mulf %788, %766 : vector<8x128xf32>
    %798 = arith.mulf %782, %790 : vector<8x128xf32>
    %799 = arith.addf %797, %798 : vector<8x128xf32>
    %800 = math.tanh %799 : vector<8x128xf32>
    %801 = arith.mulf %796, %800 : vector<8x128xf32>
    %c0_231 = arith.constant 0 : index
    %c23 = arith.constant 23 : index
    %c0_232 = arith.constant 0 : index
    %802 = vector.load %arg8[%c0_231, %c23, %c0_232] : memref<8x32x128xf32, #tpu.memory_space<vmem>>, vector<8x1x128xf32>
    %803 = vector.shape_cast %802 : vector<8x1x128xf32> to vector<8x128xf32>
    %804 = vector.shape_cast %801 : vector<8x128xf32> to vector<8x1x128xf32>
    tpu.vector_store %arg8[%c0_231, %c23, %c0_232], %804 {strides = array<i32>} : memref<8x32x128xf32, #tpu.memory_space<vmem>>, vector<8x1x128xf32>,
    %c192 = arith.constant 192 : index
    %c0_233 = arith.constant 0 : index
    %805 = vector.load %arg11[%c192, %c0_233] : memref<256x512xf32, #tpu.memory_space<vmem>>, vector<8x512xf32>
    %806 = arith.truncf %801 : vector<8x128xf32> to vector<8x128xbf16>
    %c0_234 = arith.constant 0 : index
    %c0_235 = arith.constant 0 : index
    %807 = vector.load %arg6[%c0_234, %c0_235] : memref<128x512xbf16, #tpu.memory_space<vmem>>, vector<128x512xbf16>
    %cst_236 = arith.constant dense<0.000000e+00> : vector<8x512xf32>
    %808 = tpu.matmul %806, %807, %cst_236 {dimension_numbers = #tpu.dot_dimension_numbers<[1], [0], [0], [1], [0, 0, 1, 1], [], []>} : vector<8x128xbf16>, vector<128x512xbf16>, vector<8x512xf32> -> vector<8x512xf32>
    %809 = arith.addf %805, %808 : vector<8x512xf32>
    %810 = vector.extract_strided_slice %809 {offsets = [0, 0], sizes = [8, 128], strides = [1, 1]} : vector<8x512xf32> to vector<8x128xf32>
    %811 = arith.negf %810 : vector<8x128xf32>
    %812 = math.exp %811 : vector<8x128xf32>
    %cst_237 = arith.constant 1.000000e+00 : f32
    %813 = vector.broadcast %cst_237 : f32 to vector<8x128xf32>
    %814 = arith.addf %813, %812 : vector<8x128xf32>
    %815 = arith.divf %813, %814 : vector<8x128xf32>
    %816 = vector.extract_strided_slice %809 {offsets = [0, 128], sizes = [8, 128], strides = [1, 1]} : vector<8x512xf32> to vector<8x128xf32>
    %817 = arith.negf %816 : vector<8x128xf32>
    %818 = math.exp %817 : vector<8x128xf32>
    %cst_238 = arith.constant 1.000000e+00 : f32
    %819 = vector.broadcast %cst_238 : f32 to vector<8x128xf32>
    %820 = arith.addf %819, %818 : vector<8x128xf32>
    %821 = arith.divf %819, %820 : vector<8x128xf32>
    %822 = vector.extract_strided_slice %809 {offsets = [0, 256], sizes = [8, 128], strides = [1, 1]} : vector<8x512xf32> to vector<8x128xf32>
    %823 = math.tanh %822 : vector<8x128xf32>
    %824 = vector.extract_strided_slice %809 {offsets = [0, 384], sizes = [8, 128], strides = [1, 1]} : vector<8x512xf32> to vector<8x128xf32>
    %825 = arith.negf %824 : vector<8x128xf32>
    %826 = math.exp %825 : vector<8x128xf32>
    %cst_239 = arith.constant 1.000000e+00 : f32
    %827 = vector.broadcast %cst_239 : f32 to vector<8x128xf32>
    %828 = arith.addf %827, %826 : vector<8x128xf32>
    %829 = arith.divf %827, %828 : vector<8x128xf32>
    %830 = arith.mulf %821, %799 : vector<8x128xf32>
    %831 = arith.mulf %815, %823 : vector<8x128xf32>
    %832 = arith.addf %830, %831 : vector<8x128xf32>
    %833 = math.tanh %832 : vector<8x128xf32>
    %834 = arith.mulf %829, %833 : vector<8x128xf32>
    %c0_240 = arith.constant 0 : index
    %c24_241 = arith.constant 24 : index
    %c0_242 = arith.constant 0 : index
    %835 = vector.load %arg8[%c0_240, %c24_241, %c0_242] : memref<8x32x128xf32, #tpu.memory_space<vmem>>, vector<8x1x128xf32>
    %836 = vector.shape_cast %835 : vector<8x1x128xf32> to vector<8x128xf32>
    %837 = vector.shape_cast %834 : vector<8x128xf32> to vector<8x1x128xf32>
    tpu.vector_store %arg8[%c0_240, %c24_241, %c0_242], %837 {strides = array<i32>} : memref<8x32x128xf32, #tpu.memory_space<vmem>>, vector<8x1x128xf32>,
    %c200 = arith.constant 200 : index
    %c0_243 = arith.constant 0 : index
    %838 = vector.load %arg11[%c200, %c0_243] : memref<256x512xf32, #tpu.memory_space<vmem>>, vector<8x512xf32>
    %839 = arith.truncf %834 : vector<8x128xf32> to vector<8x128xbf16>
    %c0_244 = arith.constant 0 : index
    %c0_245 = arith.constant 0 : index
    %840 = vector.load %arg6[%c0_244, %c0_245] : memref<128x512xbf16, #tpu.memory_space<vmem>>, vector<128x512xbf16>
    %cst_246 = arith.constant dense<0.000000e+00> : vector<8x512xf32>
    %841 = tpu.matmul %839, %840, %cst_246 {dimension_numbers = #tpu.dot_dimension_numbers<[1], [0], [0], [1], [0, 0, 1, 1], [], []>} : vector<8x128xbf16>, vector<128x512xbf16>, vector<8x512xf32> -> vector<8x512xf32>
    %842 = arith.addf %838, %841 : vector<8x512xf32>
    %843 = vector.extract_strided_slice %842 {offsets = [0, 0], sizes = [8, 128], strides = [1, 1]} : vector<8x512xf32> to vector<8x128xf32>
    %844 = arith.negf %843 : vector<8x128xf32>
    %845 = math.exp %844 : vector<8x128xf32>
    %cst_247 = arith.constant 1.000000e+00 : f32
    %846 = vector.broadcast %cst_247 : f32 to vector<8x128xf32>
    %847 = arith.addf %846, %845 : vector<8x128xf32>
    %848 = arith.divf %846, %847 : vector<8x128xf32>
    %849 = vector.extract_strided_slice %842 {offsets = [0, 128], sizes = [8, 128], strides = [1, 1]} : vector<8x512xf32> to vector<8x128xf32>
    %850 = arith.negf %849 : vector<8x128xf32>
    %851 = math.exp %850 : vector<8x128xf32>
    %cst_248 = arith.constant 1.000000e+00 : f32
    %852 = vector.broadcast %cst_248 : f32 to vector<8x128xf32>
    %853 = arith.addf %852, %851 : vector<8x128xf32>
    %854 = arith.divf %852, %853 : vector<8x128xf32>
    %855 = vector.extract_strided_slice %842 {offsets = [0, 256], sizes = [8, 128], strides = [1, 1]} : vector<8x512xf32> to vector<8x128xf32>
    %856 = math.tanh %855 : vector<8x128xf32>
    %857 = vector.extract_strided_slice %842 {offsets = [0, 384], sizes = [8, 128], strides = [1, 1]} : vector<8x512xf32> to vector<8x128xf32>
    %858 = arith.negf %857 : vector<8x128xf32>
    %859 = math.exp %858 : vector<8x128xf32>
    %cst_249 = arith.constant 1.000000e+00 : f32
    %860 = vector.broadcast %cst_249 : f32 to vector<8x128xf32>
    %861 = arith.addf %860, %859 : vector<8x128xf32>
    %862 = arith.divf %860, %861 : vector<8x128xf32>
    %863 = arith.mulf %854, %832 : vector<8x128xf32>
    %864 = arith.mulf %848, %856 : vector<8x128xf32>
    %865 = arith.addf %863, %864 : vector<8x128xf32>
    %866 = math.tanh %865 : vector<8x128xf32>
    %867 = arith.mulf %862, %866 : vector<8x128xf32>
    %c0_250 = arith.constant 0 : index
    %c25 = arith.constant 25 : index
    %c0_251 = arith.constant 0 : index
    %868 = vector.load %arg8[%c0_250, %c25, %c0_251] : memref<8x32x128xf32, #tpu.memory_space<vmem>>, vector<8x1x128xf32>
    %869 = vector.shape_cast %868 : vector<8x1x128xf32> to vector<8x128xf32>
    %870 = vector.shape_cast %867 : vector<8x128xf32> to vector<8x1x128xf32>
    tpu.vector_store %arg8[%c0_250, %c25, %c0_251], %870 {strides = array<i32>} : memref<8x32x128xf32, #tpu.memory_space<vmem>>, vector<8x1x128xf32>,
    %c208 = arith.constant 208 : index
    %c0_252 = arith.constant 0 : index
    %871 = vector.load %arg11[%c208, %c0_252] : memref<256x512xf32, #tpu.memory_space<vmem>>, vector<8x512xf32>
    %872 = arith.truncf %867 : vector<8x128xf32> to vector<8x128xbf16>
    %c0_253 = arith.constant 0 : index
    %c0_254 = arith.constant 0 : index
    %873 = vector.load %arg6[%c0_253, %c0_254] : memref<128x512xbf16, #tpu.memory_space<vmem>>, vector<128x512xbf16>
    %cst_255 = arith.constant dense<0.000000e+00> : vector<8x512xf32>
    %874 = tpu.matmul %872, %873, %cst_255 {dimension_numbers = #tpu.dot_dimension_numbers<[1], [0], [0], [1], [0, 0, 1, 1], [], []>} : vector<8x128xbf16>, vector<128x512xbf16>, vector<8x512xf32> -> vector<8x512xf32>
    %875 = arith.addf %871, %874 : vector<8x512xf32>
    %876 = vector.extract_strided_slice %875 {offsets = [0, 0], sizes = [8, 128], strides = [1, 1]} : vector<8x512xf32> to vector<8x128xf32>
    %877 = arith.negf %876 : vector<8x128xf32>
    %878 = math.exp %877 : vector<8x128xf32>
    %cst_256 = arith.constant 1.000000e+00 : f32
    %879 = vector.broadcast %cst_256 : f32 to vector<8x128xf32>
    %880 = arith.addf %879, %878 : vector<8x128xf32>
    %881 = arith.divf %879, %880 : vector<8x128xf32>
    %882 = vector.extract_strided_slice %875 {offsets = [0, 128], sizes = [8, 128], strides = [1, 1]} : vector<8x512xf32> to vector<8x128xf32>
    %883 = arith.negf %882 : vector<8x128xf32>
    %884 = math.exp %883 : vector<8x128xf32>
    %cst_257 = arith.constant 1.000000e+00 : f32
    %885 = vector.broadcast %cst_257 : f32 to vector<8x128xf32>
    %886 = arith.addf %885, %884 : vector<8x128xf32>
    %887 = arith.divf %885, %886 : vector<8x128xf32>
    %888 = vector.extract_strided_slice %875 {offsets = [0, 256], sizes = [8, 128], strides = [1, 1]} : vector<8x512xf32> to vector<8x128xf32>
    %889 = math.tanh %888 : vector<8x128xf32>
    %890 = vector.extract_strided_slice %875 {offsets = [0, 384], sizes = [8, 128], strides = [1, 1]} : vector<8x512xf32> to vector<8x128xf32>
    %891 = arith.negf %890 : vector<8x128xf32>
    %892 = math.exp %891 : vector<8x128xf32>
    %cst_258 = arith.constant 1.000000e+00 : f32
    %893 = vector.broadcast %cst_258 : f32 to vector<8x128xf32>
    %894 = arith.addf %893, %892 : vector<8x128xf32>
    %895 = arith.divf %893, %894 : vector<8x128xf32>
    %896 = arith.mulf %887, %865 : vector<8x128xf32>
    %897 = arith.mulf %881, %889 : vector<8x128xf32>
    %898 = arith.addf %896, %897 : vector<8x128xf32>
    %899 = math.tanh %898 : vector<8x128xf32>
    %900 = arith.mulf %895, %899 : vector<8x128xf32>
    %c0_259 = arith.constant 0 : index
    %c26 = arith.constant 26 : index
    %c0_260 = arith.constant 0 : index
    %901 = vector.load %arg8[%c0_259, %c26, %c0_260] : memref<8x32x128xf32, #tpu.memory_space<vmem>>, vector<8x1x128xf32>
    %902 = vector.shape_cast %901 : vector<8x1x128xf32> to vector<8x128xf32>
    %903 = vector.shape_cast %900 : vector<8x128xf32> to vector<8x1x128xf32>
    tpu.vector_store %arg8[%c0_259, %c26, %c0_260], %903 {strides = array<i32>} : memref<8x32x128xf32, #tpu.memory_space<vmem>>, vector<8x1x128xf32>,
    %c216 = arith.constant 216 : index
    %c0_261 = arith.constant 0 : index
    %904 = vector.load %arg11[%c216, %c0_261] : memref<256x512xf32, #tpu.memory_space<vmem>>, vector<8x512xf32>
    %905 = arith.truncf %900 : vector<8x128xf32> to vector<8x128xbf16>
    %c0_262 = arith.constant 0 : index
    %c0_263 = arith.constant 0 : index
    %906 = vector.load %arg6[%c0_262, %c0_263] : memref<128x512xbf16, #tpu.memory_space<vmem>>, vector<128x512xbf16>
    %cst_264 = arith.constant dense<0.000000e+00> : vector<8x512xf32>
    %907 = tpu.matmul %905, %906, %cst_264 {dimension_numbers = #tpu.dot_dimension_numbers<[1], [0], [0], [1], [0, 0, 1, 1], [], []>} : vector<8x128xbf16>, vector<128x512xbf16>, vector<8x512xf32> -> vector<8x512xf32>
    %908 = arith.addf %904, %907 : vector<8x512xf32>
    %909 = vector.extract_strided_slice %908 {offsets = [0, 0], sizes = [8, 128], strides = [1, 1]} : vector<8x512xf32> to vector<8x128xf32>
    %910 = arith.negf %909 : vector<8x128xf32>
    %911 = math.exp %910 : vector<8x128xf32>
    %cst_265 = arith.constant 1.000000e+00 : f32
    %912 = vector.broadcast %cst_265 : f32 to vector<8x128xf32>
    %913 = arith.addf %912, %911 : vector<8x128xf32>
    %914 = arith.divf %912, %913 : vector<8x128xf32>
    %915 = vector.extract_strided_slice %908 {offsets = [0, 128], sizes = [8, 128], strides = [1, 1]} : vector<8x512xf32> to vector<8x128xf32>
    %916 = arith.negf %915 : vector<8x128xf32>
    %917 = math.exp %916 : vector<8x128xf32>
    %cst_266 = arith.constant 1.000000e+00 : f32
    %918 = vector.broadcast %cst_266 : f32 to vector<8x128xf32>
    %919 = arith.addf %918, %917 : vector<8x128xf32>
    %920 = arith.divf %918, %919 : vector<8x128xf32>
    %921 = vector.extract_strided_slice %908 {offsets = [0, 256], sizes = [8, 128], strides = [1, 1]} : vector<8x512xf32> to vector<8x128xf32>
    %922 = math.tanh %921 : vector<8x128xf32>
    %923 = vector.extract_strided_slice %908 {offsets = [0, 384], sizes = [8, 128], strides = [1, 1]} : vector<8x512xf32> to vector<8x128xf32>
    %924 = arith.negf %923 : vector<8x128xf32>
    %925 = math.exp %924 : vector<8x128xf32>
    %cst_267 = arith.constant 1.000000e+00 : f32
    %926 = vector.broadcast %cst_267 : f32 to vector<8x128xf32>
    %927 = arith.addf %926, %925 : vector<8x128xf32>
    %928 = arith.divf %926, %927 : vector<8x128xf32>
    %929 = arith.mulf %920, %898 : vector<8x128xf32>
    %930 = arith.mulf %914, %922 : vector<8x128xf32>
    %931 = arith.addf %929, %930 : vector<8x128xf32>
    %932 = math.tanh %931 : vector<8x128xf32>
    %933 = arith.mulf %928, %932 : vector<8x128xf32>
    %c0_268 = arith.constant 0 : index
    %c27 = arith.constant 27 : index
    %c0_269 = arith.constant 0 : index
    %934 = vector.load %arg8[%c0_268, %c27, %c0_269] : memref<8x32x128xf32, #tpu.memory_space<vmem>>, vector<8x1x128xf32>
    %935 = vector.shape_cast %934 : vector<8x1x128xf32> to vector<8x128xf32>
    %936 = vector.shape_cast %933 : vector<8x128xf32> to vector<8x1x128xf32>
    tpu.vector_store %arg8[%c0_268, %c27, %c0_269], %936 {strides = array<i32>} : memref<8x32x128xf32, #tpu.memory_space<vmem>>, vector<8x1x128xf32>,
    %c224 = arith.constant 224 : index
    %c0_270 = arith.constant 0 : index
    %937 = vector.load %arg11[%c224, %c0_270] : memref<256x512xf32, #tpu.memory_space<vmem>>, vector<8x512xf32>
    %938 = arith.truncf %933 : vector<8x128xf32> to vector<8x128xbf16>
    %c0_271 = arith.constant 0 : index
    %c0_272 = arith.constant 0 : index
    %939 = vector.load %arg6[%c0_271, %c0_272] : memref<128x512xbf16, #tpu.memory_space<vmem>>, vector<128x512xbf16>
    %cst_273 = arith.constant dense<0.000000e+00> : vector<8x512xf32>
    %940 = tpu.matmul %938, %939, %cst_273 {dimension_numbers = #tpu.dot_dimension_numbers<[1], [0], [0], [1], [0, 0, 1, 1], [], []>} : vector<8x128xbf16>, vector<128x512xbf16>, vector<8x512xf32> -> vector<8x512xf32>
    %941 = arith.addf %937, %940 : vector<8x512xf32>
    %942 = vector.extract_strided_slice %941 {offsets = [0, 0], sizes = [8, 128], strides = [1, 1]} : vector<8x512xf32> to vector<8x128xf32>
    %943 = arith.negf %942 : vector<8x128xf32>
    %944 = math.exp %943 : vector<8x128xf32>
    %cst_274 = arith.constant 1.000000e+00 : f32
    %945 = vector.broadcast %cst_274 : f32 to vector<8x128xf32>
    %946 = arith.addf %945, %944 : vector<8x128xf32>
    %947 = arith.divf %945, %946 : vector<8x128xf32>
    %948 = vector.extract_strided_slice %941 {offsets = [0, 128], sizes = [8, 128], strides = [1, 1]} : vector<8x512xf32> to vector<8x128xf32>
    %949 = arith.negf %948 : vector<8x128xf32>
    %950 = math.exp %949 : vector<8x128xf32>
    %cst_275 = arith.constant 1.000000e+00 : f32
    %951 = vector.broadcast %cst_275 : f32 to vector<8x128xf32>
    %952 = arith.addf %951, %950 : vector<8x128xf32>
    %953 = arith.divf %951, %952 : vector<8x128xf32>
    %954 = vector.extract_strided_slice %941 {offsets = [0, 256], sizes = [8, 128], strides = [1, 1]} : vector<8x512xf32> to vector<8x128xf32>
    %955 = math.tanh %954 : vector<8x128xf32>
    %956 = vector.extract_strided_slice %941 {offsets = [0, 384], sizes = [8, 128], strides = [1, 1]} : vector<8x512xf32> to vector<8x128xf32>
    %957 = arith.negf %956 : vector<8x128xf32>
    %958 = math.exp %957 : vector<8x128xf32>
    %cst_276 = arith.constant 1.000000e+00 : f32
    %959 = vector.broadcast %cst_276 : f32 to vector<8x128xf32>
    %960 = arith.addf %959, %958 : vector<8x128xf32>
    %961 = arith.divf %959, %960 : vector<8x128xf32>
    %962 = arith.mulf %953, %931 : vector<8x128xf32>
    %963 = arith.mulf %947, %955 : vector<8x128xf32>
    %964 = arith.addf %962, %963 : vector<8x128xf32>
    %965 = math.tanh %964 : vector<8x128xf32>
    %966 = arith.mulf %961, %965 : vector<8x128xf32>
    %c0_277 = arith.constant 0 : index
    %c28 = arith.constant 28 : index
    %c0_278 = arith.constant 0 : index
    %967 = vector.load %arg8[%c0_277, %c28, %c0_278] : memref<8x32x128xf32, #tpu.memory_space<vmem>>, vector<8x1x128xf32>
    %968 = vector.shape_cast %967 : vector<8x1x128xf32> to vector<8x128xf32>
    %969 = vector.shape_cast %966 : vector<8x128xf32> to vector<8x1x128xf32>
    tpu.vector_store %arg8[%c0_277, %c28, %c0_278], %969 {strides = array<i32>} : memref<8x32x128xf32, #tpu.memory_space<vmem>>, vector<8x1x128xf32>,
    %c232 = arith.constant 232 : index
    %c0_279 = arith.constant 0 : index
    %970 = vector.load %arg11[%c232, %c0_279] : memref<256x512xf32, #tpu.memory_space<vmem>>, vector<8x512xf32>
    %971 = arith.truncf %966 : vector<8x128xf32> to vector<8x128xbf16>
    %c0_280 = arith.constant 0 : index
    %c0_281 = arith.constant 0 : index
    %972 = vector.load %arg6[%c0_280, %c0_281] : memref<128x512xbf16, #tpu.memory_space<vmem>>, vector<128x512xbf16>
    %cst_282 = arith.constant dense<0.000000e+00> : vector<8x512xf32>
    %973 = tpu.matmul %971, %972, %cst_282 {dimension_numbers = #tpu.dot_dimension_numbers<[1], [0], [0], [1], [0, 0, 1, 1], [], []>} : vector<8x128xbf16>, vector<128x512xbf16>, vector<8x512xf32> -> vector<8x512xf32>
    %974 = arith.addf %970, %973 : vector<8x512xf32>
    %975 = vector.extract_strided_slice %974 {offsets = [0, 0], sizes = [8, 128], strides = [1, 1]} : vector<8x512xf32> to vector<8x128xf32>
    %976 = arith.negf %975 : vector<8x128xf32>
    %977 = math.exp %976 : vector<8x128xf32>
    %cst_283 = arith.constant 1.000000e+00 : f32
    %978 = vector.broadcast %cst_283 : f32 to vector<8x128xf32>
    %979 = arith.addf %978, %977 : vector<8x128xf32>
    %980 = arith.divf %978, %979 : vector<8x128xf32>
    %981 = vector.extract_strided_slice %974 {offsets = [0, 128], sizes = [8, 128], strides = [1, 1]} : vector<8x512xf32> to vector<8x128xf32>
    %982 = arith.negf %981 : vector<8x128xf32>
    %983 = math.exp %982 : vector<8x128xf32>
    %cst_284 = arith.constant 1.000000e+00 : f32
    %984 = vector.broadcast %cst_284 : f32 to vector<8x128xf32>
    %985 = arith.addf %984, %983 : vector<8x128xf32>
    %986 = arith.divf %984, %985 : vector<8x128xf32>
    %987 = vector.extract_strided_slice %974 {offsets = [0, 256], sizes = [8, 128], strides = [1, 1]} : vector<8x512xf32> to vector<8x128xf32>
    %988 = math.tanh %987 : vector<8x128xf32>
    %989 = vector.extract_strided_slice %974 {offsets = [0, 384], sizes = [8, 128], strides = [1, 1]} : vector<8x512xf32> to vector<8x128xf32>
    %990 = arith.negf %989 : vector<8x128xf32>
    %991 = math.exp %990 : vector<8x128xf32>
    %cst_285 = arith.constant 1.000000e+00 : f32
    %992 = vector.broadcast %cst_285 : f32 to vector<8x128xf32>
    %993 = arith.addf %992, %991 : vector<8x128xf32>
    %994 = arith.divf %992, %993 : vector<8x128xf32>
    %995 = arith.mulf %986, %964 : vector<8x128xf32>
    %996 = arith.mulf %980, %988 : vector<8x128xf32>
    %997 = arith.addf %995, %996 : vector<8x128xf32>
    %998 = math.tanh %997 : vector<8x128xf32>
    %999 = arith.mulf %994, %998 : vector<8x128xf32>
    %c0_286 = arith.constant 0 : index
    %c29 = arith.constant 29 : index
    %c0_287 = arith.constant 0 : index
    %1000 = vector.load %arg8[%c0_286, %c29, %c0_287] : memref<8x32x128xf32, #tpu.memory_space<vmem>>, vector<8x1x128xf32>
    %1001 = vector.shape_cast %1000 : vector<8x1x128xf32> to vector<8x128xf32>
    %1002 = vector.shape_cast %999 : vector<8x128xf32> to vector<8x1x128xf32>
    tpu.vector_store %arg8[%c0_286, %c29, %c0_287], %1002 {strides = array<i32>} : memref<8x32x128xf32, #tpu.memory_space<vmem>>, vector<8x1x128xf32>,
    %c240 = arith.constant 240 : index
    %c0_288 = arith.constant 0 : index
    %1003 = vector.load %arg11[%c240, %c0_288] : memref<256x512xf32, #tpu.memory_space<vmem>>, vector<8x512xf32>
    %1004 = arith.truncf %999 : vector<8x128xf32> to vector<8x128xbf16>
    %c0_289 = arith.constant 0 : index
    %c0_290 = arith.constant 0 : index
    %1005 = vector.load %arg6[%c0_289, %c0_290] : memref<128x512xbf16, #tpu.memory_space<vmem>>, vector<128x512xbf16>
    %cst_291 = arith.constant dense<0.000000e+00> : vector<8x512xf32>
    %1006 = tpu.matmul %1004, %1005, %cst_291 {dimension_numbers = #tpu.dot_dimension_numbers<[1], [0], [0], [1], [0, 0, 1, 1], [], []>} : vector<8x128xbf16>, vector<128x512xbf16>, vector<8x512xf32> -> vector<8x512xf32>
    %1007 = arith.addf %1003, %1006 : vector<8x512xf32>
    %1008 = vector.extract_strided_slice %1007 {offsets = [0, 0], sizes = [8, 128], strides = [1, 1]} : vector<8x512xf32> to vector<8x128xf32>
    %1009 = arith.negf %1008 : vector<8x128xf32>
    %1010 = math.exp %1009 : vector<8x128xf32>
    %cst_292 = arith.constant 1.000000e+00 : f32
    %1011 = vector.broadcast %cst_292 : f32 to vector<8x128xf32>
    %1012 = arith.addf %1011, %1010 : vector<8x128xf32>
    %1013 = arith.divf %1011, %1012 : vector<8x128xf32>
    %1014 = vector.extract_strided_slice %1007 {offsets = [0, 128], sizes = [8, 128], strides = [1, 1]} : vector<8x512xf32> to vector<8x128xf32>
    %1015 = arith.negf %1014 : vector<8x128xf32>
    %1016 = math.exp %1015 : vector<8x128xf32>
    %cst_293 = arith.constant 1.000000e+00 : f32
    %1017 = vector.broadcast %cst_293 : f32 to vector<8x128xf32>
    %1018 = arith.addf %1017, %1016 : vector<8x128xf32>
    %1019 = arith.divf %1017, %1018 : vector<8x128xf32>
    %1020 = vector.extract_strided_slice %1007 {offsets = [0, 256], sizes = [8, 128], strides = [1, 1]} : vector<8x512xf32> to vector<8x128xf32>
    %1021 = math.tanh %1020 : vector<8x128xf32>
    %1022 = vector.extract_strided_slice %1007 {offsets = [0, 384], sizes = [8, 128], strides = [1, 1]} : vector<8x512xf32> to vector<8x128xf32>
    %1023 = arith.negf %1022 : vector<8x128xf32>
    %1024 = math.exp %1023 : vector<8x128xf32>
    %cst_294 = arith.constant 1.000000e+00 : f32
    %1025 = vector.broadcast %cst_294 : f32 to vector<8x128xf32>
    %1026 = arith.addf %1025, %1024 : vector<8x128xf32>
    %1027 = arith.divf %1025, %1026 : vector<8x128xf32>
    %1028 = arith.mulf %1019, %997 : vector<8x128xf32>
    %1029 = arith.mulf %1013, %1021 : vector<8x128xf32>
    %1030 = arith.addf %1028, %1029 : vector<8x128xf32>
    %1031 = math.tanh %1030 : vector<8x128xf32>
    %1032 = arith.mulf %1027, %1031 : vector<8x128xf32>
    %c0_295 = arith.constant 0 : index
    %c30 = arith.constant 30 : index
    %c0_296 = arith.constant 0 : index
    %1033 = vector.load %arg8[%c0_295, %c30, %c0_296] : memref<8x32x128xf32, #tpu.memory_space<vmem>>, vector<8x1x128xf32>
    %1034 = vector.shape_cast %1033 : vector<8x1x128xf32> to vector<8x128xf32>
    %1035 = vector.shape_cast %1032 : vector<8x128xf32> to vector<8x1x128xf32>
    tpu.vector_store %arg8[%c0_295, %c30, %c0_296], %1035 {strides = array<i32>} : memref<8x32x128xf32, #tpu.memory_space<vmem>>, vector<8x1x128xf32>,
    %c248 = arith.constant 248 : index
    %c0_297 = arith.constant 0 : index
    %1036 = vector.load %arg11[%c248, %c0_297] : memref<256x512xf32, #tpu.memory_space<vmem>>, vector<8x512xf32>
    %1037 = arith.truncf %1032 : vector<8x128xf32> to vector<8x128xbf16>
    %c0_298 = arith.constant 0 : index
    %c0_299 = arith.constant 0 : index
    %1038 = vector.load %arg6[%c0_298, %c0_299] : memref<128x512xbf16, #tpu.memory_space<vmem>>, vector<128x512xbf16>
    %cst_300 = arith.constant dense<0.000000e+00> : vector<8x512xf32>
    %1039 = tpu.matmul %1037, %1038, %cst_300 {dimension_numbers = #tpu.dot_dimension_numbers<[1], [0], [0], [1], [0, 0, 1, 1], [], []>} : vector<8x128xbf16>, vector<128x512xbf16>, vector<8x512xf32> -> vector<8x512xf32>
    %1040 = arith.addf %1036, %1039 : vector<8x512xf32>
    %1041 = vector.extract_strided_slice %1040 {offsets = [0, 0], sizes = [8, 128], strides = [1, 1]} : vector<8x512xf32> to vector<8x128xf32>
    %1042 = arith.negf %1041 : vector<8x128xf32>
    %1043 = math.exp %1042 : vector<8x128xf32>
    %cst_301 = arith.constant 1.000000e+00 : f32
    %1044 = vector.broadcast %cst_301 : f32 to vector<8x128xf32>
    %1045 = arith.addf %1044, %1043 : vector<8x128xf32>
    %1046 = arith.divf %1044, %1045 : vector<8x128xf32>
    %1047 = vector.extract_strided_slice %1040 {offsets = [0, 128], sizes = [8, 128], strides = [1, 1]} : vector<8x512xf32> to vector<8x128xf32>
    %1048 = arith.negf %1047 : vector<8x128xf32>
    %1049 = math.exp %1048 : vector<8x128xf32>
    %cst_302 = arith.constant 1.000000e+00 : f32
    %1050 = vector.broadcast %cst_302 : f32 to vector<8x128xf32>
    %1051 = arith.addf %1050, %1049 : vector<8x128xf32>
    %1052 = arith.divf %1050, %1051 : vector<8x128xf32>
    %1053 = vector.extract_strided_slice %1040 {offsets = [0, 256], sizes = [8, 128], strides = [1, 1]} : vector<8x512xf32> to vector<8x128xf32>
    %1054 = math.tanh %1053 : vector<8x128xf32>
    %1055 = vector.extract_strided_slice %1040 {offsets = [0, 384], sizes = [8, 128], strides = [1, 1]} : vector<8x512xf32> to vector<8x128xf32>
    %1056 = arith.negf %1055 : vector<8x128xf32>
    %1057 = math.exp %1056 : vector<8x128xf32>
    %cst_303 = arith.constant 1.000000e+00 : f32
    %1058 = vector.broadcast %cst_303 : f32 to vector<8x128xf32>
    %1059 = arith.addf %1058, %1057 : vector<8x128xf32>
    %1060 = arith.divf %1058, %1059 : vector<8x128xf32>
    %1061 = arith.mulf %1052, %1030 : vector<8x128xf32>
    %1062 = arith.mulf %1046, %1054 : vector<8x128xf32>
    %1063 = arith.addf %1061, %1062 : vector<8x128xf32>
    %1064 = math.tanh %1063 : vector<8x128xf32>
    %1065 = arith.mulf %1060, %1064 : vector<8x128xf32>
    %c0_304 = arith.constant 0 : index
    %c31 = arith.constant 31 : index
    %c0_305 = arith.constant 0 : index
    %1066 = vector.load %arg8[%c0_304, %c31, %c0_305] : memref<8x32x128xf32, #tpu.memory_space<vmem>>, vector<8x1x128xf32>
    %1067 = vector.shape_cast %1066 : vector<8x1x128xf32> to vector<8x128xf32>
    %1068 = vector.shape_cast %1065 : vector<8x128xf32> to vector<8x1x128xf32>
    tpu.vector_store %arg8[%c0_304, %c31, %c0_305], %1068 {strides = array<i32>} : memref<8x32x128xf32, #tpu.memory_space<vmem>>, vector<8x1x128xf32>,
    %c0_306 = arith.constant 0 : index
    %c0_307 = arith.constant 0 : index
    %1069 = vector.load %arg12[%c0_306, %c0_307] : memref<8x128xf32, #tpu.memory_space<vmem>>, vector<8x128xf32>
    tpu.vector_store %arg12[%c0_306, %c0_307], %1065 {strides = array<i32>} : memref<8x128xf32, #tpu.memory_space<vmem>>, vector<8x128xf32>,
    %c0_308 = arith.constant 0 : index
    %c0_309 = arith.constant 0 : index
    %1070 = vector.load %arg13[%c0_308, %c0_309] : memref<8x128xf32, #tpu.memory_space<vmem>>, vector<8x128xf32>
    tpu.vector_store %arg13[%c0_308, %c0_309], %1063 {strides = array<i32>} : memref<8x128xf32, #tpu.memory_space<vmem>>, vector<8x128xf32>,
    %c0_i32_310 = arith.constant 0 : i32
    %1071 = arith.cmpi eq, %arg1, %c0_i32_310 : i32
    %1072 = arith.extui %1071 : i1 to i32
    %c0_i32_311 = arith.constant 0 : i32
    %1073 = arith.cmpi ne, %1072, %c0_i32_311 : i32
    scf.if %1073 {
      %c0_312 = arith.constant 0 : index
      %c0_313 = arith.constant 0 : index
      %1074 = vector.load %arg9[%c0_312, %c0_313] : memref<8x128xf32, #tpu.memory_space<vmem>>, vector<8x128xf32>
      tpu.vector_store %arg9[%c0_312, %c0_313], %1065 {strides = array<i32>} : memref<8x128xf32, #tpu.memory_space<vmem>>, vector<8x128xf32>,
      %c0_314 = arith.constant 0 : index
      %c0_315 = arith.constant 0 : index
      %1075 = vector.load %arg10[%c0_314, %c0_315] : memref<8x128xf32, #tpu.memory_space<vmem>>, vector<8x128xf32>
      tpu.vector_store %arg10[%c0_314, %c0_315], %1063 {strides = array<i32>} : memref<8x128xf32, #tpu.memory_space<vmem>>, vector<8x128xf32>,
    } else {
    }
    return
  }
  func.func @transform_0(%arg0: i32, %arg1: i32) -> (i32, i32, i32) {
    %c0_i32 = arith.constant 0 : i32
    %c0_i32_0 = arith.constant 0 : i32
    return %arg1, %arg0, %c0_i32 : i32, i32, i32
  }
  func.func @transform_1(%arg0: i32, %arg1: i32) -> (i32, i32) {
    %c0_i32 = arith.constant 0 : i32
    %c0_i32_0 = arith.constant 0 : i32
    return %arg0, %c0_i32 : i32, i32
  }
  func.func @transform_2(%arg0: i32, %arg1: i32) -> (i32, i32) {
    %c0_i32 = arith.constant 0 : i32
    %c0_i32_0 = arith.constant 0 : i32
    return %arg0, %c0_i32 : i32, i32
  }
  func.func @transform_3(%arg0: i32, %arg1: i32) -> (i32, i32) {
    %c0_i32 = arith.constant 0 : i32
    %c0_i32_0 = arith.constant 0 : i32
    %c0_i32_1 = arith.constant 0 : i32
    return %c0_i32, %c0_i32_0 : i32, i32
  }
  func.func @transform_4(%arg0: i32, %arg1: i32) -> (i32, i32) {
    %c0_i32 = arith.constant 0 : i32
    %c0_i32_0 = arith.constant 0 : i32
    %c0_i32_1 = arith.constant 0 : i32
    return %c0_i32, %c0_i32_0 : i32, i32
  }
  func.func @transform_5(%arg0: i32, %arg1: i32) -> (i32, i32) {
    %c0_i32 = arith.constant 0 : i32
    %c0_i32_0 = arith.constant 0 : i32
    %c0_i32_1 = arith.constant 0 : i32
    return %c0_i32, %c0_i32_0 : i32, i32
  }
  func.func @transform_6(%arg0: i32, %arg1: i32) -> (i32, i32, i32) {
    %c0_i32 = arith.constant 0 : i32
    %c0_i32_0 = arith.constant 0 : i32
    return %arg0, %arg1, %c0_i32 : i32, i32, i32
  }
  func.func @transform_7(%arg0: i32, %arg1: i32) -> (i32, i32) {
    %c0_i32 = arith.constant 0 : i32
    %c0_i32_0 = arith.constant 0 : i32
    return %arg0, %c0_i32 : i32, i32
  }
  func.func @transform_8(%arg0: i32, %arg1: i32) -> (i32, i32) {
    %c0_i32 = arith.constant 0 : i32
    %c0_i32_0 = arith.constant 0 : i32
    return %arg0, %c0_i32 : i32, i32
  }
}

</mosaic_0001>

<bundles_post_ra>
// kernel: encoder_forward.1
= control target key start
LH: loop header
LB: loop body
LE: loop exit
PB: predicated region body
PF: predicated region fallthrough
CT: control target
= control target key end

     0   :  { %14 = vsyncpa [#allocation6], 0  ;;  %v18884_v2 = vmov 0   ;;  %s18875_s0 = inlined_call_operand.vmem [shape: bf16[32,8,128], index: 0, kind: input, shape index: {}]   ;;  %s18876_s1 = inlined_call_operand.vmem [shape: f32[8,128], index: 1, kind: input, shape index: {}]   ;;  %s18877_s2 = inlined_call_operand.vmem [shape: f32[8,128], index: 2, kind: input, shape index: {}]   ;;  %s18878_s3 = inlined_call_operand.vmem [shape: bf16[128,512], index: 3, kind: input, shape index: {}]   ;;  %s18879_s4 = inlined_call_operand.vmem [shape: bf16[128,512], index: 4, kind: input, shape index: {}]   ;;  %s18880_s5 = inlined_call_operand.vmem [shape: f32[1,512], index: 5, kind: input, shape index: {}]   ;;  %s18881_s6 = inlined_call_operand.hbm [shape: f32[8,32,128], index: 6, kind: output, shape index: {0}]   ;;  %s18882_s7 = inlined_call_operand.hbm [shape: f32[8,128], index: 7, kind: output, shape index: {1}]   ;;  %s18883_s8 = inlined_call_operand.hbm [shape: f32[8,128], index: 8, kind: output, shape index: {2}]  }
   0x1   :  { %v14184_v0 = vld [vmem:[%s18878_s3 + $0xe4] ss:$16 sps:$4 sm:$0xff]   ;;  %v14186_v1 = vld [vmem:[%s18878_s3 + $0xec] ss:$16 sps:$4 sm:$0xff]   ;;  %411 = vmatprep.mubr.bf16.mxu0 %v18884_v2  ;;  %604 = vmatprep.mubr.bf16.mxu1 %v18884_v2  ;;  %v14188_v3 = vld [vmem:[%s18878_s3 + $0xe0] ss:$16 sps:$4 sm:$0xff]  }
   0x2   :  { %379 = vmatprep.subr.bf16.mxu0 %v14184_v0  ;;  %v14189_v4 = vld [vmem:[%s18878_s3 + $0xe8] ss:$16 sps:$4 sm:$0xff]   ;;  %572 = vmatprep.subr.bf16.mxu1 %v14186_v1  ;;  %v14190_v5 = vld [vmem:[%s18878_s3 + $0xc4] ss:$16 sps:$4 sm:$0xff]   ;;  %v14192_v6 = vld [vmem:[%s18878_s3 + $0xcc] ss:$16 sps:$4 sm:$0xff]  }
   0x3   :  { %380 = vmatpush1.bf16.msra.mxu0 %v14188_v3  ;;  %573 = vmatpush1.bf16.msra.mxu1 %v14189_v4  ;;  %v14194_v7 = vld [vmem:[%s18878_s3 + $0xc0] ss:$16 sps:$4 sm:$0xff]   ;;  %v14195_v8 = vld [vmem:[%s18878_s3 + $0xc8] ss:$16 sps:$4 sm:$0xff]   ;;  %v14196_v9 = vld [vmem:[%s18878_s3 + $0xa4] ss:$16 sps:$4 sm:$0xff]  }
   0x4   :  { %381 = vmatprep.subr.bf16.mxu0 %v14190_v5  ;;  %574 = vmatprep.subr.bf16.mxu1 %v14192_v6  ;;  %v14198_v10 = vld [vmem:[%s18878_s3 + $0xac] ss:$16 sps:$4 sm:$0xff]   ;;  %v14200_v11 = vld [vmem:[%s18878_s3 + $0xa0] ss:$16 sps:$4 sm:$0xff]   ;;  %v14201_v12 = vld [vmem:[%s18878_s3 + $0xa8] ss:$16 sps:$4 sm:$0xff]  }
   0x5   :  { %v14202_v13 = vld [vmem:[%s18878_s3 + $0x84] ss:$16 sps:$4 sm:$0xff]   ;;  %v14204_v14 = vld [vmem:[%s18878_s3 + $0x8c] ss:$16 sps:$4 sm:$0xff]   ;;  %v14206_v15 = vld [vmem:[%s18878_s3 + $0x80] ss:$16 sps:$4 sm:$0xff]  }
   0x6   :  { %v14207_v16 = vld [vmem:[%s18878_s3 + $0x88] ss:$16 sps:$4 sm:$0xff]   ;;  %v14208_v17 = vld [vmem:[%s18878_s3 + $0x64] ss:$16 sps:$4 sm:$0xff]   ;;  %v14210_v18 = vld [vmem:[%s18878_s3 + $0x6c] ss:$16 sps:$4 sm:$0xff]  }
   0x7   :  { %382 = vmatpush1.bf16.msra.mxu0 %v14194_v7  ;;  %575 = vmatpush1.bf16.msra.mxu1 %v14195_v8  ;;  %v14212_v19 = vld [vmem:[%s18878_s3 + $0x60] ss:$16 sps:$4 sm:$0xff]   ;;  %v14213_v20 = vld [vmem:[%s18878_s3 + $0x68] ss:$16 sps:$4 sm:$0xff]   ;;  %v14214_v21 = vld [vmem:[%s18878_s3 + $0x44] ss:$16 sps:$4 sm:$0xff]  }
   0x8   :  { %383 = vmatprep.subr.bf16.mxu0 %v14196_v9  ;;  %576 = vmatprep.subr.bf16.mxu1 %v14198_v10  ;;  %v14216_v22 = vld [vmem:[%s18878_s3 + $0x4c] ss:$16 sps:$4 sm:$0xff]   ;;  %v14218_v23 = vld [vmem:[%s18878_s3 + $0x40] ss:$16 sps:$4 sm:$0xff]   ;;  %v14219_v24 = vld [vmem:[%s18878_s3 + $0x48] ss:$16 sps:$4 sm:$0xff]  }
   0x9   :  { %v14220_v25 = vld [vmem:[%s18878_s3 + $0x24] ss:$16 sps:$4 sm:$0xff]   ;;  %v14222_v26 = vld [vmem:[%s18878_s3 + $0x2c] ss:$16 sps:$4 sm:$0xff]   ;;  %v14224_v27 = vld [vmem:[%s18878_s3 + $0x20] ss:$16 sps:$4 sm:$0xff]  }
   0xa   :  { %v14225_v28 = vld [vmem:[%s18878_s3 + $0x28] ss:$16 sps:$4 sm:$0xff]   ;;  %v14226_v29 = vld [vmem:[%s18878_s3 + $0x4] ss:$16 sps:$4 sm:$0xff]   ;;  %v14228_v30 = vld [vmem:[%s18878_s3 + $0xc] ss:$16 sps:$4 sm:$0xff]  }
   0xb   :  { %384 = vmatpush1.bf16.msra.mxu0 %v14200_v11  ;;  %577 = vmatpush1.bf16.msra.mxu1 %v14201_v12  ;;  %v14230_v31 = vld [vmem:[%s18878_s3] ss:$16 sps:$4 sm:$0xff]   ;;  %v14231_v32 = vld [vmem:[%s18878_s3 + $0x8] ss:$16 sps:$4 sm:$0xff]   ;;  %v15409_v33 = vld [vmem:[%s18879_s4 + $0xe4] ss:$16 sps:$4 sm:$0xff]  }
   0xc   :  { %385 = vmatprep.subr.bf16.mxu0 %v14202_v13  ;;  %578 = vmatprep.subr.bf16.mxu1 %v14204_v14  ;;  %v15414_v34 = vld [vmem:[%s18879_s4 + $0xec] ss:$16 sps:$4 sm:$0xff]   ;;  %v14232_v35 = vld [vmem:[%s18875_s0] sm:$0xff]   ;;  %v15434_v38 = vld [vmem:[%s18879_s4 + $0xe8] ss:$16 sps:$4 sm:$0xff]  }
   0xd   :  { %v15422_v36 = vld [vmem:[%s18879_s4 + $0xe0] ss:$16 sps:$4 sm:$0xff]   ;;  %v15428_v37 = vld [vmem:[%s18879_s4 + $0xc4] ss:$16 sps:$4 sm:$0xff]   ;;  %v15439_v39 = vld [vmem:[%s18879_s4 + $0xcc] ss:$16 sps:$4 sm:$0xff]  }
   0xe   :  { %v15446_v40 = vld [vmem:[%s18879_s4 + $0xc0] ss:$16 sps:$4 sm:$0xff]   ;;  %v15453_v41 = vld [vmem:[%s18879_s4 + $0xa4] ss:$16 sps:$4 sm:$0xff]   ;;  %v15459_v42 = vld [vmem:[%s18879_s4 + $0xc8] ss:$16 sps:$4 sm:$0xff]  }
   0xf   :  { %386 = vmatpush1.bf16.msra.mxu0 %v14206_v15  ;;  %579 = vmatpush1.bf16.msra.mxu1 %v14207_v16  ;;  %v14236_v43 = vld [vmem:[%s18875_s0 + $0x8] sm:$0xff]   ;;  %v15469_v44 = vld [vmem:[%s18879_s4 + $0xa0] ss:$16 sps:$4 sm:$0xff]   ;;  %v15474_v45 = vld [vmem:[%s18879_s4 + $0x84] ss:$16 sps:$4 sm:$0xff]  }
  0x10   :  { %387 = vmatprep.subr.bf16.mxu0 %v14208_v17  ;;  %580 = vmatprep.subr.bf16.mxu1 %v14210_v18  ;;  %v15480_v46 = vld [vmem:[%s18879_s4 + $0xac] ss:$16 sps:$4 sm:$0xff]   ;;  %v15486_v47 = vld [vmem:[%s18879_s4 + $0xa8] ss:$16 sps:$4 sm:$0xff]   ;;  %v14237_v49 = vld [vmem:[%s18875_s0 + $0x10] sm:$0xff]  }
  0x11   :  { %v15491_v48 = vld [vmem:[%s18879_s4 + $0x8c] ss:$16 sps:$4 sm:$0xff]   ;;  %v15502_v50 = vld [vmem:[%s18879_s4 + $0x80] ss:$16 sps:$4 sm:$0xff]   ;;  %v15510_v51 = vld [vmem:[%s18879_s4 + $0x64] ss:$16 sps:$4 sm:$0xff]  }
  0x12   :  { %v15515_v52 = vld [vmem:[%s18879_s4 + $0x88] ss:$16 sps:$4 sm:$0xff]   ;;  %v15520_v53 = vld [vmem:[%s18879_s4 + $0x60] ss:$16 sps:$4 sm:$0xff]   ;;  %v15526_v54 = vld [vmem:[%s18879_s4 + $0x44] ss:$16 sps:$4 sm:$0xff]  }
  0x13   :  { %388 = vmatpush1.bf16.msra.mxu0 %v14212_v19  ;;  %581 = vmatpush1.bf16.msra.mxu1 %v14213_v20  ;;  %v15532_v55 = vld [vmem:[%s18879_s4 + $0x6c] ss:$16 sps:$4 sm:$0xff]   ;;  %v15539_v56 = vld [vmem:[%s18879_s4 + $0x68] ss:$16 sps:$4 sm:$0xff]   ;;  %v15552_v58 = vld [vmem:[%s18879_s4 + $0x40] ss:$16 sps:$4 sm:$0xff]  }
  0x14   :  { %389 = vmatprep.subr.bf16.mxu0 %v14214_v21  ;;  %582 = vmatprep.subr.bf16.mxu1 %v14216_v22  ;;  %v15544_v57 = vld [vmem:[%s18879_s4 + $0x4c] ss:$16 sps:$4 sm:$0xff]   ;;  %v15560_v59 = vld [vmem:[%s18879_s4 + $0x24] ss:$16 sps:$4 sm:$0xff]   ;;  %v15565_v60 = vld [vmem:[%s18879_s4 + $0x48] ss:$16 sps:$4 sm:$0xff]  }
  0x15   :  { %v14244_v61 = vld [vmem:[%s18875_s0 + $0x18] sm:$0xff]   ;;  %v15574_v62 = vld [vmem:[%s18879_s4 + $0x20] ss:$16 sps:$4 sm:$0xff]   ;;  %v15587_v0 = vld [vmem:[%s18879_s4 + $0x4] ss:$16 sps:$4 sm:$0xff]  }
  0x16   :  { %v15580_v63 = vld [vmem:[%s18879_s4 + $0x2c] ss:$16 sps:$4 sm:$0xff]   ;;  %v15592_v1 = vld [vmem:[%s18879_s4 + $0x28] ss:$16 sps:$4 sm:$0xff]   ;;  %v15597_v3 = vld [vmem:[%s18879_s4] ss:$16 sps:$4 sm:$0xff]  }
  0x17   :  { %390 = vmatpush1.bf16.msra.mxu0 %v14218_v23  ;;  %583 = vmatpush1.bf16.msra.mxu1 %v14219_v24  ;;  %v15602_v4 = vld [vmem:[%s18879_s4 + $0xc] ss:$16 sps:$4 sm:$0xff]   ;;  %v15609_v5 = vld [vmem:[%s18879_s4 + $0x8] ss:$16 sps:$4 sm:$0xff]   ;;  %v14245_v6 = vld [vmem:[%s18875_s0 + $0x20] sm:$0xff]  }
  0x18   :  { %391 = vmatprep.subr.bf16.mxu0 %v14220_v25  ;;  %584 = vmatprep.subr.bf16.mxu1 %v14222_v26  ;;  %v14252_v7 = vld [vmem:[%s18875_s0 + $0x28] sm:$0xff]   ;;  %v14253_v8 = vld [vmem:[%s18875_s0 + $0x30] sm:$0xff]   ;;  %v14260_v9 = vld [vmem:[%s18875_s0 + $0x38] sm:$0xff]  }
  0x19   :  { %v14261_v10 = vld [vmem:[%s18875_s0 + $0x40] sm:$0xff]   ;;  %v14268_v11 = vld [vmem:[%s18875_s0 + $0x48] sm:$0xff]   ;;  %v14269_v12 = vld [vmem:[%s18875_s0 + $0x50] sm:$0xff]  }
  0x1a   :  { %v14276_v13 = vld [vmem:[%s18875_s0 + $0x58] sm:$0xff]   ;;  %v14277_v14 = vld [vmem:[%s18875_s0 + $0x60] sm:$0xff]   ;;  %v14284_v15 = vld [vmem:[%s18875_s0 + $0x68] sm:$0xff]  }
  0x1b   :  { %392 = vmatpush1.bf16.msra.mxu0 %v14224_v27  ;;  %585 = vmatpush1.bf16.msra.mxu1 %v14225_v28  ;;  %v14285_v16 = vld [vmem:[%s18875_s0 + $0x70] sm:$0xff]  }
  0x1c   :  { %393 = vmatprep.subr.bf16.mxu0 %v14226_v29  ;;  %586 = vmatprep.subr.bf16.mxu1 %v14228_v30 }
  0x1f   :  { %394 = vmatpush1.bf16.msra.mxu0 %v14230_v31  ;;  %587 = vmatpush1.bf16.msra.mxu1 %v14231_v32 }
  0x20   :  { %1092 = vmatprep.subr.bf16.mxu0 %v15409_v33  ;;  %1133 = vmatprep.subr.bf16.mxu1 %v15414_v34 }
  0x22   :  { %412 = vmatmul.mubr.bf16.vlgmr.msra.gmra.mxu0 %v14232_v35  ;;  %605 = vmatmul.mubr.bf16.vlgmr.msra.gmra.mxu1 %v14232_v35 }
  0x23   :  { %1093 = vmatpush1.bf16.msra.mxu0 %v15422_v36  ;;  %421 = vmatprep.mubr.bf16.mxu0 %v18884_v2 }
  0x24   :  { %614 = vmatprep.mubr.bf16.mxu1 %v18884_v2  ;;  %1094 = vmatprep.subr.bf16.mxu0 %v15428_v37 }
  0x25   :  { %1134 = vmatpush1.bf16.msra.mxu1 %v15434_v38 }
  0x26   :  { %1135 = vmatprep.subr.bf16.mxu1 %v15439_v39 }
  0x27   :  { %1095 = vmatpush1.bf16.msra.mxu0 %v15446_v40 }
  0x28   :  { %1096 = vmatprep.subr.bf16.mxu0 %v15453_v41 }
  0x29   :  { %1136 = vmatpush1.bf16.msra.mxu1 %v15459_v42 }
  0x2a   :  { %422 = vmatmul.mubr.bf16.gmra.mxu0 %v14236_v43  ;;  %615 = vmatmul.mubr.bf16.gmra.mxu1 %v14236_v43 }
  0x2b   :  { %431 = vmatprep.mubr.bf16.mxu0 %v18884_v2  ;;  %624 = vmatprep.mubr.bf16.mxu1 %v18884_v2 }
  0x2c   :  { %1097 = vmatpush1.bf16.msra.mxu0 %v15469_v44  ;;  %1137 = vmatprep.subr.bf16.mxu1 %v15480_v46 }
  0x2d   :  { %1098 = vmatprep.subr.bf16.mxu0 %v15474_v45  ;;  %1138 = vmatpush1.bf16.msra.mxu1 %v15486_v47 }
  0x2e   :  { %1139 = vmatprep.subr.bf16.mxu1 %v15491_v48 }
  0x30   :  { %1099 = vmatpush1.bf16.msra.mxu0 %v15502_v50 }
  0x31   :  { %1100 = vmatprep.subr.bf16.mxu0 %v15510_v51  ;;  %1140 = vmatpush1.bf16.msra.mxu1 %v15515_v52 }
  0x32   :  { %432 = vmatmul.mubr.bf16.gmra.mxu0 %v14237_v49  ;;  %625 = vmatmul.mubr.bf16.gmra.mxu1 %v14237_v49 }
  0x33   :  { %441 = vmatprep.mubr.bf16.mxu0 %v18884_v2  ;;  %634 = vmatprep.mubr.bf16.mxu1 %v18884_v2 }
  0x34   :  { %1101 = vmatpush1.bf16.msra.mxu0 %v15520_v53  ;;  %1141 = vmatprep.subr.bf16.mxu1 %v15532_v55 }
  0x35   :  { %1102 = vmatprep.subr.bf16.mxu0 %v15526_v54  ;;  %1142 = vmatpush1.bf16.msra.mxu1 %v15539_v56 }
  0x36   :  { %1143 = vmatprep.subr.bf16.mxu1 %v15544_v57 }
  0x38   :  { %1103 = vmatpush1.bf16.msra.mxu0 %v15552_v58 }
  0x39   :  { %1104 = vmatprep.subr.bf16.mxu0 %v15560_v59  ;;  %1144 = vmatpush1.bf16.msra.mxu1 %v15565_v60 }
  0x3a   :  { %442 = vmatmul.mubr.bf16.gmra.mxu0 %v14244_v61  ;;  %635 = vmatmul.mubr.bf16.gmra.mxu1 %v14244_v61 }
  0x3b   :  { %451 = vmatprep.mubr.bf16.mxu0 %v18884_v2  ;;  %644 = vmatprep.mubr.bf16.mxu1 %v18884_v2 }
  0x3c   :  { %1105 = vmatpush1.bf16.msra.mxu0 %v15574_v62  ;;  %1145 = vmatprep.subr.bf16.mxu1 %v15580_v63 }
  0x3d   :  { %1106 = vmatprep.subr.bf16.mxu0 %v15587_v0  ;;  %1146 = vmatpush1.bf16.msra.mxu1 %v15592_v1 }
  0x3e   :  { %1147 = vmatprep.subr.bf16.mxu1 %v15602_v4 }
  0x40   :  { %1107 = vmatpush1.bf16.msra.mxu0 %v15597_v3 }
  0x41   :  { %1148 = vmatpush1.bf16.msra.mxu1 %v15609_v5  ;;  %1465 = vmatprep.subr.bf16.mxu0 %v15409_v33 }
  0x42   :  { %452 = vmatmul.mubr.bf16.gmra.mxu0 %v14245_v6  ;;  %645 = vmatmul.mubr.bf16.gmra.mxu1 %v14245_v6 }
  0x43   :  { %461 = vmatprep.mubr.bf16.mxu0 %v18884_v2  ;;  %654 = vmatprep.mubr.bf16.mxu1 %v18884_v2 }
  0x44   :  { %1506 = vmatprep.subr.bf16.mxu1 %v15414_v34 }
  0x4a   :  { %462 = vmatmul.mubr.bf16.gmra.mxu0 %v14252_v7  ;;  %655 = vmatmul.mubr.bf16.gmra.mxu1 %v14252_v7 }
  0x4b   :  { %471 = vmatprep.mubr.bf16.mxu0 %v18884_v2  ;;  %664 = vmatprep.mubr.bf16.mxu1 %v18884_v2 }
  0x52   :  { %472 = vmatmul.mubr.bf16.gmra.mxu0 %v14253_v8  ;;  %665 = vmatmul.mubr.bf16.gmra.mxu1 %v14253_v8 }
  0x53   :  { %481 = vmatprep.mubr.bf16.mxu0 %v18884_v2  ;;  %674 = vmatprep.mubr.bf16.mxu1 %v18884_v2 }
  0x5a   :  { %482 = vmatmul.mubr.bf16.gmra.mxu0 %v14260_v9  ;;  %675 = vmatmul.mubr.bf16.gmra.mxu1 %v14260_v9 }
  0x5b   :  { %491 = vmatprep.mubr.bf16.mxu0 %v18884_v2  ;;  %684 = vmatprep.mubr.bf16.mxu1 %v18884_v2 }
  0x62   :  { %492 = vmatmul.mubr.bf16.gmra.mxu0 %v14261_v10  ;;  %685 = vmatmul.mubr.bf16.gmra.mxu1 %v14261_v10 }
  0x63   :  { %501 = vmatprep.mubr.bf16.mxu0 %v18884_v2  ;;  %694 = vmatprep.mubr.bf16.mxu1 %v18884_v2 }
  0x6a   :  { %502 = vmatmul.mubr.bf16.gmra.mxu0 %v14268_v11  ;;  %695 = vmatmul.mubr.bf16.gmra.mxu1 %v14268_v11 }
  0x6b   :  { %511 = vmatprep.mubr.bf16.mxu0 %v18884_v2  ;;  %704 = vmatprep.mubr.bf16.mxu1 %v18884_v2 }
  0x72   :  { %512 = vmatmul.mubr.bf16.gmra.mxu0 %v14269_v12  ;;  %705 = vmatmul.mubr.bf16.gmra.mxu1 %v14269_v12 }
  0x73   :  { %521 = vmatprep.mubr.bf16.mxu0 %v18884_v2  ;;  %714 = vmatprep.mubr.bf16.mxu1 %v18884_v2 }
  0x7a   :  { %522 = vmatmul.mubr.bf16.gmra.mxu0 %v14276_v13  ;;  %715 = vmatmul.mubr.bf16.gmra.mxu1 %v14276_v13 }
  0x7b   :  { %531 = vmatprep.mubr.bf16.mxu0 %v18884_v2  ;;  %724 = vmatprep.mubr.bf16.mxu1 %v18884_v2 }
  0x82   :  { %532 = vmatmul.mubr.bf16.gmra.mxu0 %v14277_v14  ;;  %725 = vmatmul.mubr.bf16.gmra.mxu1 %v14277_v14 }
  0x83   :  { %541 = vmatprep.mubr.bf16.mxu0 %v18884_v2  ;;  %734 = vmatprep.mubr.bf16.mxu1 %v18884_v2 }
  0x8a   :  { %542 = vmatmul.mubr.bf16.gmra.mxu0 %v14284_v15  ;;  %735 = vmatmul.mubr.bf16.gmra.mxu1 %v14284_v15 }
  0x8b   :  { %551 = vmatprep.mubr.bf16.mxu0 %v18884_v2  ;;  %744 = vmatprep.mubr.bf16.mxu1 %v18884_v2 }
  0x8c   :  { %15 = vsyncpa [#allocation8], 0  ;;  %v14292_v17 = vld [vmem:[%s18875_s0 + $0x78] sm:$0xff]   ;;  %v33_v18 = vld [vmem:[%s18876_s1] sm:$0xff] }
  0x8d   :  { %v899_v19 = vpack.c.bf16 %v33_v18, %v33_v18 }
  0x92   :  { %552 = vmatmul.mubr.bf16.gmra.mxu0 %v14285_v16  ;;  %745 = vmatmul.mubr.bf16.gmra.mxu1 %v14285_v16 }
  0x93   :  { %561 = vmatprep.mubr.bf16.mxu0 %v18884_v2  ;;  %754 = vmatprep.mubr.bf16.mxu1 %v18884_v2 }
  0x9a   :  { %562 = vmatmul.mubr.bf16.gmra.mxu0 %v14292_v17  ;;  %755 = vmatmul.mubr.bf16.gmra.mxu1 %v14292_v17 }
  0x9b   :  { %1124 = vmatprep.mubr.bf16.mxu0 %v18884_v2  ;;  %1165 = vmatprep.mubr.bf16.mxu1 %v18884_v2 }
  0xa2   :  { %1125 = vmatmul.mubr.bf16.vlgmr.msra.gmra.mxu0 %v899_v19  ;;  %1166 = vmatmul.mubr.bf16.vlgmr.msra.gmra.mxu1 %v899_v19 }
  0xa3   :  { %1466 = vmatpush1.bf16.msra.mxu0 %v15422_v36  ;;  %1507 = vmatpush1.bf16.msra.mxu1 %v15434_v38 }
  0xa4   :  { %1467 = vmatprep.subr.bf16.mxu0 %v15428_v37  ;;  %1508 = vmatprep.subr.bf16.mxu1 %v15439_v39 }
  0xa5   :  { %1497 = vmatprep.mubr.bf16.mxu0 %v18884_v2  ;;  %1538 = vmatprep.mubr.bf16.mxu1 %v18884_v2 }
  0xa7   :  { %1468 = vmatpush1.bf16.msra.mxu0 %v15446_v40  ;;  %1509 = vmatpush1.bf16.msra.mxu1 %v15459_v42 }
  0xa8   :  { %1469 = vmatprep.subr.bf16.mxu0 %v15453_v41  ;;  %1510 = vmatprep.subr.bf16.mxu1 %v15480_v46 }
  0xab   :  { %1470 = vmatpush1.bf16.msra.mxu0 %v15469_v44  ;;  %1511 = vmatpush1.bf16.msra.mxu1 %v15486_v47 }
  0xac   :  { %1471 = vmatprep.subr.bf16.mxu0 %v15474_v45  ;;  %1512 = vmatprep.subr.bf16.mxu1 %v15491_v48 }
  0xaf   :  { %1472 = vmatpush1.bf16.msra.mxu0 %v15502_v50  ;;  %1513 = vmatpush1.bf16.msra.mxu1 %v15515_v52 }
  0xb0   :  { %1473 = vmatprep.subr.bf16.mxu0 %v15510_v51  ;;  %1514 = vmatprep.subr.bf16.mxu1 %v15532_v55 }
  0xb3   :  { %1474 = vmatpush1.bf16.msra.mxu0 %v15520_v53  ;;  %1515 = vmatpush1.bf16.msra.mxu1 %v15539_v56 }
  0xb4   :  { %1475 = vmatprep.subr.bf16.mxu0 %v15526_v54  ;;  %1516 = vmatprep.subr.bf16.mxu1 %v15544_v57 }
  0xb7   :  { %1476 = vmatpush1.bf16.msra.mxu0 %v15552_v58  ;;  %1517 = vmatpush1.bf16.msra.mxu1 %v15565_v60 }
  0xb8   :  { %1477 = vmatprep.subr.bf16.mxu0 %v15560_v59  ;;  %1518 = vmatprep.subr.bf16.mxu1 %v15580_v63 }
  0xbb   :  { %1478 = vmatpush1.bf16.msra.mxu0 %v15574_v62  ;;  %1519 = vmatpush1.bf16.msra.mxu1 %v15592_v1 }
  0xbc   :  { %1479 = vmatprep.subr.bf16.mxu0 %v15587_v0  ;;  %1520 = vmatprep.subr.bf16.mxu1 %v15602_v4 }
  0xbf   :  { %1480 = vmatpush1.bf16.msra.mxu0 %v15597_v3  ;;  %1521 = vmatpush1.bf16.msra.mxu1 %v15609_v5 }
  0xe2   :  { %v15715_v20 = vpop.f32.mrf.mxu0  ;;  %v15717_v21 = vpop.f32.mrf.mxu1 }
  0xe4   :  { %v15719_v22 = vpop.f32.mrf.mxu0  ;;  %v15721_v23 = vpop.f32.mrf.mxu1 }
  0xe6   :  { %v15723_v24 = vpop.f32.mrf.mxu0  ;;  %v15725_v25 = vpop.f32.mrf.mxu1 }
  0xe8   :  { %v15727_v26 = vpop.f32.mrf.mxu0  ;;  %v15729_v27 = vpop.f32.mrf.mxu1 }
  0xea   :  { %v15731_v28 = vpop.f32.mrf.mxu0  ;;  %v15733_v29 = vpop.f32.mrf.mxu1 }
  0xec   :  { %v15735_v30 = vpop.f32.mrf.mxu0  ;;  %v15737_v31 = vpop.f32.mrf.mxu1 }
  0xee   :  { %v15739_v32 = vpop.f32.mrf.mxu0  ;;  %v15741_v33 = vpop.f32.mrf.mxu1 }
  0xef   :  { %18886 = vst [vmem:[#allocation12_spill] sm:$0xff] %v15739_v32  ;;  %18887 = vst [vmem:[#allocation13_spill] sm:$0xff] %v15741_v33 }
  0xf0   :  { %v15743_v34 = vpop.f32.mrf.mxu0  ;;  %v15745_v35 = vpop.f32.mrf.mxu1 }
  0xf1   :  { %18888 = vst [vmem:[#allocation14_spill] sm:$0xff] %v15743_v34  ;;  %18889 = vst [vmem:[#allocation15_spill] sm:$0xff] %v15745_v35 }
  0xf2   :  { %v15747_v36 = vpop.f32.mrf.mxu0  ;;  %v15749_v37 = vpop.f32.mrf.mxu1 }
  0xf3   :  { %18890 = vst [vmem:[#allocation16_spill] sm:$0xff] %v15747_v36  ;;  %18891 = vst [vmem:[#allocation17_spill] sm:$0xff] %v15749_v37 }
  0xf4   :  { %v15751_v38 = vpop.f32.mrf.mxu0  ;;  %v15753_v39 = vpop.f32.mrf.mxu1 }
  0xf5   :  { %18892 = vst [vmem:[#allocation18_spill] sm:$0xff] %v15751_v38  ;;  %18893 = vst [vmem:[#allocation19_spill] sm:$0xff] %v15753_v39 }
  0xf6   :  { %v15755_v40 = vpop.f32.mrf.mxu0  ;;  %v15757_v41 = vpop.f32.mrf.mxu1 }
  0xf7   :  { %18894 = vst [vmem:[#allocation20_spill] sm:$0xff] %v15755_v40  ;;  %18895 = vst [vmem:[#allocation21_spill] sm:$0xff] %v15757_v41 }
  0xf8   :  { %v15759_v42 = vpop.f32.mrf.mxu0  ;;  %v15761_v43 = vpop.f32.mrf.mxu1 }
  0xf9   :  { %18896 = vst [vmem:[#allocation22_spill] sm:$0xff] %v15759_v42  ;;  %18897 = vst [vmem:[#allocation23_spill] sm:$0xff] %v15761_v43 }
  0xfa   :  { %v15763_v44 = vpop.f32.mrf.mxu0  ;;  %v15765_v45 = vpop.f32.mrf.mxu1 }
  0xfb   :  { %18898 = vst [vmem:[#allocation24_spill] sm:$0xff] %v15763_v44  ;;  %18899 = vst [vmem:[#allocation25_spill] sm:$0xff] %v15765_v45 }
  0xfc   :  { %v15767_v46 = vpop.f32.mrf.mxu0  ;;  %v15769_v47 = vpop.f32.mrf.mxu1 }
  0xfd   :  { %18900 = vst [vmem:[#allocation26_spill] sm:$0xff] %v15767_v46  ;;  %18901 = vst [vmem:[#allocation27_spill] sm:$0xff] %v15769_v47 }
  0xfe   :  { %v15771_v48 = vpop.f32.mrf.mxu0  ;;  %v15773_v49 = vpop.f32.mrf.mxu1 }
  0xff   :  { %18902 = vst [vmem:[#allocation28_spill] sm:$0xff] %v15771_v48  ;;  %18903 = vst [vmem:[#allocation29_spill] sm:$0xff] %v15773_v49  ;;  %v16187_v49 = vld [vmem:[%s18879_s4 + $0xc] ss:$16 sps:$4 sm:$0xff]  }
 0x100   :  { %v15775_v50 = vpop.f32.mrf.mxu0  ;;  %v15777_v51 = vpop.f32.mrf.mxu1 }
 0x101   :  { %18904 = vst [vmem:[#allocation30_spill] sm:$0xff] %v15775_v50  ;;  %18905 = vst [vmem:[#allocation31_spill] sm:$0xff] %v15777_v51  ;;  %v16194_v51 = vld [vmem:[%s18879_s4] ss:$16 sps:$4 sm:$0xff]   ;;  %v16199_v50 = vld [vmem:[%s18879_s4 + $0x8] ss:$16 sps:$4 sm:$0xff]  }
 0x102   :  { %v15779_v52 = vpop.f32.mrf.mxu0  ;;  %v15781_v53 = vpop.f32.mrf.mxu1 }
 0x103   :  { %18906 = vst [vmem:[#allocation32_spill] sm:$0xff] %v15779_v52  ;;  %18907 = vst [vmem:[#allocation33_spill] sm:$0xff] %v15781_v53  ;;  %v16163_v53 = vld [vmem:[%s18879_s4 + $0x2c] ss:$16 sps:$4 sm:$0xff]   ;;  %v16182_v52 = vld [vmem:[%s18879_s4 + $0x4] ss:$16 sps:$4 sm:$0xff]  }
 0x104   :  { %v15783_v54 = vpop.f32.mrf.mxu0  ;;  %v15785_v55 = vpop.f32.mrf.mxu1 }
 0x105   :  { %18908 = vst [vmem:[#allocation34_spill] sm:$0xff] %v15783_v54  ;;  %18909 = vst [vmem:[#allocation35_spill] sm:$0xff] %v15785_v55  ;;  %v16170_v55 = vld [vmem:[%s18879_s4 + $0x20] ss:$16 sps:$4 sm:$0xff]   ;;  %v16175_v54 = vld [vmem:[%s18879_s4 + $0x28] ss:$16 sps:$4 sm:$0xff]  }
 0x106   :  { %v15787_v56 = vpop.f32.mrf.mxu0  ;;  %v15789_v57 = vpop.f32.mrf.mxu1 }
 0x107   :  { %18910 = vst [vmem:[#allocation36_spill] sm:$0xff] %v15787_v56  ;;  %18911 = vst [vmem:[#allocation37_spill] sm:$0xff] %v15789_v57  ;;  %v16138_v57 = vld [vmem:[%s18879_s4 + $0x4c] ss:$16 sps:$4 sm:$0xff]   ;;  %v16158_v56 = vld [vmem:[%s18879_s4 + $0x24] ss:$16 sps:$4 sm:$0xff]  }
 0x108   :  { %v15791_v58 = vpop.f32.mrf.mxu0  ;;  %v15793_v59 = vpop.f32.mrf.mxu1 }
 0x109   :  { %18912 = vst [vmem:[#allocation38_spill] sm:$0xff] %v15791_v58  ;;  %18913 = vst [vmem:[#allocation39_spill] sm:$0xff] %v15793_v59  ;;  %v16146_v59 = vld [vmem:[%s18879_s4 + $0x40] ss:$16 sps:$4 sm:$0xff]   ;;  %v16151_v58 = vld [vmem:[%s18879_s4 + $0x48] ss:$16 sps:$4 sm:$0xff]  }
 0x10a   :  { %v15795_v60 = vpop.f32.mrf.mxu0  ;;  %v15797_v61 = vpop.f32.mrf.mxu1 }
 0x10b   :  { %18914 = vst [vmem:[#allocation40_spill] sm:$0xff] %v15795_v60  ;;  %18915 = vst [vmem:[#allocation41_spill] sm:$0xff] %v15797_v61  ;;  %v16132_v60 = vld [vmem:[%s18879_s4 + $0x44] ss:$16 sps:$4 sm:$0xff]  }
 0x10c   :  { %v15799_v62 = vpop.f32.mrf.mxu0  ;;  %v15801_v63 = vpop.f32.mrf.mxu1 }
 0x10d   :  { %18916 = vst [vmem:[#allocation42_spill] sm:$0xff] %v15799_v62  ;;  %18917 = vst [vmem:[#allocation43_spill] sm:$0xff] %v15801_v63  ;;  %v16122_v63 = vld [vmem:[%s18879_s4 + $0x68] ss:$16 sps:$4 sm:$0xff]   ;;  %v16127_v62 = vld [vmem:[%s18879_s4 + $0x6c] ss:$16 sps:$4 sm:$0xff]  }
 0x10e   :  { %v15803_v0 = vpop.f32.mrf.mxu0  ;;  %v15805_v1 = vpop.f32.mrf.mxu1 }
 0x10f   :  { %18918 = vst [vmem:[#allocation44_spill] sm:$0xff] %v15803_v0  ;;  %18919 = vst [vmem:[#allocation45_spill] sm:$0xff] %v15805_v1 }
 0x110   :  { %v15807_v3 = vpop.f32.mrf.mxu0  ;;  %v15809_v4 = vpop.f32.mrf.mxu1 }
 0x111   :  { %18920 = vst [vmem:[#allocation46_spill] sm:$0xff] %v15807_v3  ;;  %18921 = vst [vmem:[#allocation47_spill] sm:$0xff] %v15809_v4 }
 0x112   :  { %v15811_v5 = vpop.f32.mrf.mxu0  ;;  %v15813_v6 = vpop.f32.mrf.mxu1 }
 0x113   :  { %18922 = vst [vmem:[#allocation48_spill] sm:$0xff] %v15811_v5  ;;  %18923 = vst [vmem:[#allocation49_spill] sm:$0xff] %v15813_v6 }
 0x114   :  { %v15815_v7 = vpop.f32.mrf.mxu0  ;;  %v15817_v8 = vpop.f32.mrf.mxu1 }
 0x115   :  { %18924 = vst [vmem:[#allocation50_spill] sm:$0xff] %v15815_v7  ;;  %18925 = vst [vmem:[#allocation51_spill] sm:$0xff] %v15817_v8 }
 0x116   :  { %v15819_v9 = vpop.f32.mrf.mxu0  ;;  %v15821_v10 = vpop.f32.mrf.mxu1 }
 0x117   :  { %18926 = vst [vmem:[#allocation52_spill] sm:$0xff] %v15819_v9  ;;  %18927 = vst [vmem:[#allocation53_spill] sm:$0xff] %v15821_v10 }
 0x118   :  { %v15823_v11 = vpop.f32.mrf.mxu0  ;;  %v15825_v12 = vpop.f32.mrf.mxu1 }
 0x119   :  { %18928 = vst [vmem:[#allocation54_spill] sm:$0xff] %v15823_v11  ;;  %18929 = vst [vmem:[#allocation55_spill] sm:$0xff] %v15825_v12 }
 0x11a   :  { %v15827_v13 = vpop.f32.mrf.mxu0  ;;  %v15829_v14 = vpop.f32.mrf.mxu1 }
 0x11b   :  { %18930 = vst [vmem:[#allocation56_spill] sm:$0xff] %v15827_v13  ;;  %18931 = vst [vmem:[#allocation57_spill] sm:$0xff] %v15829_v14 }
 0x11c   :  { %v15831_v15 = vpop.f32.mrf.mxu0  ;;  %v15833_v16 = vpop.f32.mrf.mxu1 }
 0x11d   :  { %18932 = vst [vmem:[#allocation58_spill] sm:$0xff] %v15831_v15  ;;  %18933 = vst [vmem:[#allocation59_spill] sm:$0xff] %v15833_v16 }
 0x11e   :  { %v15835_v17 = vpop.f32.mrf.mxu0  ;;  %v15837_v18 = vpop.f32.mrf.mxu1 }
 0x11f   :  { %18934 = vst [vmem:[#allocation60_spill] sm:$0xff] %v15835_v17  ;;  %18935 = vst [vmem:[#allocation61_spill] sm:$0xff] %v15837_v18 }
 0x120   :  { %v15839_v19 = vpop.f32.mrf.mxu0  ;;  %v15841_v2 = vpop.f32.mrf.mxu1 }
 0x121   :  { %18936 = vst [vmem:[#allocation62_spill] sm:$0xff] %v15839_v19  ;;  %18937 = vst [vmem:[#allocation63_spill] sm:$0xff] %v15841_v2 }
 0x122   :  { %v15843_v10 = vpop.f32.mrf.mxu0  ;;  %v15845_v11 = vpop.f32.mrf.mxu1 }
 0x123   :  { %18938 = vst [vmem:[#allocation64_spill] sm:$0xff] %v15843_v10  ;;  %18939 = vst [vmem:[#allocation65_spill] sm:$0xff] %v15845_v11 }
 0x124   :  { %v15847_v12 = vpop.f32.mrf.mxu0  ;;  %v15849_v13 = vpop.f32.mrf.mxu1 }
 0x125   :  { %18940 = vst [vmem:[#allocation66_spill] sm:$0xff] %v15847_v12  ;;  %18941 = vst [vmem:[#allocation67_spill] sm:$0xff] %v15849_v13 }
 0x126   :  { %v15851_v14 = vpop.f32.mrf.mxu0  ;;  %v15853_v15 = vpop.f32.mrf.mxu1 }
 0x127   :  { %18942 = vst [vmem:[#allocation68_spill] sm:$0xff] %v15851_v14  ;;  %18943 = vst [vmem:[#allocation69_spill] sm:$0xff] %v15853_v15 }
 0x128   :  { %v15855_v16 = vpop.f32.mrf.mxu0  ;;  %v15857_v17 = vpop.f32.mrf.mxu1 }
 0x129   :  { %18944 = vst [vmem:[#allocation70_spill] sm:$0xff] %v15855_v16  ;;  %18945 = vst [vmem:[#allocation71_spill] sm:$0xff] %v15857_v17 }
 0x12a   :  { %v15859_v18 = vpop.f32.mrf.mxu0  ;;  %v15861_v19 = vpop.f32.mrf.mxu1 }
 0x12b   :  { %18946 = vst [vmem:[#allocation72_spill] sm:$0xff] %v15859_v18  ;;  %18947 = vst [vmem:[#allocation73_spill] sm:$0xff] %v15861_v19 }
 0x12c   :  { %v15863_v2 = vpop.f32.mrf.mxu0  ;;  %v15865_v10 = vpop.f32.mrf.mxu1 }
 0x12d   :  { %18948 = vst [vmem:[#allocation74_spill] sm:$0xff] %v15863_v2  ;;  %18949 = vst [vmem:[#allocation75_spill] sm:$0xff] %v15865_v10 }
 0x12e   :  { %v15867_v11 = vpop.f32.mrf.mxu0  ;;  %v15869_v12 = vpop.f32.mrf.mxu1 }
 0x12f   :  { %18950 = vst [vmem:[#allocation76_spill] sm:$0xff] %v15867_v11  ;;  %18951 = vst [vmem:[#allocation77_spill] sm:$0xff] %v15869_v12 }
 0x130   :  { %v15871_v13 = vpop.f32.mrf.mxu0  ;;  %v15873_v14 = vpop.f32.mrf.mxu1 }
 0x131   :  { %18952 = vst [vmem:[#allocation78_spill] sm:$0xff] %v15871_v13  ;;  %18953 = vst [vmem:[#allocation79_spill] sm:$0xff] %v15873_v14 }
 0x132   :  { %v15875_v15 = vpop.f32.mrf.mxu0  ;;  %v15877_v16 = vpop.f32.mrf.mxu1 }
 0x133   :  { %18954 = vst [vmem:[#allocation80_spill] sm:$0xff] %v15875_v15  ;;  %18955 = vst [vmem:[#allocation81_spill] sm:$0xff] %v15877_v16 }
 0x134   :  { %v15879_v17 = vpop.f32.mrf.mxu0  ;;  %v15881_v18 = vpop.f32.mrf.mxu1 }
 0x135   :  { %18956 = vst [vmem:[#allocation82_spill] sm:$0xff] %v15879_v17  ;;  %18957 = vst [vmem:[#allocation83_spill] sm:$0xff] %v15881_v18 }
 0x136   :  { %v15883_v19 = vpop.f32.mrf.mxu0  ;;  %v15885_v2 = vpop.f32.mrf.mxu1 }
 0x137   :  { %18958 = vst [vmem:[#allocation84_spill] sm:$0xff] %v15883_v19  ;;  %18959 = vst [vmem:[#allocation85_spill] sm:$0xff] %v15885_v2 }
 0x138   :  { %v15887_v10 = vpop.f32.mrf.mxu0  ;;  %v15889_v11 = vpop.f32.mrf.mxu1 }
 0x139   :  { %18960 = vst [vmem:[#allocation86_spill] sm:$0xff] %v15887_v10  ;;  %18961 = vst [vmem:[#allocation87_spill] sm:$0xff] %v15889_v11 }
 0x13a   :  { %v15891_v12 = vpop.f32.mrf.mxu0  ;;  %v15893_v13 = vpop.f32.mrf.mxu1 }
 0x13b   :  { %18962 = vst [vmem:[#allocation88_spill] sm:$0xff] %v15891_v12  ;;  %18963 = vst [vmem:[#allocation89_spill] sm:$0xff] %v15893_v13 }
 0x13c   :  { %v15895_v14 = vpop.f32.mrf.mxu0  ;;  %v15897_v15 = vpop.f32.mrf.mxu1 }
 0x13d   :  { %18964 = vst [vmem:[#allocation90_spill] sm:$0xff] %v15895_v14  ;;  %18965 = vst [vmem:[#allocation91_spill] sm:$0xff] %v15897_v15 }
 0x13e   :  { %v15899_v16 = vpop.f32.mrf.mxu0  ;;  %v15901_v17 = vpop.f32.mrf.mxu1 }
 0x13f   :  { %18966 = vst [vmem:[#allocation92_spill] sm:$0xff] %v15899_v16  ;;  %18967 = vst [vmem:[#allocation93_spill] sm:$0xff] %v15901_v17 }
 0x140   :  { %v15903_v18 = vpop.f32.mrf.mxu0  ;;  %v15905_v19 = vpop.f32.mrf.mxu1 }
 0x141   :  { %18968 = vst [vmem:[#allocation94_spill] sm:$0xff] %v15903_v18  ;;  %18969 = vst [vmem:[#allocation95_spill] sm:$0xff] %v15905_v19 }
 0x142   :  { %v15907_v2 = vpop.f32.mrf.mxu0  ;;  %v15909_v10 = vpop.f32.mrf.mxu1 }
 0x143   :  { %18970 = vst [vmem:[#allocation96_spill] sm:$0xff] %v15907_v2  ;;  %18971 = vst [vmem:[#allocation97_spill] sm:$0xff] %v15909_v10 }
 0x144   :  { %v15911_v11 = vpop.f32.mrf.mxu0  ;;  %v15913_v12 = vpop.f32.mrf.mxu1 }
 0x145   :  { %18972 = vst [vmem:[#allocation98_spill] sm:$0xff] %v15911_v11  ;;  %18973 = vst [vmem:[#allocation99_spill] sm:$0xff] %v15913_v12 }
 0x146   :  { %v15915_v13 = vpop.f32.mrf.mxu0  ;;  %v15917_v14 = vpop.f32.mrf.mxu1 }
 0x147   :  { %18974 = vst [vmem:[#allocation100_spill] sm:$0xff] %v15915_v13  ;;  %18975 = vst [vmem:[#allocation101_spill] sm:$0xff] %v15917_v14  ;;  %v103_v14 = vlaneseq }
 0x148   :  { %v15919_v15 = vpop.f32.mrf.mxu0  ;;  %v15921_v16 = vpop.f32.mrf.mxu1 }
 0x149   :  { %18976 = vst [vmem:[#allocation102_spill] sm:$0xff] %v15919_v15  ;;  %18977 = vst [vmem:[#allocation103_spill] sm:$0xff] %v15921_v16 }
 0x14a   :  { %v15923_v17 = vpop.f32.mrf.mxu0  ;;  %v15925_v18 = vpop.f32.mrf.mxu1 }
 0x14b   :  { %18978 = vst [vmem:[#allocation104_spill] sm:$0xff] %v15923_v17  ;;  %18979 = vst [vmem:[#allocation105_spill] sm:$0xff] %v15925_v18 }
 0x14c   :  { %v15927_v19 = vpop.f32.mrf.mxu0  ;;  %v15929_v2 = vpop.f32.mrf.mxu1 }
 0x14d   :  { %18980 = vst [vmem:[#allocation106_spill] sm:$0xff] %v15927_v19  ;;  %18981 = vst [vmem:[#allocation107_spill] sm:$0xff] %v15929_v2  ;;  %v15947_v19 = vshrl.u32 %v103_v14, 7 }
 0x14e   :  { %v15931_v10 = vpop.f32.mrf.mxu0  ;;  %v15933_v11 = vpop.f32.mrf.mxu1 }
 0x14f   :  { %18982 = vst [vmem:[#allocation108_spill] sm:$0xff] %v15931_v10  ;;  %18983 = vst [vmem:[#allocation109_spill] sm:$0xff] %v15933_v11  ;;  %v109_v14 = vsub.s32 1, %v15947_v19 }
 0x150   :  { %v15935_v12 = vpop.f32.mrf.mxu0  ;;  %v15937_v13 = vpop.f32.mrf.mxu1 }
 0x151   :  { %18984 = vst [vmem:[#allocation110_spill] sm:$0xff] %v15935_v12  ;;  %18985 = vst [vmem:[#allocation111_spill] sm:$0xff] %v15937_v13  ;;  %v105_v13 = vsub.s32 0, %v15947_v19 }
 0x152   :  { %v15939_v15 = vpop.f32.mrf.mxu0  ;;  %v15941_v16 = vpop.f32.mrf.mxu1 }
 0x153   :  { %18986 = vst [vmem:[#allocation112_spill] sm:$0xff] %v15939_v15  ;;  %18987 = vst [vmem:[#allocation113_spill] sm:$0xff] %v15941_v16  ;;  %v101_v16 = vld [vmem:[%s18880_s5] sm:$0xf] }
 0x154   :  { %v15943_v17 = vpop.f32.mrf.mxu0  ;;  %v15945_v18 = vpop.f32.mrf.mxu1  ;;  %v15976_v9 = vrot.slane %v101_v16, %v109_v14 }
 0x155   :  { %18988 = vst [vmem:[#allocation114_spill] sm:$0xff] %v15943_v17  ;;  %18989 = vst [vmem:[#allocation115_spill] sm:$0xff] %v15945_v18 }
 0x156   :  { %v15949_v2 = vpop.f32.mrf.mxu0  ;;  %v15951_v10 = vpop.f32.mrf.mxu1  ;;  %v420_v46 = vadd.f32 %v15727_v26, %v15976_v9 }
 0x157   :  { %18990 = vst [vmem:[#allocation116_spill] sm:$0xff] %v15949_v2  ;;  %18991 = vst [vmem:[#allocation117_spill] sm:$0xff] %v15951_v10  ;;  %v15970_v10 = vrot.slane %v101_v16, %v105_v13 }
 0x158   :  { %v15953_v11 = vpop.f32.mrf.mxu0  ;;  %v15955_v12 = vpop.f32.mrf.mxu1 }
 0x159   :  { %18992 = vst [vmem:[#allocation118_spill] sm:$0xff] %v15953_v11  ;;  %18993 = vst [vmem:[#allocation119_spill] sm:$0xff] %v15955_v12  ;;  %v418_v48 = vadd.f32 %v15723_v24, %v15970_v10 }
 0x15a   :  { %v15961_v15 = vpop.f32.mrf.mxu0  ;;  %v15963_v17 = vpop.f32.mrf.mxu1 }
 0x15b   :  { %18994 = vst [vmem:[#allocation120_spill] sm:$0xff] %v15961_v15  ;;  %18995 = vst [vmem:[#allocation121_spill] sm:$0xff] %v15963_v17  ;;  %v414_v17 = vadd.f32 %v15715_v20, %v15970_v10 }
 0x15c   :  { %v15966_v18 = vpop.f32.mrf.mxu0  ;;  %v15968_v2 = vpop.f32.mrf.mxu1 }
 0x15d   :  { %18996 = vst [vmem:[#allocation122_spill] sm:$0xff] %v15966_v18  ;;  %18997 = vst [vmem:[#allocation123_spill] sm:$0xff] %v15968_v2  ;;  %v416_v2 = vadd.f32 %v15719_v22, %v15976_v9  ;;  %v117_v18 = vsub.s32 3, %v15947_v19 }
 0x15e   :  { %v15972_v11 = vpop.f32.mrf.mxu0  ;;  %v15974_v12 = vpop.f32.mrf.mxu1 }
 0x15f   :  { %18998 = vst [vmem:[#allocation124_spill] sm:$0xff] %v15972_v11  ;;  %18999 = vst [vmem:[#allocation125_spill] sm:$0xff] %v15974_v12  ;;  %v15988_v3 = vrot.slane %v101_v16, %v117_v18 }
 0x160   :  { %v15978_v6 = vpop.f32.mrf.mxu0  ;;  %v15980_v8 = vpop.f32.mrf.mxu1 }
 0x161   :  { %19000 = vst [vmem:[#allocation126_spill] sm:$0xff] %v15978_v6  ;;  %19001 = vst [vmem:[#allocation127_spill] sm:$0xff] %v15980_v8  ;;  %v113_v6 = vsub.s32 2, %v15947_v19  ;;  %v609_v22 = vadd.f32 %v15721_v23, %v15988_v3  ;;  %v35_v23 = vld [vmem:[%s18877_s2] sm:$0xff]  ;;  %v613_v24 = vadd.f32 %v15729_v27, %v15988_v3  ;;  %s15259_s2 = smov [#allocation9]  }
 0x162   :  { %v1126_v15 = vpop.f32.mrf.mxu0  ;;  %v1167_v7 = vpop.f32.mrf.mxu1  ;;  %s12866_s9 = sshll.u32 %s15259_s2, 4  ;;  %s12867_s9 = int_to_ptr.vmem [resolvable:$true] %s12866_s9 }
 0x163   :  { %v1174_v13 = vadd.f32 %v1126_v15, %v414_v17  ;;  %v15990_v61 = vrot.slane %v101_v16, %v113_v6 }
 0x164   :  { %v1128_v11 = vpop.f32.mrf.mxu0  ;;  %v1169_v5 = vpop.f32.mrf.mxu1 }
 0x165   :  { %v12961_v12 = vmul.f32 -1.442695, %v1174_v13  ;;  %v1175_v14 = vadd.f32 %v1128_v11, %v416_v2  ;;  %v1177_v15 = vadd.f32 %v1169_v5, %v609_v22  ;;  %v607_v2 = vadd.f32 %v15717_v21, %v15990_v61 }
 0x166   :  { %v1130_v1 = vpop.f32.mrf.mxu0  ;;  %v1171_v4 = vpop.f32.mrf.mxu1  ;;  %v611_v34 = vadd.f32 %v15725_v25, %v15990_v61 }
 0x167   :  { %14680 = vpow2.f32 %v12961_v12  ;;  %v12962_v8 = vmul.f32 -1.442695, %v1175_v14  ;;  %v1176_v1 = vadd.f32 %v1167_v7, %v607_v2  ;;  %v12963_v4 = vmul.f32 -1.442695, %v1177_v15 }
 0x168   :  { %v1131_v20 = vpop.f32.mrf.mxu0  ;;  %v1172_v0 = vpop.f32.mrf.mxu1  ;;  %v15257_v14 = vmov 1966171168  }
 0x169   :  { %14682 = vpow2.f32 %v12962_v8  ;;  %v1205_v20 = vunpack.c.l.s4 %v15257_v14 }
 0x16a   :  { %14684 = vtanh.f32 %v1176_v1 }
 0x16b   :  { %14686 = vpow2.f32 %v12963_v4  ;;  %v1206_v22 = vunpack.c.0.s8 %v1205_v20 }
 0x16d   :  { %v16003_v2 = vsub.s32 %v1206_v22, %v15947_v19  ;;  %v16016_v22 = vld [vmem:[%s18879_s4 + $0xe4] ss:$16 sps:$4 sm:$0xff]  }
 0x16e   :  { %1838 = vmatprep.subr.bf16.mxu0 %v16016_v22 }
 0x174   :  { %v14681_v11 = vpop.eup %14680 }
 0x175   :  { %v1181_v17 = vadd.f32 1.0, %v14681_v11 }
 0x176   :  { %v14683_v12 = vpop.eup %14682 }
 0x177   :  { %14688 = vrcp.f32 %v1181_v17  ;;  %v1187_v18 = vadd.f32 1.0, %v14683_v12  ;;  %v14685_v0 = vpop.eup %14684 }
 0x178   :  { %v14687_v6 = vpop.eup %14686 }
 0x179   :  { %14690 = vrcp.f32 %v1187_v18  ;;  %v1194_v21 = vadd.f32 1.0, %v14687_v6 }
 0x17b   :  { %14692 = vrcp.f32 %v1194_v21 }
 0x184   :  { %v14689_v8 = vpop.eup %14688 }
 0x185   :  { %v1198_v5 = vmul.f32 %v14689_v8, %v14685_v0  ;;  %v19002_v8 = vmov 0  }
 0x186   :  { %v14691_v16 = vpop.eup %14690 }
 0x187   :  { %v1197_v7 = vmul.f32 %v14691_v16, %v35_v23 }
 0x188   :  { %v14693_v15 = vpop.eup %14692 }
 0x189   :  { %v15999_v13 = vadd.f32 %v1198_v5, %v1197_v7 }
 0x18b   :  { %14694 = vtanh.f32 %v15999_v13 }
 0x198   :  { %v14695_v1 = vpop.eup %14694 }
 0x199   :  { %v1201_v4 = vmul.f32 %v14695_v1, %v14693_v15  ;;  %v16021_v15 = vld [vmem:[%s18879_s4 + $0xec] ss:$16 sps:$4 sm:$0xff]   ;;  %v16026_v1 = vld [vmem:[%s18879_s4 + $0xe0] ss:$16 sps:$4 sm:$0xff]  }
 0x19a   :  { %1879 = vmatprep.subr.bf16.mxu1 %v16021_v15 }
 0x19b   :  { %v1203_v11 = vcombine.high %v1201_v4, %v1201_v4  ;;  %v1210_v17 = vrot.slane %v1201_v4, %v16003_v2  ;;  %v1272_v12 = vpack.c.bf16 %v1201_v4, %v1201_v4  ;;  %v16031_v4 = vld [vmem:[%s18879_s4 + $0xe8] ss:$16 sps:$4 sm:$0xff]  }
 0x19d   :  { %v1217_v18 = vrot.slane %v1203_v11, %v16003_v2  ;;  %v1218_v0 = vcombine.high %v1210_v17, %v1210_v17  ;;  %v1226_v6 = vrot.slane %v1210_v17, %v16003_v2  ;;  %12964 = vst.sshfl [vmem:[#allocation5] sm:$0x1 pattern:$0x73625140] %v1210_v17  ;;  %1498 = vmatmul.mubr.bf16.vlgmr.msra.gmra.mxu0 %v1272_v12  ;;  %v16040_v11 = vld [vmem:[%s18879_s4 + $0xc4] ss:$16 sps:$4 sm:$0xff]  }
 0x19e   :  { %1539 = vmatmul.mubr.bf16.vlgmr.msra.gmra.mxu1 %v1272_v12  ;;  %1870 = vmatprep.mubr.bf16.mxu0 %v19002_v8  ;;  %v16045_v17 = vld [vmem:[%s18879_s4 + $0xcc] ss:$16 sps:$4 sm:$0xff]   ;;  %v16050_v12 = vld [vmem:[%s18879_s4 + $0xc0] ss:$16 sps:$4 sm:$0xff]  }
 0x19f   :  { %1911 = vmatprep.mubr.bf16.mxu1 %v19002_v8  ;;  %v1219_v19 = vcombine.high %v1217_v18, %v1217_v18  ;;  %v1233_v23 = vrot.slane %v1217_v18, %v16003_v2  ;;  %v1240_v5 = vrot.slane %v1218_v0, %v16003_v2  ;;  %v1248_v16 = vcombine.high %v1226_v6, %v1226_v6  ;;  %v16069_v6 = vld [vmem:[%s18879_s4 + $0xac] ss:$16 sps:$4 sm:$0xff]  }
 0x1a0   :  { %12965 = vst.sshfl [vmem:[#allocation5 + $0x20] sm:$0x1 pattern:$0x73625140] %v1218_v0  ;;  %1839 = vmatpush1.bf16.msra.mxu0 %v16026_v1  ;;  %1880 = vmatpush1.bf16.msra.mxu1 %v16031_v4  ;;  %v16064_v0 = vld [vmem:[%s18879_s4 + $0xa4] ss:$16 sps:$4 sm:$0xff]  }
 0x1a1   :  { %12966 = vst.sshfl [vmem:[#allocation5 + $0x80] sm:$0x1 pattern:$0x73625140] %v1217_v18  ;;  %v1247_v21 = vrot.slane %v1219_v19, %v16003_v2  ;;  %v1249_v7 = vcombine.high %v1233_v23, %v1233_v23  ;;  %v1250_v14 = vcombine.high %v1240_v5, %v1240_v5  ;;  %1262 = vst [vmem:[#allocation5 + $0x40] sm:$0x1] %v1248_v16  ;;  %1840 = vmatprep.subr.bf16.mxu0 %v16040_v11 }
 0x1a2   :  { %12967 = vst.sshfl [vmem:[#allocation5 + $0xa0] sm:$0x1 pattern:$0x73625140] %v1219_v19  ;;  %v16055_v18 = vld [vmem:[%s18879_s4 + $0xc8] ss:$16 sps:$4 sm:$0xff]   ;;  %1881 = vmatprep.subr.bf16.mxu1 %v16045_v17 }
 0x1a3   :  { %v1251_v20 = vcombine.high %v1247_v21, %v1247_v21  ;;  %1263 = vst [vmem:[#allocation5 + $0x60] sm:$0x1] %v1250_v14  ;;  %1266 = vst [vmem:[#allocation5 + $0xc0] sm:$0x1] %v1249_v7  ;;  %v16074_v19 = vld [vmem:[%s18879_s4 + $0xa0] ss:$16 sps:$4 sm:$0xff]  }
 0x1a4   :  { %1841 = vmatpush1.bf16.msra.mxu0 %v16050_v12  ;;  %1882 = vmatpush1.bf16.msra.mxu1 %v16055_v18  ;;  %v16079_v23 = vld [vmem:[%s18879_s4 + $0xa8] ss:$16 sps:$4 sm:$0xff]   ;;  %v16088_v5 = vld [vmem:[%s18879_s4 + $0x84] ss:$16 sps:$4 sm:$0xff]   ;;  %v16093_v16 = vld [vmem:[%s18879_s4 + $0x8c] ss:$16 sps:$4 sm:$0xff]  }
 0x1a5   :  { %1267 = vst [vmem:[#allocation5 + $0xe0] sm:$0x1] %v1251_v20  ;;  %1842 = vmatprep.subr.bf16.mxu0 %v16064_v0  ;;  %1883 = vmatprep.subr.bf16.mxu1 %v16069_v6  ;;  %v16098_v21 = vld [vmem:[%s18879_s4 + $0x80] ss:$16 sps:$4 sm:$0xff]   ;;  %v16103_v7 = vld [vmem:[%s18879_s4 + $0x88] ss:$16 sps:$4 sm:$0xff]  }
 0x1a6   :  { %v16112_v14 = vld [vmem:[%s18879_s4 + $0x60] ss:$16 sps:$4 sm:$0xff]   ;;  %v16117_v20 = vld [vmem:[%s18879_s4 + $0x64] ss:$16 sps:$4 sm:$0xff]  }
 0x1a8   :  { %1843 = vmatpush1.bf16.msra.mxu0 %v16074_v19  ;;  %1884 = vmatpush1.bf16.msra.mxu1 %v16079_v23 }
 0x1a9   :  { %1844 = vmatprep.subr.bf16.mxu0 %v16088_v5  ;;  %1885 = vmatprep.subr.bf16.mxu1 %v16093_v16 }
 0x1ac   :  { %1845 = vmatpush1.bf16.msra.mxu0 %v16098_v21  ;;  %1886 = vmatpush1.bf16.msra.mxu1 %v16103_v7 }
 0x1ad   :  { %1846 = vmatprep.subr.bf16.mxu0 %v16117_v20  ;;  %1887 = vmatprep.subr.bf16.mxu1 %v16127_v62 }
 0x1b0   :  { %1847 = vmatpush1.bf16.msra.mxu0 %v16112_v14  ;;  %1888 = vmatpush1.bf16.msra.mxu1 %v16122_v63 }
 0x1b1   :  { %1848 = vmatprep.subr.bf16.mxu0 %v16132_v60  ;;  %1889 = vmatprep.subr.bf16.mxu1 %v16138_v57 }
 0x1b4   :  { %1849 = vmatpush1.bf16.msra.mxu0 %v16146_v59  ;;  %1890 = vmatpush1.bf16.msra.mxu1 %v16151_v58 }
 0x1b5   :  { %1850 = vmatprep.subr.bf16.mxu0 %v16158_v56  ;;  %1891 = vmatprep.subr.bf16.mxu1 %v16163_v53 }
 0x1b8   :  { %1851 = vmatpush1.bf16.msra.mxu0 %v16170_v55  ;;  %1892 = vmatpush1.bf16.msra.mxu1 %v16175_v54 }
 0x1b9   :  { %1852 = vmatprep.subr.bf16.mxu0 %v16182_v52  ;;  %1893 = vmatprep.subr.bf16.mxu1 %v16187_v49 }
 0x1bc   :  { %1853 = vmatpush1.bf16.msra.mxu0 %v16194_v51  ;;  %1894 = vmatpush1.bf16.msra.mxu1 %v16199_v50 }
 0x1bd   :  { %2211 = vmatprep.subr.bf16.mxu0 %v16016_v22  ;;  %2252 = vmatprep.subr.bf16.mxu1 %v16021_v15 }
 0x25d   :  { %v1499_v45 = vpop.f32.mrf.mxu0 }
 0x25e   :  { %v1540_v47 = vpop.f32.mrf.mxu1  ;;  %v1547_v44 = vadd.f32 %v1499_v45, %v418_v48 }
 0x25f   :  { %v1501_v41 = vpop.f32.mrf.mxu0  ;;  %v1549_v26 = vadd.f32 %v1540_v47, %v611_v34 }
 0x260   :  { %v1542_v43 = vpop.f32.mrf.mxu1  ;;  %v13000_v42 = vmul.f32 -1.442695, %v1547_v44  ;;  %v1548_v40 = vadd.f32 %v1501_v41, %v420_v46 }
 0x261   :  { %v1503_v37 = vpop.f32.mrf.mxu0  ;;  %v1550_v35 = vadd.f32 %v1542_v43, %v613_v24 }
 0x262   :  { %v1544_v39 = vpop.f32.mrf.mxu1  ;;  %14696 = vpow2.f32 %v13000_v42  ;;  %v13001_v38 = vmul.f32 -1.442695, %v1548_v40 }
 0x263   :  { %v1504_v36 = vpop.f32.mrf.mxu0  ;;  %v13002_v45 = vmul.f32 -1.442695, %v1550_v35 }
 0x264   :  { %v1545_v33 = vpop.f32.mrf.mxu1  ;;  %14698 = vpow2.f32 %v13001_v38 }
 0x265   :  { %14700 = vtanh.f32 %v1549_v26 }
 0x266   :  { %14702 = vpow2.f32 %v13002_v45 }
 0x26f   :  { %v14697_v48 = vpop.eup %14696 }
 0x270   :  { %v1554_v32 = vadd.f32 1.0, %v14697_v48 }
 0x271   :  { %v14699_v41 = vpop.eup %14698 }
 0x272   :  { %14704 = vrcp.f32 %v1554_v32  ;;  %v1560_v37 = vadd.f32 1.0, %v14699_v41  ;;  %v14701_v36 = vpop.eup %14700 }
 0x273   :  { %v14703_v33 = vpop.eup %14702 }
 0x274   :  { %14706 = vrcp.f32 %v1560_v37  ;;  %v1567_v27 = vadd.f32 1.0, %v14703_v33 }
 0x276   :  { %14708 = vrcp.f32 %v1567_v27 }
 0x27f   :  { %v14705_v38 = vpop.eup %14704 }
 0x280   :  { %v1571_v39 = vmul.f32 %v14705_v38, %v14701_v36 }
 0x281   :  { %v14707_v40 = vpop.eup %14706 }
 0x282   :  { %v1570_v42 = vmul.f32 %v14707_v40, %v15999_v13 }
 0x283   :  { %v14709_v25 = vpop.eup %14708 }
 0x284   :  { %v16216_v43 = vadd.f32 %v1571_v39, %v1570_v42  ;;  %v424_v39 = vadd.f32 %v15731_v28, %v15970_v10  ;;  %v426_v42 = vadd.f32 %v15735_v30, %v15976_v9  ;;  %v619_v28 = vadd.f32 %v15737_v31, %v15988_v3 }
 0x286   :  { %14710 = vtanh.f32 %v16216_v43 }
 0x293   :  { %v14711_v34 = vpop.eup %14710 }
 0x294   :  { %v1574_v35 = vmul.f32 %v14711_v34, %v14709_v25 }
 0x296   :  { %v1576_v44 = vcombine.high %v1574_v35, %v1574_v35  ;;  %v1583_v32 = vrot.slane %v1574_v35, %v16003_v2  ;;  %v1645_v46 = vpack.c.bf16 %v1574_v35, %v1574_v35 }
 0x298   :  { %v1590_v47 = vrot.slane %v1576_v44, %v16003_v2  ;;  %v1591_v24 = vcombine.high %v1583_v32, %v1583_v32  ;;  %v1599_v26 = vrot.slane %v1583_v32, %v16003_v2  ;;  %13003 = vst.sshfl [vmem:[#allocation5 + $0x1] sm:$0x1 pattern:$0x73625140] %v1583_v32  ;;  %1871 = vmatmul.mubr.bf16.vlgmr.msra.gmra.mxu0 %v1645_v46 }
 0x299   :  { %1912 = vmatmul.mubr.bf16.vlgmr.msra.gmra.mxu1 %v1645_v46  ;;  %2212 = vmatpush1.bf16.msra.mxu0 %v16026_v1 }
 0x29a   :  { %2253 = vmatpush1.bf16.msra.mxu1 %v16031_v4  ;;  %v1592_v13 = vcombine.high %v1590_v47, %v1590_v47  ;;  %v1606_v45 = vrot.slane %v1590_v47, %v16003_v2  ;;  %v1613_v48 = vrot.slane %v1591_v24, %v16003_v2  ;;  %v1621_v41 = vcombine.high %v1599_v26, %v1599_v26 }
 0x29b   :  { %13004 = vst.sshfl [vmem:[#allocation5 + $0x21] sm:$0x1 pattern:$0x73625140] %v1591_v24  ;;  %2213 = vmatprep.subr.bf16.mxu0 %v16040_v11  ;;  %2254 = vmatprep.subr.bf16.mxu1 %v16045_v17 }
 0x29c   :  { %13005 = vst.sshfl [vmem:[#allocation5 + $0x81] sm:$0x1 pattern:$0x73625140] %v1590_v47  ;;  %2243 = vmatprep.mubr.bf16.mxu0 %v19002_v8  ;;  %v1620_v37 = vrot.slane %v1592_v13, %v16003_v2  ;;  %v1622_v36 = vcombine.high %v1606_v45, %v1606_v45  ;;  %v1623_v33 = vcombine.high %v1613_v48, %v1613_v48  ;;  %1635 = vst [vmem:[#allocation5 + $0x41] sm:$0x1] %v1621_v41 }
 0x29d   :  { %13006 = vst.sshfl [vmem:[#allocation5 + $0xa1] sm:$0x1 pattern:$0x73625140] %v1592_v13  ;;  %2284 = vmatprep.mubr.bf16.mxu1 %v19002_v8  ;;  %2214 = vmatpush1.bf16.msra.mxu0 %v16050_v12  ;;  %v617_v48 = vadd.f32 %v15733_v29, %v15990_v61 }
 0x29e   :  { %2255 = vmatpush1.bf16.msra.mxu1 %v16055_v18  ;;  %v1624_v38 = vcombine.high %v1620_v37, %v1620_v37  ;;  %1636 = vst [vmem:[#allocation5 + $0x61] sm:$0x1] %v1623_v33  ;;  %1639 = vst [vmem:[#allocation5 + $0xc1] sm:$0x1] %v1622_v36  ;;  %2215 = vmatprep.subr.bf16.mxu0 %v16064_v0 }
 0x29f   :  { %2256 = vmatprep.subr.bf16.mxu1 %v16069_v6 }
 0x2a0   :  { %1640 = vst [vmem:[#allocation5 + $0xe1] sm:$0x1] %v1624_v38 }
 0x2a1   :  { %2216 = vmatpush1.bf16.msra.mxu0 %v16074_v19 }
 0x2a2   :  { %2257 = vmatpush1.bf16.msra.mxu1 %v16079_v23  ;;  %2217 = vmatprep.subr.bf16.mxu0 %v16088_v5 }
 0x2a3   :  { %2258 = vmatprep.subr.bf16.mxu1 %v16093_v16 }
 0x2a5   :  { %2218 = vmatpush1.bf16.msra.mxu0 %v16098_v21 }
 0x2a6   :  { %2259 = vmatpush1.bf16.msra.mxu1 %v16103_v7  ;;  %2219 = vmatprep.subr.bf16.mxu0 %v16117_v20 }
 0x2a7   :  { %2260 = vmatprep.subr.bf16.mxu1 %v16127_v62 }
 0x2a9   :  { %2220 = vmatpush1.bf16.msra.mxu0 %v16112_v14 }
 0x2aa   :  { %2261 = vmatpush1.bf16.msra.mxu1 %v16122_v63  ;;  %2221 = vmatprep.subr.bf16.mxu0 %v16132_v60 }
 0x2ab   :  { %2262 = vmatprep.subr.bf16.mxu1 %v16138_v57 }
 0x2ad   :  { %2222 = vmatpush1.bf16.msra.mxu0 %v16146_v59 }
 0x2ae   :  { %2263 = vmatpush1.bf16.msra.mxu1 %v16151_v58  ;;  %2223 = vmatprep.subr.bf16.mxu0 %v16158_v56 }
 0x2af   :  { %2264 = vmatprep.subr.bf16.mxu1 %v16163_v53 }
 0x2b1   :  { %2224 = vmatpush1.bf16.msra.mxu0 %v16170_v55 }
 0x2b2   :  { %2265 = vmatpush1.bf16.msra.mxu1 %v16175_v54  ;;  %2225 = vmatprep.subr.bf16.mxu0 %v16182_v52 }
 0x2b3   :  { %2266 = vmatprep.subr.bf16.mxu1 %v16187_v49 }
 0x2b5   :  { %2226 = vmatpush1.bf16.msra.mxu0 %v16194_v51 }
 0x2b6   :  { %2267 = vmatpush1.bf16.msra.mxu1 %v16199_v50  ;;  %2584 = vmatprep.subr.bf16.mxu0 %v16016_v22 }
 0x2b7   :  { %2625 = vmatprep.subr.bf16.mxu1 %v16021_v15 }
 0x358   :  { %v1872_v40 = vpop.f32.mrf.mxu0 }
 0x359   :  { %v1913_v27 = vpop.f32.mrf.mxu1  ;;  %v1920_v25 = vadd.f32 %v1872_v40, %v424_v39 }
 0x35a   :  { %v1874_v34 = vpop.f32.mrf.mxu0  ;;  %v1922_v30 = vadd.f32 %v1913_v27, %v617_v48 }
 0x35b   :  { %v1915_v35 = vpop.f32.mrf.mxu1  ;;  %v13039_v44 = vmul.f32 -1.442695, %v1920_v25  ;;  %v1921_v32 = vadd.f32 %v1874_v34, %v426_v42 }
 0x35c   :  { %v1876_v46 = vpop.f32.mrf.mxu0  ;;  %v1923_v45 = vadd.f32 %v1915_v35, %v619_v28 }
 0x35d   :  { %v1917_v47 = vpop.f32.mrf.mxu1  ;;  %14712 = vpow2.f32 %v13039_v44  ;;  %v13040_v24 = vmul.f32 -1.442695, %v1921_v32 }
 0x35e   :  { %v1877_v26 = vpop.f32.mrf.mxu0  ;;  %v13041_v41 = vmul.f32 -1.442695, %v1923_v45 }
 0x35f   :  { %v1918_v13 = vpop.f32.mrf.mxu1  ;;  %14714 = vpow2.f32 %v13040_v24 }
 0x360   :  { %14716 = vtanh.f32 %v1922_v30 }
 0x361   :  { %14718 = vpow2.f32 %v13041_v41 }
 0x36a   :  { %v14713_v37 = vpop.eup %14712 }
 0x36b   :  { %v1927_v36 = vadd.f32 1.0, %v14713_v37 }
 0x36c   :  { %v14715_v33 = vpop.eup %14714 }
 0x36d   :  { %14720 = vrcp.f32 %v1927_v36  ;;  %v1933_v38 = vadd.f32 1.0, %v14715_v33  ;;  %v14717_v39 = vpop.eup %14716 }
 0x36e   :  { %v14719_v40 = vpop.eup %14718 }
 0x36f   :  { %14722 = vrcp.f32 %v1933_v38  ;;  %v1940_v31 = vadd.f32 1.0, %v14719_v40  ;;  %v19003_v38 = vld [vmem:[#allocation12_spill] sm:$0xff] }
 0x371   :  { %14724 = vrcp.f32 %v1940_v31 }
 0x37a   :  { %v14721_v42 = vpop.eup %14720 }
 0x37b   :  { %v1944_v25 = vmul.f32 %v14721_v42, %v14717_v39  ;;  %v428_v39 = vadd.f32 %v19003_v38, %v15970_v10 }
 0x37c   :  { %v14723_v34 = vpop.eup %14722 }
 0x37d   :  { %v1943_v35 = vmul.f32 %v14723_v34, %v16216_v43 }
 0x37e   :  { %v14725_v29 = vpop.eup %14724 }
 0x37f   :  { %v16268_v44 = vadd.f32 %v1944_v25, %v1943_v35  ;;  %v19004_v25 = vld [vmem:[#allocation14_spill] sm:$0xff] }
 0x380   :  { %v430_v34 = vadd.f32 %v19004_v25, %v15976_v9 }
 0x381   :  { %14726 = vtanh.f32 %v16268_v44 }
 0x38e   :  { %v14727_v27 = vpop.eup %14726 }
 0x38f   :  { %v1947_v32 = vmul.f32 %v14727_v27, %v14725_v29 }
 0x391   :  { %v1949_v46 = vcombine.high %v1947_v32, %v1947_v32  ;;  %v1956_v47 = vrot.slane %v1947_v32, %v16003_v2  ;;  %v2018_v24 = vpack.c.bf16 %v1947_v32, %v1947_v32 }
 0x393   :  { %v1963_v26 = vrot.slane %v1949_v46, %v16003_v2  ;;  %v1964_v13 = vcombine.high %v1956_v47, %v1956_v47  ;;  %v1972_v28 = vrot.slane %v1956_v47, %v16003_v2  ;;  %13042 = vst.sshfl [vmem:[#allocation5 + $0x2] sm:$0x1 pattern:$0x73625140] %v1956_v47  ;;  %2244 = vmatmul.mubr.bf16.vlgmr.msra.gmra.mxu0 %v2018_v24 }
 0x394   :  { %2285 = vmatmul.mubr.bf16.vlgmr.msra.gmra.mxu1 %v2018_v24  ;;  %2585 = vmatpush1.bf16.msra.mxu0 %v16026_v1 }
 0x395   :  { %2626 = vmatpush1.bf16.msra.mxu1 %v16031_v4  ;;  %v1965_v43 = vcombine.high %v1963_v26, %v1963_v26  ;;  %v1979_v45 = vrot.slane %v1963_v26, %v16003_v2  ;;  %v1986_v48 = vrot.slane %v1964_v13, %v16003_v2  ;;  %v1994_v30 = vcombine.high %v1972_v28, %v1972_v28 }
 0x396   :  { %13043 = vst.sshfl [vmem:[#allocation5 + $0x22] sm:$0x1 pattern:$0x73625140] %v1964_v13  ;;  %2586 = vmatprep.subr.bf16.mxu0 %v16040_v11  ;;  %2627 = vmatprep.subr.bf16.mxu1 %v16045_v17 }
 0x397   :  { %13044 = vst.sshfl [vmem:[#allocation5 + $0x82] sm:$0x1 pattern:$0x73625140] %v1963_v26  ;;  %2616 = vmatprep.mubr.bf16.mxu0 %v19002_v8  ;;  %v1993_v41 = vrot.slane %v1965_v43, %v16003_v2  ;;  %v1995_v37 = vcombine.high %v1979_v45, %v1979_v45  ;;  %v1996_v36 = vcombine.high %v1986_v48, %v1986_v48  ;;  %2008 = vst [vmem:[#allocation5 + $0x42] sm:$0x1] %v1994_v30 }
 0x398   :  { %13045 = vst.sshfl [vmem:[#allocation5 + $0xa2] sm:$0x1 pattern:$0x73625140] %v1965_v43  ;;  %2657 = vmatprep.mubr.bf16.mxu1 %v19002_v8  ;;  %2587 = vmatpush1.bf16.msra.mxu0 %v16050_v12  ;;  %v19006_v43 = vld [vmem:[#allocation13_spill] sm:$0xff] }
 0x399   :  { %2628 = vmatpush1.bf16.msra.mxu1 %v16055_v18  ;;  %v1997_v33 = vcombine.high %v1993_v41, %v1993_v41  ;;  %2009 = vst [vmem:[#allocation5 + $0x62] sm:$0x1] %v1996_v36  ;;  %2012 = vst [vmem:[#allocation5 + $0xc2] sm:$0x1] %v1995_v37  ;;  %2588 = vmatprep.subr.bf16.mxu0 %v16064_v0  ;;  %v621_v45 = vadd.f32 %v19006_v43, %v15990_v61 }
 0x39a   :  { %2629 = vmatprep.subr.bf16.mxu1 %v16069_v6 }
 0x39b   :  { %2013 = vst [vmem:[#allocation5 + $0xe2] sm:$0x1] %v1997_v33 }
 0x39c   :  { %2589 = vmatpush1.bf16.msra.mxu0 %v16074_v19 }
 0x39d   :  { %2630 = vmatpush1.bf16.msra.mxu1 %v16079_v23  ;;  %2590 = vmatprep.subr.bf16.mxu0 %v16088_v5 }
 0x39e   :  { %2631 = vmatprep.subr.bf16.mxu1 %v16093_v16 }
 0x3a0   :  { %2591 = vmatpush1.bf16.msra.mxu0 %v16098_v21 }
 0x3a1   :  { %2632 = vmatpush1.bf16.msra.mxu1 %v16103_v7  ;;  %2592 = vmatprep.subr.bf16.mxu0 %v16117_v20 }
 0x3a2   :  { %2633 = vmatprep.subr.bf16.mxu1 %v16127_v62 }
 0x3a4   :  { %2593 = vmatpush1.bf16.msra.mxu0 %v16112_v14 }
 0x3a5   :  { %2634 = vmatpush1.bf16.msra.mxu1 %v16122_v63  ;;  %2594 = vmatprep.subr.bf16.mxu0 %v16132_v60 }
 0x3a6   :  { %2635 = vmatprep.subr.bf16.mxu1 %v16138_v57 }
 0x3a8   :  { %2595 = vmatpush1.bf16.msra.mxu0 %v16146_v59 }
 0x3a9   :  { %2636 = vmatpush1.bf16.msra.mxu1 %v16151_v58  ;;  %2596 = vmatprep.subr.bf16.mxu0 %v16158_v56 }
 0x3aa   :  { %2637 = vmatprep.subr.bf16.mxu1 %v16163_v53 }
 0x3ac   :  { %2597 = vmatpush1.bf16.msra.mxu0 %v16170_v55 }
 0x3ad   :  { %2638 = vmatpush1.bf16.msra.mxu1 %v16175_v54  ;;  %2598 = vmatprep.subr.bf16.mxu0 %v16182_v52 }
 0x3ae   :  { %2639 = vmatprep.subr.bf16.mxu1 %v16187_v49 }
 0x3b0   :  { %2599 = vmatpush1.bf16.msra.mxu0 %v16194_v51 }
 0x3b1   :  { %2640 = vmatpush1.bf16.msra.mxu1 %v16199_v50  ;;  %2957 = vmatprep.subr.bf16.mxu0 %v16016_v22 }
 0x3b2   :  { %2998 = vmatprep.subr.bf16.mxu1 %v16021_v15  ;;  %v19005_v15 = vld [vmem:[#allocation15_spill] sm:$0xff] }
 0x3b3   :  { %v623_v13 = vadd.f32 %v19005_v15, %v15988_v3 }
 0x453   :  { %v2245_v40 = vpop.f32.mrf.mxu0 }
 0x454   :  { %v2286_v42 = vpop.f32.mrf.mxu1  ;;  %v2293_v31 = vadd.f32 %v2245_v40, %v428_v39 }
 0x455   :  { %v2247_v35 = vpop.f32.mrf.mxu0  ;;  %v2295_v48 = vadd.f32 %v2286_v42, %v621_v45 }
 0x456   :  { %v2288_v29 = vpop.f32.mrf.mxu1  ;;  %v13078_v27 = vmul.f32 -1.442695, %v2293_v31  ;;  %v2294_v32 = vadd.f32 %v2247_v35, %v430_v34 }
 0x457   :  { %v2249_v46 = vpop.f32.mrf.mxu0  ;;  %v2296_v28 = vadd.f32 %v2288_v29, %v623_v13 }
 0x458   :  { %v2290_v47 = vpop.f32.mrf.mxu1  ;;  %14728 = vpow2.f32 %v13078_v27  ;;  %v13079_v24 = vmul.f32 -1.442695, %v2294_v32 }
 0x459   :  { %v2250_v22 = vpop.f32.mrf.mxu0  ;;  %v13080_v30 = vmul.f32 -1.442695, %v2296_v28 }
 0x45a   :  { %v2291_v26 = vpop.f32.mrf.mxu1  ;;  %14730 = vpow2.f32 %v13079_v24 }
 0x45b   :  { %14732 = vtanh.f32 %v2295_v48 }
 0x45c   :  { %14734 = vpow2.f32 %v13080_v30 }
 0x465   :  { %v14729_v41 = vpop.eup %14728 }
 0x466   :  { %v2300_v37 = vadd.f32 1.0, %v14729_v41 }
 0x467   :  { %v14731_v36 = vpop.eup %14730 }
 0x468   :  { %14736 = vrcp.f32 %v2300_v37  ;;  %v2306_v33 = vadd.f32 1.0, %v14731_v36  ;;  %v14733_v38 = vpop.eup %14732 }
 0x469   :  { %v14735_v39 = vpop.eup %14734 }
 0x46a   :  { %14738 = vrcp.f32 %v2306_v33  ;;  %v2313_v31 = vadd.f32 1.0, %v14735_v39 }
 0x46c   :  { %14740 = vrcp.f32 %v2313_v31 }
 0x475   :  { %v14737_v40 = vpop.eup %14736 }
 0x476   :  { %v2317_v25 = vmul.f32 %v14737_v40, %v14733_v38 }
 0x477   :  { %v14739_v34 = vpop.eup %14738 }
 0x478   :  { %v2316_v35 = vmul.f32 %v14739_v34, %v16268_v44 }
 0x479   :  { %v14741_v42 = vpop.eup %14740 }
 0x47a   :  { %v16320_v29 = vadd.f32 %v2317_v25, %v2316_v35 }
 0x47c   :  { %14742 = vtanh.f32 %v16320_v29 }
 0x489   :  { %v14743_v27 = vpop.eup %14742 }
 0x48a   :  { %v2320_v32 = vmul.f32 %v14743_v27, %v14741_v42 }
 0x48c   :  { %v2322_v46 = vcombine.high %v2320_v32, %v2320_v32  ;;  %v2329_v47 = vrot.slane %v2320_v32, %v16003_v2  ;;  %v2391_v24 = vpack.c.bf16 %v2320_v32, %v2320_v32 }
 0x48e   :  { %v2336_v22 = vrot.slane %v2322_v46, %v16003_v2  ;;  %v2337_v26 = vcombine.high %v2329_v47, %v2329_v47  ;;  %v2345_v15 = vrot.slane %v2329_v47, %v16003_v2  ;;  %13081 = vst.sshfl [vmem:[#allocation5 + $0x3] sm:$0x1 pattern:$0x73625140] %v2329_v47  ;;  %2617 = vmatmul.mubr.bf16.vlgmr.msra.gmra.mxu0 %v2391_v24 }
 0x48f   :  { %2658 = vmatmul.mubr.bf16.vlgmr.msra.gmra.mxu1 %v2391_v24  ;;  %2958 = vmatpush1.bf16.msra.mxu0 %v16026_v1 }
 0x490   :  { %2999 = vmatpush1.bf16.msra.mxu1 %v16031_v4  ;;  %v2338_v44 = vcombine.high %v2336_v22, %v2336_v22  ;;  %v2352_v13 = vrot.slane %v2336_v22, %v16003_v2  ;;  %v2359_v28 = vrot.slane %v2337_v26, %v16003_v2  ;;  %v2367_v43 = vcombine.high %v2345_v15, %v2345_v15 }
 0x491   :  { %13082 = vst.sshfl [vmem:[#allocation5 + $0x23] sm:$0x1 pattern:$0x73625140] %v2337_v26  ;;  %2959 = vmatprep.subr.bf16.mxu0 %v16040_v11  ;;  %3000 = vmatprep.subr.bf16.mxu1 %v16045_v17 }
 0x492   :  { %13083 = vst.sshfl [vmem:[#allocation5 + $0x83] sm:$0x1 pattern:$0x73625140] %v2336_v22  ;;  %2989 = vmatprep.mubr.bf16.mxu0 %v19002_v8  ;;  %v2366_v45 = vrot.slane %v2338_v44, %v16003_v2  ;;  %v2368_v48 = vcombine.high %v2352_v13, %v2352_v13  ;;  %v2369_v1 = vcombine.high %v2359_v28, %v2359_v28  ;;  %2381 = vst [vmem:[#allocation5 + $0x43] sm:$0x1] %v2367_v43 }
 0x493   :  { %13084 = vst.sshfl [vmem:[#allocation5 + $0xa3] sm:$0x1 pattern:$0x73625140] %v2338_v44  ;;  %3030 = vmatprep.mubr.bf16.mxu1 %v19002_v8  ;;  %2960 = vmatpush1.bf16.msra.mxu0 %v16050_v12  ;;  %v16384_v28 = vld [vmem:[%s18879_s4 + $0xe4] ss:$16 sps:$4 sm:$0xff]  }
 0x494   :  { %3001 = vmatpush1.bf16.msra.mxu1 %v16055_v18  ;;  %v2370_v4 = vcombine.high %v2366_v45, %v2366_v45  ;;  %2382 = vst [vmem:[#allocation5 + $0x63] sm:$0x1] %v2369_v1  ;;  %2385 = vst [vmem:[#allocation5 + $0xc3] sm:$0x1] %v2368_v48  ;;  %2961 = vmatprep.subr.bf16.mxu0 %v16064_v0  ;;  %v16389_v43 = vld [vmem:[%s18879_s4 + $0xec] ss:$16 sps:$4 sm:$0xff]  }
 0x495   :  { %3002 = vmatprep.subr.bf16.mxu1 %v16069_v6  ;;  %v19010_v6 = vld [vmem:[#allocation17_spill] sm:$0xff]  ;;  %v16394_v45 = vld [vmem:[%s18879_s4 + $0xe0] ss:$16 sps:$4 sm:$0xff]   ;;  %v16408_v1 = vld [vmem:[%s18879_s4 + $0xc4] ss:$16 sps:$4 sm:$0xff]  }
 0x496   :  { %2386 = vst [vmem:[#allocation5 + $0xe3] sm:$0x1] %v2370_v4  ;;  %v16399_v48 = vld [vmem:[%s18879_s4 + $0xe8] ss:$16 sps:$4 sm:$0xff]   ;;  %v16413_v4 = vld [vmem:[%s18879_s4 + $0xcc] ss:$16 sps:$4 sm:$0xff]  }
 0x497   :  { %2962 = vmatpush1.bf16.msra.mxu0 %v16074_v19  ;;  %v627_v19 = vadd.f32 %v19010_v6, %v15990_v61  ;;  %v16531_v6 = vld [vmem:[%s18879_s4 + $0x2c] ss:$16 sps:$4 sm:$0xff]  }
 0x498   :  { %3003 = vmatpush1.bf16.msra.mxu1 %v16079_v23  ;;  %2963 = vmatprep.subr.bf16.mxu0 %v16088_v5 }
 0x499   :  { %3004 = vmatprep.subr.bf16.mxu1 %v16093_v16 }
 0x49b   :  { %2964 = vmatpush1.bf16.msra.mxu0 %v16098_v21 }
 0x49c   :  { %3005 = vmatpush1.bf16.msra.mxu1 %v16103_v7  ;;  %2965 = vmatprep.subr.bf16.mxu0 %v16117_v20 }
 0x49d   :  { %3006 = vmatprep.subr.bf16.mxu1 %v16127_v62 }
 0x49f   :  { %2966 = vmatpush1.bf16.msra.mxu0 %v16112_v14 }
 0x4a0   :  { %3007 = vmatpush1.bf16.msra.mxu1 %v16122_v63  ;;  %2967 = vmatprep.subr.bf16.mxu0 %v16132_v60 }
 0x4a1   :  { %3008 = vmatprep.subr.bf16.mxu1 %v16138_v57  ;;  %v19007_v57 = vld [vmem:[#allocation16_spill] sm:$0xff] }
 0x4a3   :  { %2968 = vmatpush1.bf16.msra.mxu0 %v16146_v59  ;;  %v434_v59 = vadd.f32 %v19007_v57, %v15970_v10  ;;  %v16418_v57 = vld [vmem:[%s18879_s4 + $0xc0] ss:$16 sps:$4 sm:$0xff]  }
 0x4a4   :  { %3009 = vmatpush1.bf16.msra.mxu1 %v16151_v58  ;;  %2969 = vmatprep.subr.bf16.mxu0 %v16158_v56  ;;  %v19008_v56 = vld [vmem:[#allocation18_spill] sm:$0xff] }
 0x4a5   :  { %3010 = vmatprep.subr.bf16.mxu1 %v16163_v53  ;;  %v436_v53 = vadd.f32 %v19008_v56, %v15976_v9  ;;  %v16442_v56 = vld [vmem:[%s18879_s4 + $0xa0] ss:$16 sps:$4 sm:$0xff]  }
 0x4a7   :  { %2970 = vmatpush1.bf16.msra.mxu0 %v16170_v55 }
 0x4a8   :  { %3011 = vmatpush1.bf16.msra.mxu1 %v16175_v54  ;;  %2971 = vmatprep.subr.bf16.mxu0 %v16182_v52 }
 0x4a9   :  { %3012 = vmatprep.subr.bf16.mxu1 %v16187_v49 }
 0x4ab   :  { %2972 = vmatpush1.bf16.msra.mxu0 %v16194_v51 }
 0x4ac   :  { %3013 = vmatpush1.bf16.msra.mxu1 %v16199_v50  ;;  %v19009_v50 = vld [vmem:[#allocation19_spill] sm:$0xff]  ;;  %3330 = vmatprep.subr.bf16.mxu0 %v16384_v28 }
 0x4ad   :  { %v629_v18 = vadd.f32 %v19009_v50, %v15988_v3  ;;  %3371 = vmatprep.subr.bf16.mxu1 %v16389_v43  ;;  %v16514_v50 = vld [vmem:[%s18879_s4 + $0x40] ss:$16 sps:$4 sm:$0xff]  }
 0x54e   :  { %v2618_v58 = vpop.f32.mrf.mxu0 }
 0x54f   :  { %v2659_v60 = vpop.f32.mrf.mxu1  ;;  %v2666_v62 = vadd.f32 %v2618_v58, %v434_v59  ;;  %v16423_v59 = vld [vmem:[%s18879_s4 + $0xc8] ss:$16 sps:$4 sm:$0xff]   ;;  %v16432_v58 = vld [vmem:[%s18879_s4 + $0xa4] ss:$16 sps:$4 sm:$0xff]  }
 0x550   :  { %v2620_v55 = vpop.f32.mrf.mxu0  ;;  %v2668_v23 = vadd.f32 %v2659_v60, %v627_v19  ;;  %v16437_v60 = vld [vmem:[%s18879_s4 + $0xac] ss:$16 sps:$4 sm:$0xff]   ;;  %v16538_v19 = vld [vmem:[%s18879_s4 + $0x20] ss:$16 sps:$4 sm:$0xff]  }
 0x551   :  { %v2661_v63 = vpop.f32.mrf.mxu1  ;;  %v13117_v54 = vmul.f32 -1.442695, %v2666_v62  ;;  %v2667_v11 = vadd.f32 %v2620_v55, %v436_v53  ;;  %v16447_v53 = vld [vmem:[%s18879_s4 + $0xa8] ss:$16 sps:$4 sm:$0xff]   ;;  %v16456_v62 = vld [vmem:[%s18879_s4 + $0x84] ss:$16 sps:$4 sm:$0xff]  }
 0x552   :  { %v2622_v52 = vpop.f32.mrf.mxu0  ;;  %v2669_v0 = vadd.f32 %v2661_v63, %v629_v18  ;;  %v16461_v55 = vld [vmem:[%s18879_s4 + $0x8c] ss:$16 sps:$4 sm:$0xff]   ;;  %v16466_v63 = vld [vmem:[%s18879_s4 + $0x80] ss:$16 sps:$4 sm:$0xff]   ;;  %v16519_v18 = vld [vmem:[%s18879_s4 + $0x48] ss:$16 sps:$4 sm:$0xff]  }
 0x553   :  { %v2663_v17 = vpop.f32.mrf.mxu1  ;;  %14744 = vpow2.f32 %v13117_v54  ;;  %v13118_v49 = vmul.f32 -1.442695, %v2667_v11  ;;  %v16471_v54 = vld [vmem:[%s18879_s4 + $0x88] ss:$16 sps:$4 sm:$0xff]   ;;  %v16480_v11 = vld [vmem:[%s18879_s4 + $0x60] ss:$16 sps:$4 sm:$0xff]  }
 0x554   :  { %v2623_v51 = vpop.f32.mrf.mxu0  ;;  %v13119_v5 = vmul.f32 -1.442695, %v2669_v0  ;;  %v16485_v52 = vld [vmem:[%s18879_s4 + $0x64] ss:$16 sps:$4 sm:$0xff]   ;;  %v16490_v17 = vld [vmem:[%s18879_s4 + $0x68] ss:$16 sps:$4 sm:$0xff]  }
 0x555   :  { %v2664_v12 = vpop.f32.mrf.mxu1  ;;  %14746 = vpow2.f32 %v13118_v49  ;;  %v16495_v49 = vld [vmem:[%s18879_s4 + $0x6c] ss:$16 sps:$4 sm:$0xff]   ;;  %v16500_v51 = vld [vmem:[%s18879_s4 + $0x44] ss:$16 sps:$4 sm:$0xff]  }
 0x556   :  { %14748 = vtanh.f32 %v2668_v23  ;;  %v16506_v12 = vld [vmem:[%s18879_s4 + $0x4c] ss:$16 sps:$4 sm:$0xff]   ;;  %v16526_v0 = vld [vmem:[%s18879_s4 + $0x24] ss:$16 sps:$4 sm:$0xff]   ;;  %v16543_v23 = vld [vmem:[%s18879_s4 + $0x28] ss:$16 sps:$4 sm:$0xff]  }
 0x557   :  { %14750 = vpow2.f32 %v13119_v5  ;;  %v16550_v5 = vld [vmem:[%s18879_s4 + $0x4] ss:$16 sps:$4 sm:$0xff]  }
 0x560   :  { %v14745_v16 = vpop.eup %14744 }
 0x561   :  { %v2673_v21 = vadd.f32 1.0, %v14745_v16  ;;  %v16555_v16 = vld [vmem:[%s18879_s4 + $0xc] ss:$16 sps:$4 sm:$0xff]  }
 0x562   :  { %v14747_v7 = vpop.eup %14746 }
 0x563   :  { %14752 = vrcp.f32 %v2673_v21  ;;  %v2679_v14 = vadd.f32 1.0, %v14747_v7  ;;  %v14749_v20 = vpop.eup %14748  ;;  %v16562_v21 = vld [vmem:[%s18879_s4] ss:$16 sps:$4 sm:$0xff]   ;;  %v16567_v7 = vld [vmem:[%s18879_s4 + $0x8] ss:$16 sps:$4 sm:$0xff]  }
 0x564   :  { %v14751_v30 = vpop.eup %14750 }
 0x565   :  { %14754 = vrcp.f32 %v2679_v14  ;;  %v2686_v33 = vadd.f32 1.0, %v14751_v30  ;;  %v19011_v14 = vld [vmem:[#allocation20_spill] sm:$0xff] }
 0x567   :  { %14756 = vrcp.f32 %v2686_v33 }
 0x570   :  { %v14753_v41 = vpop.eup %14752 }
 0x571   :  { %v2690_v37 = vmul.f32 %v14753_v41, %v14749_v20  ;;  %v438_v20 = vadd.f32 %v19011_v14, %v15970_v10 }
 0x572   :  { %v14755_v36 = vpop.eup %14754 }
 0x573   :  { %v2689_v38 = vmul.f32 %v14755_v36, %v16320_v29 }
 0x574   :  { %v14757_v40 = vpop.eup %14756 }
 0x575   :  { %v16370_v39 = vadd.f32 %v2690_v37, %v2689_v38  ;;  %v19012_v37 = vld [vmem:[#allocation22_spill] sm:$0xff] }
 0x576   :  { %v440_v36 = vadd.f32 %v19012_v37, %v15976_v9 }
 0x577   :  { %14758 = vtanh.f32 %v16370_v39 }
 0x584   :  { %v14759_v25 = vpop.eup %14758 }
 0x585   :  { %v2693_v34 = vmul.f32 %v14759_v25, %v14757_v40 }
 0x587   :  { %v2695_v31 = vcombine.high %v2693_v34, %v2693_v34  ;;  %v2702_v35 = vrot.slane %v2693_v34, %v16003_v2  ;;  %v2764_v42 = vpack.c.bf16 %v2693_v34, %v2693_v34 }
 0x589   :  { %v2709_v27 = vrot.slane %v2695_v31, %v16003_v2  ;;  %v2710_v32 = vcombine.high %v2702_v35, %v2702_v35  ;;  %v2718_v46 = vrot.slane %v2702_v35, %v16003_v2  ;;  %13120 = vst.sshfl [vmem:[#allocation5 + $0x4] sm:$0x1 pattern:$0x73625140] %v2702_v35  ;;  %2990 = vmatmul.mubr.bf16.vlgmr.msra.gmra.mxu0 %v2764_v42 }
 0x58a   :  { %3031 = vmatmul.mubr.bf16.vlgmr.msra.gmra.mxu1 %v2764_v42  ;;  %3362 = vmatprep.mubr.bf16.mxu0 %v19002_v8 }
 0x58b   :  { %3403 = vmatprep.mubr.bf16.mxu1 %v19002_v8  ;;  %v2711_v29 = vcombine.high %v2709_v27, %v2709_v27  ;;  %v2725_v47 = vrot.slane %v2709_v27, %v16003_v2  ;;  %v2732_v24 = vrot.slane %v2710_v32, %v16003_v2  ;;  %v2740_v22 = vcombine.high %v2718_v46, %v2718_v46  ;;  %v19013_v46 = vld [vmem:[#allocation23_spill] sm:$0xff] }
 0x58c   :  { %13121 = vst.sshfl [vmem:[#allocation5 + $0x24] sm:$0x1 pattern:$0x73625140] %v2710_v32  ;;  %3331 = vmatpush1.bf16.msra.mxu0 %v16394_v45  ;;  %3372 = vmatpush1.bf16.msra.mxu1 %v16399_v48 }
 0x58d   :  { %13122 = vst.sshfl [vmem:[#allocation5 + $0x84] sm:$0x1 pattern:$0x73625140] %v2709_v27  ;;  %v2739_v26 = vrot.slane %v2711_v29, %v16003_v2  ;;  %v2741_v15 = vcombine.high %v2725_v47, %v2725_v47  ;;  %v2742_v44 = vcombine.high %v2732_v24, %v2732_v24  ;;  %2754 = vst [vmem:[#allocation5 + $0x44] sm:$0x1] %v2740_v22  ;;  %3332 = vmatprep.subr.bf16.mxu0 %v16408_v1 }
 0x58e   :  { %13123 = vst.sshfl [vmem:[#allocation5 + $0xa4] sm:$0x1 pattern:$0x73625140] %v2711_v29  ;;  %3373 = vmatprep.subr.bf16.mxu1 %v16413_v4  ;;  %v633_v29 = vadd.f32 %v19013_v46, %v15988_v3  ;;  %v19014_v24 = vld [vmem:[#allocation21_spill] sm:$0xff] }
 0x58f   :  { %v2743_v13 = vcombine.high %v2739_v26, %v2739_v26  ;;  %2755 = vst [vmem:[#allocation5 + $0x64] sm:$0x1] %v2742_v44  ;;  %2758 = vst [vmem:[#allocation5 + $0xc4] sm:$0x1] %v2741_v15  ;;  %v631_v22 = vadd.f32 %v19014_v24, %v15990_v61 }
 0x590   :  { %3333 = vmatpush1.bf16.msra.mxu0 %v16418_v57  ;;  %3374 = vmatpush1.bf16.msra.mxu1 %v16423_v59 }
 0x591   :  { %2759 = vst [vmem:[#allocation5 + $0xe4] sm:$0x1] %v2743_v13  ;;  %3334 = vmatprep.subr.bf16.mxu0 %v16432_v58  ;;  %3375 = vmatprep.subr.bf16.mxu1 %v16437_v60 }
 0x594   :  { %3335 = vmatpush1.bf16.msra.mxu0 %v16442_v56  ;;  %3376 = vmatpush1.bf16.msra.mxu1 %v16447_v53 }
 0x595   :  { %3336 = vmatprep.subr.bf16.mxu0 %v16456_v62  ;;  %3377 = vmatprep.subr.bf16.mxu1 %v16461_v55 }
 0x598   :  { %3337 = vmatpush1.bf16.msra.mxu0 %v16466_v63  ;;  %3378 = vmatpush1.bf16.msra.mxu1 %v16471_v54 }
 0x599   :  { %3338 = vmatprep.subr.bf16.mxu0 %v16485_v52  ;;  %3379 = vmatprep.subr.bf16.mxu1 %v16495_v49 }
 0x59c   :  { %3339 = vmatpush1.bf16.msra.mxu0 %v16480_v11  ;;  %3380 = vmatpush1.bf16.msra.mxu1 %v16490_v17 }
 0x59d   :  { %3340 = vmatprep.subr.bf16.mxu0 %v16500_v51  ;;  %3381 = vmatprep.subr.bf16.mxu1 %v16506_v12 }
 0x5a0   :  { %3341 = vmatpush1.bf16.msra.mxu0 %v16514_v50  ;;  %3382 = vmatpush1.bf16.msra.mxu1 %v16519_v18 }
 0x5a1   :  { %3342 = vmatprep.subr.bf16.mxu0 %v16526_v0  ;;  %3383 = vmatprep.subr.bf16.mxu1 %v16531_v6 }
 0x5a4   :  { %3343 = vmatpush1.bf16.msra.mxu0 %v16538_v19  ;;  %3384 = vmatpush1.bf16.msra.mxu1 %v16543_v23 }
 0x5a5   :  { %3344 = vmatprep.subr.bf16.mxu0 %v16550_v5  ;;  %3385 = vmatprep.subr.bf16.mxu1 %v16555_v16 }
 0x5a8   :  { %3345 = vmatpush1.bf16.msra.mxu0 %v16562_v21  ;;  %3386 = vmatpush1.bf16.msra.mxu1 %v16567_v7 }
 0x5a9   :  { %3703 = vmatprep.subr.bf16.mxu0 %v16384_v28  ;;  %3744 = vmatprep.subr.bf16.mxu1 %v16389_v43 }
 0x649   :  { %v2991_v30 = vpop.f32.mrf.mxu0 }
 0x64a   :  { %v3032_v41 = vpop.f32.mrf.mxu1  ;;  %v3039_v33 = vadd.f32 %v2991_v30, %v438_v20 }
 0x64b   :  { %v2993_v38 = vpop.f32.mrf.mxu0  ;;  %v3041_v26 = vadd.f32 %v3032_v41, %v631_v22 }
 0x64c   :  { %v3034_v40 = vpop.f32.mrf.mxu1  ;;  %v13156_v25 = vmul.f32 -1.442695, %v3039_v33  ;;  %v3040_v34 = vadd.f32 %v2993_v38, %v440_v36 }
 0x64d   :  { %v2995_v31 = vpop.f32.mrf.mxu0  ;;  %v3042_v47 = vadd.f32 %v3034_v40, %v633_v29 }
 0x64e   :  { %v3036_v35 = vpop.f32.mrf.mxu1  ;;  %14760 = vpow2.f32 %v13156_v25  ;;  %v13157_v42 = vmul.f32 -1.442695, %v3040_v34 }
 0x64f   :  { %v2996_v27 = vpop.f32.mrf.mxu0  ;;  %v13158_v15 = vmul.f32 -1.442695, %v3042_v47 }
 0x650   :  { %v3037_v32 = vpop.f32.mrf.mxu1  ;;  %14762 = vpow2.f32 %v13157_v42 }
 0x651   :  { %14764 = vtanh.f32 %v3041_v26 }
 0x652   :  { %14766 = vpow2.f32 %v13158_v15 }
 0x65b   :  { %v14761_v44 = vpop.eup %14760 }
 0x65c   :  { %v3046_v13 = vadd.f32 1.0, %v14761_v44 }
 0x65d   :  { %v14763_v14 = vpop.eup %14762 }
 0x65e   :  { %14768 = vrcp.f32 %v3046_v13  ;;  %v3052_v20 = vadd.f32 1.0, %v14763_v14  ;;  %v14765_v30 = vpop.eup %14764 }
 0x65f   :  { %v14767_v37 = vpop.eup %14766 }
 0x660   :  { %14770 = vrcp.f32 %v3052_v20  ;;  %v3059_v25 = vadd.f32 1.0, %v14767_v37  ;;  %v19015_v20 = vld [vmem:[#allocation24_spill] sm:$0xff] }
 0x662   :  { %14772 = vrcp.f32 %v3059_v25 }
 0x66b   :  { %v14769_v36 = vpop.eup %14768 }
 0x66c   :  { %v3063_v33 = vmul.f32 %v14769_v36, %v14765_v30  ;;  %v444_v30 = vadd.f32 %v19015_v20, %v15970_v10 }
 0x66d   :  { %v14771_v38 = vpop.eup %14770 }
 0x66e   :  { %v3062_v40 = vmul.f32 %v14771_v38, %v16370_v39 }
 0x66f   :  { %v14773_v41 = vpop.eup %14772 }
 0x670   :  { %v16584_v34 = vadd.f32 %v3063_v33, %v3062_v40  ;;  %v19016_v33 = vld [vmem:[#allocation26_spill] sm:$0xff] }
 0x671   :  { %v446_v38 = vadd.f32 %v19016_v33, %v15976_v9 }
 0x672   :  { %14774 = vtanh.f32 %v16584_v34 }
 0x67f   :  { %v14775_v31 = vpop.eup %14774 }
 0x680   :  { %v3066_v35 = vmul.f32 %v14775_v31, %v14773_v41 }
 0x682   :  { %v3068_v42 = vcombine.high %v3066_v35, %v3066_v35  ;;  %v3075_v27 = vrot.slane %v3066_v35, %v16003_v2  ;;  %v3137_v32 = vpack.c.bf16 %v3066_v35, %v3066_v35 }
 0x684   :  { %v3082_v46 = vrot.slane %v3068_v42, %v16003_v2  ;;  %v3083_v29 = vcombine.high %v3075_v27, %v3075_v27  ;;  %v3091_v47 = vrot.slane %v3075_v27, %v16003_v2  ;;  %13159 = vst.sshfl [vmem:[#allocation5 + $0x5] sm:$0x1 pattern:$0x73625140] %v3075_v27  ;;  %3363 = vmatmul.mubr.bf16.vlgmr.msra.gmra.mxu0 %v3137_v32 }
 0x685   :  { %3404 = vmatmul.mubr.bf16.vlgmr.msra.gmra.mxu1 %v3137_v32  ;;  %3704 = vmatpush1.bf16.msra.mxu0 %v16394_v45 }
 0x686   :  { %3745 = vmatpush1.bf16.msra.mxu1 %v16399_v48  ;;  %v3084_v39 = vcombine.high %v3082_v46, %v3082_v46  ;;  %v3098_v24 = vrot.slane %v3082_v46, %v16003_v2  ;;  %v3105_v22 = vrot.slane %v3083_v29, %v16003_v2  ;;  %v3113_v26 = vcombine.high %v3091_v47, %v3091_v47  ;;  %v19017_v47 = vld [vmem:[#allocation27_spill] sm:$0xff] }
 0x687   :  { %13160 = vst.sshfl [vmem:[#allocation5 + $0x25] sm:$0x1 pattern:$0x73625140] %v3083_v29  ;;  %3705 = vmatprep.subr.bf16.mxu0 %v16408_v1  ;;  %3746 = vmatprep.subr.bf16.mxu1 %v16413_v4 }
 0x688   :  { %13161 = vst.sshfl [vmem:[#allocation5 + $0x85] sm:$0x1 pattern:$0x73625140] %v3082_v46  ;;  %3735 = vmatprep.mubr.bf16.mxu0 %v19002_v8  ;;  %v3112_v15 = vrot.slane %v3084_v39, %v16003_v2  ;;  %v3114_v44 = vcombine.high %v3098_v24, %v3098_v24  ;;  %v3115_v13 = vcombine.high %v3105_v22, %v3105_v22  ;;  %3127 = vst [vmem:[#allocation5 + $0x45] sm:$0x1] %v3113_v26 }
 0x689   :  { %13162 = vst.sshfl [vmem:[#allocation5 + $0xa5] sm:$0x1 pattern:$0x73625140] %v3084_v39  ;;  %3776 = vmatprep.mubr.bf16.mxu1 %v19002_v8  ;;  %3706 = vmatpush1.bf16.msra.mxu0 %v16418_v57  ;;  %v639_v39 = vadd.f32 %v19017_v47, %v15988_v3  ;;  %v19018_v22 = vld [vmem:[#allocation25_spill] sm:$0xff] }
 0x68a   :  { %3747 = vmatpush1.bf16.msra.mxu1 %v16423_v59  ;;  %v3116_v14 = vcombine.high %v3112_v15, %v3112_v15  ;;  %3128 = vst [vmem:[#allocation5 + $0x65] sm:$0x1] %v3115_v13  ;;  %3131 = vst [vmem:[#allocation5 + $0xc5] sm:$0x1] %v3114_v44  ;;  %3707 = vmatprep.subr.bf16.mxu0 %v16432_v58  ;;  %v637_v26 = vadd.f32 %v19018_v22, %v15990_v61 }
 0x68b   :  { %3748 = vmatprep.subr.bf16.mxu1 %v16437_v60 }
 0x68c   :  { %3132 = vst [vmem:[#allocation5 + $0xe5] sm:$0x1] %v3116_v14 }
 0x68d   :  { %3708 = vmatpush1.bf16.msra.mxu0 %v16442_v56 }
 0x68e   :  { %3749 = vmatpush1.bf16.msra.mxu1 %v16447_v53  ;;  %3709 = vmatprep.subr.bf16.mxu0 %v16456_v62 }
 0x68f   :  { %3750 = vmatprep.subr.bf16.mxu1 %v16461_v55 }
 0x691   :  { %3710 = vmatpush1.bf16.msra.mxu0 %v16466_v63 }
 0x692   :  { %3751 = vmatpush1.bf16.msra.mxu1 %v16471_v54  ;;  %3711 = vmatprep.subr.bf16.mxu0 %v16485_v52 }
 0x693   :  { %3752 = vmatprep.subr.bf16.mxu1 %v16495_v49 }
 0x695   :  { %3712 = vmatpush1.bf16.msra.mxu0 %v16480_v11 }
 0x696   :  { %3753 = vmatpush1.bf16.msra.mxu1 %v16490_v17  ;;  %3713 = vmatprep.subr.bf16.mxu0 %v16500_v51 }
 0x697   :  { %3754 = vmatprep.subr.bf16.mxu1 %v16506_v12 }
 0x699   :  { %3714 = vmatpush1.bf16.msra.mxu0 %v16514_v50 }
 0x69a   :  { %3755 = vmatpush1.bf16.msra.mxu1 %v16519_v18  ;;  %3715 = vmatprep.subr.bf16.mxu0 %v16526_v0 }
 0x69b   :  { %3756 = vmatprep.subr.bf16.mxu1 %v16531_v6 }
 0x69d   :  { %3716 = vmatpush1.bf16.msra.mxu0 %v16538_v19 }
 0x69e   :  { %3757 = vmatpush1.bf16.msra.mxu1 %v16543_v23  ;;  %3717 = vmatprep.subr.bf16.mxu0 %v16550_v5 }
 0x69f   :  { %3758 = vmatprep.subr.bf16.mxu1 %v16555_v16 }
 0x6a1   :  { %3718 = vmatpush1.bf16.msra.mxu0 %v16562_v21 }
 0x6a2   :  { %3759 = vmatpush1.bf16.msra.mxu1 %v16567_v7  ;;  %4076 = vmatprep.subr.bf16.mxu0 %v16384_v28 }
 0x6a3   :  { %4117 = vmatprep.subr.bf16.mxu1 %v16389_v43 }
 0x744   :  { %v3364_v37 = vpop.f32.mrf.mxu0 }
 0x745   :  { %v3405_v36 = vpop.f32.mrf.mxu1  ;;  %v3412_v25 = vadd.f32 %v3364_v37, %v444_v30 }
 0x746   :  { %v3366_v40 = vpop.f32.mrf.mxu0  ;;  %v3414_v15 = vadd.f32 %v3405_v36, %v637_v26 }
 0x747   :  { %v3407_v41 = vpop.f32.mrf.mxu1  ;;  %v13195_v31 = vmul.f32 -1.442695, %v3412_v25  ;;  %v3413_v35 = vadd.f32 %v3366_v40, %v446_v38 }
 0x748   :  { %v3368_v42 = vpop.f32.mrf.mxu0  ;;  %v3415_v24 = vadd.f32 %v3407_v41, %v639_v39 }
 0x749   :  { %v3409_v27 = vpop.f32.mrf.mxu1  ;;  %14776 = vpow2.f32 %v13195_v31  ;;  %v13196_v32 = vmul.f32 -1.442695, %v3413_v35 }
 0x74a   :  { %v3369_v46 = vpop.f32.mrf.mxu0  ;;  %v13197_v44 = vmul.f32 -1.442695, %v3415_v24 }
 0x74b   :  { %v3410_v29 = vpop.f32.mrf.mxu1  ;;  %14778 = vpow2.f32 %v13196_v32 }
 0x74c   :  { %14780 = vtanh.f32 %v3414_v15 }
 0x74d   :  { %14782 = vpow2.f32 %v13197_v44 }
 0x756   :  { %v14777_v13 = vpop.eup %14776 }
 0x757   :  { %v3419_v14 = vadd.f32 1.0, %v14777_v13 }
 0x758   :  { %v14779_v20 = vpop.eup %14778 }
 0x759   :  { %14784 = vrcp.f32 %v3419_v14  ;;  %v3425_v30 = vadd.f32 1.0, %v14779_v20  ;;  %v14781_v37 = vpop.eup %14780 }
 0x75a   :  { %v14783_v33 = vpop.eup %14782 }
 0x75b   :  { %14786 = vrcp.f32 %v3425_v30  ;;  %v3432_v31 = vadd.f32 1.0, %v14783_v33  ;;  %v19019_v30 = vld [vmem:[#allocation28_spill] sm:$0xff] }
 0x75d   :  { %14788 = vrcp.f32 %v3432_v31 }
 0x766   :  { %v14785_v38 = vpop.eup %14784 }
 0x767   :  { %v3436_v25 = vmul.f32 %v14785_v38, %v14781_v37  ;;  %v448_v37 = vadd.f32 %v19019_v30, %v15970_v10 }
 0x768   :  { %v14787_v40 = vpop.eup %14786 }
 0x769   :  { %v3435_v41 = vmul.f32 %v14787_v40, %v16584_v34 }
 0x76a   :  { %v14789_v36 = vpop.eup %14788 }
 0x76b   :  { %v16636_v35 = vadd.f32 %v3436_v25, %v3435_v41  ;;  %v19020_v25 = vld [vmem:[#allocation30_spill] sm:$0xff] }
 0x76c   :  { %v450_v40 = vadd.f32 %v19020_v25, %v15976_v9 }
 0x76d   :  { %14790 = vtanh.f32 %v16636_v35 }
 0x77a   :  { %v14791_v42 = vpop.eup %14790 }
 0x77b   :  { %v3439_v27 = vmul.f32 %v14791_v42, %v14789_v36 }
 0x77d   :  { %v3441_v32 = vcombine.high %v3439_v27, %v3439_v27  ;;  %v3448_v46 = vrot.slane %v3439_v27, %v16003_v2  ;;  %v3510_v29 = vpack.c.bf16 %v3439_v27, %v3439_v27 }
 0x77f   :  { %v3455_v47 = vrot.slane %v3441_v32, %v16003_v2  ;;  %v3456_v39 = vcombine.high %v3448_v46, %v3448_v46  ;;  %v3464_v24 = vrot.slane %v3448_v46, %v16003_v2  ;;  %13198 = vst.sshfl [vmem:[#allocation5 + $0x6] sm:$0x1 pattern:$0x73625140] %v3448_v46  ;;  %3736 = vmatmul.mubr.bf16.vlgmr.msra.gmra.mxu0 %v3510_v29 }
 0x780   :  { %3777 = vmatmul.mubr.bf16.vlgmr.msra.gmra.mxu1 %v3510_v29  ;;  %4077 = vmatpush1.bf16.msra.mxu0 %v16394_v45 }
 0x781   :  { %4118 = vmatpush1.bf16.msra.mxu1 %v16399_v48  ;;  %v3457_v34 = vcombine.high %v3455_v47, %v3455_v47  ;;  %v3471_v22 = vrot.slane %v3455_v47, %v16003_v2  ;;  %v3478_v26 = vrot.slane %v3456_v39, %v16003_v2  ;;  %v3486_v15 = vcombine.high %v3464_v24, %v3464_v24 }
 0x782   :  { %13199 = vst.sshfl [vmem:[#allocation5 + $0x26] sm:$0x1 pattern:$0x73625140] %v3456_v39  ;;  %4078 = vmatprep.subr.bf16.mxu0 %v16408_v1  ;;  %4119 = vmatprep.subr.bf16.mxu1 %v16413_v4 }
 0x783   :  { %13200 = vst.sshfl [vmem:[#allocation5 + $0x86] sm:$0x1 pattern:$0x73625140] %v3455_v47  ;;  %4108 = vmatprep.mubr.bf16.mxu0 %v19002_v8  ;;  %v3485_v44 = vrot.slane %v3457_v34, %v16003_v2  ;;  %v3487_v13 = vcombine.high %v3471_v22, %v3471_v22  ;;  %v3488_v14 = vcombine.high %v3478_v26, %v3478_v26  ;;  %3500 = vst [vmem:[#allocation5 + $0x46] sm:$0x1] %v3486_v15 }
 0x784   :  { %13201 = vst.sshfl [vmem:[#allocation5 + $0xa6] sm:$0x1 pattern:$0x73625140] %v3457_v34  ;;  %4149 = vmatprep.mubr.bf16.mxu1 %v19002_v8  ;;  %4079 = vmatpush1.bf16.msra.mxu0 %v16418_v57  ;;  %v19022_v34 = vld [vmem:[#allocation29_spill] sm:$0xff] }
 0x785   :  { %4120 = vmatpush1.bf16.msra.mxu1 %v16423_v59  ;;  %v3489_v20 = vcombine.high %v3485_v44, %v3485_v44  ;;  %3501 = vst [vmem:[#allocation5 + $0x66] sm:$0x1] %v3488_v14  ;;  %3504 = vst [vmem:[#allocation5 + $0xc6] sm:$0x1] %v3487_v13  ;;  %4080 = vmatprep.subr.bf16.mxu0 %v16432_v58  ;;  %v641_v22 = vadd.f32 %v19022_v34, %v15990_v61 }
 0x786   :  { %4121 = vmatprep.subr.bf16.mxu1 %v16437_v60 }
 0x787   :  { %3505 = vst [vmem:[#allocation5 + $0xe6] sm:$0x1] %v3489_v20 }
 0x788   :  { %4081 = vmatpush1.bf16.msra.mxu0 %v16442_v56 }
 0x789   :  { %4122 = vmatpush1.bf16.msra.mxu1 %v16447_v53  ;;  %4082 = vmatprep.subr.bf16.mxu0 %v16456_v62 }
 0x78a   :  { %4123 = vmatprep.subr.bf16.mxu1 %v16461_v55 }
 0x78c   :  { %4083 = vmatpush1.bf16.msra.mxu0 %v16466_v63 }
 0x78d   :  { %4124 = vmatpush1.bf16.msra.mxu1 %v16471_v54  ;;  %4084 = vmatprep.subr.bf16.mxu0 %v16485_v52 }
 0x78e   :  { %4125 = vmatprep.subr.bf16.mxu1 %v16495_v49 }
 0x790   :  { %4085 = vmatpush1.bf16.msra.mxu0 %v16480_v11 }
 0x791   :  { %4126 = vmatpush1.bf16.msra.mxu1 %v16490_v17  ;;  %4086 = vmatprep.subr.bf16.mxu0 %v16500_v51 }
 0x792   :  { %4127 = vmatprep.subr.bf16.mxu1 %v16506_v12 }
 0x794   :  { %4087 = vmatpush1.bf16.msra.mxu0 %v16514_v50 }
 0x795   :  { %4128 = vmatpush1.bf16.msra.mxu1 %v16519_v18  ;;  %4088 = vmatprep.subr.bf16.mxu0 %v16526_v0 }
 0x796   :  { %4129 = vmatprep.subr.bf16.mxu1 %v16531_v6 }
 0x798   :  { %4089 = vmatpush1.bf16.msra.mxu0 %v16538_v19 }
 0x799   :  { %4130 = vmatpush1.bf16.msra.mxu1 %v16543_v23  ;;  %4090 = vmatprep.subr.bf16.mxu0 %v16550_v5 }
 0x79a   :  { %4131 = vmatprep.subr.bf16.mxu1 %v16555_v16 }
 0x79c   :  { %4091 = vmatpush1.bf16.msra.mxu0 %v16562_v21 }
 0x79d   :  { %4132 = vmatpush1.bf16.msra.mxu1 %v16567_v7  ;;  %4449 = vmatprep.subr.bf16.mxu0 %v16384_v28 }
 0x79e   :  { %4490 = vmatprep.subr.bf16.mxu1 %v16389_v43  ;;  %v19021_v43 = vld [vmem:[#allocation31_spill] sm:$0xff] }
 0x79f   :  { %v643_v39 = vadd.f32 %v19021_v43, %v15988_v3 }
 0x83f   :  { %v3737_v33 = vpop.f32.mrf.mxu0 }
 0x840   :  { %v3778_v38 = vpop.f32.mrf.mxu1  ;;  %v3785_v31 = vadd.f32 %v3737_v33, %v448_v37 }
 0x841   :  { %v3739_v41 = vpop.f32.mrf.mxu0  ;;  %v3787_v26 = vadd.f32 %v3778_v38, %v641_v22 }
 0x842   :  { %v3780_v36 = vpop.f32.mrf.mxu1  ;;  %v13234_v42 = vmul.f32 -1.442695, %v3785_v31  ;;  %v3786_v27 = vadd.f32 %v3739_v41, %v450_v40 }
 0x843   :  { %v3741_v32 = vpop.f32.mrf.mxu0  ;;  %v3788_v24 = vadd.f32 %v3780_v36, %v643_v39 }
 0x844   :  { %v3782_v46 = vpop.f32.mrf.mxu1  ;;  %14792 = vpow2.f32 %v13234_v42  ;;  %v13235_v29 = vmul.f32 -1.442695, %v3786_v27 }
 0x845   :  { %v3742_v28 = vpop.f32.mrf.mxu0  ;;  %v13236_v15 = vmul.f32 -1.442695, %v3788_v24 }
 0x846   :  { %v3783_v47 = vpop.f32.mrf.mxu1  ;;  %14794 = vpow2.f32 %v13235_v29 }
 0x847   :  { %14796 = vtanh.f32 %v3787_v26 }
 0x848   :  { %14798 = vpow2.f32 %v13236_v15 }
 0x851   :  { %v14793_v44 = vpop.eup %14792 }
 0x852   :  { %v3792_v13 = vadd.f32 1.0, %v14793_v44 }
 0x853   :  { %v14795_v14 = vpop.eup %14794 }
 0x854   :  { %14800 = vrcp.f32 %v3792_v13  ;;  %v3798_v20 = vadd.f32 1.0, %v14795_v14  ;;  %v14797_v30 = vpop.eup %14796 }
 0x855   :  { %v14799_v37 = vpop.eup %14798 }
 0x856   :  { %14802 = vrcp.f32 %v3798_v20  ;;  %v3805_v31 = vadd.f32 1.0, %v14799_v37 }
 0x858   :  { %14804 = vrcp.f32 %v3805_v31 }
 0x861   :  { %v14801_v33 = vpop.eup %14800 }
 0x862   :  { %v3809_v25 = vmul.f32 %v14801_v33, %v14797_v30 }
 0x863   :  { %v14803_v40 = vpop.eup %14802 }
 0x864   :  { %v3808_v41 = vmul.f32 %v14803_v40, %v16636_v35 }
 0x865   :  { %v14805_v38 = vpop.eup %14804 }
 0x866   :  { %v16688_v36 = vadd.f32 %v3809_v25, %v3808_v41 }
 0x868   :  { %14806 = vtanh.f32 %v16688_v36 }
 0x875   :  { %v14807_v42 = vpop.eup %14806 }
 0x876   :  { %v3812_v27 = vmul.f32 %v14807_v42, %v14805_v38 }
 0x878   :  { %v3814_v32 = vcombine.high %v3812_v27, %v3812_v27  ;;  %v3821_v46 = vrot.slane %v3812_v27, %v16003_v2  ;;  %v3883_v29 = vpack.c.bf16 %v3812_v27, %v3812_v27 }
 0x87a   :  { %v3828_v28 = vrot.slane %v3814_v32, %v16003_v2  ;;  %v3829_v47 = vcombine.high %v3821_v46, %v3821_v46  ;;  %v3837_v43 = vrot.slane %v3821_v46, %v16003_v2  ;;  %13237 = vst.sshfl [vmem:[#allocation5 + $0x7] sm:$0x1 pattern:$0x73625140] %v3821_v46  ;;  %4109 = vmatmul.mubr.bf16.vlgmr.msra.gmra.mxu0 %v3883_v29 }
 0x87b   :  { %4150 = vmatmul.mubr.bf16.vlgmr.msra.gmra.mxu1 %v3883_v29  ;;  %4450 = vmatpush1.bf16.msra.mxu0 %v16394_v45 }
 0x87c   :  { %4491 = vmatpush1.bf16.msra.mxu1 %v16399_v48  ;;  %v3830_v35 = vcombine.high %v3828_v28, %v3828_v28  ;;  %v3844_v39 = vrot.slane %v3828_v28, %v16003_v2  ;;  %v3851_v24 = vrot.slane %v3829_v47, %v16003_v2  ;;  %v3859_v34 = vcombine.high %v3837_v43, %v3837_v43 }
 0x87d   :  { %13238 = vst.sshfl [vmem:[#allocation5 + $0x27] sm:$0x1 pattern:$0x73625140] %v3829_v47  ;;  %4451 = vmatprep.subr.bf16.mxu0 %v16408_v1  ;;  %4492 = vmatprep.subr.bf16.mxu1 %v16413_v4  ;;  %v19023_v1 = vld [vmem:[#allocation32_spill] sm:$0xff] }
 0x87e   :  { %13239 = vst.sshfl [vmem:[#allocation5 + $0x87] sm:$0x1 pattern:$0x73625140] %v3828_v28  ;;  %4481 = vmatprep.mubr.bf16.mxu0 %v19002_v8  ;;  %v3858_v22 = vrot.slane %v3830_v35, %v16003_v2  ;;  %v3860_v26 = vcombine.high %v3844_v39, %v3844_v39  ;;  %v3861_v45 = vcombine.high %v3851_v24, %v3851_v24  ;;  %3873 = vst [vmem:[#allocation5 + $0x47] sm:$0x1] %v3859_v34 }
 0x87f   :  { %13240 = vst.sshfl [vmem:[#allocation5 + $0xa7] sm:$0x1 pattern:$0x73625140] %v3830_v35  ;;  %4522 = vmatprep.mubr.bf16.mxu1 %v19002_v8  ;;  %4452 = vmatpush1.bf16.msra.mxu0 %v16418_v57  ;;  %v454_v4 = vadd.f32 %v19023_v1, %v15970_v10  ;;  %v16752_v24 = vld [vmem:[%s18879_s4 + $0xe4] ss:$16 sps:$4 sm:$0xff]  }
 0x880   :  { %4493 = vmatpush1.bf16.msra.mxu1 %v16423_v59  ;;  %v3862_v48 = vcombine.high %v3858_v22, %v3858_v22  ;;  %3874 = vst [vmem:[#allocation5 + $0x67] sm:$0x1] %v3861_v45  ;;  %3877 = vst [vmem:[#allocation5 + $0xc7] sm:$0x1] %v3860_v26  ;;  %4453 = vmatprep.subr.bf16.mxu0 %v16432_v58  ;;  %v19024_v58 = vld [vmem:[#allocation34_spill] sm:$0xff] }
 0x881   :  { %4494 = vmatprep.subr.bf16.mxu1 %v16437_v60  ;;  %v456_v60 = vadd.f32 %v19024_v58, %v15976_v9  ;;  %v16757_v34 = vld [vmem:[%s18879_s4 + $0xec] ss:$16 sps:$4 sm:$0xff]   ;;  %v16762_v22 = vld [vmem:[%s18879_s4 + $0xe0] ss:$16 sps:$4 sm:$0xff]   ;;  %v16767_v26 = vld [vmem:[%s18879_s4 + $0xe8] ss:$16 sps:$4 sm:$0xff]  }
 0x882   :  { %3878 = vst [vmem:[#allocation5 + $0xe7] sm:$0x1] %v3862_v48  ;;  %v16776_v45 = vld [vmem:[%s18879_s4 + $0xc4] ss:$16 sps:$4 sm:$0xff]   ;;  %v16781_v48 = vld [vmem:[%s18879_s4 + $0xcc] ss:$16 sps:$4 sm:$0xff]  }
 0x883   :  { %4454 = vmatpush1.bf16.msra.mxu0 %v16442_v56  ;;  %v16786_v1 = vld [vmem:[%s18879_s4 + $0xc0] ss:$16 sps:$4 sm:$0xff]  }
 0x884   :  { %4495 = vmatpush1.bf16.msra.mxu1 %v16447_v53  ;;  %4455 = vmatprep.subr.bf16.mxu0 %v16456_v62  ;;  %v16810_v58 = vld [vmem:[%s18879_s4 + $0xa0] ss:$16 sps:$4 sm:$0xff]  }
 0x885   :  { %4496 = vmatprep.subr.bf16.mxu1 %v16461_v55 }
 0x887   :  { %4456 = vmatpush1.bf16.msra.mxu0 %v16466_v63 }
 0x888   :  { %4497 = vmatpush1.bf16.msra.mxu1 %v16471_v54  ;;  %4457 = vmatprep.subr.bf16.mxu0 %v16485_v52 }
 0x889   :  { %4498 = vmatprep.subr.bf16.mxu1 %v16495_v49 }
 0x88b   :  { %4458 = vmatpush1.bf16.msra.mxu0 %v16480_v11 }
 0x88c   :  { %4499 = vmatpush1.bf16.msra.mxu1 %v16490_v17  ;;  %4459 = vmatprep.subr.bf16.mxu0 %v16500_v51  ;;  %v19025_v51 = vld [vmem:[#allocation35_spill] sm:$0xff] }
 0x88d   :  { %4500 = vmatprep.subr.bf16.mxu1 %v16506_v12  ;;  %v649_v12 = vadd.f32 %v19025_v51, %v15988_v3  ;;  %v16882_v51 = vld [vmem:[%s18879_s4 + $0x40] ss:$16 sps:$4 sm:$0xff]  }
 0x88f   :  { %4460 = vmatpush1.bf16.msra.mxu0 %v16514_v50 }
 0x890   :  { %4501 = vmatpush1.bf16.msra.mxu1 %v16519_v18  ;;  %4461 = vmatprep.subr.bf16.mxu0 %v16526_v0  ;;  %v19026_v18 = vld [vmem:[#allocation33_spill] sm:$0xff] }
 0x891   :  { %4502 = vmatprep.subr.bf16.mxu1 %v16531_v6  ;;  %v647_v0 = vadd.f32 %v19026_v18, %v15990_v61  ;;  %v16899_v18 = vld [vmem:[%s18879_s4 + $0x2c] ss:$16 sps:$4 sm:$0xff]  }
 0x893   :  { %4462 = vmatpush1.bf16.msra.mxu0 %v16538_v19 }
 0x894   :  { %4503 = vmatpush1.bf16.msra.mxu1 %v16543_v23  ;;  %4463 = vmatprep.subr.bf16.mxu0 %v16550_v5 }
 0x895   :  { %4504 = vmatprep.subr.bf16.mxu1 %v16555_v16 }
 0x897   :  { %4464 = vmatpush1.bf16.msra.mxu0 %v16562_v21 }
 0x898   :  { %4505 = vmatpush1.bf16.msra.mxu1 %v16567_v7  ;;  %4822 = vmatprep.subr.bf16.mxu0 %v16752_v24 }
 0x899   :  { %4863 = vmatprep.subr.bf16.mxu1 %v16757_v34 }
 0x93a   :  { %v4110_v57 = vpop.f32.mrf.mxu0 }
 0x93b   :  { %v4151_v59 = vpop.f32.mrf.mxu1  ;;  %v4158_v56 = vadd.f32 %v4110_v57, %v454_v4  ;;  %v16791_v4 = vld [vmem:[%s18879_s4 + $0xc8] ss:$16 sps:$4 sm:$0xff]   ;;  %v16800_v57 = vld [vmem:[%s18879_s4 + $0xa4] ss:$16 sps:$4 sm:$0xff]  }
 0x93c   :  { %v4112_v53 = vpop.f32.mrf.mxu0  ;;  %v4160_v6 = vadd.f32 %v4151_v59, %v647_v0  ;;  %v16805_v59 = vld [vmem:[%s18879_s4 + $0xac] ss:$16 sps:$4 sm:$0xff]   ;;  %v16906_v0 = vld [vmem:[%s18879_s4 + $0x20] ss:$16 sps:$4 sm:$0xff]  }
 0x93d   :  { %v4153_v62 = vpop.f32.mrf.mxu1  ;;  %v13273_v55 = vmul.f32 -1.442695, %v4158_v56  ;;  %v4159_v63 = vadd.f32 %v4112_v53, %v456_v60  ;;  %v16815_v60 = vld [vmem:[%s18879_s4 + $0xa8] ss:$16 sps:$4 sm:$0xff]   ;;  %v16824_v56 = vld [vmem:[%s18879_s4 + $0x84] ss:$16 sps:$4 sm:$0xff]  }
 0x93e   :  { %v4114_v54 = vpop.f32.mrf.mxu0  ;;  %v4161_v50 = vadd.f32 %v4153_v62, %v649_v12  ;;  %v16829_v53 = vld [vmem:[%s18879_s4 + $0x8c] ss:$16 sps:$4 sm:$0xff]   ;;  %v16834_v62 = vld [vmem:[%s18879_s4 + $0x80] ss:$16 sps:$4 sm:$0xff]   ;;  %v16887_v12 = vld [vmem:[%s18879_s4 + $0x48] ss:$16 sps:$4 sm:$0xff]  }
 0x93f   :  { %v4155_v11 = vpop.f32.mrf.mxu1  ;;  %14808 = vpow2.f32 %v13273_v55  ;;  %v13274_v52 = vmul.f32 -1.442695, %v4159_v63  ;;  %v16839_v55 = vld [vmem:[%s18879_s4 + $0x88] ss:$16 sps:$4 sm:$0xff]   ;;  %v16848_v63 = vld [vmem:[%s18879_s4 + $0x60] ss:$16 sps:$4 sm:$0xff]  }
 0x940   :  { %v4115_v17 = vpop.f32.mrf.mxu0  ;;  %v13275_v19 = vmul.f32 -1.442695, %v4161_v50  ;;  %v16853_v54 = vld [vmem:[%s18879_s4 + $0x64] ss:$16 sps:$4 sm:$0xff]   ;;  %v16858_v11 = vld [vmem:[%s18879_s4 + $0x68] ss:$16 sps:$4 sm:$0xff]  }
 0x941   :  { %v4156_v49 = vpop.f32.mrf.mxu1  ;;  %14810 = vpow2.f32 %v13274_v52  ;;  %v16863_v52 = vld [vmem:[%s18879_s4 + $0x6c] ss:$16 sps:$4 sm:$0xff]   ;;  %v16868_v17 = vld [vmem:[%s18879_s4 + $0x44] ss:$16 sps:$4 sm:$0xff]  }
 0x942   :  { %14812 = vtanh.f32 %v4160_v6  ;;  %v16874_v49 = vld [vmem:[%s18879_s4 + $0x4c] ss:$16 sps:$4 sm:$0xff]   ;;  %v16894_v50 = vld [vmem:[%s18879_s4 + $0x24] ss:$16 sps:$4 sm:$0xff]   ;;  %v16911_v6 = vld [vmem:[%s18879_s4 + $0x28] ss:$16 sps:$4 sm:$0xff]  }
 0x943   :  { %14814 = vpow2.f32 %v13275_v19  ;;  %v16918_v19 = vld [vmem:[%s18879_s4 + $0x4] ss:$16 sps:$4 sm:$0xff]  }
 0x94c   :  { %v14809_v23 = vpop.eup %14808 }
 0x94d   :  { %v4165_v5 = vadd.f32 1.0, %v14809_v23  ;;  %v16923_v23 = vld [vmem:[%s18879_s4 + $0xc] ss:$16 sps:$4 sm:$0xff]  }
 0x94e   :  { %v14811_v16 = vpop.eup %14810 }
 0x94f   :  { %14816 = vrcp.f32 %v4165_v5  ;;  %v4171_v21 = vadd.f32 1.0, %v14811_v16  ;;  %v14813_v7 = vpop.eup %14812  ;;  %v16930_v5 = vld [vmem:[%s18879_s4] ss:$16 sps:$4 sm:$0xff]   ;;  %v16935_v16 = vld [vmem:[%s18879_s4 + $0x8] ss:$16 sps:$4 sm:$0xff]  }
 0x950   :  { %v14815_v15 = vpop.eup %14814 }
 0x951   :  { %14818 = vrcp.f32 %v4171_v21  ;;  %v4178_v20 = vadd.f32 1.0, %v14815_v15  ;;  %v19027_v21 = vld [vmem:[#allocation36_spill] sm:$0xff] }
 0x953   :  { %14820 = vrcp.f32 %v4178_v20 }
 0x95c   :  { %v14817_v44 = vpop.eup %14816 }
 0x95d   :  { %v4182_v13 = vmul.f32 %v14817_v44, %v14813_v7  ;;  %v458_v7 = vadd.f32 %v19027_v21, %v15970_v10 }
 0x95e   :  { %v14819_v14 = vpop.eup %14818 }
 0x95f   :  { %v4181_v30 = vmul.f32 %v14819_v14, %v16688_v36 }
 0x960   :  { %v14821_v33 = vpop.eup %14820 }
 0x961   :  { %v16738_v37 = vadd.f32 %v4182_v13, %v4181_v30  ;;  %v19028_v13 = vld [vmem:[#allocation38_spill] sm:$0xff] }
 0x962   :  { %v460_v14 = vadd.f32 %v19028_v13, %v15976_v9 }
 0x963   :  { %14822 = vtanh.f32 %v16738_v37 }
 0x970   :  { %v14823_v25 = vpop.eup %14822 }
 0x971   :  { %v4185_v40 = vmul.f32 %v14823_v25, %v14821_v33 }
 0x973   :  { %v4187_v31 = vcombine.high %v4185_v40, %v4185_v40  ;;  %v4194_v41 = vrot.slane %v4185_v40, %v16003_v2  ;;  %v4256_v38 = vpack.c.bf16 %v4185_v40, %v4185_v40 }
 0x975   :  { %v4201_v42 = vrot.slane %v4187_v31, %v16003_v2  ;;  %v4202_v27 = vcombine.high %v4194_v41, %v4194_v41  ;;  %v4210_v32 = vrot.slane %v4194_v41, %v16003_v2  ;;  %13276 = vst.sshfl [vmem:[#allocation5 + $0x8] sm:$0x1 pattern:$0x73625140] %v4194_v41  ;;  %4482 = vmatmul.mubr.bf16.vlgmr.msra.gmra.mxu0 %v4256_v38 }
 0x976   :  { %4523 = vmatmul.mubr.bf16.vlgmr.msra.gmra.mxu1 %v4256_v38  ;;  %4854 = vmatprep.mubr.bf16.mxu0 %v19002_v8 }
 0x977   :  { %4895 = vmatprep.mubr.bf16.mxu1 %v19002_v8  ;;  %v4203_v36 = vcombine.high %v4201_v42, %v4201_v42  ;;  %v4217_v46 = vrot.slane %v4201_v42, %v16003_v2  ;;  %v4224_v29 = vrot.slane %v4202_v27, %v16003_v2  ;;  %v4232_v28 = vcombine.high %v4210_v32, %v4210_v32  ;;  %v19029_v32 = vld [vmem:[#allocation39_spill] sm:$0xff] }
 0x978   :  { %13277 = vst.sshfl [vmem:[#allocation5 + $0x28] sm:$0x1 pattern:$0x73625140] %v4202_v27  ;;  %4823 = vmatpush1.bf16.msra.mxu0 %v16762_v22  ;;  %4864 = vmatpush1.bf16.msra.mxu1 %v16767_v26 }
 0x979   :  { %13278 = vst.sshfl [vmem:[#allocation5 + $0x88] sm:$0x1 pattern:$0x73625140] %v4201_v42  ;;  %v4231_v47 = vrot.slane %v4203_v36, %v16003_v2  ;;  %v4233_v43 = vcombine.high %v4217_v46, %v4217_v46  ;;  %v4234_v35 = vcombine.high %v4224_v29, %v4224_v29  ;;  %4246 = vst [vmem:[#allocation5 + $0x48] sm:$0x1] %v4232_v28  ;;  %4824 = vmatprep.subr.bf16.mxu0 %v16776_v45 }
 0x97a   :  { %13279 = vst.sshfl [vmem:[#allocation5 + $0xa8] sm:$0x1 pattern:$0x73625140] %v4203_v36  ;;  %4865 = vmatprep.subr.bf16.mxu1 %v16781_v48  ;;  %v653_v36 = vadd.f32 %v19029_v32, %v15988_v3  ;;  %v19030_v29 = vld [vmem:[#allocation37_spill] sm:$0xff] }
 0x97b   :  { %v4235_v39 = vcombine.high %v4231_v47, %v4231_v47  ;;  %4247 = vst [vmem:[#allocation5 + $0x68] sm:$0x1] %v4234_v35  ;;  %4250 = vst [vmem:[#allocation5 + $0xc8] sm:$0x1] %v4233_v43  ;;  %v651_v28 = vadd.f32 %v19030_v29, %v15990_v61 }
 0x97c   :  { %4825 = vmatpush1.bf16.msra.mxu0 %v16786_v1  ;;  %4866 = vmatpush1.bf16.msra.mxu1 %v16791_v4 }
 0x97d   :  { %4251 = vst [vmem:[#allocation5 + $0xe8] sm:$0x1] %v4235_v39  ;;  %4826 = vmatprep.subr.bf16.mxu0 %v16800_v57  ;;  %4867 = vmatprep.subr.bf16.mxu1 %v16805_v59 }
 0x980   :  { %4827 = vmatpush1.bf16.msra.mxu0 %v16810_v58  ;;  %4868 = vmatpush1.bf16.msra.mxu1 %v16815_v60 }
 0x981   :  { %4828 = vmatprep.subr.bf16.mxu0 %v16824_v56  ;;  %4869 = vmatprep.subr.bf16.mxu1 %v16829_v53 }
 0x984   :  { %4829 = vmatpush1.bf16.msra.mxu0 %v16834_v62  ;;  %4870 = vmatpush1.bf16.msra.mxu1 %v16839_v55 }
 0x985   :  { %4830 = vmatprep.subr.bf16.mxu0 %v16853_v54  ;;  %4871 = vmatprep.subr.bf16.mxu1 %v16863_v52 }
 0x988   :  { %4831 = vmatpush1.bf16.msra.mxu0 %v16848_v63  ;;  %4872 = vmatpush1.bf16.msra.mxu1 %v16858_v11 }
 0x989   :  { %4832 = vmatprep.subr.bf16.mxu0 %v16868_v17  ;;  %4873 = vmatprep.subr.bf16.mxu1 %v16874_v49 }
 0x98c   :  { %4833 = vmatpush1.bf16.msra.mxu0 %v16882_v51  ;;  %4874 = vmatpush1.bf16.msra.mxu1 %v16887_v12 }
 0x98d   :  { %4834 = vmatprep.subr.bf16.mxu0 %v16894_v50  ;;  %4875 = vmatprep.subr.bf16.mxu1 %v16899_v18 }
 0x990   :  { %4835 = vmatpush1.bf16.msra.mxu0 %v16906_v0  ;;  %4876 = vmatpush1.bf16.msra.mxu1 %v16911_v6 }
 0x991   :  { %4836 = vmatprep.subr.bf16.mxu0 %v16918_v19  ;;  %4877 = vmatprep.subr.bf16.mxu1 %v16923_v23 }
 0x994   :  { %4837 = vmatpush1.bf16.msra.mxu0 %v16930_v5  ;;  %4878 = vmatpush1.bf16.msra.mxu1 %v16935_v16 }
 0x995   :  { %5195 = vmatprep.subr.bf16.mxu0 %v16752_v24  ;;  %5236 = vmatprep.subr.bf16.mxu1 %v16757_v34 }
 0xa35   :  { %v4483_v15 = vpop.f32.mrf.mxu0 }
 0xa36   :  { %v4524_v44 = vpop.f32.mrf.mxu1  ;;  %v4531_v20 = vadd.f32 %v4483_v15, %v458_v7 }
 0xa37   :  { %v4485_v30 = vpop.f32.mrf.mxu0  ;;  %v4533_v47 = vadd.f32 %v4524_v44, %v651_v28 }
 0xa38   :  { %v4526_v33 = vpop.f32.mrf.mxu1  ;;  %v13312_v25 = vmul.f32 -1.442695, %v4531_v20  ;;  %v4532_v40 = vadd.f32 %v4485_v30, %v460_v14 }
 0xa39   :  { %v4487_v31 = vpop.f32.mrf.mxu0  ;;  %v4534_v46 = vadd.f32 %v4526_v33, %v653_v36 }
 0xa3a   :  { %v4528_v41 = vpop.f32.mrf.mxu1  ;;  %14824 = vpow2.f32 %v13312_v25  ;;  %v13313_v38 = vmul.f32 -1.442695, %v4532_v40 }
 0xa3b   :  { %v4488_v42 = vpop.f32.mrf.mxu0  ;;  %v13314_v43 = vmul.f32 -1.442695, %v4534_v46 }
 0xa3c   :  { %v4529_v27 = vpop.f32.mrf.mxu1  ;;  %14826 = vpow2.f32 %v13313_v38 }
 0xa3d   :  { %14828 = vtanh.f32 %v4533_v47 }
 0xa3e   :  { %14830 = vpow2.f32 %v13314_v43 }
 0xa47   :  { %v14825_v35 = vpop.eup %14824 }
 0xa48   :  { %v4538_v39 = vadd.f32 1.0, %v14825_v35 }
 0xa49   :  { %v14827_v21 = vpop.eup %14826 }
 0xa4a   :  { %14832 = vrcp.f32 %v4538_v39  ;;  %v4544_v7 = vadd.f32 1.0, %v14827_v21  ;;  %v14829_v15 = vpop.eup %14828 }
 0xa4b   :  { %v14831_v13 = vpop.eup %14830 }
 0xa4c   :  { %14834 = vrcp.f32 %v4544_v7  ;;  %v4551_v25 = vadd.f32 1.0, %v14831_v13  ;;  %v19031_v7 = vld [vmem:[#allocation40_spill] sm:$0xff] }
 0xa4e   :  { %14836 = vrcp.f32 %v4551_v25 }
 0xa57   :  { %v14833_v14 = vpop.eup %14832 }
 0xa58   :  { %v4555_v20 = vmul.f32 %v14833_v14, %v14829_v15  ;;  %v464_v15 = vadd.f32 %v19031_v7, %v15970_v10 }
 0xa59   :  { %v14835_v30 = vpop.eup %14834 }
 0xa5a   :  { %v4554_v33 = vmul.f32 %v14835_v30, %v16738_v37 }
 0xa5b   :  { %v14837_v44 = vpop.eup %14836 }
 0xa5c   :  { %v16952_v40 = vadd.f32 %v4555_v20, %v4554_v33  ;;  %v19032_v20 = vld [vmem:[#allocation42_spill] sm:$0xff] }
 0xa5d   :  { %v466_v30 = vadd.f32 %v19032_v20, %v15976_v9 }
 0xa5e   :  { %14838 = vtanh.f32 %v16952_v40 }
 0xa6b   :  { %v14839_v31 = vpop.eup %14838 }
 0xa6c   :  { %v4558_v41 = vmul.f32 %v14839_v31, %v14837_v44 }
 0xa6e   :  { %v4560_v38 = vcombine.high %v4558_v41, %v4558_v41  ;;  %v4567_v42 = vrot.slane %v4558_v41, %v16003_v2  ;;  %v4629_v27 = vpack.c.bf16 %v4558_v41, %v4558_v41 }
 0xa70   :  { %v4574_v32 = vrot.slane %v4560_v38, %v16003_v2  ;;  %v4575_v36 = vcombine.high %v4567_v42, %v4567_v42  ;;  %v4583_v46 = vrot.slane %v4567_v42, %v16003_v2  ;;  %13315 = vst.sshfl [vmem:[#allocation5 + $0x9] sm:$0x1 pattern:$0x73625140] %v4567_v42  ;;  %4855 = vmatmul.mubr.bf16.vlgmr.msra.gmra.mxu0 %v4629_v27 }
 0xa71   :  { %4896 = vmatmul.mubr.bf16.vlgmr.msra.gmra.mxu1 %v4629_v27  ;;  %5196 = vmatpush1.bf16.msra.mxu0 %v16762_v22 }
 0xa72   :  { %5237 = vmatpush1.bf16.msra.mxu1 %v16767_v26  ;;  %v4576_v37 = vcombine.high %v4574_v32, %v4574_v32  ;;  %v4590_v29 = vrot.slane %v4574_v32, %v16003_v2  ;;  %v4597_v28 = vrot.slane %v4575_v36, %v16003_v2  ;;  %v4605_v47 = vcombine.high %v4583_v46, %v4583_v46  ;;  %v19033_v46 = vld [vmem:[#allocation43_spill] sm:$0xff] }
 0xa73   :  { %13316 = vst.sshfl [vmem:[#allocation5 + $0x29] sm:$0x1 pattern:$0x73625140] %v4575_v36  ;;  %5197 = vmatprep.subr.bf16.mxu0 %v16776_v45  ;;  %5238 = vmatprep.subr.bf16.mxu1 %v16781_v48 }
 0xa74   :  { %13317 = vst.sshfl [vmem:[#allocation5 + $0x89] sm:$0x1 pattern:$0x73625140] %v4574_v32  ;;  %5227 = vmatprep.mubr.bf16.mxu0 %v19002_v8  ;;  %v4604_v43 = vrot.slane %v4576_v37, %v16003_v2  ;;  %v4606_v35 = vcombine.high %v4590_v29, %v4590_v29  ;;  %v4607_v39 = vcombine.high %v4597_v28, %v4597_v28  ;;  %4619 = vst [vmem:[#allocation5 + $0x49] sm:$0x1] %v4605_v47 }
 0xa75   :  { %13318 = vst.sshfl [vmem:[#allocation5 + $0xa9] sm:$0x1 pattern:$0x73625140] %v4576_v37  ;;  %5268 = vmatprep.mubr.bf16.mxu1 %v19002_v8  ;;  %5198 = vmatpush1.bf16.msra.mxu0 %v16786_v1  ;;  %v659_v37 = vadd.f32 %v19033_v46, %v15988_v3  ;;  %v19034_v28 = vld [vmem:[#allocation41_spill] sm:$0xff] }
 0xa76   :  { %5239 = vmatpush1.bf16.msra.mxu1 %v16791_v4  ;;  %v4608_v21 = vcombine.high %v4604_v43, %v4604_v43  ;;  %4620 = vst [vmem:[#allocation5 + $0x69] sm:$0x1] %v4607_v39  ;;  %4623 = vst [vmem:[#allocation5 + $0xc9] sm:$0x1] %v4606_v35  ;;  %5199 = vmatprep.subr.bf16.mxu0 %v16800_v57  ;;  %v657_v47 = vadd.f32 %v19034_v28, %v15990_v61 }
 0xa77   :  { %5240 = vmatprep.subr.bf16.mxu1 %v16805_v59 }
 0xa78   :  { %4624 = vst [vmem:[#allocation5 + $0xe9] sm:$0x1] %v4608_v21 }
 0xa79   :  { %5200 = vmatpush1.bf16.msra.mxu0 %v16810_v58 }
 0xa7a   :  { %5241 = vmatpush1.bf16.msra.mxu1 %v16815_v60  ;;  %5201 = vmatprep.subr.bf16.mxu0 %v16824_v56 }
 0xa7b   :  { %5242 = vmatprep.subr.bf16.mxu1 %v16829_v53 }
 0xa7d   :  { %5202 = vmatpush1.bf16.msra.mxu0 %v16834_v62 }
 0xa7e   :  { %5243 = vmatpush1.bf16.msra.mxu1 %v16839_v55  ;;  %5203 = vmatprep.subr.bf16.mxu0 %v16853_v54 }
 0xa7f   :  { %5244 = vmatprep.subr.bf16.mxu1 %v16863_v52 }
 0xa81   :  { %5204 = vmatpush1.bf16.msra.mxu0 %v16848_v63 }
 0xa82   :  { %5245 = vmatpush1.bf16.msra.mxu1 %v16858_v11  ;;  %5205 = vmatprep.subr.bf16.mxu0 %v16868_v17 }
 0xa83   :  { %5246 = vmatprep.subr.bf16.mxu1 %v16874_v49 }
 0xa85   :  { %5206 = vmatpush1.bf16.msra.mxu0 %v16882_v51 }
 0xa86   :  { %5247 = vmatpush1.bf16.msra.mxu1 %v16887_v12  ;;  %5207 = vmatprep.subr.bf16.mxu0 %v16894_v50 }
 0xa87   :  { %5248 = vmatprep.subr.bf16.mxu1 %v16899_v18 }
 0xa89   :  { %5208 = vmatpush1.bf16.msra.mxu0 %v16906_v0 }
 0xa8a   :  { %5249 = vmatpush1.bf16.msra.mxu1 %v16911_v6  ;;  %5209 = vmatprep.subr.bf16.mxu0 %v16918_v19 }
 0xa8b   :  { %5250 = vmatprep.subr.bf16.mxu1 %v16923_v23 }
 0xa8d   :  { %5210 = vmatpush1.bf16.msra.mxu0 %v16930_v5 }
 0xa8e   :  { %5251 = vmatpush1.bf16.msra.mxu1 %v16935_v16  ;;  %5568 = vmatprep.subr.bf16.mxu0 %v16752_v24 }
 0xa8f   :  { %5609 = vmatprep.subr.bf16.mxu1 %v16757_v34 }
 0xb30   :  { %v4856_v13 = vpop.f32.mrf.mxu0 }
 0xb31   :  { %v4897_v14 = vpop.f32.mrf.mxu1  ;;  %v4904_v25 = vadd.f32 %v4856_v13, %v464_v15 }
 0xb32   :  { %v4858_v33 = vpop.f32.mrf.mxu0  ;;  %v4906_v43 = vadd.f32 %v4897_v14, %v657_v47 }
 0xb33   :  { %v4899_v44 = vpop.f32.mrf.mxu1  ;;  %v13351_v31 = vmul.f32 -1.442695, %v4904_v25  ;;  %v4905_v41 = vadd.f32 %v4858_v33, %v466_v30 }
 0xb34   :  { %v4860_v38 = vpop.f32.mrf.mxu0  ;;  %v4907_v29 = vadd.f32 %v4899_v44, %v659_v37 }
 0xb35   :  { %v4901_v42 = vpop.f32.mrf.mxu1  ;;  %14840 = vpow2.f32 %v13351_v31  ;;  %v13352_v27 = vmul.f32 -1.442695, %v4905_v41 }
 0xb36   :  { %v4861_v32 = vpop.f32.mrf.mxu0  ;;  %v13353_v35 = vmul.f32 -1.442695, %v4907_v29 }
 0xb37   :  { %v4902_v36 = vpop.f32.mrf.mxu1  ;;  %14842 = vpow2.f32 %v13352_v27 }
 0xb38   :  { %14844 = vtanh.f32 %v4906_v43 }
 0xb39   :  { %14846 = vpow2.f32 %v13353_v35 }
 0xb42   :  { %v14841_v39 = vpop.eup %14840 }
 0xb43   :  { %v4911_v21 = vadd.f32 1.0, %v14841_v39 }
 0xb44   :  { %v14843_v7 = vpop.eup %14842 }
 0xb45   :  { %14848 = vrcp.f32 %v4911_v21  ;;  %v4917_v15 = vadd.f32 1.0, %v14843_v7  ;;  %v14845_v13 = vpop.eup %14844 }
 0xb46   :  { %v14847_v20 = vpop.eup %14846 }
 0xb47   :  { %14850 = vrcp.f32 %v4917_v15  ;;  %v4924_v31 = vadd.f32 1.0, %v14847_v20  ;;  %v19035_v15 = vld [vmem:[#allocation44_spill] sm:$0xff] }
 0xb49   :  { %14852 = vrcp.f32 %v4924_v31 }
 0xb52   :  { %v14849_v30 = vpop.eup %14848 }
 0xb53   :  { %v4928_v25 = vmul.f32 %v14849_v30, %v14845_v13  ;;  %v468_v13 = vadd.f32 %v19035_v15, %v15970_v10 }
 0xb54   :  { %v14851_v33 = vpop.eup %14850 }
 0xb55   :  { %v4927_v44 = vmul.f32 %v14851_v33, %v16952_v40 }
 0xb56   :  { %v14853_v14 = vpop.eup %14852 }
 0xb57   :  { %v17004_v41 = vadd.f32 %v4928_v25, %v4927_v44  ;;  %v19036_v25 = vld [vmem:[#allocation46_spill] sm:$0xff] }
 0xb58   :  { %v470_v33 = vadd.f32 %v19036_v25, %v15976_v9 }
 0xb59   :  { %14854 = vtanh.f32 %v17004_v41 }
 0xb66   :  { %v14855_v38 = vpop.eup %14854 }
 0xb67   :  { %v4931_v42 = vmul.f32 %v14855_v38, %v14853_v14 }
 0xb69   :  { %v4933_v27 = vcombine.high %v4931_v42, %v4931_v42  ;;  %v4940_v32 = vrot.slane %v4931_v42, %v16003_v2  ;;  %v5002_v36 = vpack.c.bf16 %v4931_v42, %v4931_v42 }
 0xb6b   :  { %v4947_v46 = vrot.slane %v4933_v27, %v16003_v2  ;;  %v4948_v37 = vcombine.high %v4940_v32, %v4940_v32  ;;  %v4956_v29 = vrot.slane %v4940_v32, %v16003_v2  ;;  %13354 = vst.sshfl [vmem:[#allocation5 + $0xa] sm:$0x1 pattern:$0x73625140] %v4940_v32  ;;  %5228 = vmatmul.mubr.bf16.vlgmr.msra.gmra.mxu0 %v5002_v36 }
 0xb6c   :  { %5269 = vmatmul.mubr.bf16.vlgmr.msra.gmra.mxu1 %v5002_v36  ;;  %5569 = vmatpush1.bf16.msra.mxu0 %v16762_v22 }
 0xb6d   :  { %5610 = vmatpush1.bf16.msra.mxu1 %v16767_v26  ;;  %v4949_v40 = vcombine.high %v4947_v46, %v4947_v46  ;;  %v4963_v28 = vrot.slane %v4947_v46, %v16003_v2  ;;  %v4970_v47 = vrot.slane %v4948_v37, %v16003_v2  ;;  %v4978_v43 = vcombine.high %v4956_v29, %v4956_v29 }
 0xb6e   :  { %13355 = vst.sshfl [vmem:[#allocation5 + $0x2a] sm:$0x1 pattern:$0x73625140] %v4948_v37  ;;  %5570 = vmatprep.subr.bf16.mxu0 %v16776_v45  ;;  %5611 = vmatprep.subr.bf16.mxu1 %v16781_v48 }
 0xb6f   :  { %13356 = vst.sshfl [vmem:[#allocation5 + $0x8a] sm:$0x1 pattern:$0x73625140] %v4947_v46  ;;  %5600 = vmatprep.mubr.bf16.mxu0 %v19002_v8  ;;  %v4977_v35 = vrot.slane %v4949_v40, %v16003_v2  ;;  %v4979_v39 = vcombine.high %v4963_v28, %v4963_v28  ;;  %v4980_v21 = vcombine.high %v4970_v47, %v4970_v47  ;;  %4992 = vst [vmem:[#allocation5 + $0x4a] sm:$0x1] %v4978_v43 }
 0xb70   :  { %13357 = vst.sshfl [vmem:[#allocation5 + $0xaa] sm:$0x1 pattern:$0x73625140] %v4949_v40  ;;  %5641 = vmatprep.mubr.bf16.mxu1 %v19002_v8  ;;  %5571 = vmatpush1.bf16.msra.mxu0 %v16786_v1  ;;  %v19038_v40 = vld [vmem:[#allocation45_spill] sm:$0xff] }
 0xb71   :  { %5612 = vmatpush1.bf16.msra.mxu1 %v16791_v4  ;;  %v4981_v7 = vcombine.high %v4977_v35, %v4977_v35  ;;  %4993 = vst [vmem:[#allocation5 + $0x6a] sm:$0x1] %v4980_v21  ;;  %4996 = vst [vmem:[#allocation5 + $0xca] sm:$0x1] %v4979_v39  ;;  %5572 = vmatprep.subr.bf16.mxu0 %v16800_v57  ;;  %v661_v28 = vadd.f32 %v19038_v40, %v15990_v61 }
 0xb72   :  { %5613 = vmatprep.subr.bf16.mxu1 %v16805_v59 }
 0xb73   :  { %4997 = vst [vmem:[#allocation5 + $0xea] sm:$0x1] %v4981_v7 }
 0xb74   :  { %5573 = vmatpush1.bf16.msra.mxu0 %v16810_v58 }
 0xb75   :  { %5614 = vmatpush1.bf16.msra.mxu1 %v16815_v60  ;;  %5574 = vmatprep.subr.bf16.mxu0 %v16824_v56 }
 0xb76   :  { %5615 = vmatprep.subr.bf16.mxu1 %v16829_v53 }
 0xb78   :  { %5575 = vmatpush1.bf16.msra.mxu0 %v16834_v62 }
 0xb79   :  { %5616 = vmatpush1.bf16.msra.mxu1 %v16839_v55  ;;  %5576 = vmatprep.subr.bf16.mxu0 %v16853_v54 }
 0xb7a   :  { %5617 = vmatprep.subr.bf16.mxu1 %v16863_v52 }
 0xb7c   :  { %5577 = vmatpush1.bf16.msra.mxu0 %v16848_v63 }
 0xb7d   :  { %5618 = vmatpush1.bf16.msra.mxu1 %v16858_v11  ;;  %5578 = vmatprep.subr.bf16.mxu0 %v16868_v17 }
 0xb7e   :  { %5619 = vmatprep.subr.bf16.mxu1 %v16874_v49 }
 0xb80   :  { %5579 = vmatpush1.bf16.msra.mxu0 %v16882_v51 }
 0xb81   :  { %5620 = vmatpush1.bf16.msra.mxu1 %v16887_v12  ;;  %5580 = vmatprep.subr.bf16.mxu0 %v16894_v50 }
 0xb82   :  { %5621 = vmatprep.subr.bf16.mxu1 %v16899_v18 }
 0xb84   :  { %5581 = vmatpush1.bf16.msra.mxu0 %v16906_v0 }
 0xb85   :  { %5622 = vmatpush1.bf16.msra.mxu1 %v16911_v6  ;;  %5582 = vmatprep.subr.bf16.mxu0 %v16918_v19 }
 0xb86   :  { %5623 = vmatprep.subr.bf16.mxu1 %v16923_v23 }
 0xb88   :  { %5583 = vmatpush1.bf16.msra.mxu0 %v16930_v5 }
 0xb89   :  { %5624 = vmatpush1.bf16.msra.mxu1 %v16935_v16  ;;  %5941 = vmatprep.subr.bf16.mxu0 %v16752_v24 }
 0xb8a   :  { %5982 = vmatprep.subr.bf16.mxu1 %v16757_v34  ;;  %v19037_v34 = vld [vmem:[#allocation47_spill] sm:$0xff] }
 0xb8b   :  { %v663_v37 = vadd.f32 %v19037_v34, %v15988_v3 }
 0xc2b   :  { %v5229_v20 = vpop.f32.mrf.mxu0 }
 0xc2c   :  { %v5270_v30 = vpop.f32.mrf.mxu1  ;;  %v5277_v31 = vadd.f32 %v5229_v20, %v468_v13 }
 0xc2d   :  { %v5231_v44 = vpop.f32.mrf.mxu0  ;;  %v5279_v47 = vadd.f32 %v5270_v30, %v661_v28 }
 0xc2e   :  { %v5272_v14 = vpop.f32.mrf.mxu1  ;;  %v13390_v38 = vmul.f32 -1.442695, %v5277_v31  ;;  %v5278_v42 = vadd.f32 %v5231_v44, %v470_v33 }
 0xc2f   :  { %v5233_v27 = vpop.f32.mrf.mxu0  ;;  %v5280_v29 = vadd.f32 %v5272_v14, %v663_v37 }
 0xc30   :  { %v5274_v32 = vpop.f32.mrf.mxu1  ;;  %14856 = vpow2.f32 %v13390_v38  ;;  %v13391_v36 = vmul.f32 -1.442695, %v5278_v42 }
 0xc31   :  { %v5234_v24 = vpop.f32.mrf.mxu0  ;;  %v13392_v43 = vmul.f32 -1.442695, %v5280_v29 }
 0xc32   :  { %v5275_v46 = vpop.f32.mrf.mxu1  ;;  %14858 = vpow2.f32 %v13391_v36 }
 0xc33   :  { %14860 = vtanh.f32 %v5279_v47 }
 0xc34   :  { %14862 = vpow2.f32 %v13392_v43 }
 0xc3d   :  { %v14857_v35 = vpop.eup %14856 }
 0xc3e   :  { %v5284_v39 = vadd.f32 1.0, %v14857_v35 }
 0xc3f   :  { %v14859_v21 = vpop.eup %14858 }
 0xc40   :  { %14864 = vrcp.f32 %v5284_v39  ;;  %v5290_v7 = vadd.f32 1.0, %v14859_v21  ;;  %v14861_v15 = vpop.eup %14860 }
 0xc41   :  { %v14863_v13 = vpop.eup %14862 }
 0xc42   :  { %14866 = vrcp.f32 %v5290_v7  ;;  %v5297_v31 = vadd.f32 1.0, %v14863_v13 }
 0xc44   :  { %14868 = vrcp.f32 %v5297_v31 }
 0xc4d   :  { %v14865_v20 = vpop.eup %14864 }
 0xc4e   :  { %v5301_v25 = vmul.f32 %v14865_v20, %v14861_v15 }
 0xc4f   :  { %v14867_v33 = vpop.eup %14866 }
 0xc50   :  { %v5300_v44 = vmul.f32 %v14867_v33, %v17004_v41 }
 0xc51   :  { %v14869_v30 = vpop.eup %14868 }
 0xc52   :  { %v17056_v14 = vadd.f32 %v5301_v25, %v5300_v44 }
 0xc54   :  { %14870 = vtanh.f32 %v17056_v14 }
 0xc61   :  { %v14871_v38 = vpop.eup %14870 }
 0xc62   :  { %v5304_v42 = vmul.f32 %v14871_v38, %v14869_v30 }
 0xc64   :  { %v5306_v27 = vcombine.high %v5304_v42, %v5304_v42  ;;  %v5313_v32 = vrot.slane %v5304_v42, %v16003_v2  ;;  %v5375_v36 = vpack.c.bf16 %v5304_v42, %v5304_v42 }
 0xc66   :  { %v5320_v24 = vrot.slane %v5306_v27, %v16003_v2  ;;  %v5321_v46 = vcombine.high %v5313_v32, %v5313_v32  ;;  %v5329_v34 = vrot.slane %v5313_v32, %v16003_v2  ;;  %13393 = vst.sshfl [vmem:[#allocation5 + $0xb] sm:$0x1 pattern:$0x73625140] %v5313_v32  ;;  %5601 = vmatmul.mubr.bf16.vlgmr.msra.gmra.mxu0 %v5375_v36 }
 0xc67   :  { %5642 = vmatmul.mubr.bf16.vlgmr.msra.gmra.mxu1 %v5375_v36  ;;  %5942 = vmatpush1.bf16.msra.mxu0 %v16762_v22 }
 0xc68   :  { %5983 = vmatpush1.bf16.msra.mxu1 %v16767_v26  ;;  %v5322_v41 = vcombine.high %v5320_v24, %v5320_v24  ;;  %v5336_v37 = vrot.slane %v5320_v24, %v16003_v2  ;;  %v5343_v29 = vrot.slane %v5321_v46, %v16003_v2  ;;  %v5351_v40 = vcombine.high %v5329_v34, %v5329_v34 }
 0xc69   :  { %13394 = vst.sshfl [vmem:[#allocation5 + $0x2b] sm:$0x1 pattern:$0x73625140] %v5321_v46  ;;  %5943 = vmatprep.subr.bf16.mxu0 %v16776_v45  ;;  %5984 = vmatprep.subr.bf16.mxu1 %v16781_v48  ;;  %v19039_v45 = vld [vmem:[#allocation48_spill] sm:$0xff] }
 0xc6a   :  { %13395 = vst.sshfl [vmem:[#allocation5 + $0x8b] sm:$0x1 pattern:$0x73625140] %v5320_v24  ;;  %5973 = vmatprep.mubr.bf16.mxu0 %v19002_v8  ;;  %v5350_v28 = vrot.slane %v5322_v41, %v16003_v2  ;;  %v5352_v47 = vcombine.high %v5336_v37, %v5336_v37  ;;  %v5353_v22 = vcombine.high %v5343_v29, %v5343_v29  ;;  %5365 = vst [vmem:[#allocation5 + $0x4b] sm:$0x1] %v5351_v40 }
 0xc6b   :  { %13396 = vst.sshfl [vmem:[#allocation5 + $0xab] sm:$0x1 pattern:$0x73625140] %v5322_v41  ;;  %6014 = vmatprep.mubr.bf16.mxu1 %v19002_v8  ;;  %5944 = vmatpush1.bf16.msra.mxu0 %v16786_v1  ;;  %v474_v48 = vadd.f32 %v19039_v45, %v15970_v10  ;;  %v17120_v29 = vld [vmem:[%s18879_s4 + $0xe4] ss:$16 sps:$4 sm:$0xff]  }
 0xc6c   :  { %5985 = vmatpush1.bf16.msra.mxu1 %v16791_v4  ;;  %v5354_v26 = vcombine.high %v5350_v28, %v5350_v28  ;;  %5366 = vst [vmem:[#allocation5 + $0x6b] sm:$0x1] %v5353_v22  ;;  %5369 = vst [vmem:[#allocation5 + $0xcb] sm:$0x1] %v5352_v47  ;;  %5945 = vmatprep.subr.bf16.mxu0 %v16800_v57  ;;  %v19040_v57 = vld [vmem:[#allocation50_spill] sm:$0xff] }
 0xc6d   :  { %5986 = vmatprep.subr.bf16.mxu1 %v16805_v59  ;;  %v476_v59 = vadd.f32 %v19040_v57, %v15976_v9  ;;  %v17125_v40 = vld [vmem:[%s18879_s4 + $0xec] ss:$16 sps:$4 sm:$0xff]   ;;  %v17130_v28 = vld [vmem:[%s18879_s4 + $0xe0] ss:$16 sps:$4 sm:$0xff]   ;;  %v17135_v47 = vld [vmem:[%s18879_s4 + $0xe8] ss:$16 sps:$4 sm:$0xff]  }
 0xc6e   :  { %5370 = vst [vmem:[#allocation5 + $0xeb] sm:$0x1] %v5354_v26  ;;  %v17144_v22 = vld [vmem:[%s18879_s4 + $0xc4] ss:$16 sps:$4 sm:$0xff]   ;;  %v17149_v26 = vld [vmem:[%s18879_s4 + $0xcc] ss:$16 sps:$4 sm:$0xff]  }
 0xc6f   :  { %5946 = vmatpush1.bf16.msra.mxu0 %v16810_v58  ;;  %v17154_v45 = vld [vmem:[%s18879_s4 + $0xc0] ss:$16 sps:$4 sm:$0xff]  }
 0xc70   :  { %5987 = vmatpush1.bf16.msra.mxu1 %v16815_v60  ;;  %5947 = vmatprep.subr.bf16.mxu0 %v16824_v56  ;;  %v17178_v57 = vld [vmem:[%s18879_s4 + $0xa0] ss:$16 sps:$4 sm:$0xff]  }
 0xc71   :  { %5988 = vmatprep.subr.bf16.mxu1 %v16829_v53 }
 0xc73   :  { %5948 = vmatpush1.bf16.msra.mxu0 %v16834_v62 }
 0xc74   :  { %5989 = vmatpush1.bf16.msra.mxu1 %v16839_v55  ;;  %5949 = vmatprep.subr.bf16.mxu0 %v16853_v54 }
 0xc75   :  { %5990 = vmatprep.subr.bf16.mxu1 %v16863_v52 }
 0xc77   :  { %5950 = vmatpush1.bf16.msra.mxu0 %v16848_v63 }
 0xc78   :  { %5991 = vmatpush1.bf16.msra.mxu1 %v16858_v11  ;;  %5951 = vmatprep.subr.bf16.mxu0 %v16868_v17  ;;  %v19041_v17 = vld [vmem:[#allocation51_spill] sm:$0xff] }
 0xc79   :  { %5992 = vmatprep.subr.bf16.mxu1 %v16874_v49  ;;  %v669_v49 = vadd.f32 %v19041_v17, %v15988_v3  ;;  %v17250_v17 = vld [vmem:[%s18879_s4 + $0x40] ss:$16 sps:$4 sm:$0xff]  }
 0xc7b   :  { %5952 = vmatpush1.bf16.msra.mxu0 %v16882_v51 }
 0xc7c   :  { %5993 = vmatpush1.bf16.msra.mxu1 %v16887_v12  ;;  %5953 = vmatprep.subr.bf16.mxu0 %v16894_v50  ;;  %v19042_v12 = vld [vmem:[#allocation49_spill] sm:$0xff] }
 0xc7d   :  { %5994 = vmatprep.subr.bf16.mxu1 %v16899_v18  ;;  %v667_v50 = vadd.f32 %v19042_v12, %v15990_v61  ;;  %v17267_v12 = vld [vmem:[%s18879_s4 + $0x2c] ss:$16 sps:$4 sm:$0xff]  }
 0xc7f   :  { %5954 = vmatpush1.bf16.msra.mxu0 %v16906_v0 }
 0xc80   :  { %5995 = vmatpush1.bf16.msra.mxu1 %v16911_v6  ;;  %5955 = vmatprep.subr.bf16.mxu0 %v16918_v19 }
 0xc81   :  { %5996 = vmatprep.subr.bf16.mxu1 %v16923_v23 }
 0xc83   :  { %5956 = vmatpush1.bf16.msra.mxu0 %v16930_v5 }
 0xc84   :  { %5997 = vmatpush1.bf16.msra.mxu1 %v16935_v16  ;;  %6314 = vmatprep.subr.bf16.mxu0 %v17120_v29 }
 0xc85   :  { %6355 = vmatprep.subr.bf16.mxu1 %v17125_v40 }
 0xd26   :  { %v5602_v1 = vpop.f32.mrf.mxu0 }
 0xd27   :  { %v5643_v4 = vpop.f32.mrf.mxu1  ;;  %v5650_v58 = vadd.f32 %v5602_v1, %v474_v48  ;;  %v17159_v48 = vld [vmem:[%s18879_s4 + $0xc8] ss:$16 sps:$4 sm:$0xff]   ;;  %v17168_v1 = vld [vmem:[%s18879_s4 + $0xa4] ss:$16 sps:$4 sm:$0xff]  }
 0xd28   :  { %v5604_v60 = vpop.f32.mrf.mxu0  ;;  %v5652_v18 = vadd.f32 %v5643_v4, %v667_v50  ;;  %v17173_v4 = vld [vmem:[%s18879_s4 + $0xac] ss:$16 sps:$4 sm:$0xff]   ;;  %v17274_v50 = vld [vmem:[%s18879_s4 + $0x20] ss:$16 sps:$4 sm:$0xff]  }
 0xd29   :  { %v5645_v56 = vpop.f32.mrf.mxu1  ;;  %v13429_v53 = vmul.f32 -1.442695, %v5650_v58  ;;  %v5651_v62 = vadd.f32 %v5604_v60, %v476_v59  ;;  %v17183_v59 = vld [vmem:[%s18879_s4 + $0xa8] ss:$16 sps:$4 sm:$0xff]   ;;  %v17192_v58 = vld [vmem:[%s18879_s4 + $0x84] ss:$16 sps:$4 sm:$0xff]  }
 0xd2a   :  { %v5606_v55 = vpop.f32.mrf.mxu0  ;;  %v5653_v51 = vadd.f32 %v5645_v56, %v669_v49  ;;  %v17197_v60 = vld [vmem:[%s18879_s4 + $0x8c] ss:$16 sps:$4 sm:$0xff]   ;;  %v17202_v56 = vld [vmem:[%s18879_s4 + $0x80] ss:$16 sps:$4 sm:$0xff]   ;;  %v17255_v49 = vld [vmem:[%s18879_s4 + $0x48] ss:$16 sps:$4 sm:$0xff]  }
 0xd2b   :  { %v5647_v63 = vpop.f32.mrf.mxu1  ;;  %14872 = vpow2.f32 %v13429_v53  ;;  %v13430_v54 = vmul.f32 -1.442695, %v5651_v62  ;;  %v17207_v53 = vld [vmem:[%s18879_s4 + $0x88] ss:$16 sps:$4 sm:$0xff]   ;;  %v17216_v62 = vld [vmem:[%s18879_s4 + $0x60] ss:$16 sps:$4 sm:$0xff]  }
 0xd2c   :  { %v5607_v11 = vpop.f32.mrf.mxu0  ;;  %v13431_v0 = vmul.f32 -1.442695, %v5653_v51  ;;  %v17221_v55 = vld [vmem:[%s18879_s4 + $0x64] ss:$16 sps:$4 sm:$0xff]   ;;  %v17226_v63 = vld [vmem:[%s18879_s4 + $0x68] ss:$16 sps:$4 sm:$0xff]  }
 0xd2d   :  { %v5648_v52 = vpop.f32.mrf.mxu1  ;;  %14874 = vpow2.f32 %v13430_v54  ;;  %v17231_v54 = vld [vmem:[%s18879_s4 + $0x6c] ss:$16 sps:$4 sm:$0xff]   ;;  %v17236_v11 = vld [vmem:[%s18879_s4 + $0x44] ss:$16 sps:$4 sm:$0xff]  }
 0xd2e   :  { %14876 = vtanh.f32 %v5652_v18  ;;  %v17242_v52 = vld [vmem:[%s18879_s4 + $0x4c] ss:$16 sps:$4 sm:$0xff]   ;;  %v17262_v51 = vld [vmem:[%s18879_s4 + $0x24] ss:$16 sps:$4 sm:$0xff]   ;;  %v17279_v18 = vld [vmem:[%s18879_s4 + $0x28] ss:$16 sps:$4 sm:$0xff]  }
 0xd2f   :  { %14878 = vpow2.f32 %v13431_v0  ;;  %v17286_v0 = vld [vmem:[%s18879_s4 + $0x4] ss:$16 sps:$4 sm:$0xff]  }
 0xd38   :  { %v14873_v6 = vpop.eup %14872 }
 0xd39   :  { %v5657_v19 = vadd.f32 1.0, %v14873_v6  ;;  %v17291_v6 = vld [vmem:[%s18879_s4 + $0xc] ss:$16 sps:$4 sm:$0xff]  }
 0xd3a   :  { %v14875_v23 = vpop.eup %14874 }
 0xd3b   :  { %14880 = vrcp.f32 %v5657_v19  ;;  %v5663_v5 = vadd.f32 1.0, %v14875_v23  ;;  %v14877_v16 = vpop.eup %14876  ;;  %v17298_v19 = vld [vmem:[%s18879_s4] ss:$16 sps:$4 sm:$0xff]   ;;  %v17303_v23 = vld [vmem:[%s18879_s4 + $0x8] ss:$16 sps:$4 sm:$0xff]  }
 0xd3c   :  { %v14879_v43 = vpop.eup %14878 }
 0xd3d   :  { %14882 = vrcp.f32 %v5663_v5  ;;  %v5670_v7 = vadd.f32 1.0, %v14879_v43  ;;  %v19043_v5 = vld [vmem:[#allocation52_spill] sm:$0xff] }
 0xd3f   :  { %14884 = vrcp.f32 %v5670_v7 }
 0xd48   :  { %v14881_v35 = vpop.eup %14880 }
 0xd49   :  { %v5674_v39 = vmul.f32 %v14881_v35, %v14877_v16  ;;  %v478_v16 = vadd.f32 %v19043_v5, %v15970_v10 }
 0xd4a   :  { %v14883_v21 = vpop.eup %14882 }
 0xd4b   :  { %v5673_v15 = vmul.f32 %v14883_v21, %v17056_v14 }
 0xd4c   :  { %v14885_v20 = vpop.eup %14884 }
 0xd4d   :  { %v17106_v13 = vadd.f32 %v5674_v39, %v5673_v15  ;;  %v19044_v39 = vld [vmem:[#allocation54_spill] sm:$0xff] }
 0xd4e   :  { %v480_v21 = vadd.f32 %v19044_v39, %v15976_v9 }
 0xd4f   :  { %14886 = vtanh.f32 %v17106_v13 }
 0xd5c   :  { %v14887_v25 = vpop.eup %14886 }
 0xd5d   :  { %v5677_v33 = vmul.f32 %v14887_v25, %v14885_v20 }
 0xd5f   :  { %v5679_v31 = vcombine.high %v5677_v33, %v5677_v33  ;;  %v5686_v44 = vrot.slane %v5677_v33, %v16003_v2  ;;  %v5748_v30 = vpack.c.bf16 %v5677_v33, %v5677_v33 }
 0xd61   :  { %v5693_v38 = vrot.slane %v5679_v31, %v16003_v2  ;;  %v5694_v42 = vcombine.high %v5686_v44, %v5686_v44  ;;  %v5702_v27 = vrot.slane %v5686_v44, %v16003_v2  ;;  %13432 = vst.sshfl [vmem:[#allocation5 + $0xc] sm:$0x1 pattern:$0x73625140] %v5686_v44  ;;  %5974 = vmatmul.mubr.bf16.vlgmr.msra.gmra.mxu0 %v5748_v30 }
 0xd62   :  { %6015 = vmatmul.mubr.bf16.vlgmr.msra.gmra.mxu1 %v5748_v30  ;;  %6346 = vmatprep.mubr.bf16.mxu0 %v19002_v8 }
 0xd63   :  { %6387 = vmatprep.mubr.bf16.mxu1 %v19002_v8  ;;  %v5695_v14 = vcombine.high %v5693_v38, %v5693_v38  ;;  %v5709_v32 = vrot.slane %v5693_v38, %v16003_v2  ;;  %v5716_v36 = vrot.slane %v5694_v42, %v16003_v2  ;;  %v5724_v24 = vcombine.high %v5702_v27, %v5702_v27  ;;  %v19045_v27 = vld [vmem:[#allocation55_spill] sm:$0xff] }
 0xd64   :  { %13433 = vst.sshfl [vmem:[#allocation5 + $0x2c] sm:$0x1 pattern:$0x73625140] %v5694_v42  ;;  %6315 = vmatpush1.bf16.msra.mxu0 %v17130_v28  ;;  %6356 = vmatpush1.bf16.msra.mxu1 %v17135_v47 }
 0xd65   :  { %13434 = vst.sshfl [vmem:[#allocation5 + $0x8c] sm:$0x1 pattern:$0x73625140] %v5693_v38  ;;  %v5723_v46 = vrot.slane %v5695_v14, %v16003_v2  ;;  %v5725_v34 = vcombine.high %v5709_v32, %v5709_v32  ;;  %v5726_v41 = vcombine.high %v5716_v36, %v5716_v36  ;;  %5738 = vst [vmem:[#allocation5 + $0x4c] sm:$0x1] %v5724_v24  ;;  %6316 = vmatprep.subr.bf16.mxu0 %v17144_v22 }
 0xd66   :  { %13435 = vst.sshfl [vmem:[#allocation5 + $0xac] sm:$0x1 pattern:$0x73625140] %v5695_v14  ;;  %6357 = vmatprep.subr.bf16.mxu1 %v17149_v26  ;;  %v673_v14 = vadd.f32 %v19045_v27, %v15988_v3  ;;  %v19046_v36 = vld [vmem:[#allocation53_spill] sm:$0xff] }
 0xd67   :  { %v5727_v37 = vcombine.high %v5723_v46, %v5723_v46  ;;  %5739 = vst [vmem:[#allocation5 + $0x6c] sm:$0x1] %v5726_v41  ;;  %5742 = vst [vmem:[#allocation5 + $0xcc] sm:$0x1] %v5725_v34  ;;  %v671_v24 = vadd.f32 %v19046_v36, %v15990_v61 }
 0xd68   :  { %6317 = vmatpush1.bf16.msra.mxu0 %v17154_v45  ;;  %6358 = vmatpush1.bf16.msra.mxu1 %v17159_v48 }
 0xd69   :  { %5743 = vst [vmem:[#allocation5 + $0xec] sm:$0x1] %v5727_v37  ;;  %6318 = vmatprep.subr.bf16.mxu0 %v17168_v1  ;;  %6359 = vmatprep.subr.bf16.mxu1 %v17173_v4 }
 0xd6c   :  { %6319 = vmatpush1.bf16.msra.mxu0 %v17178_v57  ;;  %6360 = vmatpush1.bf16.msra.mxu1 %v17183_v59 }
 0xd6d   :  { %6320 = vmatprep.subr.bf16.mxu0 %v17192_v58  ;;  %6361 = vmatprep.subr.bf16.mxu1 %v17197_v60 }
 0xd70   :  { %6321 = vmatpush1.bf16.msra.mxu0 %v17202_v56  ;;  %6362 = vmatpush1.bf16.msra.mxu1 %v17207_v53 }
 0xd71   :  { %6322 = vmatprep.subr.bf16.mxu0 %v17221_v55  ;;  %6363 = vmatprep.subr.bf16.mxu1 %v17231_v54 }
 0xd74   :  { %6323 = vmatpush1.bf16.msra.mxu0 %v17216_v62  ;;  %6364 = vmatpush1.bf16.msra.mxu1 %v17226_v63 }
 0xd75   :  { %6324 = vmatprep.subr.bf16.mxu0 %v17236_v11  ;;  %6365 = vmatprep.subr.bf16.mxu1 %v17242_v52 }
 0xd78   :  { %6325 = vmatpush1.bf16.msra.mxu0 %v17250_v17  ;;  %6366 = vmatpush1.bf16.msra.mxu1 %v17255_v49 }
 0xd79   :  { %6326 = vmatprep.subr.bf16.mxu0 %v17262_v51  ;;  %6367 = vmatprep.subr.bf16.mxu1 %v17267_v12 }
 0xd7c   :  { %6327 = vmatpush1.bf16.msra.mxu0 %v17274_v50  ;;  %6368 = vmatpush1.bf16.msra.mxu1 %v17279_v18 }
 0xd7d   :  { %6328 = vmatprep.subr.bf16.mxu0 %v17286_v0  ;;  %6369 = vmatprep.subr.bf16.mxu1 %v17291_v6 }
 0xd80   :  { %6329 = vmatpush1.bf16.msra.mxu0 %v17298_v19  ;;  %6370 = vmatpush1.bf16.msra.mxu1 %v17303_v23 }
 0xd81   :  { %6687 = vmatprep.subr.bf16.mxu0 %v17120_v29  ;;  %6728 = vmatprep.subr.bf16.mxu1 %v17125_v40 }
 0xe21   :  { %v5975_v43 = vpop.f32.mrf.mxu0 }
 0xe22   :  { %v6016_v35 = vpop.f32.mrf.mxu1  ;;  %v6023_v7 = vadd.f32 %v5975_v43, %v478_v16 }
 0xe23   :  { %v5977_v15 = vpop.f32.mrf.mxu0  ;;  %v6025_v46 = vadd.f32 %v6016_v35, %v671_v24 }
 0xe24   :  { %v6018_v20 = vpop.f32.mrf.mxu1  ;;  %v13468_v25 = vmul.f32 -1.442695, %v6023_v7  ;;  %v6024_v33 = vadd.f32 %v5977_v15, %v480_v21 }
 0xe25   :  { %v5979_v31 = vpop.f32.mrf.mxu0  ;;  %v6026_v32 = vadd.f32 %v6018_v20, %v673_v14 }
 0xe26   :  { %v6020_v44 = vpop.f32.mrf.mxu1  ;;  %14888 = vpow2.f32 %v13468_v25  ;;  %v13469_v30 = vmul.f32 -1.442695, %v6024_v33 }
 0xe27   :  { %v5980_v38 = vpop.f32.mrf.mxu0  ;;  %v13470_v34 = vmul.f32 -1.442695, %v6026_v32 }
 0xe28   :  { %v6021_v42 = vpop.f32.mrf.mxu1  ;;  %14890 = vpow2.f32 %v13469_v30 }
 0xe29   :  { %14892 = vtanh.f32 %v6025_v46 }
 0xe2a   :  { %14894 = vpow2.f32 %v13470_v34 }
 0xe33   :  { %v14889_v41 = vpop.eup %14888 }
 0xe34   :  { %v6030_v37 = vadd.f32 1.0, %v14889_v41 }
 0xe35   :  { %v14891_v5 = vpop.eup %14890 }
 0xe36   :  { %14896 = vrcp.f32 %v6030_v37  ;;  %v6036_v16 = vadd.f32 1.0, %v14891_v5  ;;  %v14893_v43 = vpop.eup %14892 }
 0xe37   :  { %v14895_v39 = vpop.eup %14894 }
 0xe38   :  { %14898 = vrcp.f32 %v6036_v16  ;;  %v6043_v25 = vadd.f32 1.0, %v14895_v39  ;;  %v19047_v16 = vld [vmem:[#allocation56_spill] sm:$0xff] }
 0xe3a   :  { %14900 = vrcp.f32 %v6043_v25 }
 0xe43   :  { %v14897_v21 = vpop.eup %14896 }
 0xe44   :  { %v6047_v7 = vmul.f32 %v14897_v21, %v14893_v43  ;;  %v484_v43 = vadd.f32 %v19047_v16, %v15970_v10 }
 0xe45   :  { %v14899_v15 = vpop.eup %14898 }
 0xe46   :  { %v6046_v20 = vmul.f32 %v14899_v15, %v17106_v13 }
 0xe47   :  { %v14901_v35 = vpop.eup %14900 }
 0xe48   :  { %v17320_v33 = vadd.f32 %v6047_v7, %v6046_v20  ;;  %v19048_v7 = vld [vmem:[#allocation58_spill] sm:$0xff] }
 0xe49   :  { %v486_v15 = vadd.f32 %v19048_v7, %v15976_v9 }
 0xe4a   :  { %14902 = vtanh.f32 %v17320_v33 }
 0xe57   :  { %v14903_v31 = vpop.eup %14902 }
 0xe58   :  { %v6050_v44 = vmul.f32 %v14903_v31, %v14901_v35 }
 0xe5a   :  { %v6052_v30 = vcombine.high %v6050_v44, %v6050_v44  ;;  %v6059_v38 = vrot.slane %v6050_v44, %v16003_v2  ;;  %v6121_v42 = vpack.c.bf16 %v6050_v44, %v6050_v44 }
 0xe5c   :  { %v6066_v27 = vrot.slane %v6052_v30, %v16003_v2  ;;  %v6067_v14 = vcombine.high %v6059_v38, %v6059_v38  ;;  %v6075_v32 = vrot.slane %v6059_v38, %v16003_v2  ;;  %13471 = vst.sshfl [vmem:[#allocation5 + $0xd] sm:$0x1 pattern:$0x73625140] %v6059_v38  ;;  %6347 = vmatmul.mubr.bf16.vlgmr.msra.gmra.mxu0 %v6121_v42 }
 0xe5d   :  { %6388 = vmatmul.mubr.bf16.vlgmr.msra.gmra.mxu1 %v6121_v42  ;;  %6688 = vmatpush1.bf16.msra.mxu0 %v17130_v28 }
 0xe5e   :  { %6729 = vmatpush1.bf16.msra.mxu1 %v17135_v47  ;;  %v6068_v13 = vcombine.high %v6066_v27, %v6066_v27  ;;  %v6082_v36 = vrot.slane %v6066_v27, %v16003_v2  ;;  %v6089_v24 = vrot.slane %v6067_v14, %v16003_v2  ;;  %v6097_v46 = vcombine.high %v6075_v32, %v6075_v32  ;;  %v19049_v32 = vld [vmem:[#allocation59_spill] sm:$0xff] }
 0xe5f   :  { %13472 = vst.sshfl [vmem:[#allocation5 + $0x2d] sm:$0x1 pattern:$0x73625140] %v6067_v14  ;;  %6689 = vmatprep.subr.bf16.mxu0 %v17144_v22  ;;  %6730 = vmatprep.subr.bf16.mxu1 %v17149_v26 }
 0xe60   :  { %13473 = vst.sshfl [vmem:[#allocation5 + $0x8d] sm:$0x1 pattern:$0x73625140] %v6066_v27  ;;  %6719 = vmatprep.mubr.bf16.mxu0 %v19002_v8  ;;  %v6096_v34 = vrot.slane %v6068_v13, %v16003_v2  ;;  %v6098_v41 = vcombine.high %v6082_v36, %v6082_v36  ;;  %v6099_v37 = vcombine.high %v6089_v24, %v6089_v24  ;;  %6111 = vst [vmem:[#allocation5 + $0x4d] sm:$0x1] %v6097_v46 }
 0xe61   :  { %13474 = vst.sshfl [vmem:[#allocation5 + $0xad] sm:$0x1 pattern:$0x73625140] %v6068_v13  ;;  %6760 = vmatprep.mubr.bf16.mxu1 %v19002_v8  ;;  %6690 = vmatpush1.bf16.msra.mxu0 %v17154_v45  ;;  %v679_v13 = vadd.f32 %v19049_v32, %v15988_v3  ;;  %v19050_v24 = vld [vmem:[#allocation57_spill] sm:$0xff] }
 0xe62   :  { %6731 = vmatpush1.bf16.msra.mxu1 %v17159_v48  ;;  %v6100_v5 = vcombine.high %v6096_v34, %v6096_v34  ;;  %6112 = vst [vmem:[#allocation5 + $0x6d] sm:$0x1] %v6099_v37  ;;  %6115 = vst [vmem:[#allocation5 + $0xcd] sm:$0x1] %v6098_v41  ;;  %6691 = vmatprep.subr.bf16.mxu0 %v17168_v1  ;;  %v677_v46 = vadd.f32 %v19050_v24, %v15990_v61 }
 0xe63   :  { %6732 = vmatprep.subr.bf16.mxu1 %v17173_v4 }
 0xe64   :  { %6116 = vst [vmem:[#allocation5 + $0xed] sm:$0x1] %v6100_v5 }
 0xe65   :  { %6692 = vmatpush1.bf16.msra.mxu0 %v17178_v57 }
 0xe66   :  { %6733 = vmatpush1.bf16.msra.mxu1 %v17183_v59  ;;  %6693 = vmatprep.subr.bf16.mxu0 %v17192_v58 }
 0xe67   :  { %6734 = vmatprep.subr.bf16.mxu1 %v17197_v60 }
 0xe69   :  { %6694 = vmatpush1.bf16.msra.mxu0 %v17202_v56 }
 0xe6a   :  { %6735 = vmatpush1.bf16.msra.mxu1 %v17207_v53  ;;  %6695 = vmatprep.subr.bf16.mxu0 %v17221_v55 }
 0xe6b   :  { %6736 = vmatprep.subr.bf16.mxu1 %v17231_v54 }
 0xe6d   :  { %6696 = vmatpush1.bf16.msra.mxu0 %v17216_v62 }
 0xe6e   :  { %6737 = vmatpush1.bf16.msra.mxu1 %v17226_v63  ;;  %6697 = vmatprep.subr.bf16.mxu0 %v17236_v11 }
 0xe6f   :  { %6738 = vmatprep.subr.bf16.mxu1 %v17242_v52 }
 0xe71   :  { %6698 = vmatpush1.bf16.msra.mxu0 %v17250_v17 }
 0xe72   :  { %6739 = vmatpush1.bf16.msra.mxu1 %v17255_v49  ;;  %6699 = vmatprep.subr.bf16.mxu0 %v17262_v51 }
 0xe73   :  { %6740 = vmatprep.subr.bf16.mxu1 %v17267_v12 }
 0xe75   :  { %6700 = vmatpush1.bf16.msra.mxu0 %v17274_v50 }
 0xe76   :  { %6741 = vmatpush1.bf16.msra.mxu1 %v17279_v18  ;;  %6701 = vmatprep.subr.bf16.mxu0 %v17286_v0 }
 0xe77   :  { %6742 = vmatprep.subr.bf16.mxu1 %v17291_v6 }
 0xe79   :  { %6702 = vmatpush1.bf16.msra.mxu0 %v17298_v19 }
 0xe7a   :  { %6743 = vmatpush1.bf16.msra.mxu1 %v17303_v23  ;;  %7060 = vmatprep.subr.bf16.mxu0 %v17120_v29 }
 0xe7b   :  { %7101 = vmatprep.subr.bf16.mxu1 %v17125_v40 }
 0xf1c   :  { %v6348_v39 = vpop.f32.mrf.mxu0 }
 0xf1d   :  { %v6389_v21 = vpop.f32.mrf.mxu1  ;;  %v6396_v25 = vadd.f32 %v6348_v39, %v484_v43 }
 0xf1e   :  { %v6350_v20 = vpop.f32.mrf.mxu0  ;;  %v6398_v34 = vadd.f32 %v6389_v21, %v677_v46 }
 0xf1f   :  { %v6391_v35 = vpop.f32.mrf.mxu1  ;;  %v13507_v31 = vmul.f32 -1.442695, %v6396_v25  ;;  %v6397_v44 = vadd.f32 %v6350_v20, %v486_v15 }
 0xf20   :  { %v6352_v30 = vpop.f32.mrf.mxu0  ;;  %v6399_v36 = vadd.f32 %v6391_v35, %v679_v13 }
 0xf21   :  { %v6393_v38 = vpop.f32.mrf.mxu1  ;;  %14904 = vpow2.f32 %v13507_v31  ;;  %v13508_v42 = vmul.f32 -1.442695, %v6397_v44 }
 0xf22   :  { %v6353_v27 = vpop.f32.mrf.mxu0  ;;  %v13509_v41 = vmul.f32 -1.442695, %v6399_v36 }
 0xf23   :  { %v6394_v14 = vpop.f32.mrf.mxu1  ;;  %14906 = vpow2.f32 %v13508_v42 }
 0xf24   :  { %14908 = vtanh.f32 %v6398_v34 }
 0xf25   :  { %14910 = vpow2.f32 %v13509_v41 }
 0xf2e   :  { %v14905_v37 = vpop.eup %14904 }
 0xf2f   :  { %v6403_v5 = vadd.f32 1.0, %v14905_v37 }
 0xf30   :  { %v14907_v16 = vpop.eup %14906 }
 0xf31   :  { %14912 = vrcp.f32 %v6403_v5  ;;  %v6409_v43 = vadd.f32 1.0, %v14907_v16  ;;  %v14909_v39 = vpop.eup %14908 }
 0xf32   :  { %v14911_v7 = vpop.eup %14910 }
 0xf33   :  { %14914 = vrcp.f32 %v6409_v43  ;;  %v6416_v31 = vadd.f32 1.0, %v14911_v7  ;;  %v19051_v43 = vld [vmem:[#allocation60_spill] sm:$0xff] }
 0xf35   :  { %14916 = vrcp.f32 %v6416_v31 }
 0xf3e   :  { %v14913_v15 = vpop.eup %14912 }
 0xf3f   :  { %v6420_v25 = vmul.f32 %v14913_v15, %v14909_v39  ;;  %v488_v39 = vadd.f32 %v19051_v43, %v15970_v10 }
 0xf40   :  { %v14915_v20 = vpop.eup %14914 }
 0xf41   :  { %v6419_v35 = vmul.f32 %v14915_v20, %v17320_v33 }
 0xf42   :  { %v14917_v21 = vpop.eup %14916 }
 0xf43   :  { %v17372_v44 = vadd.f32 %v6420_v25, %v6419_v35  ;;  %v19052_v25 = vld [vmem:[#allocation62_spill] sm:$0xff] }
 0xf44   :  { %v490_v20 = vadd.f32 %v19052_v25, %v15976_v9 }
 0xf45   :  { %14918 = vtanh.f32 %v17372_v44 }
 0xf52   :  { %v14919_v30 = vpop.eup %14918 }
 0xf53   :  { %v6423_v38 = vmul.f32 %v14919_v30, %v14917_v21 }
 0xf55   :  { %v6425_v42 = vcombine.high %v6423_v38, %v6423_v38  ;;  %v6432_v27 = vrot.slane %v6423_v38, %v16003_v2  ;;  %v6494_v14 = vpack.c.bf16 %v6423_v38, %v6423_v38 }
 0xf57   :  { %v6439_v32 = vrot.slane %v6425_v42, %v16003_v2  ;;  %v6440_v13 = vcombine.high %v6432_v27, %v6432_v27  ;;  %v6448_v36 = vrot.slane %v6432_v27, %v16003_v2  ;;  %13510 = vst.sshfl [vmem:[#allocation5 + $0xe] sm:$0x1 pattern:$0x73625140] %v6432_v27  ;;  %6720 = vmatmul.mubr.bf16.vlgmr.msra.gmra.mxu0 %v6494_v14 }
 0xf58   :  { %6761 = vmatmul.mubr.bf16.vlgmr.msra.gmra.mxu1 %v6494_v14  ;;  %7061 = vmatpush1.bf16.msra.mxu0 %v17130_v28 }
 0xf59   :  { %7102 = vmatpush1.bf16.msra.mxu1 %v17135_v47  ;;  %v6441_v33 = vcombine.high %v6439_v32, %v6439_v32  ;;  %v6455_v24 = vrot.slane %v6439_v32, %v16003_v2  ;;  %v6462_v46 = vrot.slane %v6440_v13, %v16003_v2  ;;  %v6470_v34 = vcombine.high %v6448_v36, %v6448_v36 }
 0xf5a   :  { %13511 = vst.sshfl [vmem:[#allocation5 + $0x2e] sm:$0x1 pattern:$0x73625140] %v6440_v13  ;;  %7062 = vmatprep.subr.bf16.mxu0 %v17144_v22  ;;  %7103 = vmatprep.subr.bf16.mxu1 %v17149_v26 }
 0xf5b   :  { %13512 = vst.sshfl [vmem:[#allocation5 + $0x8e] sm:$0x1 pattern:$0x73625140] %v6439_v32  ;;  %7092 = vmatprep.mubr.bf16.mxu0 %v19002_v8  ;;  %v6469_v41 = vrot.slane %v6441_v33, %v16003_v2  ;;  %v6471_v37 = vcombine.high %v6455_v24, %v6455_v24  ;;  %v6472_v5 = vcombine.high %v6462_v46, %v6462_v46  ;;  %6484 = vst [vmem:[#allocation5 + $0x4e] sm:$0x1] %v6470_v34 }
 0xf5c   :  { %13513 = vst.sshfl [vmem:[#allocation5 + $0xae] sm:$0x1 pattern:$0x73625140] %v6441_v33  ;;  %7133 = vmatprep.mubr.bf16.mxu1 %v19002_v8  ;;  %7063 = vmatpush1.bf16.msra.mxu0 %v17154_v45  ;;  %v19054_v33 = vld [vmem:[#allocation61_spill] sm:$0xff] }
 0xf5d   :  { %7104 = vmatpush1.bf16.msra.mxu1 %v17159_v48  ;;  %v6473_v16 = vcombine.high %v6469_v41, %v6469_v41  ;;  %6485 = vst [vmem:[#allocation5 + $0x6e] sm:$0x1] %v6472_v5  ;;  %6488 = vst [vmem:[#allocation5 + $0xce] sm:$0x1] %v6471_v37  ;;  %7064 = vmatprep.subr.bf16.mxu0 %v17168_v1  ;;  %v681_v24 = vadd.f32 %v19054_v33, %v15990_v61 }
 0xf5e   :  { %7105 = vmatprep.subr.bf16.mxu1 %v17173_v4 }
 0xf5f   :  { %6489 = vst [vmem:[#allocation5 + $0xee] sm:$0x1] %v6473_v16 }
 0xf60   :  { %7065 = vmatpush1.bf16.msra.mxu0 %v17178_v57 }
 0xf61   :  { %7106 = vmatpush1.bf16.msra.mxu1 %v17183_v59  ;;  %7066 = vmatprep.subr.bf16.mxu0 %v17192_v58 }
 0xf62   :  { %7107 = vmatprep.subr.bf16.mxu1 %v17197_v60 }
 0xf64   :  { %7067 = vmatpush1.bf16.msra.mxu0 %v17202_v56 }
 0xf65   :  { %7108 = vmatpush1.bf16.msra.mxu1 %v17207_v53  ;;  %7068 = vmatprep.subr.bf16.mxu0 %v17221_v55 }
 0xf66   :  { %7109 = vmatprep.subr.bf16.mxu1 %v17231_v54 }
 0xf68   :  { %7069 = vmatpush1.bf16.msra.mxu0 %v17216_v62 }
 0xf69   :  { %7110 = vmatpush1.bf16.msra.mxu1 %v17226_v63  ;;  %7070 = vmatprep.subr.bf16.mxu0 %v17236_v11 }
 0xf6a   :  { %7111 = vmatprep.subr.bf16.mxu1 %v17242_v52 }
 0xf6c   :  { %7071 = vmatpush1.bf16.msra.mxu0 %v17250_v17 }
 0xf6d   :  { %7112 = vmatpush1.bf16.msra.mxu1 %v17255_v49  ;;  %7072 = vmatprep.subr.bf16.mxu0 %v17262_v51 }
 0xf6e   :  { %7113 = vmatprep.subr.bf16.mxu1 %v17267_v12 }
 0xf70   :  { %7073 = vmatpush1.bf16.msra.mxu0 %v17274_v50 }
 0xf71   :  { %7114 = vmatpush1.bf16.msra.mxu1 %v17279_v18  ;;  %7074 = vmatprep.subr.bf16.mxu0 %v17286_v0 }
 0xf72   :  { %7115 = vmatprep.subr.bf16.mxu1 %v17291_v6 }
 0xf74   :  { %7075 = vmatpush1.bf16.msra.mxu0 %v17298_v19 }
 0xf75   :  { %7116 = vmatpush1.bf16.msra.mxu1 %v17303_v23  ;;  %7433 = vmatprep.subr.bf16.mxu0 %v17120_v29 }
 0xf76   :  { %7474 = vmatprep.subr.bf16.mxu1 %v17125_v40  ;;  %v19053_v40 = vld [vmem:[#allocation63_spill] sm:$0xff] }
 0xf77   :  { %v683_v13 = vadd.f32 %v19053_v40, %v15988_v3 }
0x1017   :  { %v6721_v7 = vpop.f32.mrf.mxu0 }
0x1018   :  { %v6762_v15 = vpop.f32.mrf.mxu1  ;;  %v6769_v31 = vadd.f32 %v6721_v7, %v488_v39 }
0x1019   :  { %v6723_v35 = vpop.f32.mrf.mxu0  ;;  %v6771_v46 = vadd.f32 %v6762_v15, %v681_v24 }
0x101a   :  { %v6764_v21 = vpop.f32.mrf.mxu1  ;;  %v13546_v30 = vmul.f32 -1.442695, %v6769_v31  ;;  %v6770_v38 = vadd.f32 %v6723_v35, %v490_v20 }
0x101b   :  { %v6725_v42 = vpop.f32.mrf.mxu0  ;;  %v6772_v36 = vadd.f32 %v6764_v21, %v683_v13 }
0x101c   :  { %v6766_v27 = vpop.f32.mrf.mxu1  ;;  %14920 = vpow2.f32 %v13546_v30  ;;  %v13547_v14 = vmul.f32 -1.442695, %v6770_v38 }
0x101d   :  { %v6726_v29 = vpop.f32.mrf.mxu0  ;;  %v13548_v34 = vmul.f32 -1.442695, %v6772_v36 }
0x101e   :  { %v6767_v32 = vpop.f32.mrf.mxu1  ;;  %14922 = vpow2.f32 %v13547_v14 }
0x101f   :  { %14924 = vtanh.f32 %v6771_v46 }
0x1020   :  { %14926 = vpow2.f32 %v13548_v34 }
0x1029   :  { %v14921_v41 = vpop.eup %14920 }
0x102a   :  { %v6776_v37 = vadd.f32 1.0, %v14921_v41 }
0x102b   :  { %v14923_v5 = vpop.eup %14922 }
0x102c   :  { %14928 = vrcp.f32 %v6776_v37  ;;  %v6782_v16 = vadd.f32 1.0, %v14923_v5  ;;  %v14925_v43 = vpop.eup %14924 }
0x102d   :  { %v14927_v39 = vpop.eup %14926 }
0x102e   :  { %14930 = vrcp.f32 %v6782_v16  ;;  %v6789_v31 = vadd.f32 1.0, %v14927_v39 }
0x1030   :  { %14932 = vrcp.f32 %v6789_v31 }
0x1039   :  { %v14929_v7 = vpop.eup %14928 }
0x103a   :  { %v6793_v25 = vmul.f32 %v14929_v7, %v14925_v43 }
0x103b   :  { %v14931_v20 = vpop.eup %14930 }
0x103c   :  { %v6792_v35 = vmul.f32 %v14931_v20, %v17372_v44 }
0x103d   :  { %v14933_v15 = vpop.eup %14932 }
0x103e   :  { %v17424_v21 = vadd.f32 %v6793_v25, %v6792_v35 }
0x1040   :  { %14934 = vtanh.f32 %v17424_v21 }
0x104d   :  { %v14935_v30 = vpop.eup %14934 }
0x104e   :  { %v6796_v38 = vmul.f32 %v14935_v30, %v14933_v15 }
0x1050   :  { %v6798_v42 = vcombine.high %v6796_v38, %v6796_v38  ;;  %v6805_v27 = vrot.slane %v6796_v38, %v16003_v2  ;;  %v6867_v14 = vpack.c.bf16 %v6796_v38, %v6796_v38 }
0x1052   :  { %v6812_v29 = vrot.slane %v6798_v42, %v16003_v2  ;;  %v6813_v32 = vcombine.high %v6805_v27, %v6805_v27  ;;  %v6821_v40 = vrot.slane %v6805_v27, %v16003_v2  ;;  %13549 = vst.sshfl [vmem:[#allocation5 + $0xf] sm:$0x1 pattern:$0x73625140] %v6805_v27  ;;  %7093 = vmatmul.mubr.bf16.vlgmr.msra.gmra.mxu0 %v6867_v14 }
0x1053   :  { %7134 = vmatmul.mubr.bf16.vlgmr.msra.gmra.mxu1 %v6867_v14  ;;  %7434 = vmatpush1.bf16.msra.mxu0 %v17130_v28 }
0x1054   :  { %7475 = vmatpush1.bf16.msra.mxu1 %v17135_v47  ;;  %v6814_v44 = vcombine.high %v6812_v29, %v6812_v29  ;;  %v6828_v13 = vrot.slane %v6812_v29, %v16003_v2  ;;  %v6835_v36 = vrot.slane %v6813_v32, %v16003_v2  ;;  %v6843_v33 = vcombine.high %v6821_v40, %v6821_v40 }
0x1055   :  { %13550 = vst.sshfl [vmem:[#allocation5 + $0x2f] sm:$0x1 pattern:$0x73625140] %v6813_v32  ;;  %7435 = vmatprep.subr.bf16.mxu0 %v17144_v22  ;;  %7476 = vmatprep.subr.bf16.mxu1 %v17149_v26  ;;  %v19055_v22 = vld [vmem:[#allocation64_spill] sm:$0xff] }
0x1056   :  { %13551 = vst.sshfl [vmem:[#allocation5 + $0x8f] sm:$0x1 pattern:$0x73625140] %v6812_v29  ;;  %7465 = vmatprep.mubr.bf16.mxu0 %v19002_v8  ;;  %v6842_v24 = vrot.slane %v6814_v44, %v16003_v2  ;;  %v6844_v46 = vcombine.high %v6828_v13, %v6828_v13  ;;  %v6845_v28 = vcombine.high %v6835_v36, %v6835_v36  ;;  %6857 = vst [vmem:[#allocation5 + $0x4f] sm:$0x1] %v6843_v33 }
0x1057   :  { %13552 = vst.sshfl [vmem:[#allocation5 + $0xaf] sm:$0x1 pattern:$0x73625140] %v6814_v44  ;;  %7506 = vmatprep.mubr.bf16.mxu1 %v19002_v8  ;;  %7436 = vmatpush1.bf16.msra.mxu0 %v17154_v45  ;;  %v494_v26 = vadd.f32 %v19055_v22, %v15970_v10  ;;  %v17488_v36 = vld [vmem:[%s18879_s4 + $0xe4] ss:$16 sps:$4 sm:$0xff]  }
0x1058   :  { %7477 = vmatpush1.bf16.msra.mxu1 %v17159_v48  ;;  %v6846_v47 = vcombine.high %v6842_v24, %v6842_v24  ;;  %6858 = vst [vmem:[#allocation5 + $0x6f] sm:$0x1] %v6845_v28  ;;  %6861 = vst [vmem:[#allocation5 + $0xcf] sm:$0x1] %v6844_v46  ;;  %7437 = vmatprep.subr.bf16.mxu0 %v17168_v1  ;;  %v19056_v1 = vld [vmem:[#allocation66_spill] sm:$0xff] }
0x1059   :  { %7478 = vmatprep.subr.bf16.mxu1 %v17173_v4  ;;  %v496_v4 = vadd.f32 %v19056_v1, %v15976_v9  ;;  %v17493_v33 = vld [vmem:[%s18879_s4 + $0xec] ss:$16 sps:$4 sm:$0xff]   ;;  %v17498_v24 = vld [vmem:[%s18879_s4 + $0xe0] ss:$16 sps:$4 sm:$0xff]   ;;  %v17503_v46 = vld [vmem:[%s18879_s4 + $0xe8] ss:$16 sps:$4 sm:$0xff]  }
0x105a   :  { %6862 = vst [vmem:[#allocation5 + $0xef] sm:$0x1] %v6846_v47  ;;  %v17512_v28 = vld [vmem:[%s18879_s4 + $0xc4] ss:$16 sps:$4 sm:$0xff]   ;;  %v17517_v47 = vld [vmem:[%s18879_s4 + $0xcc] ss:$16 sps:$4 sm:$0xff]  }
0x105b   :  { %7438 = vmatpush1.bf16.msra.mxu0 %v17178_v57  ;;  %v17522_v22 = vld [vmem:[%s18879_s4 + $0xc0] ss:$16 sps:$4 sm:$0xff]  }
0x105c   :  { %7479 = vmatpush1.bf16.msra.mxu1 %v17183_v59  ;;  %7439 = vmatprep.subr.bf16.mxu0 %v17192_v58  ;;  %v17546_v1 = vld [vmem:[%s18879_s4 + $0xa0] ss:$16 sps:$4 sm:$0xff]  }
0x105d   :  { %7480 = vmatprep.subr.bf16.mxu1 %v17197_v60 }
0x105f   :  { %7440 = vmatpush1.bf16.msra.mxu0 %v17202_v56 }
0x1060   :  { %7481 = vmatpush1.bf16.msra.mxu1 %v17207_v53  ;;  %7441 = vmatprep.subr.bf16.mxu0 %v17221_v55 }
0x1061   :  { %7482 = vmatprep.subr.bf16.mxu1 %v17231_v54 }
0x1063   :  { %7442 = vmatpush1.bf16.msra.mxu0 %v17216_v62 }
0x1064   :  { %7483 = vmatpush1.bf16.msra.mxu1 %v17226_v63  ;;  %7443 = vmatprep.subr.bf16.mxu0 %v17236_v11  ;;  %v19057_v11 = vld [vmem:[#allocation67_spill] sm:$0xff] }
0x1065   :  { %7484 = vmatprep.subr.bf16.mxu1 %v17242_v52  ;;  %v689_v52 = vadd.f32 %v19057_v11, %v15988_v3  ;;  %v17618_v11 = vld [vmem:[%s18879_s4 + $0x40] ss:$16 sps:$4 sm:$0xff]  }
0x1067   :  { %7444 = vmatpush1.bf16.msra.mxu0 %v17250_v17 }
0x1068   :  { %7485 = vmatpush1.bf16.msra.mxu1 %v17255_v49  ;;  %7445 = vmatprep.subr.bf16.mxu0 %v17262_v51  ;;  %v19058_v49 = vld [vmem:[#allocation65_spill] sm:$0xff] }
0x1069   :  { %7486 = vmatprep.subr.bf16.mxu1 %v17267_v12  ;;  %v687_v51 = vadd.f32 %v19058_v49, %v15990_v61  ;;  %v17635_v49 = vld [vmem:[%s18879_s4 + $0x2c] ss:$16 sps:$4 sm:$0xff]  }
0x106b   :  { %7446 = vmatpush1.bf16.msra.mxu0 %v17274_v50 }
0x106c   :  { %7487 = vmatpush1.bf16.msra.mxu1 %v17279_v18  ;;  %7447 = vmatprep.subr.bf16.mxu0 %v17286_v0 }
0x106d   :  { %7488 = vmatprep.subr.bf16.mxu1 %v17291_v6 }
0x106f   :  { %7448 = vmatpush1.bf16.msra.mxu0 %v17298_v19 }
0x1070   :  { %7489 = vmatpush1.bf16.msra.mxu1 %v17303_v23  ;;  %7806 = vmatprep.subr.bf16.mxu0 %v17488_v36 }
0x1071   :  { %7847 = vmatprep.subr.bf16.mxu1 %v17493_v33 }
0x1112   :  { %v7094_v45 = vpop.f32.mrf.mxu0 }
0x1113   :  { %v7135_v48 = vpop.f32.mrf.mxu1  ;;  %v7142_v57 = vadd.f32 %v7094_v45, %v494_v26  ;;  %v17527_v26 = vld [vmem:[%s18879_s4 + $0xc8] ss:$16 sps:$4 sm:$0xff]   ;;  %v17536_v45 = vld [vmem:[%s18879_s4 + $0xa4] ss:$16 sps:$4 sm:$0xff]  }
0x1114   :  { %v7096_v59 = vpop.f32.mrf.mxu0  ;;  %v7144_v12 = vadd.f32 %v7135_v48, %v687_v51  ;;  %v17541_v48 = vld [vmem:[%s18879_s4 + $0xac] ss:$16 sps:$4 sm:$0xff]   ;;  %v17642_v51 = vld [vmem:[%s18879_s4 + $0x20] ss:$16 sps:$4 sm:$0xff]  }
0x1115   :  { %v7137_v58 = vpop.f32.mrf.mxu1  ;;  %v13585_v60 = vmul.f32 -1.442695, %v7142_v57  ;;  %v7143_v56 = vadd.f32 %v7096_v59, %v496_v4  ;;  %v17551_v4 = vld [vmem:[%s18879_s4 + $0xa8] ss:$16 sps:$4 sm:$0xff]   ;;  %v17560_v57 = vld [vmem:[%s18879_s4 + $0x84] ss:$16 sps:$4 sm:$0xff]  }
0x1116   :  { %v7098_v53 = vpop.f32.mrf.mxu0  ;;  %v7145_v17 = vadd.f32 %v7137_v58, %v689_v52  ;;  %v17565_v59 = vld [vmem:[%s18879_s4 + $0x8c] ss:$16 sps:$4 sm:$0xff]   ;;  %v17570_v58 = vld [vmem:[%s18879_s4 + $0x80] ss:$16 sps:$4 sm:$0xff]   ;;  %v17623_v52 = vld [vmem:[%s18879_s4 + $0x48] ss:$16 sps:$4 sm:$0xff]  }
0x1117   :  { %v7139_v62 = vpop.f32.mrf.mxu1  ;;  %14936 = vpow2.f32 %v13585_v60  ;;  %v13586_v55 = vmul.f32 -1.442695, %v7143_v56  ;;  %v17575_v60 = vld [vmem:[%s18879_s4 + $0x88] ss:$16 sps:$4 sm:$0xff]   ;;  %v17584_v56 = vld [vmem:[%s18879_s4 + $0x60] ss:$16 sps:$4 sm:$0xff]  }
0x1118   :  { %v7099_v63 = vpop.f32.mrf.mxu0  ;;  %v13587_v50 = vmul.f32 -1.442695, %v7145_v17  ;;  %v17589_v53 = vld [vmem:[%s18879_s4 + $0x64] ss:$16 sps:$4 sm:$0xff]   ;;  %v17594_v62 = vld [vmem:[%s18879_s4 + $0x68] ss:$16 sps:$4 sm:$0xff]  }
0x1119   :  { %v7140_v54 = vpop.f32.mrf.mxu1  ;;  %14938 = vpow2.f32 %v13586_v55  ;;  %v17599_v55 = vld [vmem:[%s18879_s4 + $0x6c] ss:$16 sps:$4 sm:$0xff]   ;;  %v17604_v63 = vld [vmem:[%s18879_s4 + $0x44] ss:$16 sps:$4 sm:$0xff]  }
0x111a   :  { %14940 = vtanh.f32 %v7144_v12  ;;  %v17610_v54 = vld [vmem:[%s18879_s4 + $0x4c] ss:$16 sps:$4 sm:$0xff]   ;;  %v17630_v17 = vld [vmem:[%s18879_s4 + $0x24] ss:$16 sps:$4 sm:$0xff]   ;;  %v17647_v12 = vld [vmem:[%s18879_s4 + $0x28] ss:$16 sps:$4 sm:$0xff]  }
0x111b   :  { %14942 = vpow2.f32 %v13587_v50  ;;  %v17654_v50 = vld [vmem:[%s18879_s4 + $0x4] ss:$16 sps:$4 sm:$0xff]  }
0x1124   :  { %v14937_v18 = vpop.eup %14936 }
0x1125   :  { %v7149_v0 = vadd.f32 1.0, %v14937_v18  ;;  %v17659_v18 = vld [vmem:[%s18879_s4 + $0xc] ss:$16 sps:$4 sm:$0xff]  }
0x1126   :  { %v14939_v6 = vpop.eup %14938 }
0x1127   :  { %14944 = vrcp.f32 %v7149_v0  ;;  %v7155_v19 = vadd.f32 1.0, %v14939_v6  ;;  %v14941_v23 = vpop.eup %14940  ;;  %v17666_v0 = vld [vmem:[%s18879_s4] ss:$16 sps:$4 sm:$0xff]   ;;  %v17671_v6 = vld [vmem:[%s18879_s4 + $0x8] ss:$16 sps:$4 sm:$0xff]  }
0x1128   :  { %v14943_v34 = vpop.eup %14942 }
0x1129   :  { %14946 = vrcp.f32 %v7155_v19  ;;  %v7162_v16 = vadd.f32 1.0, %v14943_v34  ;;  %v19059_v19 = vld [vmem:[#allocation68_spill] sm:$0xff] }
0x112b   :  { %14948 = vrcp.f32 %v7162_v16 }
0x1134   :  { %v14945_v41 = vpop.eup %14944 }
0x1135   :  { %v7166_v37 = vmul.f32 %v14945_v41, %v14941_v23  ;;  %v498_v23 = vadd.f32 %v19059_v19, %v15970_v10 }
0x1136   :  { %v14947_v5 = vpop.eup %14946 }
0x1137   :  { %v7165_v43 = vmul.f32 %v14947_v5, %v17424_v21 }
0x1138   :  { %v14949_v7 = vpop.eup %14948 }
0x1139   :  { %v17474_v39 = vadd.f32 %v7166_v37, %v7165_v43  ;;  %v19060_v37 = vld [vmem:[#allocation70_spill] sm:$0xff] }
0x113a   :  { %v500_v5 = vadd.f32 %v19060_v37, %v15976_v9 }
0x113b   :  { %14950 = vtanh.f32 %v17474_v39 }
0x1148   :  { %v14951_v25 = vpop.eup %14950 }
0x1149   :  { %v7169_v20 = vmul.f32 %v14951_v25, %v14949_v7 }
0x114b   :  { %v7171_v31 = vcombine.high %v7169_v20, %v7169_v20  ;;  %v7178_v35 = vrot.slane %v7169_v20, %v16003_v2  ;;  %v7240_v15 = vpack.c.bf16 %v7169_v20, %v7169_v20 }
0x114d   :  { %v7185_v30 = vrot.slane %v7171_v31, %v16003_v2  ;;  %v7186_v38 = vcombine.high %v7178_v35, %v7178_v35  ;;  %v7194_v42 = vrot.slane %v7178_v35, %v16003_v2  ;;  %13588 = vst.sshfl [vmem:[#allocation5 + $0x10] sm:$0x1 pattern:$0x73625140] %v7178_v35  ;;  %7466 = vmatmul.mubr.bf16.vlgmr.msra.gmra.mxu0 %v7240_v15 }
0x114e   :  { %7507 = vmatmul.mubr.bf16.vlgmr.msra.gmra.mxu1 %v7240_v15  ;;  %7838 = vmatprep.mubr.bf16.mxu0 %v19002_v8 }
0x114f   :  { %7879 = vmatprep.mubr.bf16.mxu1 %v19002_v8  ;;  %v7187_v21 = vcombine.high %v7185_v30, %v7185_v30  ;;  %v7201_v27 = vrot.slane %v7185_v30, %v16003_v2  ;;  %v7208_v14 = vrot.slane %v7186_v38, %v16003_v2  ;;  %v7216_v29 = vcombine.high %v7194_v42, %v7194_v42  ;;  %v19061_v42 = vld [vmem:[#allocation71_spill] sm:$0xff] }
0x1150   :  { %13589 = vst.sshfl [vmem:[#allocation5 + $0x30] sm:$0x1 pattern:$0x73625140] %v7186_v38  ;;  %7807 = vmatpush1.bf16.msra.mxu0 %v17498_v24  ;;  %7848 = vmatpush1.bf16.msra.mxu1 %v17503_v46 }
0x1151   :  { %13590 = vst.sshfl [vmem:[#allocation5 + $0x90] sm:$0x1 pattern:$0x73625140] %v7185_v30  ;;  %v7215_v32 = vrot.slane %v7187_v21, %v16003_v2  ;;  %v7217_v40 = vcombine.high %v7201_v27, %v7201_v27  ;;  %v7218_v44 = vcombine.high %v7208_v14, %v7208_v14  ;;  %7230 = vst [vmem:[#allocation5 + $0x50] sm:$0x1] %v7216_v29  ;;  %7808 = vmatprep.subr.bf16.mxu0 %v17512_v28 }
0x1152   :  { %13591 = vst.sshfl [vmem:[#allocation5 + $0xb0] sm:$0x1 pattern:$0x73625140] %v7187_v21  ;;  %7849 = vmatprep.subr.bf16.mxu1 %v17517_v47  ;;  %v693_v21 = vadd.f32 %v19061_v42, %v15988_v3  ;;  %v19062_v14 = vld [vmem:[#allocation69_spill] sm:$0xff] }
0x1153   :  { %v7219_v13 = vcombine.high %v7215_v32, %v7215_v32  ;;  %7231 = vst [vmem:[#allocation5 + $0x70] sm:$0x1] %v7218_v44  ;;  %7234 = vst [vmem:[#allocation5 + $0xd0] sm:$0x1] %v7217_v40  ;;  %v691_v29 = vadd.f32 %v19062_v14, %v15990_v61 }
0x1154   :  { %7809 = vmatpush1.bf16.msra.mxu0 %v17522_v22  ;;  %7850 = vmatpush1.bf16.msra.mxu1 %v17527_v26 }
0x1155   :  { %7235 = vst [vmem:[#allocation5 + $0xf0] sm:$0x1] %v7219_v13  ;;  %7810 = vmatprep.subr.bf16.mxu0 %v17536_v45  ;;  %7851 = vmatprep.subr.bf16.mxu1 %v17541_v48 }
0x1158   :  { %7811 = vmatpush1.bf16.msra.mxu0 %v17546_v1  ;;  %7852 = vmatpush1.bf16.msra.mxu1 %v17551_v4 }
0x1159   :  { %7812 = vmatprep.subr.bf16.mxu0 %v17560_v57  ;;  %7853 = vmatprep.subr.bf16.mxu1 %v17565_v59 }
0x115c   :  { %7813 = vmatpush1.bf16.msra.mxu0 %v17570_v58  ;;  %7854 = vmatpush1.bf16.msra.mxu1 %v17575_v60 }
0x115d   :  { %7814 = vmatprep.subr.bf16.mxu0 %v17589_v53  ;;  %7855 = vmatprep.subr.bf16.mxu1 %v17599_v55 }
0x1160   :  { %7815 = vmatpush1.bf16.msra.mxu0 %v17584_v56  ;;  %7856 = vmatpush1.bf16.msra.mxu1 %v17594_v62 }
0x1161   :  { %7816 = vmatprep.subr.bf16.mxu0 %v17604_v63  ;;  %7857 = vmatprep.subr.bf16.mxu1 %v17610_v54 }
0x1164   :  { %7817 = vmatpush1.bf16.msra.mxu0 %v17618_v11  ;;  %7858 = vmatpush1.bf16.msra.mxu1 %v17623_v52 }
0x1165   :  { %7818 = vmatprep.subr.bf16.mxu0 %v17630_v17  ;;  %7859 = vmatprep.subr.bf16.mxu1 %v17635_v49 }
0x1168   :  { %7819 = vmatpush1.bf16.msra.mxu0 %v17642_v51  ;;  %7860 = vmatpush1.bf16.msra.mxu1 %v17647_v12 }
0x1169   :  { %7820 = vmatprep.subr.bf16.mxu0 %v17654_v50  ;;  %7861 = vmatprep.subr.bf16.mxu1 %v17659_v18 }
0x116c   :  { %7821 = vmatpush1.bf16.msra.mxu0 %v17666_v0  ;;  %7862 = vmatpush1.bf16.msra.mxu1 %v17671_v6 }
0x116d   :  { %8179 = vmatprep.subr.bf16.mxu0 %v17488_v36  ;;  %8220 = vmatprep.subr.bf16.mxu1 %v17493_v33 }
0x120d   :  { %v7467_v34 = vpop.f32.mrf.mxu0 }
0x120e   :  { %v7508_v41 = vpop.f32.mrf.mxu1  ;;  %v7515_v16 = vadd.f32 %v7467_v34, %v498_v23 }
0x120f   :  { %v7469_v43 = vpop.f32.mrf.mxu0  ;;  %v7517_v32 = vadd.f32 %v7508_v41, %v691_v29 }
0x1210   :  { %v7510_v7 = vpop.f32.mrf.mxu1  ;;  %v13624_v25 = vmul.f32 -1.442695, %v7515_v16  ;;  %v7516_v20 = vadd.f32 %v7469_v43, %v500_v5 }
0x1211   :  { %v7471_v31 = vpop.f32.mrf.mxu0  ;;  %v7518_v27 = vadd.f32 %v7510_v7, %v693_v21 }
0x1212   :  { %v7512_v35 = vpop.f32.mrf.mxu1  ;;  %14952 = vpow2.f32 %v13624_v25  ;;  %v13625_v15 = vmul.f32 -1.442695, %v7516_v20 }
0x1213   :  { %v7472_v30 = vpop.f32.mrf.mxu0  ;;  %v13626_v40 = vmul.f32 -1.442695, %v7518_v27 }
0x1214   :  { %v7513_v38 = vpop.f32.mrf.mxu1  ;;  %14954 = vpow2.f32 %v13625_v15 }
0x1215   :  { %14956 = vtanh.f32 %v7517_v32 }
0x1216   :  { %14958 = vpow2.f32 %v13626_v40 }
0x121f   :  { %v14953_v44 = vpop.eup %14952 }
0x1220   :  { %v7522_v13 = vadd.f32 1.0, %v14953_v44 }
0x1221   :  { %v14955_v19 = vpop.eup %14954 }
0x1222   :  { %14960 = vrcp.f32 %v7522_v13  ;;  %v7528_v23 = vadd.f32 1.0, %v14955_v19  ;;  %v14957_v34 = vpop.eup %14956 }
0x1223   :  { %v14959_v37 = vpop.eup %14958 }
0x1224   :  { %14962 = vrcp.f32 %v7528_v23  ;;  %v7535_v25 = vadd.f32 1.0, %v14959_v37  ;;  %v19063_v23 = vld [vmem:[#allocation72_spill] sm:$0xff] }
0x1226   :  { %14964 = vrcp.f32 %v7535_v25 }
0x122f   :  { %v14961_v5 = vpop.eup %14960 }
0x1230   :  { %v7539_v16 = vmul.f32 %v14961_v5, %v14957_v34  ;;  %v504_v34 = vadd.f32 %v19063_v23, %v15970_v10 }
0x1231   :  { %v14963_v43 = vpop.eup %14962 }
0x1232   :  { %v7538_v7 = vmul.f32 %v14963_v43, %v17474_v39 }
0x1233   :  { %v14965_v41 = vpop.eup %14964 }
0x1234   :  { %v17688_v20 = vadd.f32 %v7539_v16, %v7538_v7  ;;  %v19064_v16 = vld [vmem:[#allocation74_spill] sm:$0xff] }
0x1235   :  { %v506_v43 = vadd.f32 %v19064_v16, %v15976_v9 }
0x1236   :  { %14966 = vtanh.f32 %v17688_v20 }
0x1243   :  { %v14967_v31 = vpop.eup %14966 }
0x1244   :  { %v7542_v35 = vmul.f32 %v14967_v31, %v14965_v41 }
0x1246   :  { %v7544_v15 = vcombine.high %v7542_v35, %v7542_v35  ;;  %v7551_v30 = vrot.slane %v7542_v35, %v16003_v2  ;;  %v7613_v38 = vpack.c.bf16 %v7542_v35, %v7542_v35 }
0x1248   :  { %v7558_v42 = vrot.slane %v7544_v15, %v16003_v2  ;;  %v7559_v21 = vcombine.high %v7551_v30, %v7551_v30  ;;  %v7567_v27 = vrot.slane %v7551_v30, %v16003_v2  ;;  %13627 = vst.sshfl [vmem:[#allocation5 + $0x11] sm:$0x1 pattern:$0x73625140] %v7551_v30  ;;  %7839 = vmatmul.mubr.bf16.vlgmr.msra.gmra.mxu0 %v7613_v38 }
0x1249   :  { %7880 = vmatmul.mubr.bf16.vlgmr.msra.gmra.mxu1 %v7613_v38  ;;  %8180 = vmatpush1.bf16.msra.mxu0 %v17498_v24 }
0x124a   :  { %8221 = vmatpush1.bf16.msra.mxu1 %v17503_v46  ;;  %v7560_v39 = vcombine.high %v7558_v42, %v7558_v42  ;;  %v7574_v14 = vrot.slane %v7558_v42, %v16003_v2  ;;  %v7581_v29 = vrot.slane %v7559_v21, %v16003_v2  ;;  %v7589_v32 = vcombine.high %v7567_v27, %v7567_v27  ;;  %v19065_v27 = vld [vmem:[#allocation75_spill] sm:$0xff] }
0x124b   :  { %13628 = vst.sshfl [vmem:[#allocation5 + $0x31] sm:$0x1 pattern:$0x73625140] %v7559_v21  ;;  %8181 = vmatprep.subr.bf16.mxu0 %v17512_v28  ;;  %8222 = vmatprep.subr.bf16.mxu1 %v17517_v47 }
0x124c   :  { %13629 = vst.sshfl [vmem:[#allocation5 + $0x91] sm:$0x1 pattern:$0x73625140] %v7558_v42  ;;  %8211 = vmatprep.mubr.bf16.mxu0 %v19002_v8  ;;  %v7588_v40 = vrot.slane %v7560_v39, %v16003_v2  ;;  %v7590_v44 = vcombine.high %v7574_v14, %v7574_v14  ;;  %v7591_v13 = vcombine.high %v7581_v29, %v7581_v29  ;;  %7603 = vst [vmem:[#allocation5 + $0x51] sm:$0x1] %v7589_v32 }
0x124d   :  { %13630 = vst.sshfl [vmem:[#allocation5 + $0xb1] sm:$0x1 pattern:$0x73625140] %v7560_v39  ;;  %8252 = vmatprep.mubr.bf16.mxu1 %v19002_v8  ;;  %8182 = vmatpush1.bf16.msra.mxu0 %v17522_v22  ;;  %v699_v39 = vadd.f32 %v19065_v27, %v15988_v3  ;;  %v19066_v29 = vld [vmem:[#allocation73_spill] sm:$0xff] }
0x124e   :  { %8223 = vmatpush1.bf16.msra.mxu1 %v17527_v26  ;;  %v7592_v19 = vcombine.high %v7588_v40, %v7588_v40  ;;  %7604 = vst [vmem:[#allocation5 + $0x71] sm:$0x1] %v7591_v13  ;;  %7607 = vst [vmem:[#allocation5 + $0xd1] sm:$0x1] %v7590_v44  ;;  %8183 = vmatprep.subr.bf16.mxu0 %v17536_v45  ;;  %v697_v32 = vadd.f32 %v19066_v29, %v15990_v61 }
0x124f   :  { %8224 = vmatprep.subr.bf16.mxu1 %v17541_v48 }
0x1250   :  { %7608 = vst [vmem:[#allocation5 + $0xf1] sm:$0x1] %v7592_v19 }
0x1251   :  { %8184 = vmatpush1.bf16.msra.mxu0 %v17546_v1 }
0x1252   :  { %8225 = vmatpush1.bf16.msra.mxu1 %v17551_v4  ;;  %8185 = vmatprep.subr.bf16.mxu0 %v17560_v57 }
0x1253   :  { %8226 = vmatprep.subr.bf16.mxu1 %v17565_v59 }
0x1255   :  { %8186 = vmatpush1.bf16.msra.mxu0 %v17570_v58 }
0x1256   :  { %8227 = vmatpush1.bf16.msra.mxu1 %v17575_v60  ;;  %8187 = vmatprep.subr.bf16.mxu0 %v17589_v53 }
0x1257   :  { %8228 = vmatprep.subr.bf16.mxu1 %v17599_v55 }
0x1259   :  { %8188 = vmatpush1.bf16.msra.mxu0 %v17584_v56 }
0x125a   :  { %8229 = vmatpush1.bf16.msra.mxu1 %v17594_v62  ;;  %8189 = vmatprep.subr.bf16.mxu0 %v17604_v63 }
0x125b   :  { %8230 = vmatprep.subr.bf16.mxu1 %v17610_v54 }
0x125d   :  { %8190 = vmatpush1.bf16.msra.mxu0 %v17618_v11 }
0x125e   :  { %8231 = vmatpush1.bf16.msra.mxu1 %v17623_v52  ;;  %8191 = vmatprep.subr.bf16.mxu0 %v17630_v17 }
0x125f   :  { %8232 = vmatprep.subr.bf16.mxu1 %v17635_v49 }
0x1261   :  { %8192 = vmatpush1.bf16.msra.mxu0 %v17642_v51 }
0x1262   :  { %8233 = vmatpush1.bf16.msra.mxu1 %v17647_v12  ;;  %8193 = vmatprep.subr.bf16.mxu0 %v17654_v50 }
0x1263   :  { %8234 = vmatprep.subr.bf16.mxu1 %v17659_v18 }
0x1265   :  { %8194 = vmatpush1.bf16.msra.mxu0 %v17666_v0 }
0x1266   :  { %8235 = vmatpush1.bf16.msra.mxu1 %v17671_v6  ;;  %8552 = vmatprep.subr.bf16.mxu0 %v17488_v36 }
0x1267   :  { %8593 = vmatprep.subr.bf16.mxu1 %v17493_v33 }
0x1308   :  { %v7840_v37 = vpop.f32.mrf.mxu0 }
0x1309   :  { %v7881_v5 = vpop.f32.mrf.mxu1  ;;  %v7888_v25 = vadd.f32 %v7840_v37, %v504_v34 }
0x130a   :  { %v7842_v7 = vpop.f32.mrf.mxu0  ;;  %v7890_v40 = vadd.f32 %v7881_v5, %v697_v32 }
0x130b   :  { %v7883_v41 = vpop.f32.mrf.mxu1  ;;  %v13663_v31 = vmul.f32 -1.442695, %v7888_v25  ;;  %v7889_v35 = vadd.f32 %v7842_v7, %v506_v43 }
0x130c   :  { %v7844_v15 = vpop.f32.mrf.mxu0  ;;  %v7891_v14 = vadd.f32 %v7883_v41, %v699_v39 }
0x130d   :  { %v7885_v30 = vpop.f32.mrf.mxu1  ;;  %14968 = vpow2.f32 %v13663_v31  ;;  %v13664_v38 = vmul.f32 -1.442695, %v7889_v35 }
0x130e   :  { %v7845_v42 = vpop.f32.mrf.mxu0  ;;  %v13665_v44 = vmul.f32 -1.442695, %v7891_v14 }
0x130f   :  { %v7886_v21 = vpop.f32.mrf.mxu1  ;;  %14970 = vpow2.f32 %v13664_v38 }
0x1310   :  { %14972 = vtanh.f32 %v7890_v40 }
0x1311   :  { %14974 = vpow2.f32 %v13665_v44 }
0x131a   :  { %v14969_v13 = vpop.eup %14968 }
0x131b   :  { %v7895_v19 = vadd.f32 1.0, %v14969_v13 }
0x131c   :  { %v14971_v23 = vpop.eup %14970 }
0x131d   :  { %14976 = vrcp.f32 %v7895_v19  ;;  %v7901_v34 = vadd.f32 1.0, %v14971_v23  ;;  %v14973_v37 = vpop.eup %14972 }
0x131e   :  { %v14975_v16 = vpop.eup %14974 }
0x131f   :  { %14978 = vrcp.f32 %v7901_v34  ;;  %v7908_v31 = vadd.f32 1.0, %v14975_v16  ;;  %v19067_v34 = vld [vmem:[#allocation76_spill] sm:$0xff] }
0x1321   :  { %14980 = vrcp.f32 %v7908_v31 }
0x132a   :  { %v14977_v43 = vpop.eup %14976 }
0x132b   :  { %v7912_v25 = vmul.f32 %v14977_v43, %v14973_v37  ;;  %v508_v37 = vadd.f32 %v19067_v34, %v15970_v10 }
0x132c   :  { %v14979_v7 = vpop.eup %14978 }
0x132d   :  { %v7911_v41 = vmul.f32 %v14979_v7, %v17688_v20 }
0x132e   :  { %v14981_v5 = vpop.eup %14980 }
0x132f   :  { %v17740_v35 = vadd.f32 %v7912_v25, %v7911_v41  ;;  %v19068_v25 = vld [vmem:[#allocation78_spill] sm:$0xff] }
0x1330   :  { %v510_v7 = vadd.f32 %v19068_v25, %v15976_v9 }
0x1331   :  { %14982 = vtanh.f32 %v17740_v35 }
0x133e   :  { %v14983_v15 = vpop.eup %14982 }
0x133f   :  { %v7915_v30 = vmul.f32 %v14983_v15, %v14981_v5 }
0x1341   :  { %v7917_v38 = vcombine.high %v7915_v30, %v7915_v30  ;;  %v7924_v42 = vrot.slane %v7915_v30, %v16003_v2  ;;  %v7986_v21 = vpack.c.bf16 %v7915_v30, %v7915_v30 }
0x1343   :  { %v7931_v27 = vrot.slane %v7917_v38, %v16003_v2  ;;  %v7932_v39 = vcombine.high %v7924_v42, %v7924_v42  ;;  %v7940_v14 = vrot.slane %v7924_v42, %v16003_v2  ;;  %13666 = vst.sshfl [vmem:[#allocation5 + $0x12] sm:$0x1 pattern:$0x73625140] %v7924_v42  ;;  %8212 = vmatmul.mubr.bf16.vlgmr.msra.gmra.mxu0 %v7986_v21 }
0x1344   :  { %8253 = vmatmul.mubr.bf16.vlgmr.msra.gmra.mxu1 %v7986_v21  ;;  %8553 = vmatpush1.bf16.msra.mxu0 %v17498_v24 }
0x1345   :  { %8594 = vmatpush1.bf16.msra.mxu1 %v17503_v46  ;;  %v7933_v20 = vcombine.high %v7931_v27, %v7931_v27  ;;  %v7947_v29 = vrot.slane %v7931_v27, %v16003_v2  ;;  %v7954_v32 = vrot.slane %v7932_v39, %v16003_v2  ;;  %v7962_v40 = vcombine.high %v7940_v14, %v7940_v14 }
0x1346   :  { %13667 = vst.sshfl [vmem:[#allocation5 + $0x32] sm:$0x1 pattern:$0x73625140] %v7932_v39  ;;  %8554 = vmatprep.subr.bf16.mxu0 %v17512_v28  ;;  %8595 = vmatprep.subr.bf16.mxu1 %v17517_v47 }
0x1347   :  { %13668 = vst.sshfl [vmem:[#allocation5 + $0x92] sm:$0x1 pattern:$0x73625140] %v7931_v27  ;;  %8584 = vmatprep.mubr.bf16.mxu0 %v19002_v8  ;;  %v7961_v44 = vrot.slane %v7933_v20, %v16003_v2  ;;  %v7963_v13 = vcombine.high %v7947_v29, %v7947_v29  ;;  %v7964_v19 = vcombine.high %v7954_v32, %v7954_v32  ;;  %7976 = vst [vmem:[#allocation5 + $0x52] sm:$0x1] %v7962_v40 }
0x1348   :  { %13669 = vst.sshfl [vmem:[#allocation5 + $0xb2] sm:$0x1 pattern:$0x73625140] %v7933_v20  ;;  %8625 = vmatprep.mubr.bf16.mxu1 %v19002_v8  ;;  %8555 = vmatpush1.bf16.msra.mxu0 %v17522_v22  ;;  %v19070_v20 = vld [vmem:[#allocation77_spill] sm:$0xff] }
0x1349   :  { %8596 = vmatpush1.bf16.msra.mxu1 %v17527_v26  ;;  %v7965_v23 = vcombine.high %v7961_v44, %v7961_v44  ;;  %7977 = vst [vmem:[#allocation5 + $0x72] sm:$0x1] %v7964_v19  ;;  %7980 = vst [vmem:[#allocation5 + $0xd2] sm:$0x1] %v7963_v13  ;;  %8556 = vmatprep.subr.bf16.mxu0 %v17536_v45  ;;  %v701_v29 = vadd.f32 %v19070_v20, %v15990_v61 }
0x134a   :  { %8597 = vmatprep.subr.bf16.mxu1 %v17541_v48 }
0x134b   :  { %7981 = vst [vmem:[#allocation5 + $0xf2] sm:$0x1] %v7965_v23 }
0x134c   :  { %8557 = vmatpush1.bf16.msra.mxu0 %v17546_v1 }
0x134d   :  { %8598 = vmatpush1.bf16.msra.mxu1 %v17551_v4  ;;  %8558 = vmatprep.subr.bf16.mxu0 %v17560_v57 }
0x134e   :  { %8599 = vmatprep.subr.bf16.mxu1 %v17565_v59 }
0x1350   :  { %8559 = vmatpush1.bf16.msra.mxu0 %v17570_v58 }
0x1351   :  { %8600 = vmatpush1.bf16.msra.mxu1 %v17575_v60  ;;  %8560 = vmatprep.subr.bf16.mxu0 %v17589_v53 }
0x1352   :  { %8601 = vmatprep.subr.bf16.mxu1 %v17599_v55 }
0x1354   :  { %8561 = vmatpush1.bf16.msra.mxu0 %v17584_v56 }
0x1355   :  { %8602 = vmatpush1.bf16.msra.mxu1 %v17594_v62  ;;  %8562 = vmatprep.subr.bf16.mxu0 %v17604_v63 }
0x1356   :  { %8603 = vmatprep.subr.bf16.mxu1 %v17610_v54 }
0x1358   :  { %8563 = vmatpush1.bf16.msra.mxu0 %v17618_v11 }
0x1359   :  { %8604 = vmatpush1.bf16.msra.mxu1 %v17623_v52  ;;  %8564 = vmatprep.subr.bf16.mxu0 %v17630_v17 }
0x135a   :  { %8605 = vmatprep.subr.bf16.mxu1 %v17635_v49 }
0x135c   :  { %8565 = vmatpush1.bf16.msra.mxu0 %v17642_v51 }
0x135d   :  { %8606 = vmatpush1.bf16.msra.mxu1 %v17647_v12  ;;  %8566 = vmatprep.subr.bf16.mxu0 %v17654_v50 }
0x135e   :  { %8607 = vmatprep.subr.bf16.mxu1 %v17659_v18 }
0x1360   :  { %8567 = vmatpush1.bf16.msra.mxu0 %v17666_v0 }
0x1361   :  { %8608 = vmatpush1.bf16.msra.mxu1 %v17671_v6  ;;  %8925 = vmatprep.subr.bf16.mxu0 %v17488_v36 }
0x1362   :  { %8966 = vmatprep.subr.bf16.mxu1 %v17493_v33  ;;  %v19069_v33 = vld [vmem:[#allocation79_spill] sm:$0xff] }
0x1363   :  { %v703_v39 = vadd.f32 %v19069_v33, %v15988_v3 }
0x1403   :  { %v8213_v16 = vpop.f32.mrf.mxu0 }
0x1404   :  { %v8254_v43 = vpop.f32.mrf.mxu1  ;;  %v8261_v31 = vadd.f32 %v8213_v16, %v508_v37 }
0x1405   :  { %v8215_v41 = vpop.f32.mrf.mxu0  ;;  %v8263_v32 = vadd.f32 %v8254_v43, %v701_v29 }
0x1406   :  { %v8256_v5 = vpop.f32.mrf.mxu1  ;;  %v13702_v15 = vmul.f32 -1.442695, %v8261_v31  ;;  %v8262_v30 = vadd.f32 %v8215_v41, %v510_v7 }
0x1407   :  { %v8217_v38 = vpop.f32.mrf.mxu0  ;;  %v8264_v14 = vadd.f32 %v8256_v5, %v703_v39 }
0x1408   :  { %v8258_v42 = vpop.f32.mrf.mxu1  ;;  %14984 = vpow2.f32 %v13702_v15  ;;  %v13703_v21 = vmul.f32 -1.442695, %v8262_v30 }
0x1409   :  { %v8218_v36 = vpop.f32.mrf.mxu0  ;;  %v13704_v40 = vmul.f32 -1.442695, %v8264_v14 }
0x140a   :  { %v8259_v27 = vpop.f32.mrf.mxu1  ;;  %14986 = vpow2.f32 %v13703_v21 }
0x140b   :  { %14988 = vtanh.f32 %v8263_v32 }
0x140c   :  { %14990 = vpow2.f32 %v13704_v40 }
0x1415   :  { %v14985_v44 = vpop.eup %14984 }
0x1416   :  { %v8268_v13 = vadd.f32 1.0, %v14985_v44 }
0x1417   :  { %v14987_v19 = vpop.eup %14986 }
0x1418   :  { %14992 = vrcp.f32 %v8268_v13  ;;  %v8274_v23 = vadd.f32 1.0, %v14987_v19  ;;  %v14989_v34 = vpop.eup %14988 }
0x1419   :  { %v14991_v37 = vpop.eup %14990 }
0x141a   :  { %14994 = vrcp.f32 %v8274_v23  ;;  %v8281_v31 = vadd.f32 1.0, %v14991_v37 }
0x141c   :  { %14996 = vrcp.f32 %v8281_v31 }
0x1425   :  { %v14993_v16 = vpop.eup %14992 }
0x1426   :  { %v8285_v25 = vmul.f32 %v14993_v16, %v14989_v34 }
0x1427   :  { %v14995_v7 = vpop.eup %14994 }
0x1428   :  { %v8284_v41 = vmul.f32 %v14995_v7, %v17740_v35 }
0x1429   :  { %v14997_v43 = vpop.eup %14996 }
0x142a   :  { %v17792_v5 = vadd.f32 %v8285_v25, %v8284_v41 }
0x142c   :  { %14998 = vtanh.f32 %v17792_v5 }
0x1439   :  { %v14999_v15 = vpop.eup %14998 }
0x143a   :  { %v8288_v30 = vmul.f32 %v14999_v15, %v14997_v43 }
0x143c   :  { %v8290_v38 = vcombine.high %v8288_v30, %v8288_v30  ;;  %v8297_v42 = vrot.slane %v8288_v30, %v16003_v2  ;;  %v8359_v21 = vpack.c.bf16 %v8288_v30, %v8288_v30 }
0x143e   :  { %v8304_v36 = vrot.slane %v8290_v38, %v16003_v2  ;;  %v8305_v27 = vcombine.high %v8297_v42, %v8297_v42  ;;  %v8313_v33 = vrot.slane %v8297_v42, %v16003_v2  ;;  %13705 = vst.sshfl [vmem:[#allocation5 + $0x13] sm:$0x1 pattern:$0x73625140] %v8297_v42  ;;  %8585 = vmatmul.mubr.bf16.vlgmr.msra.gmra.mxu0 %v8359_v21 }
0x143f   :  { %8626 = vmatmul.mubr.bf16.vlgmr.msra.gmra.mxu1 %v8359_v21  ;;  %8926 = vmatpush1.bf16.msra.mxu0 %v17498_v24 }
0x1440   :  { %8967 = vmatpush1.bf16.msra.mxu1 %v17503_v46  ;;  %v8306_v35 = vcombine.high %v8304_v36, %v8304_v36  ;;  %v8320_v39 = vrot.slane %v8304_v36, %v16003_v2  ;;  %v8327_v14 = vrot.slane %v8305_v27, %v16003_v2  ;;  %v8335_v20 = vcombine.high %v8313_v33, %v8313_v33 }
0x1441   :  { %13706 = vst.sshfl [vmem:[#allocation5 + $0x33] sm:$0x1 pattern:$0x73625140] %v8305_v27  ;;  %8927 = vmatprep.subr.bf16.mxu0 %v17512_v28  ;;  %8968 = vmatprep.subr.bf16.mxu1 %v17517_v47  ;;  %v19071_v28 = vld [vmem:[#allocation80_spill] sm:$0xff] }
0x1442   :  { %13707 = vst.sshfl [vmem:[#allocation5 + $0x93] sm:$0x1 pattern:$0x73625140] %v8304_v36  ;;  %8957 = vmatprep.mubr.bf16.mxu0 %v19002_v8  ;;  %v8334_v29 = vrot.slane %v8306_v35, %v16003_v2  ;;  %v8336_v32 = vcombine.high %v8320_v39, %v8320_v39  ;;  %v8337_v24 = vcombine.high %v8327_v14, %v8327_v14  ;;  %8349 = vst [vmem:[#allocation5 + $0x53] sm:$0x1] %v8335_v20 }
0x1443   :  { %13708 = vst.sshfl [vmem:[#allocation5 + $0xb3] sm:$0x1 pattern:$0x73625140] %v8306_v35  ;;  %8998 = vmatprep.mubr.bf16.mxu1 %v19002_v8  ;;  %8928 = vmatpush1.bf16.msra.mxu0 %v17522_v22  ;;  %v514_v47 = vadd.f32 %v19071_v28, %v15970_v10  ;;  %v17856_v14 = vld [vmem:[%s18879_s4 + $0xe4] ss:$16 sps:$4 sm:$0xff]  }
0x1444   :  { %8969 = vmatpush1.bf16.msra.mxu1 %v17527_v26  ;;  %v8338_v46 = vcombine.high %v8334_v29, %v8334_v29  ;;  %8350 = vst [vmem:[#allocation5 + $0x73] sm:$0x1] %v8337_v24  ;;  %8353 = vst [vmem:[#allocation5 + $0xd3] sm:$0x1] %v8336_v32  ;;  %8929 = vmatprep.subr.bf16.mxu0 %v17536_v45  ;;  %v19072_v45 = vld [vmem:[#allocation82_spill] sm:$0xff] }
0x1445   :  { %8970 = vmatprep.subr.bf16.mxu1 %v17541_v48  ;;  %v516_v48 = vadd.f32 %v19072_v45, %v15976_v9  ;;  %v17861_v20 = vld [vmem:[%s18879_s4 + $0xec] ss:$16 sps:$4 sm:$0xff]   ;;  %v17866_v29 = vld [vmem:[%s18879_s4 + $0xe0] ss:$16 sps:$4 sm:$0xff]   ;;  %v17871_v32 = vld [vmem:[%s18879_s4 + $0xe8] ss:$16 sps:$4 sm:$0xff]  }
0x1446   :  { %8354 = vst [vmem:[#allocation5 + $0xf3] sm:$0x1] %v8338_v46  ;;  %v17880_v24 = vld [vmem:[%s18879_s4 + $0xc4] ss:$16 sps:$4 sm:$0xff]   ;;  %v17885_v46 = vld [vmem:[%s18879_s4 + $0xcc] ss:$16 sps:$4 sm:$0xff]  }
0x1447   :  { %8930 = vmatpush1.bf16.msra.mxu0 %v17546_v1  ;;  %v17890_v28 = vld [vmem:[%s18879_s4 + $0xc0] ss:$16 sps:$4 sm:$0xff]  }
0x1448   :  { %8971 = vmatpush1.bf16.msra.mxu1 %v17551_v4  ;;  %8931 = vmatprep.subr.bf16.mxu0 %v17560_v57  ;;  %v17914_v45 = vld [vmem:[%s18879_s4 + $0xa0] ss:$16 sps:$4 sm:$0xff]  }
0x1449   :  { %8972 = vmatprep.subr.bf16.mxu1 %v17565_v59 }
0x144b   :  { %8932 = vmatpush1.bf16.msra.mxu0 %v17570_v58 }
0x144c   :  { %8973 = vmatpush1.bf16.msra.mxu1 %v17575_v60  ;;  %8933 = vmatprep.subr.bf16.mxu0 %v17589_v53 }
0x144d   :  { %8974 = vmatprep.subr.bf16.mxu1 %v17599_v55 }
0x144f   :  { %8934 = vmatpush1.bf16.msra.mxu0 %v17584_v56 }
0x1450   :  { %8975 = vmatpush1.bf16.msra.mxu1 %v17594_v62  ;;  %8935 = vmatprep.subr.bf16.mxu0 %v17604_v63  ;;  %v19073_v63 = vld [vmem:[#allocation83_spill] sm:$0xff] }
0x1451   :  { %8976 = vmatprep.subr.bf16.mxu1 %v17610_v54  ;;  %v709_v54 = vadd.f32 %v19073_v63, %v15988_v3  ;;  %v17986_v63 = vld [vmem:[%s18879_s4 + $0x40] ss:$16 sps:$4 sm:$0xff]  }
0x1453   :  { %8936 = vmatpush1.bf16.msra.mxu0 %v17618_v11 }
0x1454   :  { %8977 = vmatpush1.bf16.msra.mxu1 %v17623_v52  ;;  %8937 = vmatprep.subr.bf16.mxu0 %v17630_v17  ;;  %v19074_v52 = vld [vmem:[#allocation81_spill] sm:$0xff] }
0x1455   :  { %8978 = vmatprep.subr.bf16.mxu1 %v17635_v49  ;;  %v707_v17 = vadd.f32 %v19074_v52, %v15990_v61  ;;  %v18003_v52 = vld [vmem:[%s18879_s4 + $0x2c] ss:$16 sps:$4 sm:$0xff]  }
0x1457   :  { %8938 = vmatpush1.bf16.msra.mxu0 %v17642_v51 }
0x1458   :  { %8979 = vmatpush1.bf16.msra.mxu1 %v17647_v12  ;;  %8939 = vmatprep.subr.bf16.mxu0 %v17654_v50 }
0x1459   :  { %8980 = vmatprep.subr.bf16.mxu1 %v17659_v18 }
0x145b   :  { %8940 = vmatpush1.bf16.msra.mxu0 %v17666_v0 }
0x145c   :  { %8981 = vmatpush1.bf16.msra.mxu1 %v17671_v6  ;;  %9298 = vmatprep.subr.bf16.mxu0 %v17856_v14 }
0x145d   :  { %9339 = vmatprep.subr.bf16.mxu1 %v17861_v20 }
0x14fe   :  { %v8586_v22 = vpop.f32.mrf.mxu0 }
0x14ff   :  { %v8627_v26 = vpop.f32.mrf.mxu1  ;;  %v8634_v1 = vadd.f32 %v8586_v22, %v514_v47  ;;  %v17895_v47 = vld [vmem:[%s18879_s4 + $0xc8] ss:$16 sps:$4 sm:$0xff]   ;;  %v17904_v22 = vld [vmem:[%s18879_s4 + $0xa4] ss:$16 sps:$4 sm:$0xff]  }
0x1500   :  { %v8588_v4 = vpop.f32.mrf.mxu0  ;;  %v8636_v49 = vadd.f32 %v8627_v26, %v707_v17  ;;  %v17909_v26 = vld [vmem:[%s18879_s4 + $0xac] ss:$16 sps:$4 sm:$0xff]   ;;  %v18010_v17 = vld [vmem:[%s18879_s4 + $0x20] ss:$16 sps:$4 sm:$0xff]  }
0x1501   :  { %v8629_v57 = vpop.f32.mrf.mxu1  ;;  %v13741_v59 = vmul.f32 -1.442695, %v8634_v1  ;;  %v8635_v58 = vadd.f32 %v8588_v4, %v516_v48  ;;  %v17919_v48 = vld [vmem:[%s18879_s4 + $0xa8] ss:$16 sps:$4 sm:$0xff]   ;;  %v17928_v1 = vld [vmem:[%s18879_s4 + $0x84] ss:$16 sps:$4 sm:$0xff]  }
0x1502   :  { %v8590_v60 = vpop.f32.mrf.mxu0  ;;  %v8637_v11 = vadd.f32 %v8629_v57, %v709_v54  ;;  %v17933_v4 = vld [vmem:[%s18879_s4 + $0x8c] ss:$16 sps:$4 sm:$0xff]   ;;  %v17938_v57 = vld [vmem:[%s18879_s4 + $0x80] ss:$16 sps:$4 sm:$0xff]   ;;  %v17991_v54 = vld [vmem:[%s18879_s4 + $0x48] ss:$16 sps:$4 sm:$0xff]  }
0x1503   :  { %v8631_v56 = vpop.f32.mrf.mxu1  ;;  %15000 = vpow2.f32 %v13741_v59  ;;  %v13742_v53 = vmul.f32 -1.442695, %v8635_v58  ;;  %v17943_v59 = vld [vmem:[%s18879_s4 + $0x88] ss:$16 sps:$4 sm:$0xff]   ;;  %v17952_v58 = vld [vmem:[%s18879_s4 + $0x60] ss:$16 sps:$4 sm:$0xff]  }
0x1504   :  { %v8591_v62 = vpop.f32.mrf.mxu0  ;;  %v13743_v51 = vmul.f32 -1.442695, %v8637_v11  ;;  %v17957_v60 = vld [vmem:[%s18879_s4 + $0x64] ss:$16 sps:$4 sm:$0xff]   ;;  %v17962_v56 = vld [vmem:[%s18879_s4 + $0x68] ss:$16 sps:$4 sm:$0xff]  }
0x1505   :  { %v8632_v55 = vpop.f32.mrf.mxu1  ;;  %15002 = vpow2.f32 %v13742_v53  ;;  %v17967_v53 = vld [vmem:[%s18879_s4 + $0x6c] ss:$16 sps:$4 sm:$0xff]   ;;  %v17972_v62 = vld [vmem:[%s18879_s4 + $0x44] ss:$16 sps:$4 sm:$0xff]  }
0x1506   :  { %15004 = vtanh.f32 %v8636_v49  ;;  %v17978_v55 = vld [vmem:[%s18879_s4 + $0x4c] ss:$16 sps:$4 sm:$0xff]   ;;  %v17998_v11 = vld [vmem:[%s18879_s4 + $0x24] ss:$16 sps:$4 sm:$0xff]   ;;  %v18015_v49 = vld [vmem:[%s18879_s4 + $0x28] ss:$16 sps:$4 sm:$0xff]  }
0x1507   :  { %15006 = vpow2.f32 %v13743_v51  ;;  %v18022_v51 = vld [vmem:[%s18879_s4 + $0x4] ss:$16 sps:$4 sm:$0xff]  }
0x1510   :  { %v15001_v12 = vpop.eup %15000 }
0x1511   :  { %v8641_v50 = vadd.f32 1.0, %v15001_v12  ;;  %v18027_v12 = vld [vmem:[%s18879_s4 + $0xc] ss:$16 sps:$4 sm:$0xff]  }
0x1512   :  { %v15003_v18 = vpop.eup %15002 }
0x1513   :  { %15008 = vrcp.f32 %v8641_v50  ;;  %v8647_v0 = vadd.f32 1.0, %v15003_v18  ;;  %v15005_v6 = vpop.eup %15004  ;;  %v18034_v50 = vld [vmem:[%s18879_s4] ss:$16 sps:$4 sm:$0xff]   ;;  %v18039_v18 = vld [vmem:[%s18879_s4 + $0x8] ss:$16 sps:$4 sm:$0xff]  }
0x1514   :  { %v15007_v40 = vpop.eup %15006 }
0x1515   :  { %15010 = vrcp.f32 %v8647_v0  ;;  %v8654_v23 = vadd.f32 1.0, %v15007_v40  ;;  %v19075_v0 = vld [vmem:[#allocation84_spill] sm:$0xff] }
0x1517   :  { %15012 = vrcp.f32 %v8654_v23 }
0x1520   :  { %v15009_v44 = vpop.eup %15008 }
0x1521   :  { %v8658_v13 = vmul.f32 %v15009_v44, %v15005_v6  ;;  %v518_v6 = vadd.f32 %v19075_v0, %v15970_v10 }
0x1522   :  { %v15011_v19 = vpop.eup %15010 }
0x1523   :  { %v8657_v34 = vmul.f32 %v15011_v19, %v17792_v5 }
0x1524   :  { %v15013_v16 = vpop.eup %15012 }
0x1525   :  { %v17842_v37 = vadd.f32 %v8658_v13, %v8657_v34  ;;  %v19076_v13 = vld [vmem:[#allocation86_spill] sm:$0xff] }
0x1526   :  { %v520_v19 = vadd.f32 %v19076_v13, %v15976_v9 }
0x1527   :  { %15014 = vtanh.f32 %v17842_v37 }
0x1534   :  { %v15015_v25 = vpop.eup %15014 }
0x1535   :  { %v8661_v7 = vmul.f32 %v15015_v25, %v15013_v16 }
0x1537   :  { %v8663_v31 = vcombine.high %v8661_v7, %v8661_v7  ;;  %v8670_v41 = vrot.slane %v8661_v7, %v16003_v2  ;;  %v8732_v43 = vpack.c.bf16 %v8661_v7, %v8661_v7 }
0x1539   :  { %v8677_v15 = vrot.slane %v8663_v31, %v16003_v2  ;;  %v8678_v30 = vcombine.high %v8670_v41, %v8670_v41  ;;  %v8686_v38 = vrot.slane %v8670_v41, %v16003_v2  ;;  %13744 = vst.sshfl [vmem:[#allocation5 + $0x14] sm:$0x1 pattern:$0x73625140] %v8670_v41  ;;  %8958 = vmatmul.mubr.bf16.vlgmr.msra.gmra.mxu0 %v8732_v43 }
0x153a   :  { %8999 = vmatmul.mubr.bf16.vlgmr.msra.gmra.mxu1 %v8732_v43  ;;  %9330 = vmatprep.mubr.bf16.mxu0 %v19002_v8 }
0x153b   :  { %9371 = vmatprep.mubr.bf16.mxu1 %v19002_v8  ;;  %v8679_v5 = vcombine.high %v8677_v15, %v8677_v15  ;;  %v8693_v42 = vrot.slane %v8677_v15, %v16003_v2  ;;  %v8700_v21 = vrot.slane %v8678_v30, %v16003_v2  ;;  %v8708_v36 = vcombine.high %v8686_v38, %v8686_v38  ;;  %v19077_v38 = vld [vmem:[#allocation87_spill] sm:$0xff] }
0x153c   :  { %13745 = vst.sshfl [vmem:[#allocation5 + $0x34] sm:$0x1 pattern:$0x73625140] %v8678_v30  ;;  %9299 = vmatpush1.bf16.msra.mxu0 %v17866_v29  ;;  %9340 = vmatpush1.bf16.msra.mxu1 %v17871_v32 }
0x153d   :  { %13746 = vst.sshfl [vmem:[#allocation5 + $0x94] sm:$0x1 pattern:$0x73625140] %v8677_v15  ;;  %v8707_v27 = vrot.slane %v8679_v5, %v16003_v2  ;;  %v8709_v33 = vcombine.high %v8693_v42, %v8693_v42  ;;  %v8710_v35 = vcombine.high %v8700_v21, %v8700_v21  ;;  %8722 = vst [vmem:[#allocation5 + $0x54] sm:$0x1] %v8708_v36  ;;  %9300 = vmatprep.subr.bf16.mxu0 %v17880_v24 }
0x153e   :  { %13747 = vst.sshfl [vmem:[#allocation5 + $0xb4] sm:$0x1 pattern:$0x73625140] %v8679_v5  ;;  %9341 = vmatprep.subr.bf16.mxu1 %v17885_v46  ;;  %v713_v5 = vadd.f32 %v19077_v38, %v15988_v3  ;;  %v19078_v21 = vld [vmem:[#allocation85_spill] sm:$0xff] }
0x153f   :  { %v8711_v39 = vcombine.high %v8707_v27, %v8707_v27  ;;  %8723 = vst [vmem:[#allocation5 + $0x74] sm:$0x1] %v8710_v35  ;;  %8726 = vst [vmem:[#allocation5 + $0xd4] sm:$0x1] %v8709_v33  ;;  %v711_v36 = vadd.f32 %v19078_v21, %v15990_v61 }
0x1540   :  { %9301 = vmatpush1.bf16.msra.mxu0 %v17890_v28  ;;  %9342 = vmatpush1.bf16.msra.mxu1 %v17895_v47 }
0x1541   :  { %8727 = vst [vmem:[#allocation5 + $0xf4] sm:$0x1] %v8711_v39  ;;  %9302 = vmatprep.subr.bf16.mxu0 %v17904_v22  ;;  %9343 = vmatprep.subr.bf16.mxu1 %v17909_v26 }
0x1544   :  { %9303 = vmatpush1.bf16.msra.mxu0 %v17914_v45  ;;  %9344 = vmatpush1.bf16.msra.mxu1 %v17919_v48 }
0x1545   :  { %9304 = vmatprep.subr.bf16.mxu0 %v17928_v1  ;;  %9345 = vmatprep.subr.bf16.mxu1 %v17933_v4 }
0x1548   :  { %9305 = vmatpush1.bf16.msra.mxu0 %v17938_v57  ;;  %9346 = vmatpush1.bf16.msra.mxu1 %v17943_v59 }
0x1549   :  { %9306 = vmatprep.subr.bf16.mxu0 %v17957_v60  ;;  %9347 = vmatprep.subr.bf16.mxu1 %v17967_v53 }
0x154c   :  { %9307 = vmatpush1.bf16.msra.mxu0 %v17952_v58  ;;  %9348 = vmatpush1.bf16.msra.mxu1 %v17962_v56 }
0x154d   :  { %9308 = vmatprep.subr.bf16.mxu0 %v17972_v62  ;;  %9349 = vmatprep.subr.bf16.mxu1 %v17978_v55 }
0x1550   :  { %9309 = vmatpush1.bf16.msra.mxu0 %v17986_v63  ;;  %9350 = vmatpush1.bf16.msra.mxu1 %v17991_v54 }
0x1551   :  { %9310 = vmatprep.subr.bf16.mxu0 %v17998_v11  ;;  %9351 = vmatprep.subr.bf16.mxu1 %v18003_v52 }
0x1554   :  { %9311 = vmatpush1.bf16.msra.mxu0 %v18010_v17  ;;  %9352 = vmatpush1.bf16.msra.mxu1 %v18015_v49 }
0x1555   :  { %9312 = vmatprep.subr.bf16.mxu0 %v18022_v51  ;;  %9353 = vmatprep.subr.bf16.mxu1 %v18027_v12 }
0x1558   :  { %9313 = vmatpush1.bf16.msra.mxu0 %v18034_v50  ;;  %9354 = vmatpush1.bf16.msra.mxu1 %v18039_v18 }
0x1559   :  { %9671 = vmatprep.subr.bf16.mxu0 %v17856_v14  ;;  %9712 = vmatprep.subr.bf16.mxu1 %v17861_v20 }
0x15f9   :  { %v8959_v40 = vpop.f32.mrf.mxu0 }
0x15fa   :  { %v9000_v44 = vpop.f32.mrf.mxu1  ;;  %v9007_v23 = vadd.f32 %v8959_v40, %v518_v6 }
0x15fb   :  { %v8961_v34 = vpop.f32.mrf.mxu0  ;;  %v9009_v27 = vadd.f32 %v9000_v44, %v711_v36 }
0x15fc   :  { %v9002_v16 = vpop.f32.mrf.mxu1  ;;  %v13780_v25 = vmul.f32 -1.442695, %v9007_v23  ;;  %v9008_v7 = vadd.f32 %v8961_v34, %v520_v19 }
0x15fd   :  { %v8963_v31 = vpop.f32.mrf.mxu0  ;;  %v9010_v42 = vadd.f32 %v9002_v16, %v713_v5 }
0x15fe   :  { %v9004_v41 = vpop.f32.mrf.mxu1  ;;  %15016 = vpow2.f32 %v13780_v25  ;;  %v13781_v43 = vmul.f32 -1.442695, %v9008_v7 }
0x15ff   :  { %v8964_v15 = vpop.f32.mrf.mxu0  ;;  %v13782_v33 = vmul.f32 -1.442695, %v9010_v42 }
0x1600   :  { %v9005_v30 = vpop.f32.mrf.mxu1  ;;  %15018 = vpow2.f32 %v13781_v43 }
0x1601   :  { %15020 = vtanh.f32 %v9009_v27 }
0x1602   :  { %15022 = vpow2.f32 %v13782_v33 }
0x160b   :  { %v15017_v35 = vpop.eup %15016 }
0x160c   :  { %v9014_v39 = vadd.f32 1.0, %v15017_v35 }
0x160d   :  { %v15019_v0 = vpop.eup %15018 }
0x160e   :  { %15024 = vrcp.f32 %v9014_v39  ;;  %v9020_v6 = vadd.f32 1.0, %v15019_v0  ;;  %v15021_v40 = vpop.eup %15020 }
0x160f   :  { %v15023_v13 = vpop.eup %15022 }
0x1610   :  { %15026 = vrcp.f32 %v9020_v6  ;;  %v9027_v25 = vadd.f32 1.0, %v15023_v13  ;;  %v19079_v6 = vld [vmem:[#allocation88_spill] sm:$0xff] }
0x1612   :  { %15028 = vrcp.f32 %v9027_v25 }
0x161b   :  { %v15025_v19 = vpop.eup %15024 }
0x161c   :  { %v9031_v23 = vmul.f32 %v15025_v19, %v15021_v40  ;;  %v524_v40 = vadd.f32 %v19079_v6, %v15970_v10 }
0x161d   :  { %v15027_v34 = vpop.eup %15026 }
0x161e   :  { %v9030_v16 = vmul.f32 %v15027_v34, %v17842_v37 }
0x161f   :  { %v15029_v44 = vpop.eup %15028 }
0x1620   :  { %v18056_v7 = vadd.f32 %v9031_v23, %v9030_v16  ;;  %v19080_v23 = vld [vmem:[#allocation90_spill] sm:$0xff] }
0x1621   :  { %v526_v34 = vadd.f32 %v19080_v23, %v15976_v9 }
0x1622   :  { %15030 = vtanh.f32 %v18056_v7 }
0x162f   :  { %v15031_v31 = vpop.eup %15030 }
0x1630   :  { %v9034_v41 = vmul.f32 %v15031_v31, %v15029_v44 }
0x1632   :  { %v9036_v43 = vcombine.high %v9034_v41, %v9034_v41  ;;  %v9043_v15 = vrot.slane %v9034_v41, %v16003_v2  ;;  %v9105_v30 = vpack.c.bf16 %v9034_v41, %v9034_v41 }
0x1634   :  { %v9050_v38 = vrot.slane %v9036_v43, %v16003_v2  ;;  %v9051_v5 = vcombine.high %v9043_v15, %v9043_v15  ;;  %v9059_v42 = vrot.slane %v9043_v15, %v16003_v2  ;;  %13783 = vst.sshfl [vmem:[#allocation5 + $0x15] sm:$0x1 pattern:$0x73625140] %v9043_v15  ;;  %9331 = vmatmul.mubr.bf16.vlgmr.msra.gmra.mxu0 %v9105_v30 }
0x1635   :  { %9372 = vmatmul.mubr.bf16.vlgmr.msra.gmra.mxu1 %v9105_v30  ;;  %9672 = vmatpush1.bf16.msra.mxu0 %v17866_v29 }
0x1636   :  { %9713 = vmatpush1.bf16.msra.mxu1 %v17871_v32  ;;  %v9052_v37 = vcombine.high %v9050_v38, %v9050_v38  ;;  %v9066_v21 = vrot.slane %v9050_v38, %v16003_v2  ;;  %v9073_v36 = vrot.slane %v9051_v5, %v16003_v2  ;;  %v9081_v27 = vcombine.high %v9059_v42, %v9059_v42  ;;  %v19081_v42 = vld [vmem:[#allocation91_spill] sm:$0xff] }
0x1637   :  { %13784 = vst.sshfl [vmem:[#allocation5 + $0x35] sm:$0x1 pattern:$0x73625140] %v9051_v5  ;;  %9673 = vmatprep.subr.bf16.mxu0 %v17880_v24  ;;  %9714 = vmatprep.subr.bf16.mxu1 %v17885_v46 }
0x1638   :  { %13785 = vst.sshfl [vmem:[#allocation5 + $0x95] sm:$0x1 pattern:$0x73625140] %v9050_v38  ;;  %9703 = vmatprep.mubr.bf16.mxu0 %v19002_v8  ;;  %v9080_v33 = vrot.slane %v9052_v37, %v16003_v2  ;;  %v9082_v35 = vcombine.high %v9066_v21, %v9066_v21  ;;  %v9083_v39 = vcombine.high %v9073_v36, %v9073_v36  ;;  %9095 = vst [vmem:[#allocation5 + $0x55] sm:$0x1] %v9081_v27 }
0x1639   :  { %13786 = vst.sshfl [vmem:[#allocation5 + $0xb5] sm:$0x1 pattern:$0x73625140] %v9052_v37  ;;  %9744 = vmatprep.mubr.bf16.mxu1 %v19002_v8  ;;  %9674 = vmatpush1.bf16.msra.mxu0 %v17890_v28  ;;  %v719_v37 = vadd.f32 %v19081_v42, %v15988_v3  ;;  %v19082_v36 = vld [vmem:[#allocation89_spill] sm:$0xff] }
0x163a   :  { %9715 = vmatpush1.bf16.msra.mxu1 %v17895_v47  ;;  %v9084_v0 = vcombine.high %v9080_v33, %v9080_v33  ;;  %9096 = vst [vmem:[#allocation5 + $0x75] sm:$0x1] %v9083_v39  ;;  %9099 = vst [vmem:[#allocation5 + $0xd5] sm:$0x1] %v9082_v35  ;;  %9675 = vmatprep.subr.bf16.mxu0 %v17904_v22  ;;  %v717_v27 = vadd.f32 %v19082_v36, %v15990_v61 }
0x163b   :  { %9716 = vmatprep.subr.bf16.mxu1 %v17909_v26 }
0x163c   :  { %9100 = vst [vmem:[#allocation5 + $0xf5] sm:$0x1] %v9084_v0 }
0x163d   :  { %9676 = vmatpush1.bf16.msra.mxu0 %v17914_v45 }
0x163e   :  { %9717 = vmatpush1.bf16.msra.mxu1 %v17919_v48  ;;  %9677 = vmatprep.subr.bf16.mxu0 %v17928_v1 }
0x163f   :  { %9718 = vmatprep.subr.bf16.mxu1 %v17933_v4 }
0x1641   :  { %9678 = vmatpush1.bf16.msra.mxu0 %v17938_v57 }
0x1642   :  { %9719 = vmatpush1.bf16.msra.mxu1 %v17943_v59  ;;  %9679 = vmatprep.subr.bf16.mxu0 %v17957_v60 }
0x1643   :  { %9720 = vmatprep.subr.bf16.mxu1 %v17967_v53 }
0x1645   :  { %9680 = vmatpush1.bf16.msra.mxu0 %v17952_v58 }
0x1646   :  { %9721 = vmatpush1.bf16.msra.mxu1 %v17962_v56  ;;  %9681 = vmatprep.subr.bf16.mxu0 %v17972_v62 }
0x1647   :  { %9722 = vmatprep.subr.bf16.mxu1 %v17978_v55 }
0x1649   :  { %9682 = vmatpush1.bf16.msra.mxu0 %v17986_v63 }
0x164a   :  { %9723 = vmatpush1.bf16.msra.mxu1 %v17991_v54  ;;  %9683 = vmatprep.subr.bf16.mxu0 %v17998_v11 }
0x164b   :  { %9724 = vmatprep.subr.bf16.mxu1 %v18003_v52 }
0x164d   :  { %9684 = vmatpush1.bf16.msra.mxu0 %v18010_v17 }
0x164e   :  { %9725 = vmatpush1.bf16.msra.mxu1 %v18015_v49  ;;  %9685 = vmatprep.subr.bf16.mxu0 %v18022_v51 }
0x164f   :  { %9726 = vmatprep.subr.bf16.mxu1 %v18027_v12 }
0x1651   :  { %9686 = vmatpush1.bf16.msra.mxu0 %v18034_v50 }
0x1652   :  { %9727 = vmatpush1.bf16.msra.mxu1 %v18039_v18  ;;  %10044 = vmatprep.subr.bf16.mxu0 %v17856_v14 }
0x1653   :  { %10085 = vmatprep.subr.bf16.mxu1 %v17861_v20 }
0x16f4   :  { %v9332_v13 = vpop.f32.mrf.mxu0 }
0x16f5   :  { %v9373_v19 = vpop.f32.mrf.mxu1  ;;  %v9380_v25 = vadd.f32 %v9332_v13, %v524_v40 }
0x16f6   :  { %v9334_v16 = vpop.f32.mrf.mxu0  ;;  %v9382_v33 = vadd.f32 %v9373_v19, %v717_v27 }
0x16f7   :  { %v9375_v44 = vpop.f32.mrf.mxu1  ;;  %v13819_v31 = vmul.f32 -1.442695, %v9380_v25  ;;  %v9381_v41 = vadd.f32 %v9334_v16, %v526_v34 }
0x16f8   :  { %v9336_v43 = vpop.f32.mrf.mxu0  ;;  %v9383_v21 = vadd.f32 %v9375_v44, %v719_v37 }
0x16f9   :  { %v9377_v15 = vpop.f32.mrf.mxu1  ;;  %15032 = vpow2.f32 %v13819_v31  ;;  %v13820_v30 = vmul.f32 -1.442695, %v9381_v41 }
0x16fa   :  { %v9337_v38 = vpop.f32.mrf.mxu0  ;;  %v13821_v35 = vmul.f32 -1.442695, %v9383_v21 }
0x16fb   :  { %v9378_v5 = vpop.f32.mrf.mxu1  ;;  %15034 = vpow2.f32 %v13820_v30 }
0x16fc   :  { %15036 = vtanh.f32 %v9382_v33 }
0x16fd   :  { %15038 = vpow2.f32 %v13821_v35 }
0x1706   :  { %v15033_v39 = vpop.eup %15032 }
0x1707   :  { %v9387_v0 = vadd.f32 1.0, %v15033_v39 }
0x1708   :  { %v15035_v6 = vpop.eup %15034 }
0x1709   :  { %15040 = vrcp.f32 %v9387_v0  ;;  %v9393_v40 = vadd.f32 1.0, %v15035_v6  ;;  %v15037_v13 = vpop.eup %15036 }
0x170a   :  { %v15039_v23 = vpop.eup %15038 }
0x170b   :  { %15042 = vrcp.f32 %v9393_v40  ;;  %v9400_v31 = vadd.f32 1.0, %v15039_v23  ;;  %v19083_v40 = vld [vmem:[#allocation92_spill] sm:$0xff] }
0x170d   :  { %15044 = vrcp.f32 %v9400_v31 }
0x1716   :  { %v15041_v34 = vpop.eup %15040 }
0x1717   :  { %v9404_v25 = vmul.f32 %v15041_v34, %v15037_v13  ;;  %v528_v13 = vadd.f32 %v19083_v40, %v15970_v10 }
0x1718   :  { %v15043_v16 = vpop.eup %15042 }
0x1719   :  { %v9403_v44 = vmul.f32 %v15043_v16, %v18056_v7 }
0x171a   :  { %v15045_v19 = vpop.eup %15044 }
0x171b   :  { %v18108_v41 = vadd.f32 %v9404_v25, %v9403_v44  ;;  %v19084_v25 = vld [vmem:[#allocation94_spill] sm:$0xff] }
0x171c   :  { %v530_v16 = vadd.f32 %v19084_v25, %v15976_v9 }
0x171d   :  { %15046 = vtanh.f32 %v18108_v41 }
0x172a   :  { %v15047_v43 = vpop.eup %15046 }
0x172b   :  { %v9407_v15 = vmul.f32 %v15047_v43, %v15045_v19 }
0x172d   :  { %v9409_v30 = vcombine.high %v9407_v15, %v9407_v15  ;;  %v9416_v38 = vrot.slane %v9407_v15, %v16003_v2  ;;  %v9478_v5 = vpack.c.bf16 %v9407_v15, %v9407_v15 }
0x172f   :  { %v9423_v42 = vrot.slane %v9409_v30, %v16003_v2  ;;  %v9424_v37 = vcombine.high %v9416_v38, %v9416_v38  ;;  %v9432_v21 = vrot.slane %v9416_v38, %v16003_v2  ;;  %13822 = vst.sshfl [vmem:[#allocation5 + $0x16] sm:$0x1 pattern:$0x73625140] %v9416_v38  ;;  %9704 = vmatmul.mubr.bf16.vlgmr.msra.gmra.mxu0 %v9478_v5 }
0x1730   :  { %9745 = vmatmul.mubr.bf16.vlgmr.msra.gmra.mxu1 %v9478_v5  ;;  %10045 = vmatpush1.bf16.msra.mxu0 %v17866_v29 }
0x1731   :  { %10086 = vmatpush1.bf16.msra.mxu1 %v17871_v32  ;;  %v9425_v7 = vcombine.high %v9423_v42, %v9423_v42  ;;  %v9439_v36 = vrot.slane %v9423_v42, %v16003_v2  ;;  %v9446_v27 = vrot.slane %v9424_v37, %v16003_v2  ;;  %v9454_v33 = vcombine.high %v9432_v21, %v9432_v21 }
0x1732   :  { %13823 = vst.sshfl [vmem:[#allocation5 + $0x36] sm:$0x1 pattern:$0x73625140] %v9424_v37  ;;  %10046 = vmatprep.subr.bf16.mxu0 %v17880_v24  ;;  %10087 = vmatprep.subr.bf16.mxu1 %v17885_v46 }
0x1733   :  { %13824 = vst.sshfl [vmem:[#allocation5 + $0x96] sm:$0x1 pattern:$0x73625140] %v9423_v42  ;;  %10076 = vmatprep.mubr.bf16.mxu0 %v19002_v8  ;;  %v9453_v35 = vrot.slane %v9425_v7, %v16003_v2  ;;  %v9455_v39 = vcombine.high %v9439_v36, %v9439_v36  ;;  %v9456_v0 = vcombine.high %v9446_v27, %v9446_v27  ;;  %9468 = vst [vmem:[#allocation5 + $0x56] sm:$0x1] %v9454_v33 }
0x1734   :  { %13825 = vst.sshfl [vmem:[#allocation5 + $0xb6] sm:$0x1 pattern:$0x73625140] %v9425_v7  ;;  %10117 = vmatprep.mubr.bf16.mxu1 %v19002_v8  ;;  %10047 = vmatpush1.bf16.msra.mxu0 %v17890_v28  ;;  %v19086_v7 = vld [vmem:[#allocation93_spill] sm:$0xff] }
0x1735   :  { %10088 = vmatpush1.bf16.msra.mxu1 %v17895_v47  ;;  %v9457_v6 = vcombine.high %v9453_v35, %v9453_v35  ;;  %9469 = vst [vmem:[#allocation5 + $0x76] sm:$0x1] %v9456_v0  ;;  %9472 = vst [vmem:[#allocation5 + $0xd6] sm:$0x1] %v9455_v39  ;;  %10048 = vmatprep.subr.bf16.mxu0 %v17904_v22  ;;  %v721_v36 = vadd.f32 %v19086_v7, %v15990_v61 }
0x1736   :  { %10089 = vmatprep.subr.bf16.mxu1 %v17909_v26 }
0x1737   :  { %9473 = vst [vmem:[#allocation5 + $0xf6] sm:$0x1] %v9457_v6 }
0x1738   :  { %10049 = vmatpush1.bf16.msra.mxu0 %v17914_v45 }
0x1739   :  { %10090 = vmatpush1.bf16.msra.mxu1 %v17919_v48  ;;  %10050 = vmatprep.subr.bf16.mxu0 %v17928_v1 }
0x173a   :  { %10091 = vmatprep.subr.bf16.mxu1 %v17933_v4 }
0x173c   :  { %10051 = vmatpush1.bf16.msra.mxu0 %v17938_v57 }
0x173d   :  { %10092 = vmatpush1.bf16.msra.mxu1 %v17943_v59  ;;  %10052 = vmatprep.subr.bf16.mxu0 %v17957_v60 }
0x173e   :  { %10093 = vmatprep.subr.bf16.mxu1 %v17967_v53 }
0x1740   :  { %10053 = vmatpush1.bf16.msra.mxu0 %v17952_v58 }
0x1741   :  { %10094 = vmatpush1.bf16.msra.mxu1 %v17962_v56  ;;  %10054 = vmatprep.subr.bf16.mxu0 %v17972_v62 }
0x1742   :  { %10095 = vmatprep.subr.bf16.mxu1 %v17978_v55 }
0x1744   :  { %10055 = vmatpush1.bf16.msra.mxu0 %v17986_v63 }
0x1745   :  { %10096 = vmatpush1.bf16.msra.mxu1 %v17991_v54  ;;  %10056 = vmatprep.subr.bf16.mxu0 %v17998_v11 }
0x1746   :  { %10097 = vmatprep.subr.bf16.mxu1 %v18003_v52 }
0x1748   :  { %10057 = vmatpush1.bf16.msra.mxu0 %v18010_v17 }
0x1749   :  { %10098 = vmatpush1.bf16.msra.mxu1 %v18015_v49  ;;  %10058 = vmatprep.subr.bf16.mxu0 %v18022_v51 }
0x174a   :  { %10099 = vmatprep.subr.bf16.mxu1 %v18027_v12 }
0x174c   :  { %10059 = vmatpush1.bf16.msra.mxu0 %v18034_v50 }
0x174d   :  { %10100 = vmatpush1.bf16.msra.mxu1 %v18039_v18  ;;  %10417 = vmatprep.subr.bf16.mxu0 %v17856_v14 }
0x174e   :  { %10458 = vmatprep.subr.bf16.mxu1 %v17861_v20  ;;  %v19085_v20 = vld [vmem:[#allocation95_spill] sm:$0xff] }
0x174f   :  { %v723_v37 = vadd.f32 %v19085_v20, %v15988_v3 }
0x17ef   :  { %v9705_v23 = vpop.f32.mrf.mxu0 }
0x17f0   :  { %v9746_v34 = vpop.f32.mrf.mxu1  ;;  %v9753_v31 = vadd.f32 %v9705_v23, %v528_v13 }
0x17f1   :  { %v9707_v44 = vpop.f32.mrf.mxu0  ;;  %v9755_v27 = vadd.f32 %v9746_v34, %v721_v36 }
0x17f2   :  { %v9748_v19 = vpop.f32.mrf.mxu1  ;;  %v13858_v43 = vmul.f32 -1.442695, %v9753_v31  ;;  %v9754_v15 = vadd.f32 %v9707_v44, %v530_v16 }
0x17f3   :  { %v9709_v30 = vpop.f32.mrf.mxu0  ;;  %v9756_v21 = vadd.f32 %v9748_v19, %v723_v37 }
0x17f4   :  { %v9750_v38 = vpop.f32.mrf.mxu1  ;;  %15048 = vpow2.f32 %v13858_v43  ;;  %v13859_v5 = vmul.f32 -1.442695, %v9754_v15 }
0x17f5   :  { %v9710_v14 = vpop.f32.mrf.mxu0  ;;  %v13860_v33 = vmul.f32 -1.442695, %v9756_v21 }
0x17f6   :  { %v9751_v42 = vpop.f32.mrf.mxu1  ;;  %15050 = vpow2.f32 %v13859_v5 }
0x17f7   :  { %15052 = vtanh.f32 %v9755_v27 }
0x17f8   :  { %15054 = vpow2.f32 %v13860_v33 }
0x1801   :  { %v15049_v35 = vpop.eup %15048 }
0x1802   :  { %v9760_v39 = vadd.f32 1.0, %v15049_v35 }
0x1803   :  { %v15051_v0 = vpop.eup %15050 }
0x1804   :  { %15056 = vrcp.f32 %v9760_v39  ;;  %v9766_v6 = vadd.f32 1.0, %v15051_v0  ;;  %v15053_v40 = vpop.eup %15052 }
0x1805   :  { %v15055_v13 = vpop.eup %15054 }
0x1806   :  { %15058 = vrcp.f32 %v9766_v6  ;;  %v9773_v31 = vadd.f32 1.0, %v15055_v13 }
0x1808   :  { %15060 = vrcp.f32 %v9773_v31 }
0x1811   :  { %v15057_v23 = vpop.eup %15056 }
0x1812   :  { %v9777_v25 = vmul.f32 %v15057_v23, %v15053_v40 }
0x1813   :  { %v15059_v16 = vpop.eup %15058 }
0x1814   :  { %v9776_v44 = vmul.f32 %v15059_v16, %v18108_v41 }
0x1815   :  { %v15061_v34 = vpop.eup %15060 }
0x1816   :  { %v18160_v19 = vadd.f32 %v9777_v25, %v9776_v44 }
0x1818   :  { %15062 = vtanh.f32 %v18160_v19 }
0x1825   :  { %v15063_v43 = vpop.eup %15062 }
0x1826   :  { %v9780_v15 = vmul.f32 %v15063_v43, %v15061_v34 }
0x1828   :  { %v9782_v30 = vcombine.high %v9780_v15, %v9780_v15  ;;  %v9789_v38 = vrot.slane %v9780_v15, %v16003_v2  ;;  %v9851_v5 = vpack.c.bf16 %v9780_v15, %v9780_v15 }
0x182a   :  { %v9796_v14 = vrot.slane %v9782_v30, %v16003_v2  ;;  %v9797_v42 = vcombine.high %v9789_v38, %v9789_v38  ;;  %v9805_v20 = vrot.slane %v9789_v38, %v16003_v2  ;;  %13861 = vst.sshfl [vmem:[#allocation5 + $0x17] sm:$0x1 pattern:$0x73625140] %v9789_v38  ;;  %10077 = vmatmul.mubr.bf16.vlgmr.msra.gmra.mxu0 %v9851_v5 }
0x182b   :  { %10118 = vmatmul.mubr.bf16.vlgmr.msra.gmra.mxu1 %v9851_v5  ;;  %10418 = vmatpush1.bf16.msra.mxu0 %v17866_v29 }
0x182c   :  { %10459 = vmatpush1.bf16.msra.mxu1 %v17871_v32  ;;  %v9798_v41 = vcombine.high %v9796_v14, %v9796_v14  ;;  %v9812_v37 = vrot.slane %v9796_v14, %v16003_v2  ;;  %v9819_v21 = vrot.slane %v9797_v42, %v16003_v2  ;;  %v9827_v7 = vcombine.high %v9805_v20, %v9805_v20 }
0x182d   :  { %13862 = vst.sshfl [vmem:[#allocation5 + $0x37] sm:$0x1 pattern:$0x73625140] %v9797_v42  ;;  %10419 = vmatprep.subr.bf16.mxu0 %v17880_v24  ;;  %10460 = vmatprep.subr.bf16.mxu1 %v17885_v46  ;;  %v19087_v24 = vld [vmem:[#allocation96_spill] sm:$0xff] }
0x182e   :  { %13863 = vst.sshfl [vmem:[#allocation5 + $0x97] sm:$0x1 pattern:$0x73625140] %v9796_v14  ;;  %10449 = vmatprep.mubr.bf16.mxu0 %v19002_v8  ;;  %v9826_v36 = vrot.slane %v9798_v41, %v16003_v2  ;;  %v9828_v27 = vcombine.high %v9812_v37, %v9812_v37  ;;  %v9829_v29 = vcombine.high %v9819_v21, %v9819_v21  ;;  %9841 = vst [vmem:[#allocation5 + $0x57] sm:$0x1] %v9827_v7 }
0x182f   :  { %13864 = vst.sshfl [vmem:[#allocation5 + $0xb7] sm:$0x1 pattern:$0x73625140] %v9798_v41  ;;  %10490 = vmatprep.mubr.bf16.mxu1 %v19002_v8  ;;  %10420 = vmatpush1.bf16.msra.mxu0 %v17890_v28  ;;  %v534_v46 = vadd.f32 %v19087_v24, %v15970_v10  ;;  %v18224_v21 = vld [vmem:[%s18879_s4 + $0xe4] ss:$16 sps:$4 sm:$0xff]  }
0x1830   :  { %10461 = vmatpush1.bf16.msra.mxu1 %v17895_v47  ;;  %v9830_v32 = vcombine.high %v9826_v36, %v9826_v36  ;;  %9842 = vst [vmem:[#allocation5 + $0x77] sm:$0x1] %v9829_v29  ;;  %9845 = vst [vmem:[#allocation5 + $0xd7] sm:$0x1] %v9828_v27  ;;  %10421 = vmatprep.subr.bf16.mxu0 %v17904_v22  ;;  %v19088_v22 = vld [vmem:[#allocation98_spill] sm:$0xff] }
0x1831   :  { %10462 = vmatprep.subr.bf16.mxu1 %v17909_v26  ;;  %v536_v26 = vadd.f32 %v19088_v22, %v15976_v9  ;;  %v18229_v7 = vld [vmem:[%s18879_s4 + $0xec] ss:$16 sps:$4 sm:$0xff]   ;;  %v18234_v36 = vld [vmem:[%s18879_s4 + $0xe0] ss:$16 sps:$4 sm:$0xff]   ;;  %v18239_v27 = vld [vmem:[%s18879_s4 + $0xe8] ss:$16 sps:$4 sm:$0xff]  }
0x1832   :  { %9846 = vst [vmem:[#allocation5 + $0xf7] sm:$0x1] %v9830_v32  ;;  %v18248_v29 = vld [vmem:[%s18879_s4 + $0xc4] ss:$16 sps:$4 sm:$0xff]   ;;  %v18253_v32 = vld [vmem:[%s18879_s4 + $0xcc] ss:$16 sps:$4 sm:$0xff]  }
0x1833   :  { %10422 = vmatpush1.bf16.msra.mxu0 %v17914_v45  ;;  %v18258_v24 = vld [vmem:[%s18879_s4 + $0xc0] ss:$16 sps:$4 sm:$0xff]  }
0x1834   :  { %10463 = vmatpush1.bf16.msra.mxu1 %v17919_v48  ;;  %10423 = vmatprep.subr.bf16.mxu0 %v17928_v1  ;;  %v18282_v22 = vld [vmem:[%s18879_s4 + $0xa0] ss:$16 sps:$4 sm:$0xff]  }
0x1835   :  { %10464 = vmatprep.subr.bf16.mxu1 %v17933_v4 }
0x1837   :  { %10424 = vmatpush1.bf16.msra.mxu0 %v17938_v57 }
0x1838   :  { %10465 = vmatpush1.bf16.msra.mxu1 %v17943_v59  ;;  %10425 = vmatprep.subr.bf16.mxu0 %v17957_v60 }
0x1839   :  { %10466 = vmatprep.subr.bf16.mxu1 %v17967_v53 }
0x183b   :  { %10426 = vmatpush1.bf16.msra.mxu0 %v17952_v58 }
0x183c   :  { %10467 = vmatpush1.bf16.msra.mxu1 %v17962_v56  ;;  %10427 = vmatprep.subr.bf16.mxu0 %v17972_v62  ;;  %v19089_v62 = vld [vmem:[#allocation99_spill] sm:$0xff] }
0x183d   :  { %10468 = vmatprep.subr.bf16.mxu1 %v17978_v55  ;;  %v729_v55 = vadd.f32 %v19089_v62, %v15988_v3  ;;  %v18354_v62 = vld [vmem:[%s18879_s4 + $0x40] ss:$16 sps:$4 sm:$0xff]  }
0x183f   :  { %10428 = vmatpush1.bf16.msra.mxu0 %v17986_v63 }
0x1840   :  { %10469 = vmatpush1.bf16.msra.mxu1 %v17991_v54  ;;  %10429 = vmatprep.subr.bf16.mxu0 %v17998_v11  ;;  %v19090_v54 = vld [vmem:[#allocation97_spill] sm:$0xff] }
0x1841   :  { %10470 = vmatprep.subr.bf16.mxu1 %v18003_v52  ;;  %v727_v11 = vadd.f32 %v19090_v54, %v15990_v61  ;;  %v18371_v54 = vld [vmem:[%s18879_s4 + $0x2c] ss:$16 sps:$4 sm:$0xff]  }
0x1843   :  { %10430 = vmatpush1.bf16.msra.mxu0 %v18010_v17 }
0x1844   :  { %10471 = vmatpush1.bf16.msra.mxu1 %v18015_v49  ;;  %10431 = vmatprep.subr.bf16.mxu0 %v18022_v51 }
0x1845   :  { %10472 = vmatprep.subr.bf16.mxu1 %v18027_v12 }
0x1847   :  { %10432 = vmatpush1.bf16.msra.mxu0 %v18034_v50 }
0x1848   :  { %10473 = vmatpush1.bf16.msra.mxu1 %v18039_v18  ;;  %10790 = vmatprep.subr.bf16.mxu0 %v18224_v21 }
0x1849   :  { %10831 = vmatprep.subr.bf16.mxu1 %v18229_v7 }
0x18ea   :  { %v10078_v28 = vpop.f32.mrf.mxu0 }
0x18eb   :  { %v10119_v47 = vpop.f32.mrf.mxu1  ;;  %v10126_v45 = vadd.f32 %v10078_v28, %v534_v46  ;;  %v18263_v46 = vld [vmem:[%s18879_s4 + $0xc8] ss:$16 sps:$4 sm:$0xff]   ;;  %v18272_v28 = vld [vmem:[%s18879_s4 + $0xa4] ss:$16 sps:$4 sm:$0xff]  }
0x18ec   :  { %v10080_v48 = vpop.f32.mrf.mxu0  ;;  %v10128_v52 = vadd.f32 %v10119_v47, %v727_v11  ;;  %v18277_v47 = vld [vmem:[%s18879_s4 + $0xac] ss:$16 sps:$4 sm:$0xff]   ;;  %v18378_v11 = vld [vmem:[%s18879_s4 + $0x20] ss:$16 sps:$4 sm:$0xff]  }
0x18ed   :  { %v10121_v1 = vpop.f32.mrf.mxu1  ;;  %v13897_v4 = vmul.f32 -1.442695, %v10126_v45  ;;  %v10127_v57 = vadd.f32 %v10080_v48, %v536_v26  ;;  %v18287_v26 = vld [vmem:[%s18879_s4 + $0xa8] ss:$16 sps:$4 sm:$0xff]   ;;  %v18296_v45 = vld [vmem:[%s18879_s4 + $0x84] ss:$16 sps:$4 sm:$0xff]  }
0x18ee   :  { %v10082_v59 = vpop.f32.mrf.mxu0  ;;  %v10129_v63 = vadd.f32 %v10121_v1, %v729_v55  ;;  %v18301_v48 = vld [vmem:[%s18879_s4 + $0x8c] ss:$16 sps:$4 sm:$0xff]   ;;  %v18306_v1 = vld [vmem:[%s18879_s4 + $0x80] ss:$16 sps:$4 sm:$0xff]   ;;  %v18359_v55 = vld [vmem:[%s18879_s4 + $0x48] ss:$16 sps:$4 sm:$0xff]  }
0x18ef   :  { %v10123_v58 = vpop.f32.mrf.mxu1  ;;  %15064 = vpow2.f32 %v13897_v4  ;;  %v13898_v60 = vmul.f32 -1.442695, %v10127_v57  ;;  %v18311_v4 = vld [vmem:[%s18879_s4 + $0x88] ss:$16 sps:$4 sm:$0xff]   ;;  %v18320_v57 = vld [vmem:[%s18879_s4 + $0x60] ss:$16 sps:$4 sm:$0xff]  }
0x18f0   :  { %v10083_v56 = vpop.f32.mrf.mxu0  ;;  %v13899_v17 = vmul.f32 -1.442695, %v10129_v63  ;;  %v18325_v59 = vld [vmem:[%s18879_s4 + $0x64] ss:$16 sps:$4 sm:$0xff]   ;;  %v18330_v58 = vld [vmem:[%s18879_s4 + $0x68] ss:$16 sps:$4 sm:$0xff]  }
0x18f1   :  { %v10124_v53 = vpop.f32.mrf.mxu1  ;;  %15066 = vpow2.f32 %v13898_v60  ;;  %v18335_v60 = vld [vmem:[%s18879_s4 + $0x6c] ss:$16 sps:$4 sm:$0xff]   ;;  %v18340_v56 = vld [vmem:[%s18879_s4 + $0x44] ss:$16 sps:$4 sm:$0xff]  }
0x18f2   :  { %15068 = vtanh.f32 %v10128_v52  ;;  %v18346_v53 = vld [vmem:[%s18879_s4 + $0x4c] ss:$16 sps:$4 sm:$0xff]   ;;  %v18366_v63 = vld [vmem:[%s18879_s4 + $0x24] ss:$16 sps:$4 sm:$0xff]   ;;  %v18383_v52 = vld [vmem:[%s18879_s4 + $0x28] ss:$16 sps:$4 sm:$0xff]  }
0x18f3   :  { %15070 = vpow2.f32 %v13899_v17  ;;  %v18390_v17 = vld [vmem:[%s18879_s4 + $0x4] ss:$16 sps:$4 sm:$0xff]  }
0x18fc   :  { %v15065_v49 = vpop.eup %15064 }
0x18fd   :  { %v10133_v51 = vadd.f32 1.0, %v15065_v49  ;;  %v18395_v49 = vld [vmem:[%s18879_s4 + $0xc] ss:$16 sps:$4 sm:$0xff]  }
0x18fe   :  { %v15067_v12 = vpop.eup %15066 }
0x18ff   :  { %15072 = vrcp.f32 %v10133_v51  ;;  %v10139_v50 = vadd.f32 1.0, %v15067_v12  ;;  %v15069_v18 = vpop.eup %15068  ;;  %v18402_v51 = vld [vmem:[%s18879_s4] ss:$16 sps:$4 sm:$0xff]   ;;  %v18407_v12 = vld [vmem:[%s18879_s4 + $0x8] ss:$16 sps:$4 sm:$0xff]  }
0x1900   :  { %v15071_v33 = vpop.eup %15070 }
0x1901   :  { %15074 = vrcp.f32 %v10139_v50  ;;  %v10146_v6 = vadd.f32 1.0, %v15071_v33  ;;  %v19091_v50 = vld [vmem:[#allocation100_spill] sm:$0xff] }
0x1903   :  { %15076 = vrcp.f32 %v10146_v6 }
0x190c   :  { %v15073_v35 = vpop.eup %15072 }
0x190d   :  { %v10150_v39 = vmul.f32 %v15073_v35, %v15069_v18  ;;  %v538_v18 = vadd.f32 %v19091_v50, %v15970_v10 }
0x190e   :  { %v15075_v0 = vpop.eup %15074 }
0x190f   :  { %v10149_v40 = vmul.f32 %v15075_v0, %v18160_v19 }
0x1910   :  { %v15077_v23 = vpop.eup %15076 }
0x1911   :  { %v18210_v13 = vadd.f32 %v10150_v39, %v10149_v40  ;;  %v19092_v39 = vld [vmem:[#allocation102_spill] sm:$0xff] }
0x1912   :  { %v540_v0 = vadd.f32 %v19092_v39, %v15976_v9 }
0x1913   :  { %15078 = vtanh.f32 %v18210_v13 }
0x1920   :  { %v15079_v25 = vpop.eup %15078 }
0x1921   :  { %v10153_v16 = vmul.f32 %v15079_v25, %v15077_v23 }
0x1923   :  { %v10155_v31 = vcombine.high %v10153_v16, %v10153_v16  ;;  %v10162_v44 = vrot.slane %v10153_v16, %v16003_v2  ;;  %v10224_v34 = vpack.c.bf16 %v10153_v16, %v10153_v16 }
0x1925   :  { %v10169_v43 = vrot.slane %v10155_v31, %v16003_v2  ;;  %v10170_v15 = vcombine.high %v10162_v44, %v10162_v44  ;;  %v10178_v30 = vrot.slane %v10162_v44, %v16003_v2  ;;  %13900 = vst.sshfl [vmem:[#allocation5 + $0x18] sm:$0x1 pattern:$0x73625140] %v10162_v44  ;;  %10450 = vmatmul.mubr.bf16.vlgmr.msra.gmra.mxu0 %v10224_v34 }
0x1926   :  { %10491 = vmatmul.mubr.bf16.vlgmr.msra.gmra.mxu1 %v10224_v34  ;;  %10822 = vmatprep.mubr.bf16.mxu0 %v19002_v8 }
0x1927   :  { %10863 = vmatprep.mubr.bf16.mxu1 %v19002_v8  ;;  %v10171_v19 = vcombine.high %v10169_v43, %v10169_v43  ;;  %v10185_v38 = vrot.slane %v10169_v43, %v16003_v2  ;;  %v10192_v5 = vrot.slane %v10170_v15, %v16003_v2  ;;  %v10200_v14 = vcombine.high %v10178_v30, %v10178_v30  ;;  %v19093_v30 = vld [vmem:[#allocation103_spill] sm:$0xff] }
0x1928   :  { %13901 = vst.sshfl [vmem:[#allocation5 + $0x38] sm:$0x1 pattern:$0x73625140] %v10170_v15  ;;  %10791 = vmatpush1.bf16.msra.mxu0 %v18234_v36  ;;  %10832 = vmatpush1.bf16.msra.mxu1 %v18239_v27 }
0x1929   :  { %13902 = vst.sshfl [vmem:[#allocation5 + $0x98] sm:$0x1 pattern:$0x73625140] %v10169_v43  ;;  %v10199_v42 = vrot.slane %v10171_v19, %v16003_v2  ;;  %v10201_v20 = vcombine.high %v10185_v38, %v10185_v38  ;;  %v10202_v41 = vcombine.high %v10192_v5, %v10192_v5  ;;  %10214 = vst [vmem:[#allocation5 + $0x58] sm:$0x1] %v10200_v14  ;;  %10792 = vmatprep.subr.bf16.mxu0 %v18248_v29 }
0x192a   :  { %13903 = vst.sshfl [vmem:[#allocation5 + $0xb8] sm:$0x1 pattern:$0x73625140] %v10171_v19  ;;  %10833 = vmatprep.subr.bf16.mxu1 %v18253_v32  ;;  %v733_v19 = vadd.f32 %v19093_v30, %v15988_v3  ;;  %v19094_v5 = vld [vmem:[#allocation101_spill] sm:$0xff] }
0x192b   :  { %v10203_v37 = vcombine.high %v10199_v42, %v10199_v42  ;;  %10215 = vst [vmem:[#allocation5 + $0x78] sm:$0x1] %v10202_v41  ;;  %10218 = vst [vmem:[#allocation5 + $0xd8] sm:$0x1] %v10201_v20  ;;  %v731_v14 = vadd.f32 %v19094_v5, %v15990_v61 }
0x192c   :  { %10793 = vmatpush1.bf16.msra.mxu0 %v18258_v24  ;;  %10834 = vmatpush1.bf16.msra.mxu1 %v18263_v46 }
0x192d   :  { %10219 = vst [vmem:[#allocation5 + $0xf8] sm:$0x1] %v10203_v37  ;;  %10794 = vmatprep.subr.bf16.mxu0 %v18272_v28  ;;  %10835 = vmatprep.subr.bf16.mxu1 %v18277_v47 }
0x1930   :  { %10795 = vmatpush1.bf16.msra.mxu0 %v18282_v22  ;;  %10836 = vmatpush1.bf16.msra.mxu1 %v18287_v26 }
0x1931   :  { %10796 = vmatprep.subr.bf16.mxu0 %v18296_v45  ;;  %10837 = vmatprep.subr.bf16.mxu1 %v18301_v48 }
0x1934   :  { %10797 = vmatpush1.bf16.msra.mxu0 %v18306_v1  ;;  %10838 = vmatpush1.bf16.msra.mxu1 %v18311_v4 }
0x1935   :  { %10798 = vmatprep.subr.bf16.mxu0 %v18325_v59  ;;  %10839 = vmatprep.subr.bf16.mxu1 %v18335_v60 }
0x1938   :  { %10799 = vmatpush1.bf16.msra.mxu0 %v18320_v57  ;;  %10840 = vmatpush1.bf16.msra.mxu1 %v18330_v58 }
0x1939   :  { %10800 = vmatprep.subr.bf16.mxu0 %v18340_v56  ;;  %10841 = vmatprep.subr.bf16.mxu1 %v18346_v53 }
0x193c   :  { %10801 = vmatpush1.bf16.msra.mxu0 %v18354_v62  ;;  %10842 = vmatpush1.bf16.msra.mxu1 %v18359_v55 }
0x193d   :  { %10802 = vmatprep.subr.bf16.mxu0 %v18366_v63  ;;  %10843 = vmatprep.subr.bf16.mxu1 %v18371_v54 }
0x1940   :  { %10803 = vmatpush1.bf16.msra.mxu0 %v18378_v11  ;;  %10844 = vmatpush1.bf16.msra.mxu1 %v18383_v52 }
0x1941   :  { %10804 = vmatprep.subr.bf16.mxu0 %v18390_v17  ;;  %10845 = vmatprep.subr.bf16.mxu1 %v18395_v49 }
0x1944   :  { %10805 = vmatpush1.bf16.msra.mxu0 %v18402_v51  ;;  %10846 = vmatpush1.bf16.msra.mxu1 %v18407_v12 }
0x1945   :  { %11163 = vmatprep.subr.bf16.mxu0 %v18224_v21  ;;  %11204 = vmatprep.subr.bf16.mxu1 %v18229_v7 }
0x19e5   :  { %v10451_v33 = vpop.f32.mrf.mxu0 }
0x19e6   :  { %v10492_v35 = vpop.f32.mrf.mxu1  ;;  %v10499_v6 = vadd.f32 %v10451_v33, %v538_v18 }
0x19e7   :  { %v10453_v40 = vpop.f32.mrf.mxu0  ;;  %v10501_v42 = vadd.f32 %v10492_v35, %v731_v14 }
0x19e8   :  { %v10494_v23 = vpop.f32.mrf.mxu1  ;;  %v13936_v25 = vmul.f32 -1.442695, %v10499_v6  ;;  %v10500_v16 = vadd.f32 %v10453_v40, %v540_v0 }
0x19e9   :  { %v10455_v31 = vpop.f32.mrf.mxu0  ;;  %v10502_v38 = vadd.f32 %v10494_v23, %v733_v19 }
0x19ea   :  { %v10496_v44 = vpop.f32.mrf.mxu1  ;;  %15080 = vpow2.f32 %v13936_v25  ;;  %v13937_v34 = vmul.f32 -1.442695, %v10500_v16 }
0x19eb   :  { %v10456_v43 = vpop.f32.mrf.mxu0  ;;  %v13938_v20 = vmul.f32 -1.442695, %v10502_v38 }
0x19ec   :  { %v10497_v15 = vpop.f32.mrf.mxu1  ;;  %15082 = vpow2.f32 %v13937_v34 }
0x19ed   :  { %15084 = vtanh.f32 %v10501_v42 }
0x19ee   :  { %15086 = vpow2.f32 %v13938_v20 }
0x19f7   :  { %v15081_v41 = vpop.eup %15080 }
0x19f8   :  { %v10506_v37 = vadd.f32 1.0, %v15081_v41 }
0x19f9   :  { %v15083_v50 = vpop.eup %15082 }
0x19fa   :  { %15088 = vrcp.f32 %v10506_v37  ;;  %v10512_v18 = vadd.f32 1.0, %v15083_v50  ;;  %v15085_v33 = vpop.eup %15084 }
0x19fb   :  { %v15087_v39 = vpop.eup %15086 }
0x19fc   :  { %15090 = vrcp.f32 %v10512_v18  ;;  %v10519_v25 = vadd.f32 1.0, %v15087_v39  ;;  %v19095_v18 = vld [vmem:[#allocation104_spill] sm:$0xff] }
0x19fe   :  { %15092 = vrcp.f32 %v10519_v25 }
0x1a07   :  { %v15089_v0 = vpop.eup %15088 }
0x1a08   :  { %v10523_v6 = vmul.f32 %v15089_v0, %v15085_v33  ;;  %v544_v33 = vadd.f32 %v19095_v18, %v15970_v10 }
0x1a09   :  { %v15091_v40 = vpop.eup %15090 }
0x1a0a   :  { %v10522_v23 = vmul.f32 %v15091_v40, %v18210_v13 }
0x1a0b   :  { %v15093_v35 = vpop.eup %15092 }
0x1a0c   :  { %v18424_v16 = vadd.f32 %v10523_v6, %v10522_v23  ;;  %v19096_v6 = vld [vmem:[#allocation106_spill] sm:$0xff] }
0x1a0d   :  { %v546_v40 = vadd.f32 %v19096_v6, %v15976_v9 }
0x1a0e   :  { %15094 = vtanh.f32 %v18424_v16 }
0x1a1b   :  { %v15095_v31 = vpop.eup %15094 }
0x1a1c   :  { %v10526_v44 = vmul.f32 %v15095_v31, %v15093_v35 }
0x1a1e   :  { %v10528_v34 = vcombine.high %v10526_v44, %v10526_v44  ;;  %v10535_v43 = vrot.slane %v10526_v44, %v16003_v2  ;;  %v10597_v15 = vpack.c.bf16 %v10526_v44, %v10526_v44 }
0x1a20   :  { %v10542_v30 = vrot.slane %v10528_v34, %v16003_v2  ;;  %v10543_v19 = vcombine.high %v10535_v43, %v10535_v43  ;;  %v10551_v38 = vrot.slane %v10535_v43, %v16003_v2  ;;  %13939 = vst.sshfl [vmem:[#allocation5 + $0x19] sm:$0x1 pattern:$0x73625140] %v10535_v43  ;;  %10823 = vmatmul.mubr.bf16.vlgmr.msra.gmra.mxu0 %v10597_v15 }
0x1a21   :  { %10864 = vmatmul.mubr.bf16.vlgmr.msra.gmra.mxu1 %v10597_v15  ;;  %11164 = vmatpush1.bf16.msra.mxu0 %v18234_v36 }
0x1a22   :  { %11205 = vmatpush1.bf16.msra.mxu1 %v18239_v27  ;;  %v10544_v13 = vcombine.high %v10542_v30, %v10542_v30  ;;  %v10558_v5 = vrot.slane %v10542_v30, %v16003_v2  ;;  %v10565_v14 = vrot.slane %v10543_v19, %v16003_v2  ;;  %v10573_v42 = vcombine.high %v10551_v38, %v10551_v38  ;;  %v19097_v38 = vld [vmem:[#allocation107_spill] sm:$0xff] }
0x1a23   :  { %13940 = vst.sshfl [vmem:[#allocation5 + $0x39] sm:$0x1 pattern:$0x73625140] %v10543_v19  ;;  %11165 = vmatprep.subr.bf16.mxu0 %v18248_v29  ;;  %11206 = vmatprep.subr.bf16.mxu1 %v18253_v32 }
0x1a24   :  { %13941 = vst.sshfl [vmem:[#allocation5 + $0x99] sm:$0x1 pattern:$0x73625140] %v10542_v30  ;;  %11195 = vmatprep.mubr.bf16.mxu0 %v19002_v8  ;;  %v10572_v20 = vrot.slane %v10544_v13, %v16003_v2  ;;  %v10574_v41 = vcombine.high %v10558_v5, %v10558_v5  ;;  %v10575_v37 = vcombine.high %v10565_v14, %v10565_v14  ;;  %10587 = vst [vmem:[#allocation5 + $0x59] sm:$0x1] %v10573_v42 }
0x1a25   :  { %13942 = vst.sshfl [vmem:[#allocation5 + $0xb9] sm:$0x1 pattern:$0x73625140] %v10544_v13  ;;  %11236 = vmatprep.mubr.bf16.mxu1 %v19002_v8  ;;  %11166 = vmatpush1.bf16.msra.mxu0 %v18258_v24  ;;  %v739_v13 = vadd.f32 %v19097_v38, %v15988_v3  ;;  %v19098_v14 = vld [vmem:[#allocation105_spill] sm:$0xff] }
0x1a26   :  { %11207 = vmatpush1.bf16.msra.mxu1 %v18263_v46  ;;  %v10576_v50 = vcombine.high %v10572_v20, %v10572_v20  ;;  %10588 = vst [vmem:[#allocation5 + $0x79] sm:$0x1] %v10575_v37  ;;  %10591 = vst [vmem:[#allocation5 + $0xd9] sm:$0x1] %v10574_v41  ;;  %11167 = vmatprep.subr.bf16.mxu0 %v18272_v28  ;;  %v737_v42 = vadd.f32 %v19098_v14, %v15990_v61 }
0x1a27   :  { %11208 = vmatprep.subr.bf16.mxu1 %v18277_v47 }
0x1a28   :  { %10592 = vst [vmem:[#allocation5 + $0xf9] sm:$0x1] %v10576_v50 }
0x1a29   :  { %11168 = vmatpush1.bf16.msra.mxu0 %v18282_v22 }
0x1a2a   :  { %11209 = vmatpush1.bf16.msra.mxu1 %v18287_v26  ;;  %11169 = vmatprep.subr.bf16.mxu0 %v18296_v45 }
0x1a2b   :  { %11210 = vmatprep.subr.bf16.mxu1 %v18301_v48 }
0x1a2d   :  { %11170 = vmatpush1.bf16.msra.mxu0 %v18306_v1 }
0x1a2e   :  { %11211 = vmatpush1.bf16.msra.mxu1 %v18311_v4  ;;  %11171 = vmatprep.subr.bf16.mxu0 %v18325_v59 }
0x1a2f   :  { %11212 = vmatprep.subr.bf16.mxu1 %v18335_v60 }
0x1a31   :  { %11172 = vmatpush1.bf16.msra.mxu0 %v18320_v57 }
0x1a32   :  { %11213 = vmatpush1.bf16.msra.mxu1 %v18330_v58  ;;  %11173 = vmatprep.subr.bf16.mxu0 %v18340_v56 }
0x1a33   :  { %11214 = vmatprep.subr.bf16.mxu1 %v18346_v53 }
0x1a35   :  { %11174 = vmatpush1.bf16.msra.mxu0 %v18354_v62 }
0x1a36   :  { %11215 = vmatpush1.bf16.msra.mxu1 %v18359_v55  ;;  %11175 = vmatprep.subr.bf16.mxu0 %v18366_v63 }
0x1a37   :  { %11216 = vmatprep.subr.bf16.mxu1 %v18371_v54 }
0x1a39   :  { %11176 = vmatpush1.bf16.msra.mxu0 %v18378_v11 }
0x1a3a   :  { %11217 = vmatpush1.bf16.msra.mxu1 %v18383_v52  ;;  %11177 = vmatprep.subr.bf16.mxu0 %v18390_v17 }
0x1a3b   :  { %11218 = vmatprep.subr.bf16.mxu1 %v18395_v49 }
0x1a3d   :  { %11178 = vmatpush1.bf16.msra.mxu0 %v18402_v51 }
0x1a3e   :  { %11219 = vmatpush1.bf16.msra.mxu1 %v18407_v12  ;;  %11536 = vmatprep.subr.bf16.mxu0 %v18224_v21 }
0x1a3f   :  { %11577 = vmatprep.subr.bf16.mxu1 %v18229_v7 }
0x1ae0   :  { %v10824_v39 = vpop.f32.mrf.mxu0 }
0x1ae1   :  { %v10865_v0 = vpop.f32.mrf.mxu1  ;;  %v10872_v25 = vadd.f32 %v10824_v39, %v544_v33 }
0x1ae2   :  { %v10826_v23 = vpop.f32.mrf.mxu0  ;;  %v10874_v20 = vadd.f32 %v10865_v0, %v737_v42 }
0x1ae3   :  { %v10867_v35 = vpop.f32.mrf.mxu1  ;;  %v13975_v31 = vmul.f32 -1.442695, %v10872_v25  ;;  %v10873_v44 = vadd.f32 %v10826_v23, %v546_v40 }
0x1ae4   :  { %v10828_v34 = vpop.f32.mrf.mxu0  ;;  %v10875_v5 = vadd.f32 %v10867_v35, %v739_v13 }
0x1ae5   :  { %v10869_v43 = vpop.f32.mrf.mxu1  ;;  %15096 = vpow2.f32 %v13975_v31  ;;  %v13976_v15 = vmul.f32 -1.442695, %v10873_v44 }
0x1ae6   :  { %v10829_v30 = vpop.f32.mrf.mxu0  ;;  %v13977_v41 = vmul.f32 -1.442695, %v10875_v5 }
0x1ae7   :  { %v10870_v19 = vpop.f32.mrf.mxu1  ;;  %15098 = vpow2.f32 %v13976_v15 }
0x1ae8   :  { %15100 = vtanh.f32 %v10874_v20 }
0x1ae9   :  { %15102 = vpow2.f32 %v13977_v41 }
0x1af2   :  { %v15097_v37 = vpop.eup %15096 }
0x1af3   :  { %v10879_v50 = vadd.f32 1.0, %v15097_v37 }
0x1af4   :  { %v15099_v18 = vpop.eup %15098 }
0x1af5   :  { %15104 = vrcp.f32 %v10879_v50  ;;  %v10885_v33 = vadd.f32 1.0, %v15099_v18  ;;  %v15101_v39 = vpop.eup %15100 }
0x1af6   :  { %v15103_v6 = vpop.eup %15102 }
0x1af7   :  { %15106 = vrcp.f32 %v10885_v33  ;;  %v10892_v31 = vadd.f32 1.0, %v15103_v6  ;;  %v19099_v33 = vld [vmem:[#allocation108_spill] sm:$0xff] }
0x1af9   :  { %15108 = vrcp.f32 %v10892_v31 }
0x1b02   :  { %v15105_v40 = vpop.eup %15104 }
0x1b03   :  { %v10896_v25 = vmul.f32 %v15105_v40, %v15101_v39  ;;  %v548_v39 = vadd.f32 %v19099_v33, %v15970_v10 }
0x1b04   :  { %v15107_v23 = vpop.eup %15106 }
0x1b05   :  { %v10895_v35 = vmul.f32 %v15107_v23, %v18424_v16 }
0x1b06   :  { %v15109_v0 = vpop.eup %15108 }
0x1b07   :  { %v18476_v44 = vadd.f32 %v10896_v25, %v10895_v35  ;;  %v19100_v25 = vld [vmem:[#allocation110_spill] sm:$0xff] }
0x1b08   :  { %v550_v23 = vadd.f32 %v19100_v25, %v15976_v9 }
0x1b09   :  { %15110 = vtanh.f32 %v18476_v44 }
0x1b16   :  { %v15111_v34 = vpop.eup %15110 }
0x1b17   :  { %v10899_v43 = vmul.f32 %v15111_v34, %v15109_v0 }
0x1b19   :  { %v10901_v15 = vcombine.high %v10899_v43, %v10899_v43  ;;  %v10908_v30 = vrot.slane %v10899_v43, %v16003_v2  ;;  %v10970_v19 = vpack.c.bf16 %v10899_v43, %v10899_v43 }
0x1b1b   :  { %v10915_v38 = vrot.slane %v10901_v15, %v16003_v2  ;;  %v10916_v13 = vcombine.high %v10908_v30, %v10908_v30  ;;  %v10924_v5 = vrot.slane %v10908_v30, %v16003_v2  ;;  %13978 = vst.sshfl [vmem:[#allocation5 + $0x1a] sm:$0x1 pattern:$0x73625140] %v10908_v30  ;;  %11196 = vmatmul.mubr.bf16.vlgmr.msra.gmra.mxu0 %v10970_v19 }
0x1b1c   :  { %11237 = vmatmul.mubr.bf16.vlgmr.msra.gmra.mxu1 %v10970_v19  ;;  %11537 = vmatpush1.bf16.msra.mxu0 %v18234_v36 }
0x1b1d   :  { %11578 = vmatpush1.bf16.msra.mxu1 %v18239_v27  ;;  %v10917_v16 = vcombine.high %v10915_v38, %v10915_v38  ;;  %v10931_v14 = vrot.slane %v10915_v38, %v16003_v2  ;;  %v10938_v42 = vrot.slane %v10916_v13, %v16003_v2  ;;  %v10946_v20 = vcombine.high %v10924_v5, %v10924_v5 }
0x1b1e   :  { %13979 = vst.sshfl [vmem:[#allocation5 + $0x3a] sm:$0x1 pattern:$0x73625140] %v10916_v13  ;;  %11538 = vmatprep.subr.bf16.mxu0 %v18248_v29  ;;  %11579 = vmatprep.subr.bf16.mxu1 %v18253_v32 }
0x1b1f   :  { %13980 = vst.sshfl [vmem:[#allocation5 + $0x9a] sm:$0x1 pattern:$0x73625140] %v10915_v38  ;;  %11568 = vmatprep.mubr.bf16.mxu0 %v19002_v8  ;;  %v10945_v41 = vrot.slane %v10917_v16, %v16003_v2  ;;  %v10947_v37 = vcombine.high %v10931_v14, %v10931_v14  ;;  %v10948_v50 = vcombine.high %v10938_v42, %v10938_v42  ;;  %10960 = vst [vmem:[#allocation5 + $0x5a] sm:$0x1] %v10946_v20 }
0x1b20   :  { %13981 = vst.sshfl [vmem:[#allocation5 + $0xba] sm:$0x1 pattern:$0x73625140] %v10917_v16  ;;  %11609 = vmatprep.mubr.bf16.mxu1 %v19002_v8  ;;  %11539 = vmatpush1.bf16.msra.mxu0 %v18258_v24  ;;  %v19102_v16 = vld [vmem:[#allocation109_spill] sm:$0xff] }
0x1b21   :  { %11580 = vmatpush1.bf16.msra.mxu1 %v18263_v46  ;;  %v10949_v18 = vcombine.high %v10945_v41, %v10945_v41  ;;  %10961 = vst [vmem:[#allocation5 + $0x7a] sm:$0x1] %v10948_v50  ;;  %10964 = vst [vmem:[#allocation5 + $0xda] sm:$0x1] %v10947_v37  ;;  %11540 = vmatprep.subr.bf16.mxu0 %v18272_v28  ;;  %v741_v14 = vadd.f32 %v19102_v16, %v15990_v61 }
0x1b22   :  { %11581 = vmatprep.subr.bf16.mxu1 %v18277_v47 }
0x1b23   :  { %10965 = vst [vmem:[#allocation5 + $0xfa] sm:$0x1] %v10949_v18 }
0x1b24   :  { %11541 = vmatpush1.bf16.msra.mxu0 %v18282_v22 }
0x1b25   :  { %11582 = vmatpush1.bf16.msra.mxu1 %v18287_v26  ;;  %11542 = vmatprep.subr.bf16.mxu0 %v18296_v45 }
0x1b26   :  { %11583 = vmatprep.subr.bf16.mxu1 %v18301_v48 }
0x1b28   :  { %11543 = vmatpush1.bf16.msra.mxu0 %v18306_v1 }
0x1b29   :  { %11584 = vmatpush1.bf16.msra.mxu1 %v18311_v4  ;;  %11544 = vmatprep.subr.bf16.mxu0 %v18325_v59 }
0x1b2a   :  { %11585 = vmatprep.subr.bf16.mxu1 %v18335_v60 }
0x1b2c   :  { %11545 = vmatpush1.bf16.msra.mxu0 %v18320_v57 }
0x1b2d   :  { %11586 = vmatpush1.bf16.msra.mxu1 %v18330_v58  ;;  %11546 = vmatprep.subr.bf16.mxu0 %v18340_v56 }
0x1b2e   :  { %11587 = vmatprep.subr.bf16.mxu1 %v18346_v53 }
0x1b30   :  { %11547 = vmatpush1.bf16.msra.mxu0 %v18354_v62 }
0x1b31   :  { %11588 = vmatpush1.bf16.msra.mxu1 %v18359_v55  ;;  %11548 = vmatprep.subr.bf16.mxu0 %v18366_v63 }
0x1b32   :  { %11589 = vmatprep.subr.bf16.mxu1 %v18371_v54 }
0x1b34   :  { %11549 = vmatpush1.bf16.msra.mxu0 %v18378_v11 }
0x1b35   :  { %11590 = vmatpush1.bf16.msra.mxu1 %v18383_v52  ;;  %11550 = vmatprep.subr.bf16.mxu0 %v18390_v17 }
0x1b36   :  { %11591 = vmatprep.subr.bf16.mxu1 %v18395_v49 }
0x1b38   :  { %11551 = vmatpush1.bf16.msra.mxu0 %v18402_v51 }
0x1b39   :  { %11592 = vmatpush1.bf16.msra.mxu1 %v18407_v12  ;;  %11909 = vmatprep.subr.bf16.mxu0 %v18224_v21 }
0x1b3a   :  { %11950 = vmatprep.subr.bf16.mxu1 %v18229_v7  ;;  %v19101_v7 = vld [vmem:[#allocation111_spill] sm:$0xff] }
0x1b3b   :  { %v743_v13 = vadd.f32 %v19101_v7, %v15988_v3 }
0x1bdb   :  { %v11197_v6 = vpop.f32.mrf.mxu0 }
0x1bdc   :  { %v11238_v40 = vpop.f32.mrf.mxu1  ;;  %v11245_v31 = vadd.f32 %v11197_v6, %v548_v39 }
0x1bdd   :  { %v11199_v35 = vpop.f32.mrf.mxu0  ;;  %v11247_v42 = vadd.f32 %v11238_v40, %v741_v14 }
0x1bde   :  { %v11240_v0 = vpop.f32.mrf.mxu1  ;;  %v14014_v34 = vmul.f32 -1.442695, %v11245_v31  ;;  %v11246_v43 = vadd.f32 %v11199_v35, %v550_v23 }
0x1bdf   :  { %v11201_v15 = vpop.f32.mrf.mxu0  ;;  %v11248_v5 = vadd.f32 %v11240_v0, %v743_v13 }
0x1be0   :  { %v11242_v30 = vpop.f32.mrf.mxu1  ;;  %15112 = vpow2.f32 %v14014_v34  ;;  %v14015_v19 = vmul.f32 -1.442695, %v11246_v43 }
0x1be1   :  { %v11202_v21 = vpop.f32.mrf.mxu0  ;;  %v14016_v20 = vmul.f32 -1.442695, %v11248_v5 }
0x1be2   :  { %v11243_v38 = vpop.f32.mrf.mxu1  ;;  %15114 = vpow2.f32 %v14015_v19 }
0x1be3   :  { %15116 = vtanh.f32 %v11247_v42 }
0x1be4   :  { %15118 = vpow2.f32 %v14016_v20 }
0x1bed   :  { %v15113_v41 = vpop.eup %15112 }
0x1bee   :  { %v11252_v37 = vadd.f32 1.0, %v15113_v41 }
0x1bef   :  { %v15115_v50 = vpop.eup %15114 }
0x1bf0   :  { %15120 = vrcp.f32 %v11252_v37  ;;  %v11258_v18 = vadd.f32 1.0, %v15115_v50  ;;  %v15117_v33 = vpop.eup %15116 }
0x1bf1   :  { %v15119_v39 = vpop.eup %15118 }
0x1bf2   :  { %15122 = vrcp.f32 %v11258_v18  ;;  %v11265_v31 = vadd.f32 1.0, %v15119_v39 }
0x1bf4   :  { %15124 = vrcp.f32 %v11265_v31 }
0x1bfd   :  { %v15121_v6 = vpop.eup %15120 }
0x1bfe   :  { %v11269_v25 = vmul.f32 %v15121_v6, %v15117_v33 }
0x1bff   :  { %v15123_v23 = vpop.eup %15122 }
0x1c00   :  { %v11268_v35 = vmul.f32 %v15123_v23, %v18476_v44 }
0x1c01   :  { %v15125_v40 = vpop.eup %15124 }
0x1c02   :  { %v18528_v0 = vadd.f32 %v11269_v25, %v11268_v35 }
0x1c04   :  { %15126 = vtanh.f32 %v18528_v0 }
0x1c11   :  { %v15127_v34 = vpop.eup %15126 }
0x1c12   :  { %v11272_v43 = vmul.f32 %v15127_v34, %v15125_v40 }
0x1c14   :  { %v11274_v15 = vcombine.high %v11272_v43, %v11272_v43  ;;  %v11281_v30 = vrot.slane %v11272_v43, %v16003_v2  ;;  %v11343_v19 = vpack.c.bf16 %v11272_v43, %v11272_v43 }
0x1c16   :  { %v11288_v21 = vrot.slane %v11274_v15, %v16003_v2  ;;  %v11289_v38 = vcombine.high %v11281_v30, %v11281_v30  ;;  %v11297_v7 = vrot.slane %v11281_v30, %v16003_v2  ;;  %14017 = vst.sshfl [vmem:[#allocation5 + $0x1b] sm:$0x1 pattern:$0x73625140] %v11281_v30  ;;  %11569 = vmatmul.mubr.bf16.vlgmr.msra.gmra.mxu0 %v11343_v19 }
0x1c17   :  { %11610 = vmatmul.mubr.bf16.vlgmr.msra.gmra.mxu1 %v11343_v19  ;;  %11910 = vmatpush1.bf16.msra.mxu0 %v18234_v36 }
0x1c18   :  { %11951 = vmatpush1.bf16.msra.mxu1 %v18239_v27  ;;  %v11290_v44 = vcombine.high %v11288_v21, %v11288_v21  ;;  %v11304_v13 = vrot.slane %v11288_v21, %v16003_v2  ;;  %v11311_v5 = vrot.slane %v11289_v38, %v16003_v2  ;;  %v11319_v16 = vcombine.high %v11297_v7, %v11297_v7 }
0x1c19   :  { %14018 = vst.sshfl [vmem:[#allocation5 + $0x3b] sm:$0x1 pattern:$0x73625140] %v11289_v38  ;;  %11911 = vmatprep.subr.bf16.mxu0 %v18248_v29  ;;  %11952 = vmatprep.subr.bf16.mxu1 %v18253_v32  ;;  %v19103_v29 = vld [vmem:[#allocation112_spill] sm:$0xff] }
0x1c1a   :  { %14019 = vst.sshfl [vmem:[#allocation5 + $0x9b] sm:$0x1 pattern:$0x73625140] %v11288_v21  ;;  %11941 = vmatprep.mubr.bf16.mxu0 %v19002_v8  ;;  %v11318_v14 = vrot.slane %v11290_v44, %v16003_v2  ;;  %v11320_v42 = vcombine.high %v11304_v13, %v11304_v13  ;;  %v11321_v36 = vcombine.high %v11311_v5, %v11311_v5  ;;  %11333 = vst [vmem:[#allocation5 + $0x5b] sm:$0x1] %v11319_v16 }
0x1c1b   :  { %14020 = vst.sshfl [vmem:[#allocation5 + $0xbb] sm:$0x1 pattern:$0x73625140] %v11290_v44  ;;  %11982 = vmatprep.mubr.bf16.mxu1 %v19002_v8  ;;  %11912 = vmatpush1.bf16.msra.mxu0 %v18258_v24  ;;  %v554_v32 = vadd.f32 %v19103_v29, %v15970_v10  ;;  %v18592_v5 = vld [vmem:[%s18879_s4 + $0xe4] ss:$16 sps:$4 sm:$0xff]  }
0x1c1c   :  { %11953 = vmatpush1.bf16.msra.mxu1 %v18263_v46  ;;  %v11322_v27 = vcombine.high %v11318_v14, %v11318_v14  ;;  %11334 = vst [vmem:[#allocation5 + $0x7b] sm:$0x1] %v11321_v36  ;;  %11337 = vst [vmem:[#allocation5 + $0xdb] sm:$0x1] %v11320_v42  ;;  %11913 = vmatprep.subr.bf16.mxu0 %v18272_v28  ;;  %v19104_v28 = vld [vmem:[#allocation114_spill] sm:$0xff] }
0x1c1d   :  { %11954 = vmatprep.subr.bf16.mxu1 %v18277_v47  ;;  %v556_v47 = vadd.f32 %v19104_v28, %v15976_v9  ;;  %v18597_v16 = vld [vmem:[%s18879_s4 + $0xec] ss:$16 sps:$4 sm:$0xff]   ;;  %v18602_v14 = vld [vmem:[%s18879_s4 + $0xe0] ss:$16 sps:$4 sm:$0xff]   ;;  %v18607_v42 = vld [vmem:[%s18879_s4 + $0xe8] ss:$16 sps:$4 sm:$0xff]  }
0x1c1e   :  { %11338 = vst [vmem:[#allocation5 + $0xfb] sm:$0x1] %v11322_v27  ;;  %v18616_v36 = vld [vmem:[%s18879_s4 + $0xc4] ss:$16 sps:$4 sm:$0xff]   ;;  %v18621_v27 = vld [vmem:[%s18879_s4 + $0xcc] ss:$16 sps:$4 sm:$0xff]  }
0x1c1f   :  { %11914 = vmatpush1.bf16.msra.mxu0 %v18282_v22  ;;  %v18626_v29 = vld [vmem:[%s18879_s4 + $0xc0] ss:$16 sps:$4 sm:$0xff]  }
0x1c20   :  { %11955 = vmatpush1.bf16.msra.mxu1 %v18287_v26  ;;  %11915 = vmatprep.subr.bf16.mxu0 %v18296_v45  ;;  %v18650_v28 = vld [vmem:[%s18879_s4 + $0xa0] ss:$16 sps:$4 sm:$0xff]  }
0x1c21   :  { %11956 = vmatprep.subr.bf16.mxu1 %v18301_v48 }
0x1c23   :  { %11916 = vmatpush1.bf16.msra.mxu0 %v18306_v1 }
0x1c24   :  { %11957 = vmatpush1.bf16.msra.mxu1 %v18311_v4  ;;  %11917 = vmatprep.subr.bf16.mxu0 %v18325_v59 }
0x1c25   :  { %11958 = vmatprep.subr.bf16.mxu1 %v18335_v60 }
0x1c27   :  { %11918 = vmatpush1.bf16.msra.mxu0 %v18320_v57 }
0x1c28   :  { %11959 = vmatpush1.bf16.msra.mxu1 %v18330_v58  ;;  %11919 = vmatprep.subr.bf16.mxu0 %v18340_v56  ;;  %v19105_v56 = vld [vmem:[#allocation115_spill] sm:$0xff] }
0x1c29   :  { %11960 = vmatprep.subr.bf16.mxu1 %v18346_v53  ;;  %v749_v53 = vadd.f32 %v19105_v56, %v15988_v3  ;;  %v18722_v56 = vld [vmem:[%s18879_s4 + $0x40] ss:$16 sps:$4 sm:$0xff]  }
0x1c2b   :  { %11920 = vmatpush1.bf16.msra.mxu0 %v18354_v62 }
0x1c2c   :  { %11961 = vmatpush1.bf16.msra.mxu1 %v18359_v55  ;;  %11921 = vmatprep.subr.bf16.mxu0 %v18366_v63  ;;  %v19106_v55 = vld [vmem:[#allocation113_spill] sm:$0xff] }
0x1c2d   :  { %11962 = vmatprep.subr.bf16.mxu1 %v18371_v54  ;;  %v747_v63 = vadd.f32 %v19106_v55, %v15990_v61  ;;  %v18739_v55 = vld [vmem:[%s18879_s4 + $0x2c] ss:$16 sps:$4 sm:$0xff]  }
0x1c2f   :  { %11922 = vmatpush1.bf16.msra.mxu0 %v18378_v11 }
0x1c30   :  { %11963 = vmatpush1.bf16.msra.mxu1 %v18383_v52  ;;  %11923 = vmatprep.subr.bf16.mxu0 %v18390_v17 }
0x1c31   :  { %11964 = vmatprep.subr.bf16.mxu1 %v18395_v49 }
0x1c33   :  { %11924 = vmatpush1.bf16.msra.mxu0 %v18402_v51 }
0x1c34   :  { %11965 = vmatpush1.bf16.msra.mxu1 %v18407_v12  ;;  %12282 = vmatprep.subr.bf16.mxu0 %v18592_v5 }
0x1c35   :  { %12323 = vmatprep.subr.bf16.mxu1 %v18597_v16 }
0x1cd6   :  { %v11570_v24 = vpop.f32.mrf.mxu0 }
0x1cd7   :  { %v11611_v46 = vpop.f32.mrf.mxu1  ;;  %v11618_v22 = vadd.f32 %v11570_v24, %v554_v32  ;;  %v18631_v32 = vld [vmem:[%s18879_s4 + $0xc8] ss:$16 sps:$4 sm:$0xff]   ;;  %v18640_v24 = vld [vmem:[%s18879_s4 + $0xa4] ss:$16 sps:$4 sm:$0xff]  }
0x1cd8   :  { %v11572_v26 = vpop.f32.mrf.mxu0  ;;  %v11620_v54 = vadd.f32 %v11611_v46, %v747_v63  ;;  %v18645_v46 = vld [vmem:[%s18879_s4 + $0xac] ss:$16 sps:$4 sm:$0xff]   ;;  %v18746_v63 = vld [vmem:[%s18879_s4 + $0x20] ss:$16 sps:$4 sm:$0xff]  }
0x1cd9   :  { %v11613_v45 = vpop.f32.mrf.mxu1  ;;  %v14053_v48 = vmul.f32 -1.442695, %v11618_v22  ;;  %v11619_v1 = vadd.f32 %v11572_v26, %v556_v47  ;;  %v18655_v47 = vld [vmem:[%s18879_s4 + $0xa8] ss:$16 sps:$4 sm:$0xff]   ;;  %v18664_v22 = vld [vmem:[%s18879_s4 + $0x84] ss:$16 sps:$4 sm:$0xff]  }
0x1cda   :  { %v11574_v4 = vpop.f32.mrf.mxu0  ;;  %v11621_v62 = vadd.f32 %v11613_v45, %v749_v53  ;;  %v18669_v26 = vld [vmem:[%s18879_s4 + $0x8c] ss:$16 sps:$4 sm:$0xff]   ;;  %v18674_v45 = vld [vmem:[%s18879_s4 + $0x80] ss:$16 sps:$4 sm:$0xff]   ;;  %v18727_v53 = vld [vmem:[%s18879_s4 + $0x48] ss:$16 sps:$4 sm:$0xff]  }
0x1cdb   :  { %v11615_v57 = vpop.f32.mrf.mxu1  ;;  %15128 = vpow2.f32 %v14053_v48  ;;  %v14054_v59 = vmul.f32 -1.442695, %v11619_v1  ;;  %v18679_v48 = vld [vmem:[%s18879_s4 + $0x88] ss:$16 sps:$4 sm:$0xff]   ;;  %v18688_v1 = vld [vmem:[%s18879_s4 + $0x60] ss:$16 sps:$4 sm:$0xff]  }
0x1cdc   :  { %v11575_v58 = vpop.f32.mrf.mxu0  ;;  %v14055_v11 = vmul.f32 -1.442695, %v11621_v62  ;;  %v18693_v4 = vld [vmem:[%s18879_s4 + $0x64] ss:$16 sps:$4 sm:$0xff]   ;;  %v18698_v57 = vld [vmem:[%s18879_s4 + $0x68] ss:$16 sps:$4 sm:$0xff]  }
0x1cdd   :  { %v11616_v60 = vpop.f32.mrf.mxu1  ;;  %15130 = vpow2.f32 %v14054_v59  ;;  %v18703_v59 = vld [vmem:[%s18879_s4 + $0x6c] ss:$16 sps:$4 sm:$0xff]   ;;  %v18708_v58 = vld [vmem:[%s18879_s4 + $0x44] ss:$16 sps:$4 sm:$0xff]  }
0x1cde   :  { %15132 = vtanh.f32 %v11620_v54  ;;  %v18714_v60 = vld [vmem:[%s18879_s4 + $0x4c] ss:$16 sps:$4 sm:$0xff]   ;;  %v18734_v62 = vld [vmem:[%s18879_s4 + $0x24] ss:$16 sps:$4 sm:$0xff]   ;;  %v18751_v54 = vld [vmem:[%s18879_s4 + $0x28] ss:$16 sps:$4 sm:$0xff]  }
0x1cdf   :  { %15134 = vpow2.f32 %v14055_v11  ;;  %v18758_v11 = vld [vmem:[%s18879_s4 + $0x4] ss:$16 sps:$4 sm:$0xff]  }
0x1ce8   :  { %v15129_v52 = vpop.eup %15128 }
0x1ce9   :  { %v11625_v17 = vadd.f32 1.0, %v15129_v52  ;;  %v18763_v52 = vld [vmem:[%s18879_s4 + $0xc] ss:$16 sps:$4 sm:$0xff]  }
0x1cea   :  { %v15131_v49 = vpop.eup %15130 }
0x1ceb   :  { %15136 = vrcp.f32 %v11625_v17  ;;  %v11631_v51 = vadd.f32 1.0, %v15131_v49  ;;  %v15133_v12 = vpop.eup %15132  ;;  %v18770_v17 = vld [vmem:[%s18879_s4] ss:$16 sps:$4 sm:$0xff]   ;;  %v18775_v49 = vld [vmem:[%s18879_s4 + $0x8] ss:$16 sps:$4 sm:$0xff]   ;;  %s15258_s4 = smov [#allocation7]  }
0x1cec   :  { %v15135_v20 = vpop.eup %15134  ;;  %s12856_s3 = sshll.u32 %s15258_s4, 4  ;;  %s12857_s3 = int_to_ptr.vmem [resolvable:$true] %s12856_s3 }
0x1ced   :  { %15138 = vrcp.f32 %v11631_v51  ;;  %v11638_v18 = vadd.f32 1.0, %v15135_v20  ;;  %v19107_v51 = vld [vmem:[#allocation116_spill] sm:$0xff]  ;;  %s15192_s10 = scalar_lea.vmem %s12857_s3, 128  ;;  %p15197_p1 = scmp.lt.s32.totalorder %s12857_s3, %s12857_s3 }
0x1cee   :  { %p15193_p0 = scmp.ne.s32.totalorder %s12857_s3, %s15192_s10  ;;  %p15198_p2 = scmp.lt.s32.totalorder %s15192_s10, %s15192_s10 }
0x1cef   :  { %15140 = vrcp.f32 %v11638_v18 }
0x1cf0   :  { %p15199_p3 = por %p15198_p2, %p15197_p1 }
0x1cf2   :  { %p15200_p4 = pnand %p15199_p3, %p15193_p0 }
0x1cf8   :  { %v15137_v41 = vpop.eup %15136 }
0x1cf9   :  { %v11642_v37 = vmul.f32 %v15137_v41, %v15133_v12  ;;  %v558_v12 = vadd.f32 %v19107_v51, %v15970_v10 }
0x1cfa   :  { %v15139_v50 = vpop.eup %15138 }
0x1cfb   :  { %v11641_v33 = vmul.f32 %v15139_v50, %v18528_v0 }
0x1cfc   :  { %v15141_v6 = vpop.eup %15140 }
0x1cfd   :  { %v18578_v39 = vadd.f32 %v11642_v37, %v11641_v33  ;;  %v19108_v37 = vld [vmem:[#allocation118_spill] sm:$0xff] }
0x1cfe   :  { %v560_v50 = vadd.f32 %v19108_v37, %v15976_v9 }
0x1cff   :  { %15142 = vtanh.f32 %v18578_v39 }
0x1d0c   :  { %v15143_v25 = vpop.eup %15142 }
0x1d0d   :  { %v11645_v23 = vmul.f32 %v15143_v25, %v15141_v6 }
0x1d0f   :  { %v11647_v31 = vcombine.high %v11645_v23, %v11645_v23  ;;  %v11654_v35 = vrot.slane %v11645_v23, %v16003_v2  ;;  %v11716_v40 = vpack.c.bf16 %v11645_v23, %v11645_v23 }
0x1d11   :  { %v11661_v34 = vrot.slane %v11647_v31, %v16003_v2  ;;  %v11662_v43 = vcombine.high %v11654_v35, %v11654_v35  ;;  %v11670_v15 = vrot.slane %v11654_v35, %v16003_v2  ;;  %14056 = vst.sshfl [vmem:[#allocation5 + $0x1c] sm:$0x1 pattern:$0x73625140] %v11654_v35  ;;  %11942 = vmatmul.mubr.bf16.vlgmr.msra.gmra.mxu0 %v11716_v40 }
0x1d12   :  { %11983 = vmatmul.mubr.bf16.vlgmr.msra.gmra.mxu1 %v11716_v40  ;;  %12314 = vmatprep.mubr.bf16.mxu0 %v19002_v8 }
0x1d13   :  { %12355 = vmatprep.mubr.bf16.mxu1 %v19002_v8  ;;  %v11663_v0 = vcombine.high %v11661_v34, %v11661_v34  ;;  %v11677_v30 = vrot.slane %v11661_v34, %v16003_v2  ;;  %v11684_v19 = vrot.slane %v11662_v43, %v16003_v2  ;;  %v11692_v21 = vcombine.high %v11670_v15, %v11670_v15  ;;  %v19109_v15 = vld [vmem:[#allocation119_spill] sm:$0xff] }
0x1d14   :  { %14057 = vst.sshfl [vmem:[#allocation5 + $0x3c] sm:$0x1 pattern:$0x73625140] %v11662_v43  ;;  %12283 = vmatpush1.bf16.msra.mxu0 %v18602_v14  ;;  %12324 = vmatpush1.bf16.msra.mxu1 %v18607_v42 }
0x1d15   :  { %14058 = vst.sshfl [vmem:[#allocation5 + $0x9c] sm:$0x1 pattern:$0x73625140] %v11661_v34  ;;  %v11691_v38 = vrot.slane %v11663_v0, %v16003_v2  ;;  %v11693_v7 = vcombine.high %v11677_v30, %v11677_v30  ;;  %v11694_v44 = vcombine.high %v11684_v19, %v11684_v19  ;;  %11706 = vst [vmem:[#allocation5 + $0x5c] sm:$0x1] %v11692_v21  ;;  %12284 = vmatprep.subr.bf16.mxu0 %v18616_v36 }
0x1d16   :  { %14059 = vst.sshfl [vmem:[#allocation5 + $0xbc] sm:$0x1 pattern:$0x73625140] %v11663_v0  ;;  %12325 = vmatprep.subr.bf16.mxu1 %v18621_v27  ;;  %v753_v0 = vadd.f32 %v19109_v15, %v15988_v3  ;;  %v19110_v19 = vld [vmem:[#allocation117_spill] sm:$0xff] }
0x1d17   :  { %v11695_v13 = vcombine.high %v11691_v38, %v11691_v38  ;;  %11707 = vst [vmem:[#allocation5 + $0x7c] sm:$0x1] %v11694_v44  ;;  %11710 = vst [vmem:[#allocation5 + $0xdc] sm:$0x1] %v11693_v7  ;;  %v751_v21 = vadd.f32 %v19110_v19, %v15990_v61 }
0x1d18   :  { %12285 = vmatpush1.bf16.msra.mxu0 %v18626_v29  ;;  %12326 = vmatpush1.bf16.msra.mxu1 %v18631_v32 }
0x1d19   :  { %11711 = vst [vmem:[#allocation5 + $0xfc] sm:$0x1] %v11695_v13  ;;  %12286 = vmatprep.subr.bf16.mxu0 %v18640_v24  ;;  %12327 = vmatprep.subr.bf16.mxu1 %v18645_v46 }
0x1d1c   :  { %12287 = vmatpush1.bf16.msra.mxu0 %v18650_v28  ;;  %12328 = vmatpush1.bf16.msra.mxu1 %v18655_v47 }
0x1d1d   :  { %12288 = vmatprep.subr.bf16.mxu0 %v18664_v22  ;;  %12329 = vmatprep.subr.bf16.mxu1 %v18669_v26 }
0x1d20   :  { %12289 = vmatpush1.bf16.msra.mxu0 %v18674_v45  ;;  %12330 = vmatpush1.bf16.msra.mxu1 %v18679_v48 }
0x1d21   :  { %12290 = vmatprep.subr.bf16.mxu0 %v18693_v4  ;;  %12331 = vmatprep.subr.bf16.mxu1 %v18703_v59 }
0x1d24   :  { %12291 = vmatpush1.bf16.msra.mxu0 %v18688_v1  ;;  %12332 = vmatpush1.bf16.msra.mxu1 %v18698_v57 }
0x1d25   :  { %12292 = vmatprep.subr.bf16.mxu0 %v18708_v58  ;;  %12333 = vmatprep.subr.bf16.mxu1 %v18714_v60 }
0x1d28   :  { %12293 = vmatpush1.bf16.msra.mxu0 %v18722_v56  ;;  %12334 = vmatpush1.bf16.msra.mxu1 %v18727_v53 }
0x1d29   :  { %12294 = vmatprep.subr.bf16.mxu0 %v18734_v62  ;;  %12335 = vmatprep.subr.bf16.mxu1 %v18739_v55 }
0x1d2c   :  { %12295 = vmatpush1.bf16.msra.mxu0 %v18746_v63  ;;  %12336 = vmatpush1.bf16.msra.mxu1 %v18751_v54 }
0x1d2d   :  { %12296 = vmatprep.subr.bf16.mxu0 %v18758_v11  ;;  %12337 = vmatprep.subr.bf16.mxu1 %v18763_v52 }
0x1d30   :  { %12297 = vmatpush1.bf16.msra.mxu0 %v18770_v17  ;;  %12338 = vmatpush1.bf16.msra.mxu1 %v18775_v49 }
0x1d31   :  { %12655 = vmatprep.subr.bf16.mxu0 %v18592_v5  ;;  %12696 = vmatprep.subr.bf16.mxu1 %v18597_v16 }
0x1dd1   :  { %v11943_v20 = vpop.f32.mrf.mxu0 }
0x1dd2   :  { %v11984_v41 = vpop.f32.mrf.mxu1  ;;  %v11991_v18 = vadd.f32 %v11943_v20, %v558_v12 }
0x1dd3   :  { %v11945_v33 = vpop.f32.mrf.mxu0  ;;  %v11993_v38 = vadd.f32 %v11984_v41, %v751_v21 }
0x1dd4   :  { %v11986_v6 = vpop.f32.mrf.mxu1  ;;  %v14092_v25 = vmul.f32 -1.442695, %v11991_v18  ;;  %v11992_v23 = vadd.f32 %v11945_v33, %v560_v50 }
0x1dd5   :  { %v11947_v31 = vpop.f32.mrf.mxu0  ;;  %v11994_v30 = vadd.f32 %v11986_v6, %v753_v0 }
0x1dd6   :  { %v11988_v35 = vpop.f32.mrf.mxu1  ;;  %15144 = vpow2.f32 %v14092_v25  ;;  %v14093_v40 = vmul.f32 -1.442695, %v11992_v23 }
0x1dd7   :  { %v11948_v34 = vpop.f32.mrf.mxu0  ;;  %v14094_v7 = vmul.f32 -1.442695, %v11994_v30 }
0x1dd8   :  { %v11989_v43 = vpop.f32.mrf.mxu1  ;;  %15146 = vpow2.f32 %v14093_v40 }
0x1dd9   :  { %15148 = vtanh.f32 %v11993_v38 }
0x1dda   :  { %15150 = vpow2.f32 %v14094_v7 }
0x1de3   :  { %v15145_v44 = vpop.eup %15144 }
0x1de4   :  { %v11998_v13 = vadd.f32 1.0, %v15145_v44 }
0x1de5   :  { %v15147_v5 = vpop.eup %15146 }
0x1de6   :  { %15152 = vrcp.f32 %v11998_v13  ;;  %v12004_v16 = vadd.f32 1.0, %v15147_v5  ;;  %v15149_v51 = vpop.eup %15148 }
0x1de7   :  { %v15151_v12 = vpop.eup %15150 }
0x1de8   :  { %15154 = vrcp.f32 %v12004_v16  ;;  %v12011_v18 = vadd.f32 1.0, %v15151_v12 }
0x1dea   :  { %15156 = vrcp.f32 %v12011_v18 }
0x1df3   :  { %v15153_v20 = vpop.eup %15152 }
0x1df4   :  { %v12015_v37 = vmul.f32 %v15153_v20, %v15149_v51 }
0x1df5   :  { %v15155_v50 = vpop.eup %15154 }
0x1df6   :  { %v12014_v33 = vmul.f32 %v15155_v50, %v18578_v39 }
0x1df7   :  { %v15157_v41 = vpop.eup %15156 }
0x1df8   :  { %v18792_v6 = vadd.f32 %v12015_v37, %v12014_v33 }
0x1dfa   :  { %15158 = vtanh.f32 %v18792_v6 }
0x1e07   :  { %v15159_v25 = vpop.eup %15158 }
0x1e08   :  { %v12018_v23 = vmul.f32 %v15159_v25, %v15157_v41 }
0x1e0a   :  { %v12020_v31 = vcombine.high %v12018_v23, %v12018_v23  ;;  %v12027_v35 = vrot.slane %v12018_v23, %v16003_v2  ;;  %v12089_v40 = vpack.c.bf16 %v12018_v23, %v12018_v23 }
0x1e0c   :  { %v12034_v34 = vrot.slane %v12020_v31, %v16003_v2  ;;  %v12035_v43 = vcombine.high %v12027_v35, %v12027_v35  ;;  %v12043_v15 = vrot.slane %v12027_v35, %v16003_v2  ;;  %14095 = vst.sshfl [vmem:[#allocation5 + $0x1d] sm:$0x1 pattern:$0x73625140] %v12027_v35  ;;  %12315 = vmatmul.mubr.bf16.vlgmr.msra.gmra.mxu0 %v12089_v40 }
0x1e0d   :  { %12356 = vmatmul.mubr.bf16.vlgmr.msra.gmra.mxu1 %v12089_v40  ;;  %12656 = vmatpush1.bf16.msra.mxu0 %v18602_v14 }
0x1e0e   :  { %12697 = vmatpush1.bf16.msra.mxu1 %v18607_v42  ;;  %v12036_v39 = vcombine.high %v12034_v34, %v12034_v34  ;;  %v12050_v0 = vrot.slane %v12034_v34, %v16003_v2  ;;  %v12057_v30 = vrot.slane %v12035_v43, %v16003_v2  ;;  %v12065_v19 = vcombine.high %v12043_v15, %v12043_v15 }
0x1e0f   :  { %14096 = vst.sshfl [vmem:[#allocation5 + $0x3d] sm:$0x1 pattern:$0x73625140] %v12035_v43  ;;  %12657 = vmatprep.subr.bf16.mxu0 %v18616_v36  ;;  %12698 = vmatprep.subr.bf16.mxu1 %v18621_v27 }
0x1e10   :  { %14097 = vst.sshfl [vmem:[#allocation5 + $0x9d] sm:$0x1 pattern:$0x73625140] %v12034_v34  ;;  %12687 = vmatprep.mubr.bf16.mxu0 %v19002_v8  ;;  %v12064_v21 = vrot.slane %v12036_v39, %v16003_v2  ;;  %v12066_v38 = vcombine.high %v12050_v0, %v12050_v0  ;;  %v12067_v14 = vcombine.high %v12057_v30, %v12057_v30  ;;  %12079 = vst [vmem:[#allocation5 + $0x5d] sm:$0x1] %v12065_v19 }
0x1e11   :  { %14098 = vst.sshfl [vmem:[#allocation5 + $0xbd] sm:$0x1 pattern:$0x73625140] %v12036_v39  ;;  %12728 = vmatprep.mubr.bf16.mxu1 %v19002_v8  ;;  %12658 = vmatpush1.bf16.msra.mxu0 %v18626_v29  ;;  %v19111_v8 = vld [vmem:[#allocation120_spill] sm:$0xff] }
0x1e12   :  { %12699 = vmatpush1.bf16.msra.mxu1 %v18631_v32  ;;  %v12068_v42 = vcombine.high %v12064_v21, %v12064_v21  ;;  %12080 = vst [vmem:[#allocation5 + $0x7d] sm:$0x1] %v12067_v14  ;;  %12083 = vst [vmem:[#allocation5 + $0xdd] sm:$0x1] %v12066_v38  ;;  %12659 = vmatprep.subr.bf16.mxu0 %v18640_v24  ;;  %v564_v36 = vadd.f32 %v19111_v8, %v15970_v10  ;;  %v19112_v32 = vld [vmem:[#allocation122_spill] sm:$0xff]  ;;  %v19115_v0 = vld [vmem:[#allocation124_spill] sm:$0xff] }
0x1e13   :  { %12700 = vmatprep.subr.bf16.mxu1 %v18645_v46  ;;  %v566_v24 = vadd.f32 %v19112_v32, %v15976_v9  ;;  %v568_v30 = vadd.f32 %v19115_v0, %v15970_v10  ;;  %v19116_v38 = vld [vmem:[#allocation126_spill] sm:$0xff] }
0x1e14   :  { %12084 = vst [vmem:[#allocation5 + $0xfd] sm:$0x1] %v12068_v42  ;;  %v570_v14 = vadd.f32 %v19116_v38, %v15976_v9 }
0x1e15   :  { %12660 = vmatpush1.bf16.msra.mxu0 %v18650_v28 }
0x1e16   :  { %12701 = vmatpush1.bf16.msra.mxu1 %v18655_v47  ;;  %12661 = vmatprep.subr.bf16.mxu0 %v18664_v22 }
0x1e17   :  { %12702 = vmatprep.subr.bf16.mxu1 %v18669_v26 }
0x1e19   :  { %12662 = vmatpush1.bf16.msra.mxu0 %v18674_v45 }
0x1e1a   :  { %12703 = vmatpush1.bf16.msra.mxu1 %v18679_v48  ;;  %12663 = vmatprep.subr.bf16.mxu0 %v18693_v4 }
0x1e1b   :  { %12704 = vmatprep.subr.bf16.mxu1 %v18703_v59  ;;  %v19113_v59 = vld [vmem:[#allocation123_spill] sm:$0xff] }
0x1e1d   :  { %12664 = vmatpush1.bf16.msra.mxu0 %v18688_v1 }
0x1e1e   :  { %12705 = vmatpush1.bf16.msra.mxu1 %v18698_v57  ;;  %12665 = vmatprep.subr.bf16.mxu0 %v18708_v58  ;;  %v759_v58 = vadd.f32 %v19113_v59, %v15988_v3 }
0x1e1f   :  { %12706 = vmatprep.subr.bf16.mxu1 %v18714_v60 }
0x1e21   :  { %12666 = vmatpush1.bf16.msra.mxu0 %v18722_v56  ;;  %v19114_v56 = vld [vmem:[#allocation121_spill] sm:$0xff] }
0x1e22   :  { %12707 = vmatpush1.bf16.msra.mxu1 %v18727_v53  ;;  %12667 = vmatprep.subr.bf16.mxu0 %v18734_v62  ;;  %v757_v53 = vadd.f32 %v19114_v56, %v15990_v61 }
0x1e23   :  { %12708 = vmatprep.subr.bf16.mxu1 %v18739_v55 }
0x1e25   :  { %12668 = vmatpush1.bf16.msra.mxu0 %v18746_v63 }
0x1e26   :  { %12709 = vmatpush1.bf16.msra.mxu1 %v18751_v54  ;;  %12669 = vmatprep.subr.bf16.mxu0 %v18758_v11 }
0x1e27   :  { %12710 = vmatprep.subr.bf16.mxu1 %v18763_v52 }
0x1e29   :  { %12670 = vmatpush1.bf16.msra.mxu0 %v18770_v17 }
0x1e2a   :  { %12711 = vmatpush1.bf16.msra.mxu1 %v18775_v49 }
0x1ecc   :  { %v12316_v27 = vpop.f32.mrf.mxu0 }
0x1ecd   :  { %v12357_v29 = vpop.f32.mrf.mxu1  ;;  %v12364_v46 = vadd.f32 %v12316_v27, %v564_v36 }
0x1ece   :  { %v12318_v28 = vpop.f32.mrf.mxu0  ;;  %v12366_v62 = vadd.f32 %v12357_v29, %v757_v53 }
0x1ecf   :  { %v12359_v47 = vpop.f32.mrf.mxu1  ;;  %v14131_v22 = vmul.f32 -1.442695, %v12364_v46  ;;  %v12365_v26 = vadd.f32 %v12318_v28, %v566_v24 }
0x1ed0   :  { %v12320_v45 = vpop.f32.mrf.mxu0  ;;  %v12367_v60 = vadd.f32 %v12359_v47, %v759_v58 }
0x1ed1   :  { %v12361_v48 = vpop.f32.mrf.mxu1  ;;  %15160 = vpow2.f32 %v14131_v22  ;;  %v14132_v1 = vmul.f32 -1.442695, %v12365_v26  ;;  %v19117_v22 = vld [vmem:[#allocation127_spill] sm:$0xff]  ;;  %v19118_v45 = vld [vmem:[#allocation125_spill] sm:$0xff] }
0x1ed2   :  { %v12321_v4 = vpop.f32.mrf.mxu0  ;;  %v14133_v55 = vmul.f32 -1.442695, %v12367_v60  ;;  %v763_v10 = vadd.f32 %v19117_v22, %v15988_v3  ;;  %v761_v48 = vadd.f32 %v19118_v45, %v15990_v61 }
0x1ed3   :  { %v12362_v57 = vpop.f32.mrf.mxu1  ;;  %15162 = vpow2.f32 %v14132_v1 }
0x1ed4   :  { %15164 = vtanh.f32 %v12366_v62 }
0x1ed5   :  { %15166 = vpow2.f32 %v14133_v55 }
0x1ede   :  { %v15161_v63 = vpop.eup %15160 }
0x1edf   :  { %v12371_v54 = vadd.f32 1.0, %v15161_v63 }
0x1ee0   :  { %v15163_v11 = vpop.eup %15162 }
0x1ee1   :  { %15168 = vrcp.f32 %v12371_v54  ;;  %v12377_v52 = vadd.f32 1.0, %v15163_v11  ;;  %v15165_v17 = vpop.eup %15164 }
0x1ee2   :  { %v15167_v49 = vpop.eup %15166 }
0x1ee3   :  { %15170 = vrcp.f32 %v12377_v52  ;;  %v12384_v5 = vadd.f32 1.0, %v15167_v49 }
0x1ee5   :  { %15172 = vrcp.f32 %v12384_v5 }
0x1eee   :  { %v15169_v7 = vpop.eup %15168 }
0x1eef   :  { %v12388_v44 = vmul.f32 %v15169_v7, %v15165_v17 }
0x1ef0   :  { %v15171_v13 = vpop.eup %15170 }
0x1ef1   :  { %v12387_v16 = vmul.f32 %v15171_v13, %v18792_v6 }
0x1ef2   :  { %v15173_v12 = vpop.eup %15172 }
0x1ef3   :  { %v18842_v51 = vadd.f32 %v12388_v44, %v12387_v16 }
0x1ef5   :  { %15174 = vtanh.f32 %v18842_v51 }
0x1f02   :  { %v15175_v20 = vpop.eup %15174 }
0x1f03   :  { %v12391_v37 = vmul.f32 %v15175_v20, %v15173_v12 }
0x1f05   :  { %v12393_v50 = vcombine.high %v12391_v37, %v12391_v37  ;;  %v12400_v18 = vrot.slane %v12391_v37, %v16003_v2  ;;  %v12462_v33 = vpack.c.bf16 %v12391_v37, %v12391_v37 }
0x1f07   :  { %v12407_v41 = vrot.slane %v12393_v50, %v16003_v2  ;;  %v12408_v25 = vcombine.high %v12400_v18, %v12400_v18  ;;  %v12416_v23 = vrot.slane %v12400_v18, %v16003_v2  ;;  %14134 = vst.sshfl [vmem:[#allocation5 + $0x1e] sm:$0x1 pattern:$0x73625140] %v12400_v18  ;;  %12688 = vmatmul.mubr.bf16.vlgmr.msra.gmra.mxu0 %v12462_v33 }
0x1f08   :  { %12729 = vmatmul.mubr.bf16.vlgmr.msra.gmra.mxu1 %v12462_v33 }
0x1f09   :  { %v12409_v6 = vcombine.high %v12407_v41, %v12407_v41  ;;  %v12423_v31 = vrot.slane %v12407_v41, %v16003_v2  ;;  %v12430_v35 = vrot.slane %v12408_v25, %v16003_v2  ;;  %v12438_v40 = vcombine.high %v12416_v23, %v12416_v23  ;;  %14135 = vst.sshfl [vmem:[#allocation5 + $0x3e] sm:$0x1 pattern:$0x73625140] %v12408_v25 }
0x1f0a   :  { %14136 = vst.sshfl [vmem:[#allocation5 + $0x9e] sm:$0x1 pattern:$0x73625140] %v12407_v41 }
0x1f0b   :  { %v12437_v34 = vrot.slane %v12409_v6, %v16003_v2  ;;  %v12439_v43 = vcombine.high %v12423_v31, %v12423_v31  ;;  %v12440_v15 = vcombine.high %v12430_v35, %v12430_v35  ;;  %12452 = vst [vmem:[#allocation5 + $0x5e] sm:$0x1] %v12438_v40  ;;  %14137 = vst.sshfl [vmem:[#allocation5 + $0xbe] sm:$0x1 pattern:$0x73625140] %v12409_v6 }
0x1f0d   :  { %v12441_v39 = vcombine.high %v12437_v34, %v12437_v34  ;;  %12453 = vst [vmem:[#allocation5 + $0x7e] sm:$0x1] %v12440_v15  ;;  %12456 = vst [vmem:[#allocation5 + $0xde] sm:$0x1] %v12439_v43 }
0x1f0f   :  { %12457 = vst [vmem:[#allocation5 + $0xfe] sm:$0x1] %v12441_v39 }
0x1fc7   :  { %v12689_v19 = vpop.f32.mrf.mxu0 }
0x1fc8   :  { %v12730_v21 = vpop.f32.mrf.mxu1  ;;  %v12737_v42 = vadd.f32 %v12689_v19, %v568_v30 }
0x1fc9   :  { %v12691_v8 = vpop.f32.mrf.mxu0  ;;  %v12739_v9 = vadd.f32 %v12730_v21, %v761_v48 }
0x1fca   :  { %v12732_v36 = vpop.f32.mrf.mxu1  ;;  %v14170_v27 = vmul.f32 -1.442695, %v12737_v42  ;;  %v12738_v29 = vadd.f32 %v12691_v8, %v570_v14 }
0x1fcb   :  { %v12693_v32 = vpop.f32.mrf.mxu0  ;;  %v12740_v26 = vadd.f32 %v12732_v36, %v763_v10 }
0x1fcc   :  { %v12734_v24 = vpop.f32.mrf.mxu1  ;;  %15176 = vpow2.f32 %v14170_v27  ;;  %v14171_v46 = vmul.f32 -1.442695, %v12738_v29 }
0x1fcd   :  { %v12694_v28 = vpop.f32.mrf.mxu0  ;;  %v14172_v1 = vmul.f32 -1.442695, %v12740_v26 }
0x1fce   :  { %v12735_v47 = vpop.f32.mrf.mxu1  ;;  %15178 = vpow2.f32 %v14171_v46 }
0x1fcf   :  { %15180 = vtanh.f32 %v12739_v9 }
0x1fd0   :  { %15182 = vpow2.f32 %v14172_v1 }
0x1fd9   :  { %v15177_v4 = vpop.eup %15176 }
0x1fda   :  { %v12744_v57 = vadd.f32 1.0, %v15177_v4 }
0x1fdb   :  { %v15179_v59 = vpop.eup %15178 }
0x1fdc   :  { %15184 = vrcp.f32 %v12744_v57  ;;  %v12750_v58 = vadd.f32 1.0, %v15179_v59  ;;  %v15181_v60 = vpop.eup %15180 }
0x1fdd   :  { %v15183_v56 = vpop.eup %15182 }
0x1fde   :  { %15186 = vrcp.f32 %v12750_v58  ;;  %v12757_v3 = vadd.f32 1.0, %v15183_v56 }
0x1fe0   :  { %15188 = vrcp.f32 %v12757_v3 }
0x1fe9   :  { %v15185_v53 = vpop.eup %15184 }
0x1fea   :  { %v12761_v62 = vmul.f32 %v15185_v53, %v15181_v60 }
0x1feb   :  { %v15187_v55 = vpop.eup %15186 }
0x1fec   :  { %v12760_v63 = vmul.f32 %v15187_v55, %v18842_v51 }
0x1fed   :  { %v15189_v61 = vpop.eup %15188 }
0x1fee   :  { %v12762_v54 = vadd.f32 %v12761_v62, %v12760_v63 }
0x1ff0   :  { %12837 = vst [vmem:[#allocation9] sm:$0xff] %v12762_v54  ;;  %15190 = vtanh.f32 %v12762_v54 }
0x1ffd   :  { %v15191_v11 = vpop.eup %15190 }
0x1ffe   :  { %v12764_v52 = vmul.f32 %v15191_v11, %v15189_v61 }
0x2000   :  { %v12766_v17 = vcombine.high %v12764_v52, %v12764_v52  ;;  %v12773_v49 = vrot.slane %v12764_v52, %v16003_v2  ;;  %12836 = vst [vmem:[#allocation7] sm:$0xff] %v12764_v52 }
0x2001   :  { %15203 = shalt.err (!%p15200_p4)
}
0x2002   :  { %12859 = dma.vmem_to_hbm [thread:$0]  %s12857_s3, 128, %s18882_s7, [#allocation8]   ;;  %v12780_v7 = vrot.slane %v12766_v17, %v16003_v2  ;;  %v12781_v44 = vcombine.high %v12773_v49, %v12773_v49  ;;  %v12789_v13 = vrot.slane %v12773_v49, %v16003_v2  ;;  %14173 = vst.sshfl [vmem:[#allocation5 + $0x1f] sm:$0x1 pattern:$0x73625140] %v12773_v49 }
0x2003   :  { %s15212_s13 = scalar_lea.vmem %s12867_s9, 128  ;;  %p15217_p6 = scmp.lt.s32.totalorder %s12867_s9, %s12867_s9 }
0x2004   :  { %p15213_p5 = scmp.ne.s32.totalorder %s12867_s9, %s15212_s13  ;;  %p15218_p7 = scmp.lt.s32.totalorder %s15212_s13, %s15212_s13 }
0x2006   :  { %p15219_p8 = por %p15218_p7, %p15217_p6 }
0x2008   :  { %p15220_p9 = pnand %p15219_p8, %p15213_p5 }
0x200a   :  { %15223 = shalt.err (!%p15220_p9)
}
0x200b   :  { %12869 = dma.vmem_to_hbm [thread:$0]  %s12867_s9, 128, %s18883_s8, [#allocation8]   ;;  %v12782_v5 = vcombine.high %v12780_v7, %v12780_v7  ;;  %v12796_v16 = vrot.slane %v12780_v7, %v16003_v2  ;;  %v12803_v51 = vrot.slane %v12781_v44, %v16003_v2  ;;  %v12811_v12 = vcombine.high %v12789_v13, %v12789_v13  ;;  %14174 = vst.sshfl [vmem:[#allocation5 + $0x3f] sm:$0x1 pattern:$0x73625140] %v12781_v44 }
0x200c   :  { %14175 = vst.sshfl [vmem:[#allocation5 + $0x9f] sm:$0x1 pattern:$0x73625140] %v12780_v7  ;;  %s15260_s7 = smov [#allocation5]  }
0x200d   :  { %s12843_s16 = sshll.u32 %s15260_s7, 4  ;;  %v12810_v20 = vrot.slane %v12782_v5, %v16003_v2  ;;  %v12812_v37 = vcombine.high %v12796_v16, %v12796_v16  ;;  %v12813_v50 = vcombine.high %v12803_v51, %v12803_v51  ;;  %12825 = vst [vmem:[#allocation5 + $0x5f] sm:$0x1] %v12811_v12  ;;  %s12844_s16 = int_to_ptr.vmem [resolvable:$true] %s12843_s16 }
0x200e   :  { %14176 = vst.sshfl [vmem:[#allocation5 + $0xbf] sm:$0x1 pattern:$0x73625140] %v12782_v5  ;;  %s15232_s8 = scalar_lea.vmem %s12844_s16, 4096  ;;  %p15237_p11 = scmp.lt.s32.totalorder %s12844_s16, %s12844_s16 }
0x200f   :  { %v12814_v18 = vcombine.high %v12810_v20, %v12810_v20  ;;  %12826 = vst [vmem:[#allocation5 + $0x7f] sm:$0x1] %v12813_v50  ;;  %12829 = vst [vmem:[#allocation5 + $0xdf] sm:$0x1] %v12812_v37  ;;  %p15233_p10 = scmp.ne.s32.totalorder %s12844_s16, %s15232_s8  ;;  %p15238_p12 = scmp.lt.s32.totalorder %s15232_s8, %s15232_s8 }
0x2011   :  { %12830 = vst [vmem:[#allocation5 + $0xff] sm:$0x1] %v12814_v18  ;;  %p15239_p13 = por %p15238_p12, %p15237_p11 }
0x2013   :  { %p15240_p0 = pnand %p15239_p13, %p15233_p10 }
0x2015   :  { %15243 = shalt.err (!%p15240_p0)
}
0x2016   :  { %s15261_s17 = smov 128   ;;  %s15262_s18 = smov 8  }
0x2017   :  { %12849 = dma.vmem_to_hbm [thread:$0]  %s12844_s16, 4096, %s18881_s6, [#allocation6], %s15261_s17, %s15261_s17, %s15262_s18  }
0x2018   :  { %15252 = dma.done.wait [#allocation6], 4096  }
0x2019   :  { %15253 = vsyncadd [#allocation6], 4294963200 }
0x201a   :  { %15254 = dma.done.wait [#allocation8], 256  }
0x201b   :  { %15255 = vsyncadd [#allocation8], 4294967040 }
0x201c   :  { %12879 = vsyncpa [#allocation6], 1 }
0x201d   :  { %12880 = vsyncpa [#allocation8], 1 }

</bundles_post_ra>
